<compile_context>
chip_gen: v7x
topology: tpu7x:2x2x1
jax: 0.10.0
libtpu: 0.0.40
codegen_flags: <defaults>
</compile_context>

<pallas_src>
import jax
import jax.numpy as jnp
from jax.experimental import pallas as pl
from jax.experimental.pallas import tpu as pltpu

_VMEM_LIMIT = 32 * 1024 * 1024
_TM_CAP = 1024            # row-tile cap (fits comfortably in v7x's 64 MiB VMEM)


def _round_up(x, m):
    return (x + m - 1) // m * m


def _pad_rows_to(m):
    mp = _round_up(m, 8)
    if mp > _TM_CAP:
        mp = _round_up(m, _TM_CAP)
    return mp


# ----------------------------------------------------------------------------
# Pallas kernels
# ----------------------------------------------------------------------------
def _mm_bn_stats_kernel(a_ref, w_ref, mrow_ref, ph_ref, y_ref, stats_ref):
    """Single-shot matmul (K fits in one block) + masked per-tile column stats.

    mask[r, c] = sum_q mrow[r, q] * ph[q, c]  selects, per column-phase, the rows whose
    output position actually lands inside the image (and zeroes padded rows).
    """
    y = jnp.dot(a_ref[...], w_ref[...], preferred_element_type=jnp.float32)  # (tm, Cp)
    y_ref[...] = y.astype(y_ref.dtype)

    mask = (mrow_ref[:, 0:1] * ph_ref[0:1, :]
            + mrow_ref[:, 1:2] * ph_ref[1:2, :]
            + mrow_ref[:, 2:3] * ph_ref[2:3, :]
            + mrow_ref[:, 3:4] * ph_ref[3:4, :])                              # (tm, Cp)
    ym = y * mask
    s = jnp.sum(ym, axis=0, keepdims=True)                                    # (1, Cp)
    sq = jnp.sum(ym * y, axis=0, keepdims=True)                               # (1, Cp)
    cp = s.shape[-1]
    stats_ref[:, :cp] = jnp.broadcast_to(s, (8, cp))      # packed: [sum | sumsq]
    stats_ref[:, cp:] = jnp.broadcast_to(sq, (8, cp))


def _mm_bias_tanh_kernel(a_ref, w_ref, b_ref, y_ref):
    """Single-shot matmul with fused bias + tanh epilogue (final layer), bf16 output."""
    y = jnp.dot(a_ref[...], w_ref[...], preferred_element_type=jnp.float32)
    y_ref[...] = jnp.tanh(y + b_ref[...]).astype(y_ref.dtype)


def _affine_relu_kernel(x_ref, scale_ref, shift_ref, o_ref):
    y = x_ref[...].astype(jnp.float32) * scale_ref[...] + shift_ref[...]
    o_ref[...] = jnp.maximum(y, 0.0).astype(o_ref.dtype)


# ----------------------------------------------------------------------------
# Pallas wrappers
# ----------------------------------------------------------------------------
def pallas_matmul_bn_stats(a, w, mrow, ph):
    """a (Mp,Kp) bf16, w (Kp,Cp) bf16, mrow (Mp,8) f32, ph (8,Cp) f32
       -> y (Mp,Cp) bf16, col_sum (Cp,) f32, col_sumsq (Cp,) f32 (masked)."""
    Mp, Kp = a.shape
    _, Cp = w.shape
    tm = Mp if Mp <= _TM_CAP else _TM_CAP
    nm = Mp // tm

    y, stats = pl.pallas_call(
        _mm_bn_stats_kernel,
        out_shape=(
            jax.ShapeDtypeStruct((Mp, Cp), jnp.bfloat16),
            jax.ShapeDtypeStruct((nm * 8, 2 * Cp), jnp.float32),
        ),
        grid_spec=pltpu.PrefetchScalarGridSpec(
            num_scalar_prefetch=0,
            grid=(nm,),
            in_specs=[
                pl.BlockSpec((tm, Kp), lambda i: (i, 0)),
                pl.BlockSpec((Kp, Cp), lambda i: (0, 0)),   # whole-K resident weight
                pl.BlockSpec((tm, 8), lambda i: (i, 0)),
                pl.BlockSpec((8, Cp), lambda i: (0, 0)),
            ],
            out_specs=[
                pl.BlockSpec((tm, Cp), lambda i: (i, 0)),
                pl.BlockSpec((8, 2 * Cp), lambda i: (i, 0)),
            ],
        ),
        compiler_params=pltpu.CompilerParams(
            dimension_semantics=("parallel",),
            vmem_limit_bytes=_VMEM_LIMIT,
        ),
    )(a, w, mrow, ph)

    col = jnp.sum(stats.reshape(nm, 8, 2 * Cp)[:, 0, :], axis=0)
    return y, col[:Cp], col[Cp:]


def pallas_matmul_bias_tanh(a, w, bias_row):
    """a (Mp,Kp) bf16, w (Kp,Cp) bf16, bias_row (1,Cp) f32 -> tanh(a@w + b) bf16."""
    Mp, Kp = a.shape
    _, Cp = w.shape
    tm = Mp if Mp <= _TM_CAP else _TM_CAP

    return pl.pallas_call(
        _mm_bias_tanh_kernel,
        out_shape=jax.ShapeDtypeStruct((Mp, Cp), jnp.bfloat16),
        grid_spec=pltpu.PrefetchScalarGridSpec(
            num_scalar_prefetch=0,
            grid=(Mp // tm,),
            in_specs=[
                pl.BlockSpec((tm, Kp), lambda i: (i, 0)),
                pl.BlockSpec((Kp, Cp), lambda i: (0, 0)),
                pl.BlockSpec((1, Cp), lambda i: (0, 0)),
            ],
            out_specs=pl.BlockSpec((tm, Cp), lambda i: (i, 0)),
        ),
        compiler_params=pltpu.CompilerParams(
            dimension_semantics=("parallel",),
            vmem_limit_bytes=_VMEM_LIMIT,
        ),
    )(a, w, bias_row)


def pallas_affine_relu(x, scale_col, shift_col):
    """x (Mp,Cp) bf16; per-column scale/shift (Cp,) f32 -> bf16 relu(x*scale+shift)."""
    Mp, Cp = x.shape
    tm = Mp if Mp <= _TM_CAP else _TM_CAP

    return pl.pallas_call(
        _affine_relu_kernel,
        out_shape=jax.ShapeDtypeStruct((Mp, Cp), jnp.bfloat16),
        grid_spec=pltpu.PrefetchScalarGridSpec(
            num_scalar_prefetch=0,
            grid=(Mp // tm,),
            in_specs=[
                pl.BlockSpec((tm, Cp), lambda i: (i, 0)),
                pl.BlockSpec((1, Cp), lambda i: (0, 0)),
                pl.BlockSpec((1, Cp), lambda i: (0, 0)),
            ],
            out_specs=pl.BlockSpec((tm, Cp), lambda i: (i, 0)),
        ),
        compiler_params=pltpu.CompilerParams(
            dimension_semantics=("parallel",),
            vmem_limit_bytes=_VMEM_LIMIT,
        ),
    )(x, scale_col.reshape(1, Cp).astype(jnp.float32),
      shift_col.reshape(1, Cp).astype(jnp.float32))


# ----------------------------------------------------------------------------
# ConvTranspose2d lowerings (sub-pixel decomposition, plain-JAX glue)
# ----------------------------------------------------------------------------
def _phase_onehot4(cq, cp):
    q_of_col = jnp.repeat(jnp.arange(4), cq)                           # (Cp,)
    return (jnp.arange(8)[:, None] == q_of_col[None, :]).astype(jnp.float32)


def subpixel_operands(h, w):
    """Stride-2, k=4, pad=1 ConvTranspose2d as 2x2-window im2col with the 4 output
    phases folded into the weight's output dim.

    h: (N,H,W,Cin) NHWC.  w: PyTorch ConvTranspose2d weight (Cin,Cout,4,4).
    Window (ty,tx) over the 1-padded input produces output pixels (2ty-1+py, 2tx-1+px).
    Returns A (M,4Cin->Kp) bf16, Wm (Kp,Cp) bf16, row-phase mask (M,4) f32, meta.
    """
    N, H, W_, Cin = h.shape
    Cin_w, Cout, k, k2 = w.shape
    assert k == 4 and k2 == 4 and Cin_w == Cin

    hp = jnp.pad(h.astype(jnp.bfloat16), ((0, 0), (1, 1), (1, 1), (0, 0)))
    taps = [hp[:, a:a + H + 1, b:b + W_ + 1, :] for a in range(2) for b in range(2)]
    A = jnp.stack(taps, axis=3).reshape(N * (H + 1) * (W_ + 1), 4 * Cin)
    M = A.shape[0]

    # W'[(a,b,ci),(py,px,co)] = w[ci, co, 2-2a+py, 2-2b+px]
    wr = w.reshape(Cin, Cout, 2, 2, 2, 2)          # (ci, co, uh, vh, uw, vw), kh=2uh+vh
    wr = wr[:, :, ::-1, :, ::-1, :]                # uh -> a, uw -> b
    Wt = jnp.transpose(wr, (2, 4, 0, 3, 5, 1))     # (a, b, ci, py, px, co)
    Cp = _round_up(4 * Cout, 128)
    Cq = Cp // 4
    Wm = Wt.reshape(4 * Cin, 4, Cout)
    Wm = jnp.pad(Wm, ((0, 0), (0, 0), (0, Cq - Cout))).reshape(4 * Cin, Cp)
    Wm = Wm.astype(jnp.bfloat16)

    Kp = _round_up(4 * Cin, 128)
    A = jnp.pad(A, ((0, 0), (0, Kp - 4 * Cin)))
    Wm = jnp.pad(Wm, ((0, Kp - 4 * Cin), (0, 0)))

    # Row-phase validity (phases whose output pixel is outside 2H x 2W are excluded
    # from BN stats).
    ty = jnp.arange(H + 1)
    tx = jnp.arange(W_ + 1)
    ry = jnp.stack([ty >= 1, ty <= H - 1], axis=-1).astype(jnp.float32)   # (H+1, 2)
    rx = jnp.stack([tx >= 1, tx <= W_ - 1], axis=-1).astype(jnp.float32)  # (W+1, 2)
    m = ry[:, None, :, None] * rx[None, :, None, :]                       # (H+1,W+1,2,2)
    mrow = jnp.broadcast_to(m[None], (N, H + 1, W_ + 1, 2, 2)).reshape(M, 4)

    return A, Wm, mrow, (N, H, W_, Cout, Cq, Cp, M)


def _depth_to_space(yf, N, H, W_, Cq, Cout, M):
    """Fold (n,ty,tx) x (py,px,co) matmul output back to (N, 2H, 2W, Cout) NHWC."""
    y = yf[:M].reshape(N, H + 1, W_ + 1, 2, 2, Cq)[..., :Cout]
    y = jnp.transpose(y, (0, 1, 3, 2, 4, 5)).reshape(N, 2 * H + 2, 2 * W_ + 2, Cout)
    return y[:, 1:2 * H + 1, 1:2 * W_ + 1, :]


def _bn_relu(y, col_sum, col_sq, count, gamma, beta, G, Cq, Cout):
    """Finish BN (batch stats pooled over the G column groups) + fused affine/ReLU."""
    s_co = col_sum.reshape(G, Cq)[:, :Cout].sum(axis=0)
    q_co = col_sq.reshape(G, Cq)[:, :Cout].sum(axis=0)
    mean = s_co / count
    var = jnp.maximum(q_co / count - mean * mean, 0.0)     # biased var, clamped
    scale = gamma.astype(jnp.float32) / jnp.sqrt(var + 1e-5)
    shift = beta.astype(jnp.float32) - mean * scale
    pad = Cq - Cout
    scale_col = jnp.tile(jnp.concatenate([scale, jnp.ones((pad,), jnp.float32)]), G)
    shift_col = jnp.tile(jnp.concatenate([shift, jnp.zeros((pad,), jnp.float32)]), G)
    return pallas_affine_relu(y, scale_col, shift_col)


# ----------------------------------------------------------------------------
# Generator blocks
# ----------------------------------------------------------------------------
def first_block(h, w, gamma, beta):
    """ConvTranspose2d(k=4, s=1, p=0) on a 1x1 input + BN + ReLU.
    out[n, kh, kw, co] = sum_ci x[n, ci] * w[ci, co, kh, kw] -> one small matmul."""
    N, H, W_, Cin = h.shape
    assert H == 1 and W_ == 1
    Cin_w, Cout, k, _ = w.shape
    G = k * k
    Cq = Cout
    Cp = G * Cq
    assert Cp % 128 == 0

    A = h.reshape(N, Cin).astype(jnp.bfloat16)
    Kp = _round_up(Cin, 128)
    A = jnp.pad(A, ((0, 0), (0, Kp - Cin)))
    Wm = jnp.transpose(w, (0, 2, 3, 1)).reshape(Cin, Cp).astype(jnp.bfloat16)
    Wm = jnp.pad(Wm, ((0, Kp - Cin), (0, 0)))

    M = N
    Mp = _pad_rows_to(M)
    A = jnp.pad(A, ((0, Mp - M), (0, 0)))
    mrow = jnp.zeros((Mp, 8), jnp.float32).at[:M, 0].set(1.0)   # all real rows valid
    ph = jnp.zeros((8, Cp), jnp.float32).at[0].set(1.0)

    y, col_sum, col_sq = pallas_matmul_bn_stats(A, Wm, mrow, ph)
    yf = _bn_relu(y, col_sum, col_sq, N * G, gamma, beta, G, Cq, Cout)
    return yf[:M].reshape(N, k, k, Cout)


def up_block(h, w, gamma, beta):
    """ConvTranspose2d(k=4, s=2, p=1, bias=False) + BatchNorm2d (batch stats) + ReLU."""
    A, Wm, mrow, (N, H, W_, Cout, Cq, Cp, M) = subpixel_operands(h, w)
    Mp = _pad_rows_to(M)
    A = jnp.pad(A, ((0, Mp - M), (0, 0)))
    mrow = jnp.pad(mrow, ((0, Mp - M), (0, 4)))                 # (Mp, 8)
    ph = _phase_onehot4(Cq, Cp)

    y, col_sum, col_sq = pallas_matmul_bn_stats(A, Wm, mrow, ph)
    count = N * (2 * H) * (2 * W_)
    yf = _bn_relu(y, col_sum, col_sq, count, gamma, beta, 4, Cq, Cout)
    return _depth_to_space(yf, N, H, W_, Cq, Cout, M)


def final_block(h, w, bias):
    """ConvTranspose2d(k=4, s=2, p=1, bias=True) + Tanh, fused in one matmul kernel."""
    A, Wm, _, (N, H, W_, Cout, Cq, Cp, M) = subpixel_operands(h, w)
    Mp = _pad_rows_to(M)
    A = jnp.pad(A, ((0, Mp - M), (0, 0)))
    pad = Cq - Cout
    bias_col = jnp.tile(
        jnp.concatenate([bias.astype(jnp.float32), jnp.zeros((pad,), jnp.float32)]), 4)
    yf = pallas_matmul_bias_tanh(A, Wm, bias_col.reshape(1, Cp))
    return _depth_to_space(yf, N, H, W_, Cq, Cout, M)


# ----------------------------------------------------------------------------
# Generator parameters + forward
# ----------------------------------------------------------------------------
def init_params(key, channels_noise, channels_img, features_g, num_classes, embed_size):
    ks = jax.random.split(key, 12)
    fg = features_g
    c_in = channels_noise + embed_size

    def conv_w(k, cin, cout):
        return 0.05 * jax.random.normal(k, (cin, cout, 4, 4), jnp.float32)

    return {
        "embed": 0.1 * jax.random.normal(ks[0], (num_classes, embed_size), jnp.float32),
        "w1": conv_w(ks[1], c_in, fg * 16),
        "g1": 1.0 + 0.1 * jax.random.normal(ks[2], (fg * 16,), jnp.float32),
        "b1": 0.1 * jax.random.normal(ks[3], (fg * 16,), jnp.float32),
        "w2": conv_w(ks[4], fg * 16, fg * 8),
        "g2": jnp.ones((fg * 8,), jnp.float32),
        "b2": jnp.zeros((fg * 8,), jnp.float32),
        "w3": conv_w(ks[5], fg * 8, fg * 4),
        "g3": jnp.ones((fg * 4,), jnp.float32),
        "b3": jnp.zeros((fg * 4,), jnp.float32),
        "w4": conv_w(ks[6], fg * 4, fg * 2),
        "g4": jnp.ones((fg * 2,), jnp.float32),
        "b4": jnp.zeros((fg * 2,), jnp.float32),
        "w5": conv_w(ks[7], fg * 2, channels_img),
        "bias5": 0.01 * jax.random.normal(ks[8], (channels_img,), jnp.float32),
    }


def generator_forward(params, x, labels):
    """x: (N, channels_noise, 1, 1) NCHW, labels: (N,) int32 -> (N, channels_img, 64, 64)."""
    N, Cn = x.shape[0], x.shape[1]
    emb = params["embed"][labels]                              # embedding gather (glue)
    xin = jnp.concatenate([x.reshape(N, Cn), emb], axis=1)     # cat along channel dim
    h = xin.reshape(N, 1, 1, -1)                               # NHWC, 1x1 spatial

    h = first_block(h, params["w1"], params["g1"], params["b1"])              # 4x4
    h = up_block(h, params["w2"], params["g2"], params["b2"])                 # 8x8
    h = up_block(h, params["w3"], params["g3"], params["b3"])                 # 16x16
    h = up_block(h, params["w4"], params["g4"], params["b4"])                 # 32x32
    out = final_block(h, params["w5"], params["bias5"])                       # 64x64
    return jnp.transpose(out.astype(jnp.float32), (0, 3, 1, 2))               # NCHW


# ----------------------------------------------------------------------------
if __name__ == "__main__":
    channels_noise = 8
    channels_img = 3
    features_g = 4
    num_classes = 10
    img_size = 64
    embed_size = 8
    N = 2

    key = jax.random.PRNGKey(0)
    k_params, k_x, k_lbl = jax.random.split(key, 3)
    params = init_params(k_params, channels_noise, channels_img, features_g,
                         num_classes, embed_size)
    x = jax.random.normal(k_x, (N, channels_noise, 1, 1), jnp.float32)
    labels = jax.random.randint(k_lbl, (N,), 0, num_classes, jnp.int32)

    fwd = jax.jit(generator_forward)
    out = fwd(params, x, labels)
    out = jax.block_until_ready(out)

    assert out.shape == (N, channels_img, 64, 64), out.shape
    assert bool(jnp.all(jnp.isfinite(out)))
    assert bool(jnp.all(jnp.abs(out) <= 1.0 + 1e-6))           # tanh range
    print("KERNEL_OK")
</pallas_src>

<mosaic_0001>
module attributes {stable_mosaic.version = 11 : i64} {
  func.func @_mm_bn_stats_kernel(%arg0: i32, %arg1: memref<8x128xbf16, #tpu.memory_space<vmem>>, %arg2: memref<128x1024xbf16, #tpu.memory_space<vmem>>, %arg3: memref<8x8xf32, #tpu.memory_space<vmem>>, %arg4: memref<8x1024xf32, #tpu.memory_space<vmem>>, %arg5: memref<8x1024xbf16, #tpu.memory_space<vmem>>, %arg6: memref<8x2048xf32, #tpu.memory_space<vmem>>) attributes {dimension_semantics = [#tpu.dimension_semantics<parallel>], iteration_bounds = array<i64: 1>, scalar_prefetch = 0 : i64, scratch_operands = 0 : i64, tpu.core_type = #tpu.core_type<tc>, window_params = [{transform_indices = @transform_0, window_bounds = array<i64: 8, 128>}, {pipeline_mode = #tpu.pipeline_mode<synchronous>, transform_indices = @transform_1, window_bounds = array<i64: 128, 1024>}, {transform_indices = @transform_2, window_bounds = array<i64: 8, 8>}, {pipeline_mode = #tpu.pipeline_mode<synchronous>, transform_indices = @transform_3, window_bounds = array<i64: 8, 1024>}, {transform_indices = @transform_4, window_bounds = array<i64: 8, 1024>}, {transform_indices = @transform_5, window_bounds = array<i64: 8, 2048>}]} {
    %c0 = arith.constant 0 : index
    %c0_0 = arith.constant 0 : index
    %0 = vector.load %arg1[%c0, %c0_0] : memref<8x128xbf16, #tpu.memory_space<vmem>>, vector<8x128xbf16>
    %c0_1 = arith.constant 0 : index
    %c0_2 = arith.constant 0 : index
    %1 = vector.load %arg2[%c0_1, %c0_2] : memref<128x1024xbf16, #tpu.memory_space<vmem>>, vector<128x1024xbf16>
    %cst = arith.constant dense<0.000000e+00> : vector<8x1024xf32>
    %2 = tpu.matmul %0, %1, %cst {dimension_numbers = #tpu.dot_dimension_numbers<[1], [0], [0], [1], [0, 0, 1, 1], [], []>} : vector<8x128xbf16>, vector<128x1024xbf16>, vector<8x1024xf32> -> vector<8x1024xf32>
    %3 = arith.truncf %2 : vector<8x1024xf32> to vector<8x1024xbf16>
    %c0_3 = arith.constant 0 : index
    %c0_4 = arith.constant 0 : index
    %4 = vector.load %arg5[%c0_3, %c0_4] : memref<8x1024xbf16, #tpu.memory_space<vmem>>, vector<8x1024xbf16>
    tpu.vector_store %arg5[%c0_3, %c0_4], %3 {strides = array<i32>} : memref<8x1024xbf16, #tpu.memory_space<vmem>>, vector<8x1024xbf16>,
    %c0_5 = arith.constant 0 : index
    %c0_6 = arith.constant 0 : index
    %5 = vector.load %arg3[%c0_5, %c0_6] : memref<8x8xf32, #tpu.memory_space<vmem>>, vector<8x1xf32>
    %c0_7 = arith.constant 0 : index
    %c0_8 = arith.constant 0 : index
    %6 = vector.load %arg4[%c0_7, %c0_8] : memref<8x1024xf32, #tpu.memory_space<vmem>>, vector<1x1024xf32>
    %7 = vector.broadcast %5 : vector<8x1xf32> to vector<8x1024xf32>
    %8 = vector.broadcast %6 : vector<1x1024xf32> to vector<8x1024xf32>
    %9 = arith.mulf %7, %8 : vector<8x1024xf32>
    %c0_9 = arith.constant 0 : index
    %c1 = arith.constant 1 : index
    %10 = vector.load %arg3[%c0_9, %c1] : memref<8x8xf32, #tpu.memory_space<vmem>>, vector<8x1xf32>
    %c1_10 = arith.constant 1 : index
    %c0_11 = arith.constant 0 : index
    %11 = vector.load %arg4[%c1_10, %c0_11] : memref<8x1024xf32, #tpu.memory_space<vmem>>, vector<1x1024xf32>
    %12 = vector.broadcast %10 : vector<8x1xf32> to vector<8x1024xf32>
    %13 = vector.broadcast %11 : vector<1x1024xf32> to vector<8x1024xf32>
    %14 = arith.mulf %12, %13 : vector<8x1024xf32>
    %15 = arith.addf %9, %14 : vector<8x1024xf32>
    %c0_12 = arith.constant 0 : index
    %c2 = arith.constant 2 : index
    %16 = vector.load %arg3[%c0_12, %c2] : memref<8x8xf32, #tpu.memory_space<vmem>>, vector<8x1xf32>
    %c2_13 = arith.constant 2 : index
    %c0_14 = arith.constant 0 : index
    %17 = vector.load %arg4[%c2_13, %c0_14] : memref<8x1024xf32, #tpu.memory_space<vmem>>, vector<1x1024xf32>
    %18 = vector.broadcast %16 : vector<8x1xf32> to vector<8x1024xf32>
    %19 = vector.broadcast %17 : vector<1x1024xf32> to vector<8x1024xf32>
    %20 = arith.mulf %18, %19 : vector<8x1024xf32>
    %21 = arith.addf %15, %20 : vector<8x1024xf32>
    %c0_15 = arith.constant 0 : index
    %c3 = arith.constant 3 : index
    %22 = vector.load %arg3[%c0_15, %c3] : memref<8x8xf32, #tpu.memory_space<vmem>>, vector<8x1xf32>
    %c3_16 = arith.constant 3 : index
    %c0_17 = arith.constant 0 : index
    %23 = vector.load %arg4[%c3_16, %c0_17] : memref<8x1024xf32, #tpu.memory_space<vmem>>, vector<1x1024xf32>
    %24 = vector.broadcast %22 : vector<8x1xf32> to vector<8x1024xf32>
    %25 = vector.broadcast %23 : vector<1x1024xf32> to vector<8x1024xf32>
    %26 = arith.mulf %24, %25 : vector<8x1024xf32>
    %27 = arith.addf %21, %26 : vector<8x1024xf32>
    %28 = arith.mulf %2, %27 : vector<8x1024xf32>
    %cst_18 = arith.constant dense<0.000000e+00> : vector<1024xf32>
    %29 = vector.multi_reduction <add>, %28, %cst_18 [0] : vector<8x1024xf32> to vector<1024xf32>
    %30 = vector.shape_cast %29 : vector<1024xf32> to vector<1x1024xf32>
    %31 = arith.mulf %28, %2 : vector<8x1024xf32>
    %cst_19 = arith.constant dense<0.000000e+00> : vector<1024xf32>
    %32 = vector.multi_reduction <add>, %31, %cst_19 [0] : vector<8x1024xf32> to vector<1024xf32>
    %33 = vector.shape_cast %32 : vector<1024xf32> to vector<1x1024xf32>
    %34 = vector.shape_cast %30 : vector<1x1024xf32> to vector<1x1024xf32>
    %35 = vector.broadcast %34 : vector<1x1024xf32> to vector<8x1024xf32>
    %c0_20 = arith.constant 0 : index
    %c0_21 = arith.constant 0 : index
    %36 = vector.load %arg6[%c0_20, %c0_21] : memref<8x2048xf32, #tpu.memory_space<vmem>>, vector<8x1024xf32>
    tpu.vector_store %arg6[%c0_20, %c0_21], %35 {strides = array<i32>} : memref<8x2048xf32, #tpu.memory_space<vmem>>, vector<8x1024xf32>,
    %37 = vector.shape_cast %33 : vector<1x1024xf32> to vector<1x1024xf32>
    %38 = vector.broadcast %37 : vector<1x1024xf32> to vector<8x1024xf32>
    %c0_22 = arith.constant 0 : index
    %c1024 = arith.constant 1024 : index
    %39 = vector.load %arg6[%c0_22, %c1024] : memref<8x2048xf32, #tpu.memory_space<vmem>>, vector<8x1024xf32>
    tpu.vector_store %arg6[%c0_22, %c1024], %38 {strides = array<i32>} : memref<8x2048xf32, #tpu.memory_space<vmem>>, vector<8x1024xf32>,
    return
  }
  func.func @transform_0(%arg0: i32) -> (i32, i32) {
    %c0_i32 = arith.constant 0 : i32
    %c0_i32_0 = arith.constant 0 : i32
    return %arg0, %c0_i32 : i32, i32
  }
  func.func @transform_1(%arg0: i32) -> (i32, i32) {
    %c0_i32 = arith.constant 0 : i32
    %c0_i32_0 = arith.constant 0 : i32
    %c0_i32_1 = arith.constant 0 : i32
    return %c0_i32, %c0_i32_0 : i32, i32
  }
  func.func @transform_2(%arg0: i32) -> (i32, i32) {
    %c0_i32 = arith.constant 0 : i32
    %c0_i32_0 = arith.constant 0 : i32
    return %arg0, %c0_i32 : i32, i32
  }
  func.func @transform_3(%arg0: i32) -> (i32, i32) {
    %c0_i32 = arith.constant 0 : i32
    %c0_i32_0 = arith.constant 0 : i32
    %c0_i32_1 = arith.constant 0 : i32
    return %c0_i32, %c0_i32_0 : i32, i32
  }
  func.func @transform_4(%arg0: i32) -> (i32, i32) {
    %c0_i32 = arith.constant 0 : i32
    %c0_i32_0 = arith.constant 0 : i32
    return %arg0, %c0_i32 : i32, i32
  }
  func.func @transform_5(%arg0: i32) -> (i32, i32) {
    %c0_i32 = arith.constant 0 : i32
    %c0_i32_0 = arith.constant 0 : i32
    return %arg0, %c0_i32 : i32, i32
  }
}

module attributes {stable_mosaic.version = 11 : i64} {
  func.func @_affine_relu_kernel(%arg0: i32, %arg1: memref<8x1024xbf16, #tpu.memory_space<vmem>>, %arg2: memref<1x1024xf32, #tpu.memory_space<vmem>>, %arg3: memref<1x1024xf32, #tpu.memory_space<vmem>>, %arg4: memref<8x1024xbf16, #tpu.memory_space<vmem>>) attributes {dimension_semantics = [#tpu.dimension_semantics<parallel>], iteration_bounds = array<i64: 1>, scalar_prefetch = 0 : i64, scratch_operands = 0 : i64, tpu.core_type = #tpu.core_type<tc>, window_params = [{transform_indices = @transform_0, window_bounds = array<i64: 8, 1024>}, {pipeline_mode = #tpu.pipeline_mode<synchronous>, transform_indices = @transform_1, window_bounds = array<i64: 1, 1024>}, {pipeline_mode = #tpu.pipeline_mode<synchronous>, transform_indices = @transform_2, window_bounds = array<i64: 1, 1024>}, {transform_indices = @transform_3, window_bounds = array<i64: 8, 1024>}]} {
    %c0 = arith.constant 0 : index
    %c0_0 = arith.constant 0 : index
    %0 = vector.load %arg1[%c0, %c0_0] : memref<8x1024xbf16, #tpu.memory_space<vmem>>, vector<8x1024xbf16>
    %1 = arith.extf %0 : vector<8x1024xbf16> to vector<8x1024xf32>
    %c0_1 = arith.constant 0 : index
    %c0_2 = arith.constant 0 : index
    %2 = vector.load %arg2[%c0_1, %c0_2] : memref<1x1024xf32, #tpu.memory_space<vmem>>, vector<1x1024xf32>
    %3 = vector.broadcast %2 : vector<1x1024xf32> to vector<8x1024xf32>
    %4 = arith.mulf %1, %3 : vector<8x1024xf32>
    %c0_3 = arith.constant 0 : index
    %c0_4 = arith.constant 0 : index
    %5 = vector.load %arg3[%c0_3, %c0_4] : memref<1x1024xf32, #tpu.memory_space<vmem>>, vector<1x1024xf32>
    %6 = vector.broadcast %5 : vector<1x1024xf32> to vector<8x1024xf32>
    %7 = arith.addf %4, %6 : vector<8x1024xf32>
    %cst = arith.constant 0.000000e+00 : f32
    %8 = vector.broadcast %cst : f32 to vector<8x1024xf32>
    %9 = arith.maximumf %7, %8 : vector<8x1024xf32>
    %10 = arith.truncf %9 : vector<8x1024xf32> to vector<8x1024xbf16>
    %c0_5 = arith.constant 0 : index
    %c0_6 = arith.constant 0 : index
    %11 = vector.load %arg4[%c0_5, %c0_6] : memref<8x1024xbf16, #tpu.memory_space<vmem>>, vector<8x1024xbf16>
    tpu.vector_store %arg4[%c0_5, %c0_6], %10 {strides = array<i32>} : memref<8x1024xbf16, #tpu.memory_space<vmem>>, vector<8x1024xbf16>,
    return
  }
  func.func @transform_0(%arg0: i32) -> (i32, i32) {
    %c0_i32 = arith.constant 0 : i32
    %c0_i32_0 = arith.constant 0 : i32
    return %arg0, %c0_i32 : i32, i32
  }
  func.func @transform_1(%arg0: i32) -> (i32, i32) {
    %c0_i32 = arith.constant 0 : i32
    %c0_i32_0 = arith.constant 0 : i32
    %c0_i32_1 = arith.constant 0 : i32
    return %c0_i32, %c0_i32_0 : i32, i32
  }
  func.func @transform_2(%arg0: i32) -> (i32, i32) {
    %c0_i32 = arith.constant 0 : i32
    %c0_i32_0 = arith.constant 0 : i32
    %c0_i32_1 = arith.constant 0 : i32
    return %c0_i32, %c0_i32_0 : i32, i32
  }
  func.func @transform_3(%arg0: i32) -> (i32, i32) {
    %c0_i32 = arith.constant 0 : i32
    %c0_i32_0 = arith.constant 0 : i32
    return %arg0, %c0_i32 : i32, i32
  }
}

module attributes {stable_mosaic.version = 11 : i64} {
  func.func @_mm_bn_stats_kernel(%arg0: i32, %arg1: memref<56x256xbf16, #tpu.memory_space<vmem>>, %arg2: memref<256x128xbf16, #tpu.memory_space<vmem>>, %arg3: memref<56x8xf32, #tpu.memory_space<vmem>>, %arg4: memref<8x128xf32, #tpu.memory_space<vmem>>, %arg5: memref<56x128xbf16, #tpu.memory_space<vmem>>, %arg6: memref<8x256xf32, #tpu.memory_space<vmem>>) attributes {dimension_semantics = [#tpu.dimension_semantics<parallel>], iteration_bounds = array<i64: 1>, scalar_prefetch = 0 : i64, scratch_operands = 0 : i64, tpu.core_type = #tpu.core_type<tc>, window_params = [{transform_indices = @transform_0, window_bounds = array<i64: 56, 256>}, {pipeline_mode = #tpu.pipeline_mode<synchronous>, transform_indices = @transform_1, window_bounds = array<i64: 256, 128>}, {transform_indices = @transform_2, window_bounds = array<i64: 56, 8>}, {pipeline_mode = #tpu.pipeline_mode<synchronous>, transform_indices = @transform_3, window_bounds = array<i64: 8, 128>}, {transform_indices = @transform_4, window_bounds = array<i64: 56, 128>}, {transform_indices = @transform_5, window_bounds = array<i64: 8, 256>}]} {
    %c0 = arith.constant 0 : index
    %c0_0 = arith.constant 0 : index
    %0 = vector.load %arg1[%c0, %c0_0] : memref<56x256xbf16, #tpu.memory_space<vmem>>, vector<56x256xbf16>
    %c0_1 = arith.constant 0 : index
    %c0_2 = arith.constant 0 : index
    %1 = vector.load %arg2[%c0_1, %c0_2] : memref<256x128xbf16, #tpu.memory_space<vmem>>, vector<256x128xbf16>
    %cst = arith.constant dense<0.000000e+00> : vector<56x128xf32>
    %2 = tpu.matmul %0, %1, %cst {dimension_numbers = #tpu.dot_dimension_numbers<[1], [0], [0], [1], [0, 0, 1, 1], [], []>} : vector<56x256xbf16>, vector<256x128xbf16>, vector<56x128xf32> -> vector<56x128xf32>
    %3 = arith.truncf %2 : vector<56x128xf32> to vector<56x128xbf16>
    %c0_3 = arith.constant 0 : index
    %c0_4 = arith.constant 0 : index
    %4 = vector.load %arg5[%c0_3, %c0_4] : memref<56x128xbf16, #tpu.memory_space<vmem>>, vector<56x128xbf16>
    tpu.vector_store %arg5[%c0_3, %c0_4], %3 {strides = array<i32>} : memref<56x128xbf16, #tpu.memory_space<vmem>>, vector<56x128xbf16>,
    %c0_5 = arith.constant 0 : index
    %c0_6 = arith.constant 0 : index
    %5 = vector.load %arg3[%c0_5, %c0_6] : memref<56x8xf32, #tpu.memory_space<vmem>>, vector<56x1xf32>
    %c0_7 = arith.constant 0 : index
    %c0_8 = arith.constant 0 : index
    %6 = vector.load %arg4[%c0_7, %c0_8] : memref<8x128xf32, #tpu.memory_space<vmem>>, vector<1x128xf32>
    %7 = vector.broadcast %5 : vector<56x1xf32> to vector<56x128xf32>
    %8 = vector.broadcast %6 : vector<1x128xf32> to vector<56x128xf32>
    %9 = arith.mulf %7, %8 : vector<56x128xf32>
    %c0_9 = arith.constant 0 : index
    %c1 = arith.constant 1 : index
    %10 = vector.load %arg3[%c0_9, %c1] : memref<56x8xf32, #tpu.memory_space<vmem>>, vector<56x1xf32>
    %c1_10 = arith.constant 1 : index
    %c0_11 = arith.constant 0 : index
    %11 = vector.load %arg4[%c1_10, %c0_11] : memref<8x128xf32, #tpu.memory_space<vmem>>, vector<1x128xf32>
    %12 = vector.broadcast %10 : vector<56x1xf32> to vector<56x128xf32>
    %13 = vector.broadcast %11 : vector<1x128xf32> to vector<56x128xf32>
    %14 = arith.mulf %12, %13 : vector<56x128xf32>
    %15 = arith.addf %9, %14 : vector<56x128xf32>
    %c0_12 = arith.constant 0 : index
    %c2 = arith.constant 2 : index
    %16 = vector.load %arg3[%c0_12, %c2] : memref<56x8xf32, #tpu.memory_space<vmem>>, vector<56x1xf32>
    %c2_13 = arith.constant 2 : index
    %c0_14 = arith.constant 0 : index
    %17 = vector.load %arg4[%c2_13, %c0_14] : memref<8x128xf32, #tpu.memory_space<vmem>>, vector<1x128xf32>
    %18 = vector.broadcast %16 : vector<56x1xf32> to vector<56x128xf32>
    %19 = vector.broadcast %17 : vector<1x128xf32> to vector<56x128xf32>
    %20 = arith.mulf %18, %19 : vector<56x128xf32>
    %21 = arith.addf %15, %20 : vector<56x128xf32>
    %c0_15 = arith.constant 0 : index
    %c3 = arith.constant 3 : index
    %22 = vector.load %arg3[%c0_15, %c3] : memref<56x8xf32, #tpu.memory_space<vmem>>, vector<56x1xf32>
    %c3_16 = arith.constant 3 : index
    %c0_17 = arith.constant 0 : index
    %23 = vector.load %arg4[%c3_16, %c0_17] : memref<8x128xf32, #tpu.memory_space<vmem>>, vector<1x128xf32>
    %24 = vector.broadcast %22 : vector<56x1xf32> to vector<56x128xf32>
    %25 = vector.broadcast %23 : vector<1x128xf32> to vector<56x128xf32>
    %26 = arith.mulf %24, %25 : vector<56x128xf32>
    %27 = arith.addf %21, %26 : vector<56x128xf32>
    %28 = arith.mulf %2, %27 : vector<56x128xf32>
    %cst_18 = arith.constant dense<0.000000e+00> : vector<128xf32>
    %29 = vector.multi_reduction <add>, %28, %cst_18 [0] : vector<56x128xf32> to vector<128xf32>
    %30 = vector.shape_cast %29 : vector<128xf32> to vector<1x128xf32>
    %31 = arith.mulf %28, %2 : vector<56x128xf32>
    %cst_19 = arith.constant dense<0.000000e+00> : vector<128xf32>
    %32 = vector.multi_reduction <add>, %31, %cst_19 [0] : vector<56x128xf32> to vector<128xf32>
    %33 = vector.shape_cast %32 : vector<128xf32> to vector<1x128xf32>
    %34 = vector.shape_cast %30 : vector<1x128xf32> to vector<1x128xf32>
    %35 = vector.broadcast %34 : vector<1x128xf32> to vector<8x128xf32>
    %c0_20 = arith.constant 0 : index
    %c0_21 = arith.constant 0 : index
    %36 = vector.load %arg6[%c0_20, %c0_21] : memref<8x256xf32, #tpu.memory_space<vmem>>, vector<8x128xf32>
    tpu.vector_store %arg6[%c0_20, %c0_21], %35 {strides = array<i32>} : memref<8x256xf32, #tpu.memory_space<vmem>>, vector<8x128xf32>,
    %37 = vector.shape_cast %33 : vector<1x128xf32> to vector<1x128xf32>
    %38 = vector.broadcast %37 : vector<1x128xf32> to vector<8x128xf32>
    %c0_22 = arith.constant 0 : index
    %c128 = arith.constant 128 : index
    %39 = vector.load %arg6[%c0_22, %c128] : memref<8x256xf32, #tpu.memory_space<vmem>>, vector<8x128xf32>
    tpu.vector_store %arg6[%c0_22, %c128], %38 {strides = array<i32>} : memref<8x256xf32, #tpu.memory_space<vmem>>, vector<8x128xf32>,
    return
  }
  func.func @transform_0(%arg0: i32) -> (i32, i32) {
    %c0_i32 = arith.constant 0 : i32
    %c0_i32_0 = arith.constant 0 : i32
    return %arg0, %c0_i32 : i32, i32
  }
  func.func @transform_1(%arg0: i32) -> (i32, i32) {
    %c0_i32 = arith.constant 0 : i32
    %c0_i32_0 = arith.constant 0 : i32
    %c0_i32_1 = arith.constant 0 : i32
    return %c0_i32, %c0_i32_0 : i32, i32
  }
  func.func @transform_2(%arg0: i32) -> (i32, i32) {
    %c0_i32 = arith.constant 0 : i32
    %c0_i32_0 = arith.constant 0 : i32
    return %arg0, %c0_i32 : i32, i32
  }
  func.func @transform_3(%arg0: i32) -> (i32, i32) {
    %c0_i32 = arith.constant 0 : i32
    %c0_i32_0 = arith.constant 0 : i32
    %c0_i32_1 = arith.constant 0 : i32
    return %c0_i32, %c0_i32_0 : i32, i32
  }
  func.func @transform_4(%arg0: i32) -> (i32, i32) {
    %c0_i32 = arith.constant 0 : i32
    %c0_i32_0 = arith.constant 0 : i32
    return %arg0, %c0_i32 : i32, i32
  }
  func.func @transform_5(%arg0: i32) -> (i32, i32) {
    %c0_i32 = arith.constant 0 : i32
    %c0_i32_0 = arith.constant 0 : i32
    return %arg0, %c0_i32 : i32, i32
  }
}

module attributes {stable_mosaic.version = 11 : i64} {
  func.func @_affine_relu_kernel(%arg0: i32, %arg1: memref<56x128xbf16, #tpu.memory_space<vmem>>, %arg2: memref<1x128xf32, #tpu.memory_space<vmem>>, %arg3: memref<1x128xf32, #tpu.memory_space<vmem>>, %arg4: memref<56x128xbf16, #tpu.memory_space<vmem>>) attributes {dimension_semantics = [#tpu.dimension_semantics<parallel>], iteration_bounds = array<i64: 1>, scalar_prefetch = 0 : i64, scratch_operands = 0 : i64, tpu.core_type = #tpu.core_type<tc>, window_params = [{transform_indices = @transform_0, window_bounds = array<i64: 56, 128>}, {pipeline_mode = #tpu.pipeline_mode<synchronous>, transform_indices = @transform_1, window_bounds = array<i64: 1, 128>}, {pipeline_mode = #tpu.pipeline_mode<synchronous>, transform_indices = @transform_2, window_bounds = array<i64: 1, 128>}, {transform_indices = @transform_3, window_bounds = array<i64: 56, 128>}]} {
    %c0 = arith.constant 0 : index
    %c0_0 = arith.constant 0 : index
    %0 = vector.load %arg1[%c0, %c0_0] : memref<56x128xbf16, #tpu.memory_space<vmem>>, vector<56x128xbf16>
    %1 = arith.extf %0 : vector<56x128xbf16> to vector<56x128xf32>
    %c0_1 = arith.constant 0 : index
    %c0_2 = arith.constant 0 : index
    %2 = vector.load %arg2[%c0_1, %c0_2] : memref<1x128xf32, #tpu.memory_space<vmem>>, vector<1x128xf32>
    %3 = vector.broadcast %2 : vector<1x128xf32> to vector<56x128xf32>
    %4 = arith.mulf %1, %3 : vector<56x128xf32>
    %c0_3 = arith.constant 0 : index
    %c0_4 = arith.constant 0 : index
    %5 = vector.load %arg3[%c0_3, %c0_4] : memref<1x128xf32, #tpu.memory_space<vmem>>, vector<1x128xf32>
    %6 = vector.broadcast %5 : vector<1x128xf32> to vector<56x128xf32>
    %7 = arith.addf %4, %6 : vector<56x128xf32>
    %cst = arith.constant 0.000000e+00 : f32
    %8 = vector.broadcast %cst : f32 to vector<56x128xf32>
    %9 = arith.maximumf %7, %8 : vector<56x128xf32>
    %10 = arith.truncf %9 : vector<56x128xf32> to vector<56x128xbf16>
    %c0_5 = arith.constant 0 : index
    %c0_6 = arith.constant 0 : index
    %11 = vector.load %arg4[%c0_5, %c0_6] : memref<56x128xbf16, #tpu.memory_space<vmem>>, vector<56x128xbf16>
    tpu.vector_store %arg4[%c0_5, %c0_6], %10 {strides = array<i32>} : memref<56x128xbf16, #tpu.memory_space<vmem>>, vector<56x128xbf16>,
    return
  }
  func.func @transform_0(%arg0: i32) -> (i32, i32) {
    %c0_i32 = arith.constant 0 : i32
    %c0_i32_0 = arith.constant 0 : i32
    return %arg0, %c0_i32 : i32, i32
  }
  func.func @transform_1(%arg0: i32) -> (i32, i32) {
    %c0_i32 = arith.constant 0 : i32
    %c0_i32_0 = arith.constant 0 : i32
    %c0_i32_1 = arith.constant 0 : i32
    return %c0_i32, %c0_i32_0 : i32, i32
  }
  func.func @transform_2(%arg0: i32) -> (i32, i32) {
    %c0_i32 = arith.constant 0 : i32
    %c0_i32_0 = arith.constant 0 : i32
    %c0_i32_1 = arith.constant 0 : i32
    return %c0_i32, %c0_i32_0 : i32, i32
  }
  func.func @transform_3(%arg0: i32) -> (i32, i32) {
    %c0_i32 = arith.constant 0 : i32
    %c0_i32_0 = arith.constant 0 : i32
    return %arg0, %c0_i32 : i32, i32
  }
}

module attributes {stable_mosaic.version = 11 : i64} {
  func.func @_mm_bn_stats_kernel(%arg0: i32, %arg1: memref<168x128xbf16, #tpu.memory_space<vmem>>, %arg2: memref<128x128xbf16, #tpu.memory_space<vmem>>, %arg3: memref<168x8xf32, #tpu.memory_space<vmem>>, %arg4: memref<8x128xf32, #tpu.memory_space<vmem>>, %arg5: memref<168x128xbf16, #tpu.memory_space<vmem>>, %arg6: memref<8x256xf32, #tpu.memory_space<vmem>>) attributes {dimension_semantics = [#tpu.dimension_semantics<parallel>], iteration_bounds = array<i64: 1>, scalar_prefetch = 0 : i64, scratch_operands = 0 : i64, tpu.core_type = #tpu.core_type<tc>, window_params = [{transform_indices = @transform_0, window_bounds = array<i64: 168, 128>}, {pipeline_mode = #tpu.pipeline_mode<synchronous>, transform_indices = @transform_1, window_bounds = array<i64: 128, 128>}, {transform_indices = @transform_2, window_bounds = array<i64: 168, 8>}, {pipeline_mode = #tpu.pipeline_mode<synchronous>, transform_indices = @transform_3, window_bounds = array<i64: 8, 128>}, {transform_indices = @transform_4, window_bounds = array<i64: 168, 128>}, {transform_indices = @transform_5, window_bounds = array<i64: 8, 256>}]} {
    %c0 = arith.constant 0 : index
    %c0_0 = arith.constant 0 : index
    %0 = vector.load %arg1[%c0, %c0_0] : memref<168x128xbf16, #tpu.memory_space<vmem>>, vector<168x128xbf16>
    %c0_1 = arith.constant 0 : index
    %c0_2 = arith.constant 0 : index
    %1 = vector.load %arg2[%c0_1, %c0_2] : memref<128x128xbf16, #tpu.memory_space<vmem>>, vector<128x128xbf16>
    %cst = arith.constant dense<0.000000e+00> : vector<168x128xf32>
    %2 = tpu.matmul %0, %1, %cst {dimension_numbers = #tpu.dot_dimension_numbers<[1], [0], [0], [1], [0, 0, 1, 1], [], []>} : vector<168x128xbf16>, vector<128x128xbf16>, vector<168x128xf32> -> vector<168x128xf32>
    %3 = arith.truncf %2 : vector<168x128xf32> to vector<168x128xbf16>
    %c0_3 = arith.constant 0 : index
    %c0_4 = arith.constant 0 : index
    %4 = vector.load %arg5[%c0_3, %c0_4] : memref<168x128xbf16, #tpu.memory_space<vmem>>, vector<168x128xbf16>
    tpu.vector_store %arg5[%c0_3, %c0_4], %3 {strides = array<i32>} : memref<168x128xbf16, #tpu.memory_space<vmem>>, vector<168x128xbf16>,
    %c0_5 = arith.constant 0 : index
    %c0_6 = arith.constant 0 : index
    %5 = vector.load %arg3[%c0_5, %c0_6] : memref<168x8xf32, #tpu.memory_space<vmem>>, vector<168x1xf32>
    %c0_7 = arith.constant 0 : index
    %c0_8 = arith.constant 0 : index
    %6 = vector.load %arg4[%c0_7, %c0_8] : memref<8x128xf32, #tpu.memory_space<vmem>>, vector<1x128xf32>
    %7 = vector.broadcast %5 : vector<168x1xf32> to vector<168x128xf32>
    %8 = vector.broadcast %6 : vector<1x128xf32> to vector<168x128xf32>
    %9 = arith.mulf %7, %8 : vector<168x128xf32>
    %c0_9 = arith.constant 0 : index
    %c1 = arith.constant 1 : index
    %10 = vector.load %arg3[%c0_9, %c1] : memref<168x8xf32, #tpu.memory_space<vmem>>, vector<168x1xf32>
    %c1_10 = arith.constant 1 : index
    %c0_11 = arith.constant 0 : index
    %11 = vector.load %arg4[%c1_10, %c0_11] : memref<8x128xf32, #tpu.memory_space<vmem>>, vector<1x128xf32>
    %12 = vector.broadcast %10 : vector<168x1xf32> to vector<168x128xf32>
    %13 = vector.broadcast %11 : vector<1x128xf32> to vector<168x128xf32>
    %14 = arith.mulf %12, %13 : vector<168x128xf32>
    %15 = arith.addf %9, %14 : vector<168x128xf32>
    %c0_12 = arith.constant 0 : index
    %c2 = arith.constant 2 : index
    %16 = vector.load %arg3[%c0_12, %c2] : memref<168x8xf32, #tpu.memory_space<vmem>>, vector<168x1xf32>
    %c2_13 = arith.constant 2 : index
    %c0_14 = arith.constant 0 : index
    %17 = vector.load %arg4[%c2_13, %c0_14] : memref<8x128xf32, #tpu.memory_space<vmem>>, vector<1x128xf32>
    %18 = vector.broadcast %16 : vector<168x1xf32> to vector<168x128xf32>
    %19 = vector.broadcast %17 : vector<1x128xf32> to vector<168x128xf32>
    %20 = arith.mulf %18, %19 : vector<168x128xf32>
    %21 = arith.addf %15, %20 : vector<168x128xf32>
    %c0_15 = arith.constant 0 : index
    %c3 = arith.constant 3 : index
    %22 = vector.load %arg3[%c0_15, %c3] : memref<168x8xf32, #tpu.memory_space<vmem>>, vector<168x1xf32>
    %c3_16 = arith.constant 3 : index
    %c0_17 = arith.constant 0 : index
    %23 = vector.load %arg4[%c3_16, %c0_17] : memref<8x128xf32, #tpu.memory_space<vmem>>, vector<1x128xf32>
    %24 = vector.broadcast %22 : vector<168x1xf32> to vector<168x128xf32>
    %25 = vector.broadcast %23 : vector<1x128xf32> to vector<168x128xf32>
    %26 = arith.mulf %24, %25 : vector<168x128xf32>
    %27 = arith.addf %21, %26 : vector<168x128xf32>
    %28 = arith.mulf %2, %27 : vector<168x128xf32>
    %cst_18 = arith.constant dense<0.000000e+00> : vector<128xf32>
    %29 = vector.multi_reduction <add>, %28, %cst_18 [0] : vector<168x128xf32> to vector<128xf32>
    %30 = vector.shape_cast %29 : vector<128xf32> to vector<1x128xf32>
    %31 = arith.mulf %28, %2 : vector<168x128xf32>
    %cst_19 = arith.constant dense<0.000000e+00> : vector<128xf32>
    %32 = vector.multi_reduction <add>, %31, %cst_19 [0] : vector<168x128xf32> to vector<128xf32>
    %33 = vector.shape_cast %32 : vector<128xf32> to vector<1x128xf32>
    %34 = vector.shape_cast %30 : vector<1x128xf32> to vector<1x128xf32>
    %35 = vector.broadcast %34 : vector<1x128xf32> to vector<8x128xf32>
    %c0_20 = arith.constant 0 : index
    %c0_21 = arith.constant 0 : index
    %36 = vector.load %arg6[%c0_20, %c0_21] : memref<8x256xf32, #tpu.memory_space<vmem>>, vector<8x128xf32>
    tpu.vector_store %arg6[%c0_20, %c0_21], %35 {strides = array<i32>} : memref<8x256xf32, #tpu.memory_space<vmem>>, vector<8x128xf32>,
    %37 = vector.shape_cast %33 : vector<1x128xf32> to vector<1x128xf32>
    %38 = vector.broadcast %37 : vector<1x128xf32> to vector<8x128xf32>
    %c0_22 = arith.constant 0 : index
    %c128 = arith.constant 128 : index
    %39 = vector.load %arg6[%c0_22, %c128] : memref<8x256xf32, #tpu.memory_space<vmem>>, vector<8x128xf32>
    tpu.vector_store %arg6[%c0_22, %c128], %38 {strides = array<i32>} : memref<8x256xf32, #tpu.memory_space<vmem>>, vector<8x128xf32>,
    return
  }
  func.func @transform_0(%arg0: i32) -> (i32, i32) {
    %c0_i32 = arith.constant 0 : i32
    %c0_i32_0 = arith.constant 0 : i32
    return %arg0, %c0_i32 : i32, i32
  }
  func.func @transform_1(%arg0: i32) -> (i32, i32) {
    %c0_i32 = arith.constant 0 : i32
    %c0_i32_0 = arith.constant 0 : i32
    %c0_i32_1 = arith.constant 0 : i32
    return %c0_i32, %c0_i32_0 : i32, i32
  }
  func.func @transform_2(%arg0: i32) -> (i32, i32) {
    %c0_i32 = arith.constant 0 : i32
    %c0_i32_0 = arith.constant 0 : i32
    return %arg0, %c0_i32 : i32, i32
  }
  func.func @transform_3(%arg0: i32) -> (i32, i32) {
    %c0_i32 = arith.constant 0 : i32
    %c0_i32_0 = arith.constant 0 : i32
    %c0_i32_1 = arith.constant 0 : i32
    return %c0_i32, %c0_i32_0 : i32, i32
  }
  func.func @transform_4(%arg0: i32) -> (i32, i32) {
    %c0_i32 = arith.constant 0 : i32
    %c0_i32_0 = arith.constant 0 : i32
    return %arg0, %c0_i32 : i32, i32
  }
  func.func @transform_5(%arg0: i32) -> (i32, i32) {
    %c0_i32 = arith.constant 0 : i32
    %c0_i32_0 = arith.constant 0 : i32
    return %arg0, %c0_i32 : i32, i32
  }
}

module attributes {stable_mosaic.version = 11 : i64} {
  func.func @_affine_relu_kernel(%arg0: i32, %arg1: memref<168x128xbf16, #tpu.memory_space<vmem>>, %arg2: memref<1x128xf32, #tpu.memory_space<vmem>>, %arg3: memref<1x128xf32, #tpu.memory_space<vmem>>, %arg4: memref<168x128xbf16, #tpu.memory_space<vmem>>) attributes {dimension_semantics = [#tpu.dimension_semantics<parallel>], iteration_bounds = array<i64: 1>, scalar_prefetch = 0 : i64, scratch_operands = 0 : i64, tpu.core_type = #tpu.core_type<tc>, window_params = [{transform_indices = @transform_0, window_bounds = array<i64: 168, 128>}, {pipeline_mode = #tpu.pipeline_mode<synchronous>, transform_indices = @transform_1, window_bounds = array<i64: 1, 128>}, {pipeline_mode = #tpu.pipeline_mode<synchronous>, transform_indices = @transform_2, window_bounds = array<i64: 1, 128>}, {transform_indices = @transform_3, window_bounds = array<i64: 168, 128>}]} {
    %c0 = arith.constant 0 : index
    %c0_0 = arith.constant 0 : index
    %0 = vector.load %arg1[%c0, %c0_0] : memref<168x128xbf16, #tpu.memory_space<vmem>>, vector<168x128xbf16>
    %1 = arith.extf %0 : vector<168x128xbf16> to vector<168x128xf32>
    %c0_1 = arith.constant 0 : index
    %c0_2 = arith.constant 0 : index
    %2 = vector.load %arg2[%c0_1, %c0_2] : memref<1x128xf32, #tpu.memory_space<vmem>>, vector<1x128xf32>
    %3 = vector.broadcast %2 : vector<1x128xf32> to vector<168x128xf32>
    %4 = arith.mulf %1, %3 : vector<168x128xf32>
    %c0_3 = arith.constant 0 : index
    %c0_4 = arith.constant 0 : index
    %5 = vector.load %arg3[%c0_3, %c0_4] : memref<1x128xf32, #tpu.memory_space<vmem>>, vector<1x128xf32>
    %6 = vector.broadcast %5 : vector<1x128xf32> to vector<168x128xf32>
    %7 = arith.addf %4, %6 : vector<168x128xf32>
    %cst = arith.constant 0.000000e+00 : f32
    %8 = vector.broadcast %cst : f32 to vector<168x128xf32>
    %9 = arith.maximumf %7, %8 : vector<168x128xf32>
    %10 = arith.truncf %9 : vector<168x128xf32> to vector<168x128xbf16>
    %c0_5 = arith.constant 0 : index
    %c0_6 = arith.constant 0 : index
    %11 = vector.load %arg4[%c0_5, %c0_6] : memref<168x128xbf16, #tpu.memory_space<vmem>>, vector<168x128xbf16>
    tpu.vector_store %arg4[%c0_5, %c0_6], %10 {strides = array<i32>} : memref<168x128xbf16, #tpu.memory_space<vmem>>, vector<168x128xbf16>,
    return
  }
  func.func @transform_0(%arg0: i32) -> (i32, i32) {
    %c0_i32 = arith.constant 0 : i32
    %c0_i32_0 = arith.constant 0 : i32
    return %arg0, %c0_i32 : i32, i32
  }
  func.func @transform_1(%arg0: i32) -> (i32, i32) {
    %c0_i32 = arith.constant 0 : i32
    %c0_i32_0 = arith.constant 0 : i32
    %c0_i32_1 = arith.constant 0 : i32
    return %c0_i32, %c0_i32_0 : i32, i32
  }
  func.func @transform_2(%arg0: i32) -> (i32, i32) {
    %c0_i32 = arith.constant 0 : i32
    %c0_i32_0 = arith.constant 0 : i32
    %c0_i32_1 = arith.constant 0 : i32
    return %c0_i32, %c0_i32_0 : i32, i32
  }
  func.func @transform_3(%arg0: i32) -> (i32, i32) {
    %c0_i32 = arith.constant 0 : i32
    %c0_i32_0 = arith.constant 0 : i32
    return %arg0, %c0_i32 : i32, i32
  }
}

module attributes {stable_mosaic.version = 11 : i64} {
  func.func @_mm_bn_stats_kernel(%arg0: i32, %arg1: memref<584x128xbf16, #tpu.memory_space<vmem>>, %arg2: memref<128x128xbf16, #tpu.memory_space<vmem>>, %arg3: memref<584x8xf32, #tpu.memory_space<vmem>>, %arg4: memref<8x128xf32, #tpu.memory_space<vmem>>, %arg5: memref<584x128xbf16, #tpu.memory_space<vmem>>, %arg6: memref<8x256xf32, #tpu.memory_space<vmem>>) attributes {dimension_semantics = [#tpu.dimension_semantics<parallel>], iteration_bounds = array<i64: 1>, scalar_prefetch = 0 : i64, scratch_operands = 0 : i64, tpu.core_type = #tpu.core_type<tc>, window_params = [{transform_indices = @transform_0, window_bounds = array<i64: 584, 128>}, {pipeline_mode = #tpu.pipeline_mode<synchronous>, transform_indices = @transform_1, window_bounds = array<i64: 128, 128>}, {transform_indices = @transform_2, window_bounds = array<i64: 584, 8>}, {pipeline_mode = #tpu.pipeline_mode<synchronous>, transform_indices = @transform_3, window_bounds = array<i64: 8, 128>}, {transform_indices = @transform_4, window_bounds = array<i64: 584, 128>}, {transform_indices = @transform_5, window_bounds = array<i64: 8, 256>}]} {
    %c0 = arith.constant 0 : index
    %c0_0 = arith.constant 0 : index
    %0 = vector.load %arg1[%c0, %c0_0] : memref<584x128xbf16, #tpu.memory_space<vmem>>, vector<584x128xbf16>
    %c0_1 = arith.constant 0 : index
    %c0_2 = arith.constant 0 : index
    %1 = vector.load %arg2[%c0_1, %c0_2] : memref<128x128xbf16, #tpu.memory_space<vmem>>, vector<128x128xbf16>
    %cst = arith.constant dense<0.000000e+00> : vector<584x128xf32>
    %2 = tpu.matmul %0, %1, %cst {dimension_numbers = #tpu.dot_dimension_numbers<[1], [0], [0], [1], [0, 0, 1, 1], [], []>} : vector<584x128xbf16>, vector<128x128xbf16>, vector<584x128xf32> -> vector<584x128xf32>
    %3 = arith.truncf %2 : vector<584x128xf32> to vector<584x128xbf16>
    %c0_3 = arith.constant 0 : index
    %c0_4 = arith.constant 0 : index
    %4 = vector.load %arg5[%c0_3, %c0_4] : memref<584x128xbf16, #tpu.memory_space<vmem>>, vector<584x128xbf16>
    tpu.vector_store %arg5[%c0_3, %c0_4], %3 {strides = array<i32>} : memref<584x128xbf16, #tpu.memory_space<vmem>>, vector<584x128xbf16>,
    %c0_5 = arith.constant 0 : index
    %c0_6 = arith.constant 0 : index
    %5 = vector.load %arg3[%c0_5, %c0_6] : memref<584x8xf32, #tpu.memory_space<vmem>>, vector<584x1xf32>
    %c0_7 = arith.constant 0 : index
    %c0_8 = arith.constant 0 : index
    %6 = vector.load %arg4[%c0_7, %c0_8] : memref<8x128xf32, #tpu.memory_space<vmem>>, vector<1x128xf32>
    %7 = vector.broadcast %5 : vector<584x1xf32> to vector<584x128xf32>
    %8 = vector.broadcast %6 : vector<1x128xf32> to vector<584x128xf32>
    %9 = arith.mulf %7, %8 : vector<584x128xf32>
    %c0_9 = arith.constant 0 : index
    %c1 = arith.constant 1 : index
    %10 = vector.load %arg3[%c0_9, %c1] : memref<584x8xf32, #tpu.memory_space<vmem>>, vector<584x1xf32>
    %c1_10 = arith.constant 1 : index
    %c0_11 = arith.constant 0 : index
    %11 = vector.load %arg4[%c1_10, %c0_11] : memref<8x128xf32, #tpu.memory_space<vmem>>, vector<1x128xf32>
    %12 = vector.broadcast %10 : vector<584x1xf32> to vector<584x128xf32>
    %13 = vector.broadcast %11 : vector<1x128xf32> to vector<584x128xf32>
    %14 = arith.mulf %12, %13 : vector<584x128xf32>
    %15 = arith.addf %9, %14 : vector<584x128xf32>
    %c0_12 = arith.constant 0 : index
    %c2 = arith.constant 2 : index
    %16 = vector.load %arg3[%c0_12, %c2] : memref<584x8xf32, #tpu.memory_space<vmem>>, vector<584x1xf32>
    %c2_13 = arith.constant 2 : index
    %c0_14 = arith.constant 0 : index
    %17 = vector.load %arg4[%c2_13, %c0_14] : memref<8x128xf32, #tpu.memory_space<vmem>>, vector<1x128xf32>
    %18 = vector.broadcast %16 : vector<584x1xf32> to vector<584x128xf32>
    %19 = vector.broadcast %17 : vector<1x128xf32> to vector<584x128xf32>
    %20 = arith.mulf %18, %19 : vector<584x128xf32>
    %21 = arith.addf %15, %20 : vector<584x128xf32>
    %c0_15 = arith.constant 0 : index
    %c3 = arith.constant 3 : index
    %22 = vector.load %arg3[%c0_15, %c3] : memref<584x8xf32, #tpu.memory_space<vmem>>, vector<584x1xf32>
    %c3_16 = arith.constant 3 : index
    %c0_17 = arith.constant 0 : index
    %23 = vector.load %arg4[%c3_16, %c0_17] : memref<8x128xf32, #tpu.memory_space<vmem>>, vector<1x128xf32>
    %24 = vector.broadcast %22 : vector<584x1xf32> to vector<584x128xf32>
    %25 = vector.broadcast %23 : vector<1x128xf32> to vector<584x128xf32>
    %26 = arith.mulf %24, %25 : vector<584x128xf32>
    %27 = arith.addf %21, %26 : vector<584x128xf32>
    %28 = arith.mulf %2, %27 : vector<584x128xf32>
    %cst_18 = arith.constant dense<0.000000e+00> : vector<128xf32>
    %29 = vector.multi_reduction <add>, %28, %cst_18 [0] : vector<584x128xf32> to vector<128xf32>
    %30 = vector.shape_cast %29 : vector<128xf32> to vector<1x128xf32>
    %31 = arith.mulf %28, %2 : vector<584x128xf32>
    %cst_19 = arith.constant dense<0.000000e+00> : vector<128xf32>
    %32 = vector.multi_reduction <add>, %31, %cst_19 [0] : vector<584x128xf32> to vector<128xf32>
    %33 = vector.shape_cast %32 : vector<128xf32> to vector<1x128xf32>
    %34 = vector.shape_cast %30 : vector<1x128xf32> to vector<1x128xf32>
    %35 = vector.broadcast %34 : vector<1x128xf32> to vector<8x128xf32>
    %c0_20 = arith.constant 0 : index
    %c0_21 = arith.constant 0 : index
    %36 = vector.load %arg6[%c0_20, %c0_21] : memref<8x256xf32, #tpu.memory_space<vmem>>, vector<8x128xf32>
    tpu.vector_store %arg6[%c0_20, %c0_21], %35 {strides = array<i32>} : memref<8x256xf32, #tpu.memory_space<vmem>>, vector<8x128xf32>,
    %37 = vector.shape_cast %33 : vector<1x128xf32> to vector<1x128xf32>
    %38 = vector.broadcast %37 : vector<1x128xf32> to vector<8x128xf32>
    %c0_22 = arith.constant 0 : index
    %c128 = arith.constant 128 : index
    %39 = vector.load %arg6[%c0_22, %c128] : memref<8x256xf32, #tpu.memory_space<vmem>>, vector<8x128xf32>
    tpu.vector_store %arg6[%c0_22, %c128], %38 {strides = array<i32>} : memref<8x256xf32, #tpu.memory_space<vmem>>, vector<8x128xf32>,
    return
  }
  func.func @transform_0(%arg0: i32) -> (i32, i32) {
    %c0_i32 = arith.constant 0 : i32
    %c0_i32_0 = arith.constant 0 : i32
    return %arg0, %c0_i32 : i32, i32
  }
  func.func @transform_1(%arg0: i32) -> (i32, i32) {
    %c0_i32 = arith.constant 0 : i32
    %c0_i32_0 = arith.constant 0 : i32
    %c0_i32_1 = arith.constant 0 : i32
    return %c0_i32, %c0_i32_0 : i32, i32
  }
  func.func @transform_2(%arg0: i32) -> (i32, i32) {
    %c0_i32 = arith.constant 0 : i32
    %c0_i32_0 = arith.constant 0 : i32
    return %arg0, %c0_i32 : i32, i32
  }
  func.func @transform_3(%arg0: i32) -> (i32, i32) {
    %c0_i32 = arith.constant 0 : i32
    %c0_i32_0 = arith.constant 0 : i32
    %c0_i32_1 = arith.constant 0 : i32
    return %c0_i32, %c0_i32_0 : i32, i32
  }
  func.func @transform_4(%arg0: i32) -> (i32, i32) {
    %c0_i32 = arith.constant 0 : i32
    %c0_i32_0 = arith.constant 0 : i32
    return %arg0, %c0_i32 : i32, i32
  }
  func.func @transform_5(%arg0: i32) -> (i32, i32) {
    %c0_i32 = arith.constant 0 : i32
    %c0_i32_0 = arith.constant 0 : i32
    return %arg0, %c0_i32 : i32, i32
  }
}

module attributes {stable_mosaic.version = 11 : i64} {
  func.func @_affine_relu_kernel(%arg0: i32, %arg1: memref<584x128xbf16, #tpu.memory_space<vmem>>, %arg2: memref<1x128xf32, #tpu.memory_space<vmem>>, %arg3: memref<1x128xf32, #tpu.memory_space<vmem>>, %arg4: memref<584x128xbf16, #tpu.memory_space<vmem>>) attributes {dimension_semantics = [#tpu.dimension_semantics<parallel>], iteration_bounds = array<i64: 1>, scalar_prefetch = 0 : i64, scratch_operands = 0 : i64, tpu.core_type = #tpu.core_type<tc>, window_params = [{transform_indices = @transform_0, window_bounds = array<i64: 584, 128>}, {pipeline_mode = #tpu.pipeline_mode<synchronous>, transform_indices = @transform_1, window_bounds = array<i64: 1, 128>}, {pipeline_mode = #tpu.pipeline_mode<synchronous>, transform_indices = @transform_2, window_bounds = array<i64: 1, 128>}, {transform_indices = @transform_3, window_bounds = array<i64: 584, 128>}]} {
    %c0 = arith.constant 0 : index
    %c0_0 = arith.constant 0 : index
    %0 = vector.load %arg1[%c0, %c0_0] : memref<584x128xbf16, #tpu.memory_space<vmem>>, vector<584x128xbf16>
    %1 = arith.extf %0 : vector<584x128xbf16> to vector<584x128xf32>
    %c0_1 = arith.constant 0 : index
    %c0_2 = arith.constant 0 : index
    %2 = vector.load %arg2[%c0_1, %c0_2] : memref<1x128xf32, #tpu.memory_space<vmem>>, vector<1x128xf32>
    %3 = vector.broadcast %2 : vector<1x128xf32> to vector<584x128xf32>
    %4 = arith.mulf %1, %3 : vector<584x128xf32>
    %c0_3 = arith.constant 0 : index
    %c0_4 = arith.constant 0 : index
    %5 = vector.load %arg3[%c0_3, %c0_4] : memref<1x128xf32, #tpu.memory_space<vmem>>, vector<1x128xf32>
    %6 = vector.broadcast %5 : vector<1x128xf32> to vector<584x128xf32>
    %7 = arith.addf %4, %6 : vector<584x128xf32>
    %cst = arith.constant 0.000000e+00 : f32
    %8 = vector.broadcast %cst : f32 to vector<584x128xf32>
    %9 = arith.maximumf %7, %8 : vector<584x128xf32>
    %10 = arith.truncf %9 : vector<584x128xf32> to vector<584x128xbf16>
    %c0_5 = arith.constant 0 : index
    %c0_6 = arith.constant 0 : index
    %11 = vector.load %arg4[%c0_5, %c0_6] : memref<584x128xbf16, #tpu.memory_space<vmem>>, vector<584x128xbf16>
    tpu.vector_store %arg4[%c0_5, %c0_6], %10 {strides = array<i32>} : memref<584x128xbf16, #tpu.memory_space<vmem>>, vector<584x128xbf16>,
    return
  }
  func.func @transform_0(%arg0: i32) -> (i32, i32) {
    %c0_i32 = arith.constant 0 : i32
    %c0_i32_0 = arith.constant 0 : i32
    return %arg0, %c0_i32 : i32, i32
  }
  func.func @transform_1(%arg0: i32) -> (i32, i32) {
    %c0_i32 = arith.constant 0 : i32
    %c0_i32_0 = arith.constant 0 : i32
    %c0_i32_1 = arith.constant 0 : i32
    return %c0_i32, %c0_i32_0 : i32, i32
  }
  func.func @transform_2(%arg0: i32) -> (i32, i32) {
    %c0_i32 = arith.constant 0 : i32
    %c0_i32_0 = arith.constant 0 : i32
    %c0_i32_1 = arith.constant 0 : i32
    return %c0_i32, %c0_i32_0 : i32, i32
  }
  func.func @transform_3(%arg0: i32) -> (i32, i32) {
    %c0_i32 = arith.constant 0 : i32
    %c0_i32_0 = arith.constant 0 : i32
    return %arg0, %c0_i32 : i32, i32
  }
}

module attributes {stable_mosaic.version = 11 : i64} {
  func.func @_mm_bias_tanh_kernel(%arg0: i32, %arg1: memref<1024x128xbf16, #tpu.memory_space<vmem>>, %arg2: memref<128x128xbf16, #tpu.memory_space<vmem>>, %arg3: memref<1x128xf32, #tpu.memory_space<vmem>>, %arg4: memref<1024x128xbf16, #tpu.memory_space<vmem>>) attributes {dimension_semantics = [#tpu.dimension_semantics<parallel>], iteration_bounds = array<i64: 3>, scalar_prefetch = 0 : i64, scratch_operands = 0 : i64, tpu.core_type = #tpu.core_type<tc>, window_params = [{transform_indices = @transform_0, window_bounds = array<i64: 1024, 128>}, {pipeline_mode = #tpu.pipeline_mode<synchronous>, transform_indices = @transform_1, window_bounds = array<i64: 128, 128>}, {pipeline_mode = #tpu.pipeline_mode<synchronous>, transform_indices = @transform_2, window_bounds = array<i64: 1, 128>}, {transform_indices = @transform_3, window_bounds = array<i64: 1024, 128>}]} {
    %c0 = arith.constant 0 : index
    %c0_0 = arith.constant 0 : index
    %0 = vector.load %arg1[%c0, %c0_0] : memref<1024x128xbf16, #tpu.memory_space<vmem>>, vector<1024x128xbf16>
    %c0_1 = arith.constant 0 : index
    %c0_2 = arith.constant 0 : index
    %1 = vector.load %arg2[%c0_1, %c0_2] : memref<128x128xbf16, #tpu.memory_space<vmem>>, vector<128x128xbf16>
    %cst = arith.constant dense<0.000000e+00> : vector<1024x128xf32>
    %2 = tpu.matmul %0, %1, %cst {dimension_numbers = #tpu.dot_dimension_numbers<[1], [0], [0], [1], [0, 0, 1, 1], [], []>} : vector<1024x128xbf16>, vector<128x128xbf16>, vector<1024x128xf32> -> vector<1024x128xf32>
    %c0_3 = arith.constant 0 : index
    %c0_4 = arith.constant 0 : index
    %3 = vector.load %arg3[%c0_3, %c0_4] : memref<1x128xf32, #tpu.memory_space<vmem>>, vector<1x128xf32>
    %4 = vector.broadcast %3 : vector<1x128xf32> to vector<1024x128xf32>
    %5 = arith.addf %2, %4 : vector<1024x128xf32>
    %6 = math.tanh %5 : vector<1024x128xf32>
    %7 = arith.truncf %6 : vector<1024x128xf32> to vector<1024x128xbf16>
    %c0_5 = arith.constant 0 : index
    %c0_6 = arith.constant 0 : index
    %8 = vector.load %arg4[%c0_5, %c0_6] : memref<1024x128xbf16, #tpu.memory_space<vmem>>, vector<1024x128xbf16>
    tpu.vector_store %arg4[%c0_5, %c0_6], %7 {strides = array<i32>} : memref<1024x128xbf16, #tpu.memory_space<vmem>>, vector<1024x128xbf16>,
    return
  }
  func.func @transform_0(%arg0: i32) -> (i32, i32) {
    %c0_i32 = arith.constant 0 : i32
    %c0_i32_0 = arith.constant 0 : i32
    return %arg0, %c0_i32 : i32, i32
  }
  func.func @transform_1(%arg0: i32) -> (i32, i32) {
    %c0_i32 = arith.constant 0 : i32
    %c0_i32_0 = arith.constant 0 : i32
    %c0_i32_1 = arith.constant 0 : i32
    return %c0_i32, %c0_i32_0 : i32, i32
  }
  func.func @transform_2(%arg0: i32) -> (i32, i32) {
    %c0_i32 = arith.constant 0 : i32
    %c0_i32_0 = arith.constant 0 : i32
    %c0_i32_1 = arith.constant 0 : i32
    return %c0_i32, %c0_i32_0 : i32, i32
  }
  func.func @transform_3(%arg0: i32) -> (i32, i32) {
    %c0_i32 = arith.constant 0 : i32
    %c0_i32_0 = arith.constant 0 : i32
    return %arg0, %c0_i32 : i32, i32
  }
}

</mosaic_0001>

<bundles_post_ra>
// kernel: tile.88
= control target key start
LH: loop header
LB: loop body
LE: loop exit
PB: predicated region body
PF: predicated region fallthrough
CT: control target
= control target key end

     0   :  { %s22_s0 = inlined_call_operand.vmem [shape: f32[32], index: 0, kind: input, shape index: {}]   ;;  %s23_s1 = inlined_call_operand.vmem [shape: f32[4,32], index: 1, kind: output, shape index: {}]  }
   0x1   :  { %v4_v0 = vld [vmem:[%s22_s0] ss:$0 sm:$0xff] }
   0x2   :  { %5 = vst [vmem:[%s23_s1] sm:$0xf] %v4_v0 }

// kernel: tile.89
= control target key start
LH: loop header
LB: loop body
LE: loop exit
PB: predicated region body
PF: predicated region fallthrough
CT: control target
= control target key end

     0   :  { %vm7_vm0 = vcmask 261120   ;;  %s37_s8 = smov 32   ;;  %s38_s9 = smov 64   ;;  %vm13_vm1 = vcmask 1048320   ;;  %vm19_vm2 = vcmask 785920   ;;  %vm25_vm3 = vcmask 523520   ;;  %s55_s0 = inlined_call_operand.vmem [shape: f32[4,32], index: 0, kind: input, shape index: {}]   ;;  %s56_s1 = inlined_call_operand.vmem [shape: f32[1,128], index: 1, kind: output, shape index: {}]  }
   0x1   :  { %v4_v0 = vld [vmem:[%s55_s0] sm:$0xf]  ;;  %s36_s0 = smov 96  }
   0x2   :  { %5 = vst [vmem:[#allocation1] sm:$0xf] %v4_v0 }
   0x9   :  { %v10_v1 = vld [vmem:[#allocation1 + $0x3] sm:$0x1]   ;;  %v22_v2 = vld [vmem:[#allocation1 + $0x1] sm:$0x1]   ;;  %v6_v3 = vld [vmem:[#allocation1] sm:$0x1]  }
   0xa   :  { %11 = vrot.lane.b32.xlu0 %v10_v1, %s36_s0  ;;  %23 = vrot.lane.b32.xlu1 %v22_v2, %s37_s8  ;;  %v16_v4 = vld [vmem:[#allocation1 + $0x2] sm:$0x1]   ;;  %8 = vst.msk [vmem:[#allocation0] sm:$0x1] %vm7_vm0, %v6_v3  }
   0xe   :  { %17 = vrot.lane.b32.xlu0 %v16_v4, %s38_s9 }
  0x7c   :  { %v12_v5 = vpop.permute.xlu0 %11   ;;  %v24_v6 = vpop.permute.xlu1 %23  }
  0x7d   :  { %14 = vst.msk [vmem:[#allocation0] sm:$0x1] %vm13_vm1, %v12_v5  }
  0x80   :  { %v18_v7 = vpop.permute.xlu0 %17  }
  0x81   :  { %20 = vst.msk [vmem:[#allocation0] sm:$0x1] %vm19_vm2, %v18_v7  }
  0x82   :  { %26 = vst.msk [vmem:[#allocation0] sm:$0x1] %vm25_vm3, %v24_v6  }
  0x89   :  { %v30_v8 = vld [vmem:[#allocation0] sm:$0x1] }
  0x8a   :  { %32 = vst [vmem:[%s56_s1] sm:$0x1] %v30_v8 }

// kernel: eq.25
= control target key start
LH: loop header
LB: loop body
LE: loop exit
PB: predicated region body
PF: predicated region fallthrough
CT: control target
= control target key end

     0   :  { %vm7_vm0 = vcmask 261120   ;;  %s37_s8 = smov 32   ;;  %s38_s9 = smov 64   ;;  %vm13_vm1 = vcmask 1048320   ;;  %vm19_vm2 = vcmask 785920   ;;  %vm25_vm3 = vcmask 523520   ;;  %s55_s0 = inlined_call_operand.vmem [shape: s32[4,32], index: 0, kind: input, shape index: {}]   ;;  %s56_s1 = inlined_call_operand.vmem [shape: s32[128], index: 1, kind: output, shape index: {}]  }
   0x1   :  { %v4_v0 = vld [vmem:[%s55_s0] sm:$0xf]  ;;  %s36_s0 = smov 96  }
   0x2   :  { %5 = vst [vmem:[#allocation1] sm:$0xf] %v4_v0 }
   0x9   :  { %v10_v1 = vld [vmem:[#allocation1 + $0x3] sm:$0x1]   ;;  %v22_v2 = vld [vmem:[#allocation1 + $0x1] sm:$0x1]   ;;  %v6_v3 = vld [vmem:[#allocation1] sm:$0x1]  }
   0xa   :  { %11 = vrot.lane.b32.xlu0 %v10_v1, %s36_s0  ;;  %23 = vrot.lane.b32.xlu1 %v22_v2, %s37_s8  ;;  %v16_v4 = vld [vmem:[#allocation1 + $0x2] sm:$0x1]   ;;  %8 = vst.msk [vmem:[#allocation0] sm:$0x1] %vm7_vm0, %v6_v3  }
   0xe   :  { %17 = vrot.lane.b32.xlu0 %v16_v4, %s38_s9 }
  0x7c   :  { %v12_v5 = vpop.permute.xlu0 %11   ;;  %v24_v6 = vpop.permute.xlu1 %23  }
  0x7d   :  { %14 = vst.msk [vmem:[#allocation0] sm:$0x1] %vm13_vm1, %v12_v5  }
  0x80   :  { %v18_v7 = vpop.permute.xlu0 %17  }
  0x81   :  { %20 = vst.msk [vmem:[#allocation0] sm:$0x1] %vm19_vm2, %v18_v7  }
  0x82   :  { %26 = vst.msk [vmem:[#allocation0] sm:$0x1] %vm25_vm3, %v24_v6  }
  0x89   :  { %v30_v8 = vld [vmem:[#allocation0] sm:$0x1] }
  0x8a   :  { %32 = vst [vmem:[%s56_s1] sm:$0x1] %v30_v8 }

// kernel: tile.52
= control target key start
LH: loop header
LB: loop body
LE: loop exit
PB: predicated region body
PF: predicated region fallthrough
CT: control target
= control target key end

     0   :  { %s28_s0 = inlined_call_operand.vmem [shape: f32[64], index: 0, kind: input, shape index: {}]   ;;  %s29_s1 = inlined_call_operand.vmem [shape: f32[16,64], index: 1, kind: output, shape index: {}]  }
   0x1   :  { %v4_v0 = vld [vmem:[%s28_s0] ss:$0 sm:$0xff] }
   0x2   :  { %5 = vst [vmem:[%s29_s1] sm:$0xff] %v4_v0  ;;  %8 = vst [vmem:[%s29_s1 + $0x8] sm:$0xff] %v4_v0 }

// kernel: tile.54
= control target key start
LH: loop header
LB: loop body
LE: loop exit
PB: predicated region body
PF: predicated region fallthrough
CT: control target
= control target key end

     0   :  { %vm3_vm0 = vcmask 523264   ;;  %vm10_vm1 = vcmask 1048064   ;;  %s116_s0 = inlined_call_operand.vmem [shape: f32[16,64], index: 0, kind: input, shape index: {}]   ;;  %s117_s1 = inlined_call_operand.vmem [shape: f32[1,1024], index: 1, kind: output, shape index: {}]  }
   0x1   :  { %v66_v0 = vld [vmem:[%s116_s0 + $0x1] ss:$2 sm:$0xff]   ;;  %v2_v1 = vld [vmem:[%s116_s0] ss:$2 sm:$0xff]   ;;  %s75_s0 = smov 64  }
   0x2   :  { %8 = vrot.lane.b32.xlu0 %v66_v0, %s75_s0  ;;  %4 = vst.msk [vmem:[#allocation0] ss:$8 sm:$0xf] %vm3_vm0, %v2_v1   ;;  %5 = vst.msk [vmem:[#allocation0] ss:$8 sm:$0xf0] %vm3_vm0, %v2_v1  }
  0x74   :  { %v9_v2 = vpop.permute.xlu0 %8  }
  0x75   :  { %11 = vst.msk [vmem:[#allocation0] ss:$8 sm:$0xf] %vm10_vm1, %v9_v2   ;;  %12 = vst.msk [vmem:[#allocation0] ss:$8 sm:$0xf0] %vm10_vm1, %v9_v2  }
  0x7c   :  { %v16_v3 = vld [vmem:[#allocation0] sm:$0x1]  ;;  %v20_v4 = vld [vmem:[#allocation0 + $0x8] sm:$0x1]  ;;  %v25_v5 = vld [vmem:[#allocation0 + $0x10] sm:$0x1] }
  0x7d   :  { %18 = vst [vmem:[%s117_s1] sm:$0x1] %v16_v3  ;;  %67 = vst [vmem:[%s117_s1 + $0x1] sm:$0x1] %v20_v4  ;;  %v31_v6 = vld [vmem:[#allocation0 + $0x18] sm:$0x1] }
  0x7e   :  { %68 = vst [vmem:[%s117_s1 + $0x2] sm:$0x1] %v25_v5  ;;  %v37_v7 = vld [vmem:[#allocation0 + $0x20] sm:$0x1]  ;;  %v43_v8 = vld [vmem:[#allocation0 + $0x28] sm:$0x1] }
  0x7f   :  { %69 = vst [vmem:[%s117_s1 + $0x3] sm:$0x1] %v31_v6  ;;  %70 = vst [vmem:[%s117_s1 + $0x4] sm:$0x1] %v37_v7  ;;  %v49_v9 = vld [vmem:[#allocation0 + $0x30] sm:$0x1] }
  0x80   :  { %71 = vst [vmem:[%s117_s1 + $0x5] sm:$0x1] %v43_v8  ;;  %v55_v10 = vld [vmem:[#allocation0 + $0x38] sm:$0x1]  ;;  %72 = vst [vmem:[%s117_s1 + $0x6] sm:$0x1] %v49_v9 }
  0x81   :  { %73 = vst [vmem:[%s117_s1 + $0x7] sm:$0x1] %v55_v10 }

// kernel: generator_forward.10
= control target key start
LH: loop header
LB: loop body
LE: loop exit
PB: predicated region body
PF: predicated region fallthrough
CT: control target
= control target key end

     0   :  { %v28_v0 = vlaneseq  ;;  %s232_s0 = inlined_call_operand.vmem [shape: bf16[8,1024], index: 0, kind: input, shape index: {}]   ;;  %s233_s1 = inlined_call_operand.vmem [shape: f32[1,1024], index: 1, kind: input, shape index: {}]   ;;  %s234_s2 = inlined_call_operand.vmem [shape: f32[1,1024], index: 2, kind: input, shape index: {}]   ;;  %s235_s3 = inlined_call_operand.vmem [shape: bf16[8,1024], index: 3, kind: output, shape index: {}]  }
   0x1   :  { %v14_v1 = vld [vmem:[%s232_s0] sm:$0xff]  ;;  %v15_v5 = vld [vmem:[%s232_s0 + $0x8] sm:$0xff]  ;;  %v16_v6 = vld [vmem:[%s232_s0 + $0x10] sm:$0xff] }
   0x2   :  { %v18_v2 = vunpack.c.l.bf16 %v14_v1  ;;  %v19_v3 = vunpack.c.h.bf16 %v14_v1  ;;  %v29_v4 = vshrl.u32 %v28_v0, 7  ;;  %v17_v7 = vld [vmem:[%s232_s0 + $0x18] sm:$0xff]  ;;  %v26_v8 = vld [vmem:[%s233_s1] sm:$0xff]  ;;  %v20_v10 = vunpack.c.l.bf16 %v15_v5 }
   0x3   :  { %v76_v9 = vld [vmem:[%s234_s2] sm:$0xff]  ;;  %v21_v11 = vunpack.c.h.bf16 %v15_v5  ;;  %v22_v12 = vunpack.c.l.bf16 %v16_v6  ;;  %v23_v13 = vunpack.c.h.bf16 %v16_v6  ;;  %v24_v20 = vunpack.c.l.bf16 %v17_v7 }
   0x4   :  { %v30_v14 = vsub.s32 0, %v29_v4  ;;  %v34_v15 = vsub.s32 1, %v29_v4  ;;  %v38_v16 = vsub.s32 2, %v29_v4  ;;  %v42_v17 = vsub.s32 3, %v29_v4 }
   0x5   :  { %v46_v18 = vsub.s32 4, %v29_v4  ;;  %v50_v19 = vsub.s32 5, %v29_v4  ;;  %v25_v21 = vunpack.c.h.bf16 %v17_v7  ;;  %v54_v44 = vsub.s32 6, %v29_v4 }
   0x6   :  { %v31_v22 = vrot.slane %v26_v8, %v30_v14  ;;  %v35_v23 = vrot.slane %v26_v8, %v34_v15  ;;  %v81_v24 = vrot.slane %v76_v9, %v30_v14  ;;  %v85_v25 = vrot.slane %v76_v9, %v34_v15 }
   0x7   :  { %v39_v26 = vrot.slane %v26_v8, %v38_v16  ;;  %v43_v27 = vrot.slane %v26_v8, %v42_v17  ;;  %v89_v28 = vrot.slane %v76_v9, %v38_v16  ;;  %v93_v29 = vrot.slane %v76_v9, %v42_v17 }
   0x8   :  { %v68_v30 = vmul.f32 %v31_v22, %v18_v2  ;;  %v69_v31 = vmul.f32 %v35_v23, %v19_v3  ;;  %v47_v32 = vrot.slane %v26_v8, %v46_v18  ;;  %v51_v33 = vrot.slane %v26_v8, %v50_v19 }
   0x9   :  { %v70_v34 = vmul.f32 %v39_v26, %v20_v10  ;;  %v71_v35 = vmul.f32 %v43_v27, %v21_v11  ;;  %v97_v36 = vrot.slane %v76_v9, %v46_v18  ;;  %v101_v37 = vrot.slane %v76_v9, %v50_v19 }
   0xa   :  { %v118_v38 = vadd.f32 %v81_v24, %v68_v30  ;;  %v119_v39 = vadd.f32 %v85_v25, %v69_v31  ;;  %v72_v40 = vmul.f32 %v47_v32, %v22_v12  ;;  %v73_v41 = vmul.f32 %v51_v33, %v23_v13 }
   0xb   :  { %v120_v42 = vadd.f32 %v89_v28, %v70_v34  ;;  %v121_v43 = vadd.f32 %v93_v29, %v71_v35  ;;  %v58_v45 = vsub.s32 7, %v29_v4  ;;  %v55_v52 = vrot.slane %v26_v8, %v54_v44 }
   0xc   :  { %v126_v46 = vmax.f32 %v118_v38, 0.0  ;;  %v127_v47 = vmax.f32 %v119_v39, 0.0  ;;  %v122_v48 = vadd.f32 %v97_v36, %v72_v40  ;;  %v123_v49 = vadd.f32 %v101_v37, %v73_v41 }
   0xd   :  { %v128_v50 = vmax.f32 %v120_v42, 0.0  ;;  %v129_v51 = vmax.f32 %v121_v43, 0.0  ;;  %v59_v53 = vrot.slane %v26_v8, %v58_v45  ;;  %v105_v57 = vrot.slane %v76_v9, %v54_v44 }
   0xe   :  { %v178_v54 = vpack.c.bf16 %v127_v47, %v126_v46  ;;  %v130_v55 = vmax.f32 %v122_v48, 0.0  ;;  %v131_v56 = vmax.f32 %v123_v49, 0.0  ;;  %v74_v59 = vmul.f32 %v55_v52, %v24_v20 }
   0xf   :  { %v179_v58 = vpack.c.bf16 %v129_v51, %v128_v50  ;;  %v75_v60 = vmul.f32 %v59_v53, %v25_v21  ;;  %v109_v61 = vrot.slane %v76_v9, %v58_v45 }
  0x10   :  { %166 = vst [vmem:[%s235_s3] sm:$0xff] %v178_v54  ;;  %v180_v62 = vpack.c.bf16 %v131_v56, %v130_v55  ;;  %v124_v63 = vadd.f32 %v105_v57, %v74_v59 }
  0x11   :  { %167 = vst [vmem:[%s235_s3 + $0x8] sm:$0xff] %v179_v58  ;;  %v125_v0 = vadd.f32 %v109_v61, %v75_v60 }
  0x12   :  { %168 = vst [vmem:[%s235_s3 + $0x10] sm:$0xff] %v180_v62  ;;  %v132_v1 = vmax.f32 %v124_v63, 0.0 }
  0x13   :  { %v133_v2 = vmax.f32 %v125_v0, 0.0 }
  0x15   :  { %v181_v3 = vpack.c.bf16 %v133_v2, %v132_v1 }
  0x17   :  { %169 = vst [vmem:[%s235_s3 + $0x18] sm:$0xff] %v181_v3 }

// kernel: generator_forward.9
= control target key start
LH: loop header
LB: loop body
LE: loop exit
PB: predicated region body
PF: predicated region fallthrough
CT: control target
= control target key end

     0   :  { %v1081_v3 = vmov 0   ;;  %v1082_v9 = vmov 2   ;;  %s1531_s1 = inlined_call_operand.vmem [shape: bf16[128,1024], index: 1, kind: input, shape index: {}]   ;;  %s1532_s2 = inlined_call_operand.vmem [shape: f32[8,8], index: 2, kind: input, shape index: {}]   ;;  %s1533_s0 = inlined_call_operand.vmem [shape: bf16[8,128], index: 0, kind: input, shape index: {}]   ;;  %s1534_s3 = inlined_call_operand.vmem [shape: f32[8,1024], index: 3, kind: input, shape index: {}]   ;;  %s1535_s4 = inlined_call_operand.vmem [shape: bf16[8,1024], index: 4, kind: output, shape index: {0}]   ;;  %s1536_s5 = inlined_call_operand.vmem [shape: f32[8,2048], index: 5, kind: output, shape index: {1}]  }
   0x1   :  { %v21_v0 = vld [vmem:[%s1531_s1] sm:$0xff]  ;;  %v22_v2 = vld [vmem:[%s1531_s1 + $0x8] sm:$0xff]  ;;  %437 = vmatprep.mubr.bf16.mxu0 %v1081_v3  ;;  %478 = vmatprep.mubr.bf16.mxu1 %v1081_v3 }
   0x2   :  { %v25_v1 = vld [vmem:[%s1531_s1 + $0x20] sm:$0xff]  ;;  %v26_v5 = vld [vmem:[%s1531_s1 + $0x28] sm:$0xff]  ;;  %1076 = vset.pattern.permute.xlu0 %v1081_v3  ;;  %1078 = vset.pattern.permute.xlu1 %v1082_v9 }
   0x3   :  { %v995_v4 = vcombine.high %v21_v0, %v25_v1  ;;  %v994_v6 = vcombine.low %v21_v0, %v25_v1  ;;  %v29_v7 = vld [vmem:[%s1531_s1 + $0x40] sm:$0xff]  ;;  %v997_v10 = vcombine.high %v22_v2, %v26_v5  ;;  %v996_v11 = vcombine.low %v22_v2, %v26_v5  ;;  %v30_v13 = vld [vmem:[%s1531_s1 + $0x48] sm:$0xff]  ;;  %v23_v1 = vld [vmem:[%s1531_s1 + $0x10] sm:$0xff] }
   0x4   :  { %v33_v8 = vld [vmem:[%s1531_s1 + $0x60] sm:$0xff]  ;;  %v34_v14 = vld [vmem:[%s1531_s1 + $0x68] sm:$0xff]  ;;  %v27_v2 = vld [vmem:[%s1531_s1 + $0x30] sm:$0xff] }
   0x5   :  { %v1003_v12 = vcombine.high %v29_v7, %v33_v8  ;;  %v37_v15 = vld [vmem:[%s1531_s1 + $0x80] sm:$0xff]  ;;  %405 = vmatprep.subr.bf16.mxu0 %v995_v4  ;;  %v1005_v16 = vcombine.high %v30_v13, %v34_v14  ;;  %v38_v18 = vld [vmem:[%s1531_s1 + $0x88] sm:$0xff]  ;;  %446 = vmatprep.subr.bf16.mxu1 %v997_v10  ;;  %v1002_v20 = vcombine.low %v29_v7, %v33_v8  ;;  %v1083_v4 = vmov 1   ;;  %v24_v5 = vld [vmem:[%s1531_s1 + $0x18] sm:$0xff] }
   0x6   :  { %v41_v17 = vld [vmem:[%s1531_s1 + $0xa0] sm:$0xff]  ;;  %v42_v19 = vld [vmem:[%s1531_s1 + $0xa8] sm:$0xff]  ;;  %406 = vmatpush1.bf16.msra.mxu0 %v994_v6  ;;  %447 = vmatpush1.bf16.msra.mxu1 %v996_v11  ;;  %v1004_v21 = vcombine.low %v30_v13, %v34_v14  ;;  %v28_v6 = vld [vmem:[%s1531_s1 + $0x38] sm:$0xff]  ;;  %v1084_v7 = vmov 3   ;;  %v999_v10 = vcombine.high %v23_v1, %v27_v2 }
   0x7   :  { %407 = vmatprep.subr.bf16.mxu0 %v1003_v12  ;;  %v1011_v22 = vcombine.high %v37_v15, %v41_v17  ;;  %448 = vmatprep.subr.bf16.mxu1 %v1005_v16  ;;  %v1013_v23 = vcombine.high %v38_v18, %v42_v19  ;;  %v45_v24 = vld [vmem:[%s1531_s1 + $0xc0] sm:$0xff]  ;;  %v46_v26 = vld [vmem:[%s1531_s1 + $0xc8] sm:$0xff]  ;;  %v1010_v28 = vcombine.low %v37_v15, %v41_v17  ;;  %v31_v12 = vld [vmem:[%s1531_s1 + $0x50] sm:$0xff] }
   0x8   :  { %v49_v25 = vld [vmem:[%s1531_s1 + $0xe0] sm:$0xff]  ;;  %v50_v27 = vld [vmem:[%s1531_s1 + $0xe8] sm:$0xff]  ;;  %v1012_v29 = vcombine.low %v38_v18, %v42_v19  ;;  %v1001_v11 = vcombine.high %v24_v5, %v28_v6  ;;  %v35_v13 = vld [vmem:[%s1531_s1 + $0x70] sm:$0xff]  ;;  %v998_v17 = vcombine.low %v23_v1, %v27_v2  ;;  %v1000_v18 = vcombine.low %v24_v5, %v28_v6 }
   0x9   :  { %v1019_v30 = vcombine.high %v45_v24, %v49_v25  ;;  %v1021_v31 = vcombine.high %v46_v26, %v50_v27  ;;  %v53_v32 = vld [vmem:[%s1531_s1 + $0x100] sm:$0xff]  ;;  %v54_v34 = vld [vmem:[%s1531_s1 + $0x108] sm:$0xff]  ;;  %v1018_v36 = vcombine.low %v45_v24, %v49_v25  ;;  %v1020_v37 = vcombine.low %v46_v26, %v50_v27  ;;  %v32_v14 = vld [vmem:[%s1531_s1 + $0x58] sm:$0xff] }
   0xa   :  { %408 = vmatpush1.bf16.msra.mxu0 %v1002_v20  ;;  %449 = vmatpush1.bf16.msra.mxu1 %v1004_v21  ;;  %v57_v33 = vld [vmem:[%s1531_s1 + $0x120] sm:$0xff]  ;;  %v58_v35 = vld [vmem:[%s1531_s1 + $0x128] sm:$0xff]  ;;  %v36_v15 = vld [vmem:[%s1531_s1 + $0x78] sm:$0xff]  ;;  %v1007_v19 = vcombine.high %v31_v12, %v35_v13  ;;  %v1006_v25 = vcombine.low %v31_v12, %v35_v13 }
   0xb   :  { %409 = vmatprep.subr.bf16.mxu0 %v1011_v22  ;;  %450 = vmatprep.subr.bf16.mxu1 %v1013_v23  ;;  %v1027_v38 = vcombine.high %v53_v32, %v57_v33  ;;  %v1029_v39 = vcombine.high %v54_v34, %v58_v35  ;;  %v61_v40 = vld [vmem:[%s1531_s1 + $0x140] sm:$0xff]  ;;  %v62_v42 = vld [vmem:[%s1531_s1 + $0x148] sm:$0xff]  ;;  %v1026_v44 = vcombine.low %v53_v32, %v57_v33  ;;  %v39_v21 = vld [vmem:[%s1531_s1 + $0x90] sm:$0xff] }
   0xc   :  { %v65_v41 = vld [vmem:[%s1531_s1 + $0x160] sm:$0xff]  ;;  %v66_v43 = vld [vmem:[%s1531_s1 + $0x168] sm:$0xff]  ;;  %v1028_v45 = vcombine.low %v54_v34, %v58_v35  ;;  %v1009_v20 = vcombine.high %v32_v14, %v36_v15  ;;  %v43_v22 = vld [vmem:[%s1531_s1 + $0xb0] sm:$0xff]  ;;  %v1008_v26 = vcombine.low %v32_v14, %v36_v15 }
   0xd   :  { %v1035_v46 = vcombine.high %v61_v40, %v65_v41  ;;  %v1037_v47 = vcombine.high %v62_v42, %v66_v43  ;;  %v69_v48 = vld [vmem:[%s1531_s1 + $0x180] sm:$0xff]  ;;  %v70_v50 = vld [vmem:[%s1531_s1 + $0x188] sm:$0xff]  ;;  %v1034_v52 = vcombine.low %v61_v40, %v65_v41  ;;  %v1036_v53 = vcombine.low %v62_v42, %v66_v43  ;;  %v40_v23 = vld [vmem:[%s1531_s1 + $0x98] sm:$0xff] }
   0xe   :  { %410 = vmatpush1.bf16.msra.mxu0 %v1010_v28  ;;  %451 = vmatpush1.bf16.msra.mxu1 %v1012_v29  ;;  %v73_v49 = vld [vmem:[%s1531_s1 + $0x1a0] sm:$0xff]  ;;  %v74_v51 = vld [vmem:[%s1531_s1 + $0x1a8] sm:$0xff]  ;;  %v44_v24 = vld [vmem:[%s1531_s1 + $0xb8] sm:$0xff]  ;;  %v1015_v27 = vcombine.high %v39_v21, %v43_v22  ;;  %v1014_v33 = vcombine.low %v39_v21, %v43_v22 }
   0xf   :  { %411 = vmatprep.subr.bf16.mxu0 %v1019_v30  ;;  %452 = vmatprep.subr.bf16.mxu1 %v1021_v31  ;;  %v1043_v54 = vcombine.high %v69_v48, %v73_v49  ;;  %v605_v55 = vld [vmem:[%s1532_s2] sm:$0xff]  ;;  %v1045_v56 = vcombine.high %v70_v50, %v74_v51  ;;  %v78_v59 = vld [vmem:[%s1531_s1 + $0x1c8] sm:$0xff]  ;;  %v1042_v61 = vcombine.low %v69_v48, %v73_v49  ;;  %v47_v29 = vld [vmem:[%s1531_s1 + $0xd0] sm:$0xff] }
  0x10   :  { %v77_v57 = vld [vmem:[%s1531_s1 + $0x1c0] sm:$0xff]  ;;  %611 = vperm.xlu0 %1076, %v605_v55   ;;  %v82_v60 = vld [vmem:[%s1531_s1 + $0x1e8] sm:$0xff]  ;;  %733 = vperm.xlu1 %1078, %v605_v55   ;;  %v1044_v62 = vcombine.low %v70_v50, %v74_v51  ;;  %v1017_v28 = vcombine.high %v40_v23, %v44_v24  ;;  %v51_v30 = vld [vmem:[%s1531_s1 + $0xf0] sm:$0xff]  ;;  %v1016_v34 = vcombine.low %v40_v23, %v44_v24 }
  0x11   :  { %v81_v58 = vld [vmem:[%s1531_s1 + $0x1e0] sm:$0xff]  ;;  %v1053_v0 = vcombine.high %v78_v59, %v82_v60  ;;  %v1052_v9 = vcombine.low %v78_v59, %v82_v60  ;;  %v48_v31 = vld [vmem:[%s1531_s1 + $0xd8] sm:$0xff]  ;;  %v1023_v35 = vcombine.high %v47_v29, %v51_v30  ;;  %v1022_v40 = vcombine.low %v47_v29, %v51_v30  ;;  %v79_v60 = vld [vmem:[%s1531_s1 + $0x1d0] sm:$0xff] }
  0x12   :  { %412 = vmatpush1.bf16.msra.mxu0 %v1018_v36  ;;  %453 = vmatpush1.bf16.msra.mxu1 %v1020_v37  ;;  %v1051_v63 = vcombine.high %v77_v57, %v81_v58  ;;  %v1050_v8 = vcombine.low %v77_v57, %v81_v58  ;;  %v1244_v16 = vld [vmem:[%s1533_s0] sm:$0xf]  ;;  %v52_v32 = vld [vmem:[%s1531_s1 + $0xf8] sm:$0xff]  ;;  %v55_v37 = vld [vmem:[%s1531_s1 + $0x110] sm:$0xff] }
  0x13   :  { %413 = vmatprep.subr.bf16.mxu0 %v1027_v38  ;;  %454 = vmatprep.subr.bf16.mxu1 %v1029_v39  ;;  %v1025_v36 = vcombine.high %v48_v31, %v52_v32  ;;  %v59_v38 = vld [vmem:[%s1531_s1 + $0x130] sm:$0xff]  ;;  %v60_v39 = vld [vmem:[%s1531_s1 + $0x138] sm:$0xff]  ;;  %v1024_v41 = vcombine.low %v48_v31, %v52_v32 }
  0x14   :  { %1077 = vset.pattern.permute.xlu0 %v1083_v4  ;;  %1079 = vset.pattern.permute.xlu1 %v1084_v7  ;;  %v1031_v42 = vcombine.high %v55_v37, %v59_v38  ;;  %v1030_v48 = vcombine.low %v55_v37, %v59_v38  ;;  %v1063_v12 = vld [vmem:[%s1534_s3 + $0x1] ss:$8 sm:$0xf0] }
  0x15   :  { %668 = vperm.xlu0 %1077, %v605_v55   ;;  %798 = vperm.xlu1 %1079, %v605_v55   ;;  %v76_v55 = vld [vmem:[%s1531_s1 + $0x1b8] sm:$0xff] }
  0x16   :  { %414 = vmatpush1.bf16.msra.mxu0 %v1026_v44  ;;  %455 = vmatpush1.bf16.msra.mxu1 %v1028_v45  ;;  %v63_v44 = vld [vmem:[%s1531_s1 + $0x150] sm:$0xff] }
  0x17   :  { %415 = vmatprep.subr.bf16.mxu0 %v1035_v46  ;;  %456 = vmatprep.subr.bf16.mxu1 %v1037_v47  ;;  %v67_v45 = vld [vmem:[%s1531_s1 + $0x170] sm:$0xff]  ;;  %v64_v46 = vld [vmem:[%s1531_s1 + $0x158] sm:$0xff] }
  0x18   :  { %v68_v47 = vld [vmem:[%s1531_s1 + $0x178] sm:$0xff]  ;;  %v1039_v50 = vcombine.high %v63_v44, %v67_v45 }
  0x19   :  { %1080 = vset.pattern.permute.xlu0 %v1084_v7  ;;  %v1041_v51 = vcombine.high %v64_v46, %v68_v47  ;;  %v1040_v57 = vcombine.low %v64_v46, %v68_v47  ;;  %v615_v7 = vlaneseq }
  0x1a   :  { %416 = vmatpush1.bf16.msra.mxu0 %v1034_v52  ;;  %457 = vmatpush1.bf16.msra.mxu1 %v1036_v53  ;;  %v71_v52 = vld [vmem:[%s1531_s1 + $0x190] sm:$0xff] }
  0x1b   :  { %417 = vmatprep.subr.bf16.mxu0 %v1043_v54  ;;  %458 = vmatprep.subr.bf16.mxu1 %v1045_v56  ;;  %v75_v53 = vld [vmem:[%s1531_s1 + $0x1b0] sm:$0xff]  ;;  %v72_v54 = vld [vmem:[%s1531_s1 + $0x198] sm:$0xff]  ;;  %v1038_v56 = vcombine.low %v63_v44, %v67_v45 }
  0x1c   :  { %v1047_v58 = vcombine.high %v71_v52, %v75_v53  ;;  %v1049_v59 = vcombine.high %v72_v54, %v76_v55  ;;  %v1048_v1 = vcombine.low %v72_v54, %v76_v55 }
  0x1e   :  { %418 = vmatpush1.bf16.msra.mxu0 %v1042_v61  ;;  %459 = vmatpush1.bf16.msra.mxu1 %v1044_v62  ;;  %v83_v61 = vld [vmem:[%s1531_s1 + $0x1f0] sm:$0xff]  ;;  %v80_v62 = vld [vmem:[%s1531_s1 + $0x1d8] sm:$0xff] }
  0x1f   :  { %419 = vmatprep.subr.bf16.mxu0 %v1051_v63  ;;  %460 = vmatprep.subr.bf16.mxu1 %v1053_v0  ;;  %v84_v63 = vld [vmem:[%s1531_s1 + $0x1f8] sm:$0xff]  ;;  %v1046_v0 = vcombine.low %v71_v52, %v75_v53  ;;  %v1055_v2 = vcombine.high %v79_v60, %v83_v61  ;;  %v1054_v5 = vcombine.low %v79_v60, %v83_v61 }
  0x20   :  { %v1057_v4 = vcombine.high %v80_v62, %v84_v63  ;;  %v1056_v6 = vcombine.low %v80_v62, %v84_v63 }
  0x22   :  { %420 = vmatpush1.bf16.msra.mxu0 %v1050_v8  ;;  %461 = vmatpush1.bf16.msra.mxu1 %v1052_v9  ;;  %v1324_v8 = vshrl.u32 %v615_v7, 7  ;;  %v606_v9 = vld [vmem:[%s1534_s3] ss:$8 sm:$0xf] }
  0x23   :  { %487 = vmatprep.subr.bf16.mxu0 %v999_v10  ;;  %528 = vmatprep.subr.bf16.mxu1 %v1001_v11  ;;  %v607_v10 = vld [vmem:[%s1534_s3] ss:$8 sm:$0xf0]  ;;  %v1062_v11 = vld [vmem:[%s1534_s3 + $0x1] ss:$8 sm:$0xf] }
  0x24   :  { %v617_v14 = vsub.s32 0, %v1324_v8  ;;  %v1341_v15 = vor.u32 %v607_v10, %v606_v9  ;;  %v629_v21 = vsub.s32 3, %v1324_v8  ;;  %v1406_v10 = vsub.s32 6, %v1324_v8 }
  0x25   :  { %438 = vmatmul.mubr.bf16.vlgmr.msra.gmra.mrb[0].mxu0 %v1244_v16  ;;  %479 = vmatmul.mubr.bf16.vlgmr.msra.gmra.mrb[0].mxu1 %v1244_v16 }
  0x26   :  { %488 = vmatpush1.bf16.msra.mxu0 %v998_v17  ;;  %529 = vmatpush1.bf16.msra.mxu1 %v1000_v18  ;;  %v1064_v17 = vld [vmem:[%s1534_s3 + $0x2] ss:$8 sm:$0xf]  ;;  %v618_v23 = vrot.slane %v1341_v15, %v617_v14  ;;  %v630_v32 = vrot.slane %v1341_v15, %v629_v21 }
  0x27   :  { %489 = vmatprep.subr.bf16.mxu0 %v1007_v19  ;;  %530 = vmatprep.subr.bf16.mxu1 %v1009_v20  ;;  %v1065_v18 = vld [vmem:[%s1534_s3 + $0x2] ss:$8 sm:$0xf0]  ;;  %v625_v19 = vsub.s32 2, %v1324_v8  ;;  %v621_v20 = vsub.s32 1, %v1324_v8 }
  0x28   :  { %519 = vmatprep.mubr.bf16.mxu0 %v1081_v3  ;;  %560 = vmatprep.mubr.bf16.mxu1 %v1081_v3  ;;  %v56_v3 = vld [vmem:[%s1531_s1 + $0x118] sm:$0xff]  ;;  %v1354_v22 = vor.u32 %v1065_v18, %v1064_v17 }
  0x29   :  { %v1033_v43 = vcombine.high %v56_v3, %v60_v39  ;;  %v1032_v49 = vcombine.low %v56_v3, %v60_v39  ;;  %v622_v30 = vrot.slane %v1341_v15, %v621_v20 }
  0x2a   :  { %490 = vmatpush1.bf16.msra.mxu0 %v1006_v25  ;;  %531 = vmatpush1.bf16.msra.mxu1 %v1008_v26  ;;  %v1066_v25 = vld [vmem:[%s1534_s3 + $0x3] ss:$8 sm:$0xf]  ;;  %v748_v3 = vrot.slane %v1354_v22, %v625_v19  ;;  %v744_v39 = vrot.slane %v1354_v22, %v621_v20  ;;  %v752_v46 = vrot.slane %v1354_v22, %v629_v21 }
  0x2b   :  { %491 = vmatprep.subr.bf16.mxu0 %v1015_v27  ;;  %532 = vmatprep.subr.bf16.mxu1 %v1017_v28  ;;  %v1067_v26 = vld [vmem:[%s1534_s3 + $0x3] ss:$8 sm:$0xf0]  ;;  %v626_v28 = vrot.slane %v1341_v15, %v625_v19 }
  0x2e   :  { %492 = vmatpush1.bf16.msra.mxu0 %v1014_v33  ;;  %533 = vmatpush1.bf16.msra.mxu1 %v1016_v34 }
  0x2f   :  { %493 = vmatprep.subr.bf16.mxu0 %v1023_v35  ;;  %534 = vmatprep.subr.bf16.mxu1 %v1025_v36  ;;  %v740_v35 = vrot.slane %v1354_v22, %v617_v14  ;;  %v1375_v36 = vor.u32 %v1067_v26, %v1066_v25 }
  0x31   :  { %v805_v47 = vrot.slane %v1375_v36, %v617_v14 }
  0x32   :  { %494 = vmatpush1.bf16.msra.mxu0 %v1022_v40  ;;  %535 = vmatpush1.bf16.msra.mxu1 %v1024_v41 }
  0x33   :  { %495 = vmatprep.subr.bf16.mxu0 %v1031_v42  ;;  %536 = vmatprep.subr.bf16.mxu1 %v1033_v43 }
  0x36   :  { %496 = vmatpush1.bf16.msra.mxu0 %v1030_v48  ;;  %537 = vmatpush1.bf16.msra.mxu1 %v1032_v49 }
  0x37   :  { %497 = vmatprep.subr.bf16.mxu0 %v1039_v50  ;;  %538 = vmatprep.subr.bf16.mxu1 %v1041_v51  ;;  %v813_v50 = vrot.slane %v1375_v36, %v625_v19  ;;  %v809_v51 = vrot.slane %v1375_v36, %v621_v20 }
  0x3a   :  { %498 = vmatpush1.bf16.msra.mxu0 %v1038_v56  ;;  %539 = vmatpush1.bf16.msra.mxu1 %v1040_v57 }
  0x3b   :  { %499 = vmatprep.subr.bf16.mxu0 %v1047_v58  ;;  %540 = vmatprep.subr.bf16.mxu1 %v1049_v59  ;;  %v817_v59 = vrot.slane %v1375_v36, %v629_v21 }
  0x3e   :  { %500 = vmatpush1.bf16.msra.mxu0 %v1046_v0  ;;  %541 = vmatpush1.bf16.msra.mxu1 %v1048_v1 }
  0x3f   :  { %501 = vmatprep.subr.bf16.mxu0 %v1055_v2  ;;  %542 = vmatprep.subr.bf16.mxu1 %v1057_v4 }
  0x42   :  { %502 = vmatpush1.bf16.msra.mxu0 %v1054_v5  ;;  %543 = vmatpush1.bf16.msra.mxu1 %v1056_v6  ;;  %v1403_v6 = vsub.s32 4, %v1324_v8 }
  0x45   :  { %520 = vmatmul.mubr.bf16.vlgmr.msra.gmra.mrb[4].mxu0 %v1244_v16  ;;  %561 = vmatmul.mubr.bf16.vlgmr.msra.gmra.mrb[4].mxu1 %v1244_v16  ;;  %v1343_v16 = vor.u32 %v1063_v12, %v1062_v11 }
  0x47   :  { %v675_v24 = vrot.slane %v1343_v16, %v617_v14  ;;  %v683_v29 = vrot.slane %v1343_v16, %v625_v19  ;;  %v679_v31 = vrot.slane %v1343_v16, %v621_v20  ;;  %v687_v33 = vrot.slane %v1343_v16, %v629_v21 }
  0x48   :  { %v1409_v14 = vsub.s32 5, %v1324_v8  ;;  %v634_v20 = vrot.slane %v1341_v15, %v1403_v6  ;;  %v691_v21 = vrot.slane %v1343_v16, %v1403_v6 }
  0x8f   :  { %v1338_v13 = vpop.permute.xlu0 %611  ;;  %v1372_v34 = vpop.permute.xlu1 %733 }
  0x90   :  { %v655_v37 = vmul.f32 %v618_v23, %v1338_v13  ;;  %v657_v40 = vmul.f32 %v626_v28, %v1338_v13  ;;  %v656_v42 = vmul.f32 %v622_v30, %v1338_v13  ;;  %v658_v44 = vmul.f32 %v630_v32, %v1338_v13 }
  0x91   :  { %v777_v49 = vmul.f32 %v740_v35, %v1372_v34  ;;  %v779_v54 = vmul.f32 %v748_v3, %v1372_v34  ;;  %v778_v56 = vmul.f32 %v744_v39, %v1372_v34  ;;  %v780_v58 = vmul.f32 %v752_v46, %v1372_v34 }
  0x92   :  { %v1416_v23 = vsub.s32 7, %v1324_v8  ;;  %v642_v30 = vrot.slane %v1341_v15, %v1406_v10 }
  0x94   :  { %v1364_v27 = vpop.permute.xlu0 %668  ;;  %v1392_v52 = vpop.permute.xlu1 %798 }
  0x95   :  { %v712_v38 = vmul.f32 %v675_v24, %v1364_v27  ;;  %v714_v41 = vmul.f32 %v683_v29, %v1364_v27  ;;  %v713_v43 = vmul.f32 %v679_v31, %v1364_v27  ;;  %v715_v45 = vmul.f32 %v687_v33, %v1364_v27 }
  0x96   :  { %v842_v61 = vmul.f32 %v805_v47, %v1392_v52  ;;  %v844_v63 = vmul.f32 %v813_v50, %v1392_v52  ;;  %v843_v1 = vmul.f32 %v809_v51, %v1392_v52  ;;  %v845_v4 = vmul.f32 %v817_v59, %v1392_v52 }
  0x97   :  { %v720_v48 = vadd.f32 %v712_v38, %v655_v37  ;;  %v722_v53 = vadd.f32 %v714_v41, %v657_v40  ;;  %v721_v55 = vadd.f32 %v713_v43, %v656_v42  ;;  %v723_v57 = vadd.f32 %v715_v45, %v658_v44 }
  0x99   :  { %v785_v60 = vadd.f32 %v777_v49, %v720_v48  ;;  %v787_v62 = vadd.f32 %v779_v54, %v722_v53  ;;  %v786_v0 = vadd.f32 %v778_v56, %v721_v55  ;;  %v788_v2 = vadd.f32 %v780_v58, %v723_v57 }
  0x9b   :  { %v850_v5 = vadd.f32 %v842_v61, %v785_v60  ;;  %v852_v7 = vadd.f32 %v844_v63, %v787_v62  ;;  %v851_v9 = vadd.f32 %v843_v1, %v786_v0  ;;  %v853_v11 = vadd.f32 %v845_v4, %v788_v2 }
  0xf8   :  { %v439_v12 = vpop.f32.mrb[0].mxu0  ;;  %v480_v18 = vpop.f32.mrb[0].mxu1 }
  0xf9   :  { %v858_v17 = vmul.f32 %v850_v5, %v439_v12  ;;  %v441_v19 = vpop.f32.mrb[1].mxu0  ;;  %v860_v24 = vmul.f32 %v852_v7, %v480_v18  ;;  %v482_v28 = vpop.f32.mrb[1].mxu1 }
  0xfa   :  { %v1068_v25 = vpack.c.bf16 %v441_v19, %v439_v12  ;;  %v859_v26 = vmul.f32 %v851_v9, %v441_v19  ;;  %v443_v29 = vpop.f32.mrb[2].mxu0  ;;  %v1069_v33 = vpack.c.bf16 %v482_v28, %v480_v18  ;;  %v861_v35 = vmul.f32 %v853_v11, %v482_v28  ;;  %v484_v37 = vpop.f32.mrb[2].mxu1 }
  0xfb   :  { %v866_v31 = vrot.slane %v858_v17, 4  ;;  %v914_v32 = vmul.f32 %v858_v17, %v439_v12  ;;  %v444_v38 = vpop.f32.mrb[3].mxu0  ;;  %v878_v3 = vrot.slane %v860_v24, 4  ;;  %v916_v39 = vmul.f32 %v860_v24, %v480_v18  ;;  %v485_v41 = vpop.f32.mrb[3].mxu1 }
  0xfc   :  { %601 = vst [vmem:[%s1535_s4] sm:$0xff] %v1068_v25  ;;  %v872_v8 = vrot.slane %v859_v26, 4  ;;  %v915_v40 = vmul.f32 %v859_v26, %v441_v19  ;;  %602 = vst [vmem:[%s1535_s4 + $0x8] sm:$0xff] %v1069_v33  ;;  %v884_v44 = vrot.slane %v861_v35, 4  ;;  %v917_v45 = vmul.f32 %v861_v35, %v482_v28 }
  0xfd   :  { %v867_v42 = vadd.f32 %v866_v31, %v858_v17  ;;  %v922_v43 = vrot.slane %v914_v32, 4  ;;  %v879_v46 = vadd.f32 %v878_v3, %v860_v24  ;;  %v934_v47 = vrot.slane %v916_v39, 4 }
  0xfe   :  { %v873_v48 = vadd.f32 %v872_v8, %v859_v26  ;;  %v928_v49 = vrot.slane %v915_v40, 4  ;;  %v885_v53 = vadd.f32 %v884_v44, %v861_v35  ;;  %v940_v54 = vrot.slane %v917_v45, 4 }
  0xff   :  { %v868_v50 = vrot.slane %v867_v42, 2  ;;  %v923_v51 = vadd.f32 %v922_v43, %v914_v32  ;;  %v880_v55 = vrot.slane %v879_v46, 2  ;;  %v935_v56 = vadd.f32 %v934_v47, %v916_v39 }
 0x100   :  { %v874_v57 = vrot.slane %v873_v48, 2  ;;  %v929_v58 = vadd.f32 %v928_v49, %v915_v40  ;;  %v886_v61 = vrot.slane %v885_v53, 2  ;;  %v941_v62 = vadd.f32 %v940_v54, %v917_v45 }
 0x101   :  { %v869_v59 = vadd.f32 %v868_v50, %v867_v42  ;;  %v924_v60 = vrot.slane %v923_v51, 2  ;;  %v881_v63 = vadd.f32 %v880_v55, %v879_v46  ;;  %v936_v0 = vrot.slane %v935_v56, 2 }
 0x102   :  { %v875_v1 = vadd.f32 %v874_v57, %v873_v48  ;;  %v930_v2 = vrot.slane %v929_v58, 2  ;;  %v887_v7 = vadd.f32 %v886_v61, %v885_v53  ;;  %v942_v9 = vrot.slane %v941_v62, 2 }
 0x103   :  { %v870_v4 = vrot.slane %v869_v59, 1  ;;  %v925_v5 = vadd.f32 %v924_v60, %v923_v51  ;;  %v882_v11 = vrot.slane %v881_v63, 1  ;;  %v937_v12 = vadd.f32 %v936_v0, %v935_v56 }
 0x104   :  { %v876_v17 = vrot.slane %v875_v1, 1  ;;  %v931_v18 = vadd.f32 %v930_v2, %v929_v58  ;;  %v888_v25 = vrot.slane %v887_v7, 1  ;;  %v943_v26 = vadd.f32 %v942_v9, %v941_v62 }
 0x105   :  { %v871_v19 = vadd.f32 %v870_v4, %v869_v59  ;;  %v926_v24 = vrot.slane %v925_v5, 1  ;;  %v883_v28 = vadd.f32 %v882_v11, %v881_v63  ;;  %v938_v29 = vrot.slane %v937_v12, 1 }
 0x106   :  { %v877_v31 = vadd.f32 %v876_v17, %v875_v1  ;;  %v932_v32 = vrot.slane %v931_v18, 1  ;;  %v889_v35 = vadd.f32 %v888_v25, %v887_v7  ;;  %v944_v37 = vrot.slane %v943_v26, 1 }
 0x107   :  { %v927_v33 = vadd.f32 %v926_v24, %v925_v5  ;;  %970 = vst [vmem:[%s1536_s5] sm:$0xff] %v871_v19  ;;  %v699_v38 = vrot.slane %v1343_v16, %v1406_v10  ;;  %v939_v3 = vadd.f32 %v938_v29, %v937_v12  ;;  %972 = vst [vmem:[%s1536_s5 + $0x10] sm:$0xff] %v883_v28 }
 0x108   :  { %v933_v39 = vadd.f32 %v932_v32, %v931_v18  ;;  %971 = vst [vmem:[%s1536_s5 + $0x8] sm:$0xff] %v877_v31  ;;  %v638_v8 = vrot.slane %v1341_v15, %v1409_v14  ;;  %v695_v40 = vrot.slane %v1343_v16, %v1409_v14  ;;  %v945_v41 = vadd.f32 %v944_v37, %v943_v26 }
 0x109   :  { %978 = vst [vmem:[%s1536_s5 + $0x40] sm:$0xff] %v927_v33  ;;  %973 = vst [vmem:[%s1536_s5 + $0x18] sm:$0xff] %v889_v35  ;;  %v646_v42 = vrot.slane %v1341_v15, %v1416_v23  ;;  %v703_v43 = vrot.slane %v1343_v16, %v1416_v23  ;;  %v756_v44 = vrot.slane %v1354_v22, %v1403_v6 }
 0x10a   :  { %980 = vst [vmem:[%s1536_s5 + $0x50] sm:$0xff] %v939_v3  ;;  %979 = vst [vmem:[%s1536_s5 + $0x48] sm:$0xff] %v933_v39  ;;  %v659_v45 = vmul.f32 %v634_v20, %v1338_v13  ;;  %v716_v46 = vmul.f32 %v691_v21, %v1364_v27  ;;  %v764_v47 = vrot.slane %v1354_v22, %v1406_v10 }
 0x10b   :  { %981 = vst [vmem:[%s1536_s5 + $0x58] sm:$0xff] %v945_v41  ;;  %v760_v48 = vrot.slane %v1354_v22, %v1409_v14  ;;  %v661_v49 = vmul.f32 %v642_v30, %v1338_v13  ;;  %v718_v50 = vmul.f32 %v699_v38, %v1364_v27  ;;  %v660_v20 = vmul.f32 %v638_v8, %v1338_v13 }
 0x10c   :  { %v717_v51 = vmul.f32 %v695_v40, %v1364_v27  ;;  %v662_v16 = vmul.f32 %v646_v42, %v1338_v13  ;;  %v719_v21 = vmul.f32 %v703_v43, %v1364_v27  ;;  %v768_v53 = vrot.slane %v1354_v22, %v1416_v23 }
 0x10d   :  { %v821_v54 = vrot.slane %v1375_v36, %v1403_v6  ;;  %v724_v55 = vadd.f32 %v716_v46, %v659_v45  ;;  %v781_v15 = vmul.f32 %v756_v44, %v1372_v34  ;;  %v829_v30 = vrot.slane %v1375_v36, %v1406_v10 }
 0x10e   :  { %v825_v56 = vrot.slane %v1375_v36, %v1409_v14  ;;  %v726_v57 = vadd.f32 %v718_v50, %v661_v49  ;;  %v783_v13 = vmul.f32 %v764_v47, %v1372_v34  ;;  %v725_v58 = vadd.f32 %v717_v51, %v660_v20 }
 0x10f   :  { %v782_v27 = vmul.f32 %v760_v48, %v1372_v34  ;;  %v727_v59 = vadd.f32 %v719_v21, %v662_v16  ;;  %v784_v22 = vmul.f32 %v768_v53, %v1372_v34  ;;  %v833_v6 = vrot.slane %v1375_v36, %v1416_v23 }
 0x110   :  { %v789_v60 = vadd.f32 %v781_v15, %v724_v55  ;;  %v846_v61 = vmul.f32 %v821_v54, %v1392_v52  ;;  %v791_v62 = vadd.f32 %v783_v13, %v726_v57  ;;  %v848_v10 = vmul.f32 %v829_v30, %v1392_v52 }
 0x111   :  { %v790_v63 = vadd.f32 %v782_v27, %v725_v58  ;;  %v847_v14 = vmul.f32 %v825_v56, %v1392_v52  ;;  %v792_v0 = vadd.f32 %v784_v22, %v727_v59  ;;  %v849_v1 = vmul.f32 %v833_v6, %v1392_v52 }
 0x112   :  { %v854_v2 = vadd.f32 %v846_v61, %v789_v60  ;;  %v856_v5 = vadd.f32 %v848_v10, %v791_v62 }
 0x113   :  { %v855_v7 = vadd.f32 %v847_v14, %v790_v63  ;;  %v857_v36 = vadd.f32 %v849_v1, %v792_v0 }
 0x118   :  { %v521_v4 = vpop.f32.mrb[4].mxu0  ;;  %v562_v9 = vpop.f32.mrb[4].mxu1 }
 0x119   :  { %v862_v34 = vmul.f32 %v854_v2, %v521_v4  ;;  %v523_v11 = vpop.f32.mrb[5].mxu0  ;;  %v864_v23 = vmul.f32 %v856_v5, %v562_v9  ;;  %v564_v18 = vpop.f32.mrb[5].mxu1 }
 0x11a   :  { %v1070_v12 = vpack.c.bf16 %v523_v11, %v521_v4  ;;  %v863_v17 = vmul.f32 %v855_v7, %v523_v11  ;;  %v525_v19 = vpop.f32.mrb[6].mxu0  ;;  %v1071_v26 = vpack.c.bf16 %v564_v18, %v562_v9  ;;  %v865_v28 = vmul.f32 %v857_v36, %v564_v18  ;;  %v566_v29 = vpop.f32.mrb[6].mxu1 }
 0x11b   :  { %v890_v24 = vrot.slane %v862_v34, 4  ;;  %v918_v25 = vmul.f32 %v862_v34, %v521_v4  ;;  %v526_v31 = vpop.f32.mrb[7].mxu0  ;;  %v902_v52 = vrot.slane %v864_v23, 4  ;;  %v920_v32 = vmul.f32 %v864_v23, %v562_v9  ;;  %v567_v37 = vpop.f32.mrb[7].mxu1 }
 0x11c   :  { %603 = vst [vmem:[%s1535_s4 + $0x10] sm:$0xff] %v1070_v12  ;;  %v896_v33 = vrot.slane %v863_v17, 4  ;;  %v919_v35 = vmul.f32 %v863_v17, %v523_v11  ;;  %604 = vst [vmem:[%s1535_s4 + $0x18] sm:$0xff] %v1071_v26  ;;  %v908_v39 = vrot.slane %v865_v28, 4  ;;  %v921_v8 = vmul.f32 %v865_v28, %v564_v18 }
 0x11d   :  { %v891_v38 = vadd.f32 %v890_v24, %v862_v34  ;;  %v946_v3 = vrot.slane %v918_v25, 4  ;;  %v903_v40 = vadd.f32 %v902_v52, %v864_v23  ;;  %v958_v41 = vrot.slane %v920_v32, 4 }
 0x11e   :  { %v897_v42 = vadd.f32 %v896_v33, %v863_v17  ;;  %v952_v43 = vrot.slane %v919_v35, 4  ;;  %v909_v46 = vadd.f32 %v908_v39, %v865_v28  ;;  %v964_v47 = vrot.slane %v921_v8, 4 }
 0x11f   :  { %v892_v44 = vrot.slane %v891_v38, 2  ;;  %v947_v45 = vadd.f32 %v946_v3, %v918_v25  ;;  %v904_v48 = vrot.slane %v903_v40, 2  ;;  %v959_v49 = vadd.f32 %v958_v41, %v920_v32 }
 0x120   :  { %v898_v50 = vrot.slane %v897_v42, 2  ;;  %v953_v20 = vadd.f32 %v952_v43, %v919_v35  ;;  %v910_v21 = vrot.slane %v909_v46, 2  ;;  %v965_v53 = vadd.f32 %v964_v47, %v921_v8 }
 0x121   :  { %v893_v51 = vadd.f32 %v892_v44, %v891_v38  ;;  %v948_v16 = vrot.slane %v947_v45, 2  ;;  %v905_v54 = vadd.f32 %v904_v48, %v903_v40  ;;  %v960_v55 = vrot.slane %v959_v49, 2 }
 0x122   :  { %v899_v15 = vadd.f32 %v898_v50, %v897_v42  ;;  %v954_v30 = vrot.slane %v953_v20, 2  ;;  %v911_v13 = vadd.f32 %v910_v21, %v909_v46  ;;  %v966_v58 = vrot.slane %v965_v53, 2 }
 0x123   :  { %v894_v56 = vrot.slane %v893_v51, 1  ;;  %v949_v57 = vadd.f32 %v948_v16, %v947_v45  ;;  %v906_v27 = vrot.slane %v905_v54, 1  ;;  %v961_v59 = vadd.f32 %v960_v55, %v959_v49 }
 0x124   :  { %v900_v22 = vrot.slane %v899_v15, 1  ;;  %v955_v6 = vadd.f32 %v954_v30, %v953_v20  ;;  %v912_v62 = vrot.slane %v911_v13, 1  ;;  %v967_v10 = vadd.f32 %v966_v58, %v965_v53 }
 0x125   :  { %v895_v60 = vadd.f32 %v894_v56, %v893_v51  ;;  %v950_v61 = vrot.slane %v949_v57, 1  ;;  %v907_v63 = vadd.f32 %v906_v27, %v905_v54  ;;  %v962_v14 = vrot.slane %v961_v59, 1 }
 0x126   :  { %v901_v0 = vadd.f32 %v900_v22, %v899_v15  ;;  %v956_v1 = vrot.slane %v955_v6, 1  ;;  %v913_v4 = vadd.f32 %v912_v62, %v911_v13  ;;  %v968_v5 = vrot.slane %v967_v10, 1 }
 0x127   :  { %v951_v2 = vadd.f32 %v950_v61, %v949_v57  ;;  %974 = vst [vmem:[%s1536_s5 + $0x20] sm:$0xff] %v895_v60  ;;  %v963_v7 = vadd.f32 %v962_v14, %v961_v59  ;;  %976 = vst [vmem:[%s1536_s5 + $0x30] sm:$0xff] %v907_v63 }
 0x128   :  { %v957_v34 = vadd.f32 %v956_v1, %v955_v6  ;;  %975 = vst [vmem:[%s1536_s5 + $0x28] sm:$0xff] %v901_v0  ;;  %v969_v9 = vadd.f32 %v968_v5, %v967_v10  ;;  %977 = vst [vmem:[%s1536_s5 + $0x38] sm:$0xff] %v913_v4 }
 0x129   :  { %982 = vst [vmem:[%s1536_s5 + $0x60] sm:$0xff] %v951_v2  ;;  %984 = vst [vmem:[%s1536_s5 + $0x70] sm:$0xff] %v963_v7 }
 0x12a   :  { %983 = vst [vmem:[%s1536_s5 + $0x68] sm:$0xff] %v957_v34  ;;  %985 = vst [vmem:[%s1536_s5 + $0x78] sm:$0xff] %v969_v9 }

// kernel: generator_forward.11
= control target key start
LH: loop header
LB: loop body
LE: loop exit
PB: predicated region body
PF: predicated region fallthrough
CT: control target
= control target key end

     0   :  { %v701_v1 = vmov 0   ;;  %v702_v2 = vmov 3   ;;  %v703_v13 = vmov 1   ;;  %v704_v21 = vmov 2   ;;  %s927_s1 = inlined_call_operand.vmem [shape: bf16[256,128], index: 1, kind: input, shape index: {}]   ;;  %s928_s2 = inlined_call_operand.vmem [shape: f32[56,8], index: 2, kind: input, shape index: {}]   ;;  %s929_s0 = inlined_call_operand.vmem [shape: bf16[56,256], index: 0, kind: input, shape index: {}]   ;;  %s930_s3 = inlined_call_operand.vmem [shape: f32[8,128], index: 3, kind: input, shape index: {}]   ;;  %s931_s4 = inlined_call_operand.vmem [shape: bf16[56,128], index: 4, kind: output, shape index: {0}]   ;;  %s932_s5 = inlined_call_operand.vmem [shape: f32[8,256], index: 5, kind: output, shape index: {1}]  }
   0x1   :  { %v674_v0 = vld [vmem:[%s927_s1 + $0x40] sm:$0xff]   ;;  %654 = vset.pattern.permute.xlu1 %v701_v1  ;;  %660 = vset.pattern.permute.xlu0 %v702_v2  ;;  %v676_v4 = vld [vmem:[%s927_s1 + $0x48] sm:$0xff]   ;;  %v678_v6 = vld [vmem:[%s927_s1 + $0x50] sm:$0xff]  }
   0x2   :  { %v675_v3 = vld [vmem:[%s927_s1] sm:$0xff]   ;;  %594 = vmatprep.subr.bf16.mxu0 %v674_v0  ;;  %634 = vmatprep.subr.bf16.mxu1 %v674_v0  ;;  %v677_v5 = vld [vmem:[%s927_s1 + $0x8] sm:$0xff]   ;;  %v755_v7 = vld [vmem:[%s928_s2 + $0x10] sm:$0xff] }
   0x3   :  { %595 = vmatpush3.bf16.msra.mxu0 %v675_v3  ;;  %642 = vmatpush3.bf16.msra.mxu1 %v675_v3  ;;  %v679_v8 = vld [vmem:[%s927_s1 + $0x10] sm:$0xff]   ;;  %v680_v9 = vld [vmem:[%s927_s1 + $0x58] sm:$0xff]   ;;  %v770_v11 = vld [vmem:[%s928_s2] sm:$0xff] }
   0x4   :  { %596 = vmatprep.subr.bf16.mxu0 %v676_v4  ;;  %635 = vmatprep.subr.bf16.mxu1 %v676_v4  ;;  %v681_v10 = vld [vmem:[%s927_s1 + $0x18] sm:$0xff]   ;;  %v682_v12 = vld [vmem:[%s927_s1 + $0x60] sm:$0xff]   ;;  %v783_v15 = vld [vmem:[%s928_s2 + $0x8] sm:$0xff] }
   0x5   :  { %312 = vperm.xlu1 %654, %v755_v7   ;;  %v683_v14 = vld [vmem:[%s927_s1 + $0x20] sm:$0xff]   ;;  %v684_v16 = vld [vmem:[%s927_s1 + $0x68] sm:$0xff]   ;;  %446 = vperm.xlu0 %660, %v783_v15   ;;  %v686_v20 = vld [vmem:[%s927_s1 + $0x70] sm:$0xff]  }
   0x6   :  { %v692_v17 = vld [vmem:[%s929_s0 + $0x4] ss:$8 sps:$4 sm:$0xff]   ;;  %v687_v22 = vld [vmem:[%s927_s1 + $0x30] sm:$0xff]   ;;  %v688_v23 = vld [vmem:[%s927_s1 + $0x78] sm:$0xff]  }
   0x7   :  { %597 = vmatpush3.bf16.msra.mxu0 %v677_v5  ;;  %643 = vmatpush3.bf16.msra.mxu1 %v677_v5  ;;  %v685_v18 = vld [vmem:[%s927_s1 + $0x28] sm:$0xff]   ;;  %v689_v24 = vld [vmem:[%s927_s1 + $0x38] sm:$0xff]   ;;  %v26_v26 = vld [vmem:[%s929_s0 + $0x30] sm:$0xff] }
   0x8   :  { %598 = vmatprep.subr.bf16.mxu0 %v678_v6  ;;  %636 = vmatprep.subr.bf16.mxu1 %v678_v6  ;;  %v695_v19 = vld [vmem:[%s929_s0 + $0x24] ss:$8 sps:$4 sm:$0xff]   ;;  %v295_v25 = vld [vmem:[%s928_s2 + $0x18] sm:$0xff]  ;;  %v690_v27 = vld [vmem:[%s929_s0] ss:$8 sps:$4 sm:$0xff]   ;;  %v542_v30 = vcombine.high %v26_v26, %v26_v26  ;;  %v541_v32 = vcombine.low %v26_v26, %v26_v26 }
   0x9   :  { %655 = vset.pattern.permute.xlu1 %v703_v13  ;;  %224 = vmatprep.mubr.bf16.mxu0 %v692_v17  ;;  %v693_v28 = vld [vmem:[%s929_s0 + $0x20] ss:$8 sps:$4 sm:$0xff]   ;;  %v696_v29 = vld [vmem:[%s929_s0 + $0x14] ss:$8 sps:$4 sm:$0xff]   ;;  %v699_v31 = vld [vmem:[%s929_s0 + $0x10] ss:$8 sps:$4 sm:$0xff]  }
   0xa   :  { %348 = vperm.xlu1 %655, %v770_v11   ;;  %240 = vmatprep.mubr.bf16.mxu1 %v695_v19  ;;  %v297_v33 = vld [vmem:[%s928_s2 + $0x28] sm:$0xff]  ;;  %v296_v34 = vld [vmem:[%s928_s2 + $0x20] sm:$0xff]  ;;  %v298_v35 = vld [vmem:[%s928_s2 + $0x30] sm:$0xff] }
   0xb   :  { %599 = vmatpush3.bf16.msra.mxu0 %v679_v8  ;;  %644 = vmatpush3.bf16.msra.mxu1 %v679_v8  ;;  %v566_v58 = vld [vmem:[%s930_s3] ss:$0 sm:$0xff]  ;;  %v567_v59 = vld [vmem:[%s930_s3 + $0x1] ss:$0 sm:$0xff]  ;;  %v876_v0 = vld [vmem:[%s930_s3 + $0x2] ss:$0 sm:$0xff] }
   0xc   :  { %600 = vmatprep.subr.bf16.mxu0 %v680_v9  ;;  %637 = vmatprep.subr.bf16.mxu1 %v680_v9  ;;  %v883_v9 = vld [vmem:[%s930_s3 + $0x3] ss:$0 sm:$0xff] }
   0xd   :  { %661 = vset.pattern.permute.xlu0 %v704_v21 }
   0xe   :  { %356 = vperm.xlu1 %655, %v755_v7   ;;  %399 = vperm.xlu0 %661, %v783_v15  }
   0xf   :  { %601 = vmatpush3.bf16.msra.mxu0 %v681_v10  ;;  %645 = vmatpush3.bf16.msra.mxu1 %v681_v10 }
  0x10   :  { %602 = vmatprep.subr.bf16.mxu0 %v682_v12  ;;  %638 = vmatprep.subr.bf16.mxu1 %v682_v12 }
  0x12   :  { %656 = vset.pattern.permute.xlu1 %v704_v21  ;;  %403 = vperm.xlu0 %661, %v755_v7  }
  0x13   :  { %603 = vmatpush3.bf16.msra.mxu0 %v683_v14  ;;  %646 = vmatpush3.bf16.msra.mxu1 %v683_v14 }
  0x14   :  { %604 = vmatprep.subr.bf16.mxu0 %v684_v16  ;;  %639 = vmatprep.subr.bf16.mxu1 %v684_v16 }
  0x15   :  { %395 = vperm.xlu1 %656, %v770_v11  }
  0x16   :  { %407 = vperm.xlu0 %661, %v295_v25  }
  0x17   :  { %605 = vmatpush3.bf16.msra.mxu0 %v685_v18  ;;  %647 = vmatpush3.bf16.msra.mxu1 %v685_v18 }
  0x18   :  { %606 = vmatprep.subr.bf16.mxu0 %v686_v20  ;;  %640 = vmatprep.subr.bf16.mxu1 %v686_v20 }
  0x19   :  { %657 = vset.pattern.permute.xlu1 %v701_v1 }
  0x1a   :  { %317 = vperm.xlu1 %657, %v295_v25   ;;  %664 = vset.pattern.permute.xlu0 %v703_v13 }
  0x1b   :  { %607 = vmatpush3.bf16.msra.mxu0 %v687_v22  ;;  %648 = vmatpush3.bf16.msra.mxu1 %v687_v22 }
  0x1c   :  { %608 = vmatprep.subr.bf16.mxu0 %v688_v23  ;;  %641 = vmatprep.subr.bf16.mxu1 %v688_v23 }
  0x1d   :  { %352 = vperm.xlu0 %664, %v783_v15  }
  0x1e   :  { %658 = vset.pattern.permute.xlu1 %v703_v13 }
  0x1f   :  { %609 = vmatpush3.bf16.msra.mxu0 %v689_v24  ;;  %649 = vmatpush3.bf16.msra.mxu1 %v689_v24 }
  0x20   :  { %360 = vperm.xlu1 %658, %v295_v25  }
  0x21   :  { %368 = vperm.xlu0 %664, %v297_v33  }
  0x22   :  { %225 = vmatmul.mubr.bf16.vlgmr.msra.gmra.mrb[0].mxu0 %v690_v27  ;;  %241 = vmatmul.mubr.bf16.vlgmr.msra.gmra.mrb[0].mxu1 %v693_v28 }
  0x23   :  { %232 = vmatprep.mubr.bf16.mxu0 %v696_v29  ;;  %248 = vmatprep.mubr.bf16.mxu1 %v542_v30 }
  0x24   :  { %659 = vset.pattern.permute.xlu1 %v702_v2 }
  0x25   :  { %442 = vperm.xlu1 %659, %v770_v11   ;;  %667 = vset.pattern.permute.xlu0 %v701_v1 }
  0x26   :  { %302 = vperm.xlu0 %667, %v770_v11  }
  0x29   :  { %662 = vset.pattern.permute.xlu1 %v701_v1 }
  0x2a   :  { %233 = vmatmul.mubr.bf16.gmra.mrb[4].mxu0 %v699_v31  ;;  %249 = vmatmul.mubr.bf16.gmra.mrb[4].mxu1 %v541_v32 }
  0x2b   :  { %322 = vperm.xlu1 %662, %v296_v34   ;;  %307 = vperm.xlu0 %667, %v783_v15  }
  0x2f   :  { %663 = vset.pattern.permute.xlu1 %v703_v13  ;;  %332 = vperm.xlu0 %667, %v298_v35  }
  0x30   :  { %364 = vperm.xlu1 %663, %v296_v34  }
  0x33   :  { %672 = vset.pattern.permute.xlu0 %v702_v2 }
  0x34   :  { %665 = vset.pattern.permute.xlu1 %v702_v2  ;;  %458 = vperm.xlu0 %672, %v296_v34  }
  0x35   :  { %450 = vperm.xlu1 %665, %v755_v7  }
  0x38   :  { %466 = vperm.xlu0 %672, %v298_v35  }
  0x39   :  { %666 = vset.pattern.permute.xlu1 %v701_v1 }
  0x3a   :  { %327 = vperm.xlu1 %666, %v297_v33  }
  0x3e   :  { %668 = vset.pattern.permute.xlu1 %v704_v21 }
  0x3f   :  { %411 = vperm.xlu1 %668, %v296_v34  }
  0x43   :  { %669 = vset.pattern.permute.xlu1 %v702_v2 }
  0x44   :  { %454 = vperm.xlu1 %669, %v295_v25  }
  0x48   :  { %670 = vset.pattern.permute.xlu1 %v703_v13 }
  0x49   :  { %372 = vperm.xlu1 %670, %v298_v35  }
  0x4d   :  { %671 = vset.pattern.permute.xlu1 %v704_v21 }
  0x4e   :  { %415 = vperm.xlu1 %671, %v297_v33  }
  0x52   :  { %419 = vperm.xlu1 %671, %v298_v35  }
  0x56   :  { %673 = vset.pattern.permute.xlu1 %v702_v2 }
  0x57   :  { %462 = vperm.xlu1 %673, %v297_v33  }
  0x84   :  { %v313_v36 = vpop.permute.xlu1 %312  ;;  %v447_v42 = vpop.permute.xlu0 %446 }
  0x85   :  { %v341_v7 = vmul.f32 %v566_v58, %v313_v36  ;;  %v474_v16 = vmul.f32 %v883_v9, %v447_v42 }
  0x89   :  { %v349_v37 = vpop.permute.xlu1 %348 }
  0x8a   :  { %v379_v60 = vmul.f32 %v567_v59, %v349_v37 }
  0x8d   :  { %v357_v38 = vpop.permute.xlu1 %356  ;;  %v400_v44 = vpop.permute.xlu0 %399 }
  0x8e   :  { %v427_v5 = vmul.f32 %v876_v0, %v400_v44  ;;  %v381_v8 = vmul.f32 %v567_v59, %v357_v38 }
  0x90   :  { %v388_v20 = vadd.f32 %v381_v8, %v341_v7 }
  0x91   :  { %v404_v46 = vpop.permute.xlu0 %403 }
  0x92   :  { %v428_v25 = vmul.f32 %v876_v0, %v404_v46 }
  0x94   :  { %v396_v39 = vpop.permute.xlu1 %395 }
  0x95   :  { %v408_v48 = vpop.permute.xlu0 %407  ;;  %v426_v3 = vmul.f32 %v876_v0, %v396_v39 }
  0x96   :  { %v429_v32 = vmul.f32 %v876_v0, %v408_v48 }
  0x99   :  { %v318_v40 = vpop.permute.xlu1 %317 }
  0x9a   :  { %v342_v12 = vmul.f32 %v566_v58, %v318_v40 }
  0x9c   :  { %v353_v50 = vpop.permute.xlu0 %352 }
  0x9d   :  { %v380_v62 = vmul.f32 %v567_v59, %v353_v50 }
  0x9f   :  { %v361_v41 = vpop.permute.xlu1 %360 }
  0xa0   :  { %v369_v52 = vpop.permute.xlu0 %368  ;;  %v382_v13 = vmul.f32 %v567_v59, %v361_v41 }
  0xa1   :  { %v384_v33 = vmul.f32 %v567_v59, %v369_v52 }
  0xa2   :  { %v389_v31 = vadd.f32 %v382_v13, %v342_v12 }
  0xa4   :  { %v443_v43 = vpop.permute.xlu1 %442  ;;  %v436_v50 = vadd.f32 %v429_v32, %v389_v31 }
  0xa5   :  { %v303_v54 = vpop.permute.xlu0 %302  ;;  %v473_v10 = vmul.f32 %v883_v9, %v443_v43 }
  0xa6   :  { %v339_v61 = vmul.f32 %v566_v58, %v303_v54 }
  0xa8   :  { %v386_v4 = vadd.f32 %v379_v60, %v339_v61 }
  0xaa   :  { %v323_v45 = vpop.permute.xlu1 %322  ;;  %v308_v56 = vpop.permute.xlu0 %307  ;;  %v433_v11 = vadd.f32 %v426_v3, %v386_v4 }
  0xab   :  { %v340_v63 = vmul.f32 %v566_v58, %v308_v56  ;;  %v343_v21 = vmul.f32 %v566_v58, %v323_v45  ;;  %v435_v45 = vadd.f32 %v428_v25, %v388_v20 }
  0xac   :  { %v480_v26 = vadd.f32 %v473_v10, %v433_v11 }
  0xad   :  { %v387_v6 = vadd.f32 %v380_v62, %v340_v63 }
  0xae   :  { %v333_v1 = vpop.permute.xlu0 %332 }
  0xaf   :  { %v365_v47 = vpop.permute.xlu1 %364  ;;  %v434_v17 = vadd.f32 %v427_v5, %v387_v6  ;;  %v345_v43 = vmul.f32 %v566_v58, %v333_v1 }
  0xb0   :  { %v383_v22 = vmul.f32 %v567_v59, %v365_v47 }
  0xb1   :  { %v481_v37 = vadd.f32 %v474_v16, %v434_v17 }
  0xb2   :  { %v390_v41 = vadd.f32 %v383_v22, %v343_v21 }
  0xb3   :  { %v459_v14 = vpop.permute.xlu0 %458 }
  0xb4   :  { %v863_v49 = vpop.permute.xlu1 %450  ;;  %v477_v61 = vmul.f32 %v883_v9, %v459_v14 }
  0xb5   :  { %v475_v46 = vmul.f32 %v883_v9, %v863_v49 }
  0xb7   :  { %v467_v56 = vpop.permute.xlu0 %466  ;;  %v482_v5 = vadd.f32 %v475_v46, %v435_v45 }
  0xb8   :  { %v479_v20 = vmul.f32 %v883_v9, %v467_v56 }
  0xb9   :  { %v328_v51 = vpop.permute.xlu1 %327 }
  0xba   :  { %v344_v34 = vmul.f32 %v566_v58, %v328_v51 }
  0xbc   :  { %v391_v51 = vadd.f32 %v384_v33, %v344_v34 }
  0xbe   :  { %v412_v53 = vpop.permute.xlu1 %411 }
  0xbf   :  { %v430_v42 = vmul.f32 %v876_v0, %v412_v53 }
  0xc1   :  { %v437_v62 = vadd.f32 %v430_v42, %v390_v41 }
  0xc3   :  { %v865_v55 = vpop.permute.xlu1 %454 }
  0xc4   :  { %v476_v63 = vmul.f32 %v883_v9, %v865_v55 }
  0xc8   :  { %v373_v57 = vpop.permute.xlu1 %372 }
  0xc9   :  { %v385_v44 = vmul.f32 %v567_v59, %v373_v57 }
  0xcb   :  { %v392_v1 = vadd.f32 %v385_v44, %v345_v43 }
  0xcd   :  { %v416_v2 = vpop.permute.xlu1 %415 }
  0xce   :  { %v431_v52 = vmul.f32 %v876_v0, %v416_v2 }
  0xd0   :  { %v438_v12 = vadd.f32 %v431_v52, %v391_v51 }
  0xd1   :  { %v420_v15 = vpop.permute.xlu1 %419 }
  0xd2   :  { %v432_v2 = vmul.f32 %v876_v0, %v420_v15  ;;  %v483_v15 = vadd.f32 %v476_v63, %v436_v50 }
  0xd6   :  { %v463_v54 = vpop.permute.xlu1 %462 }
  0xd7   :  { %v478_v13 = vmul.f32 %v883_v9, %v463_v54 }
  0xf5   :  { %v610_v18 = vpop.f32.mrb[0].mxu0  ;;  %v622_v19 = vpop.f32.mrb[0].mxu1 }
  0xf6   :  { %v611_v23 = vpop.f32.mrb[1].mxu0  ;;  %v623_v24 = vpop.f32.mrb[1].mxu1 }
  0xf7   :  { %v612_v27 = vadd.f32 %v611_v23, %v610_v18  ;;  %v888_v28 = vadd.f32 %v623_v24, %v622_v19  ;;  %v613_v29 = vpop.f32.mrb[2].mxu0  ;;  %v625_v30 = vpop.f32.mrb[2].mxu1  ;;  %v484_v18 = vadd.f32 %v477_v61, %v437_v62  ;;  %v439_v19 = vadd.f32 %v432_v2, %v392_v1 }
  0xf8   :  { %v614_v35 = vpop.f32.mrb[3].mxu0  ;;  %v626_v36 = vpop.f32.mrb[3].mxu1  ;;  %v485_v24 = vadd.f32 %v478_v13, %v438_v12 }
  0xf9   :  { %v487_v38 = vmul.f32 %v612_v27, %v480_v26  ;;  %v615_v39 = vadd.f32 %v614_v35, %v613_v29  ;;  %v891_v40 = vadd.f32 %v626_v36, %v625_v30  ;;  %v491_v25 = vmul.f32 %v888_v28, %v484_v18 }
  0xfa   :  { %v486_v29 = vadd.f32 %v479_v20, %v439_v19 }
  0xfb   :  { %v580_v47 = vpack.c.bf16 %v615_v39, %v612_v27  ;;  %v488_v48 = vmul.f32 %v615_v39, %v481_v37  ;;  %v590_v60 = vpack.c.bf16 %v891_v40, %v888_v28  ;;  %v506_v53 = vmul.f32 %v612_v27, %v487_v38 }
  0xfc   :  { %v492_v30 = vmul.f32 %v891_v40, %v485_v24  ;;  %v510_v32 = vmul.f32 %v888_v28, %v491_v25 }
  0xfd   :  { %581 = vst [vmem:[%s931_s4] sm:$0xff] %v580_v47   ;;  %v494_v57 = vadd.f32 %v488_v48, %v487_v38  ;;  %v507_v49 = vmul.f32 %v615_v39, %v488_v48  ;;  %v616_v58 = vpop.f32.mrb[4].mxu0  ;;  %v628_v59 = vpop.f32.mrb[4].mxu1  ;;  %593 = vst [vmem:[%s931_s4 + $0x10] sm:$0xff] %v590_v60  }
  0xfe   :  { %v617_v3 = vpop.f32.mrb[5].mxu0  ;;  %v629_v4 = vpop.f32.mrb[5].mxu1  ;;  %v511_v36 = vmul.f32 %v891_v40, %v492_v30 }
  0xff   :  { %v513_v6 = vadd.f32 %v507_v49, %v506_v53  ;;  %v618_v7 = vadd.f32 %v617_v3, %v616_v58  ;;  %v630_v8 = vadd.f32 %v629_v4, %v628_v59  ;;  %v619_v10 = vpop.f32.mrb[6].mxu0  ;;  %v631_v11 = vpop.f32.mrb[6].mxu1 }
 0x100   :  { %v620_v14 = vpop.f32.mrb[7].mxu0  ;;  %v632_v55 = vpop.f32.mrb[7].mxu1 }
 0x101   :  { %v489_v16 = vmul.f32 %v618_v7, %v482_v5  ;;  %v576_v17 = vpack.c.bf16 %v630_v8, %v630_v8  ;;  %v621_v0 = vadd.f32 %v620_v14, %v619_v10  ;;  %v493_v33 = vmul.f32 %v630_v8, %v486_v29 }
 0x103   :  { %v495_v21 = vadd.f32 %v494_v57, %v489_v16  ;;  %v508_v22 = vmul.f32 %v618_v7, %v489_v16  ;;  %291 = vst [vmem:[%s931_s4 + $0x18] sm:$0xf] %v576_v17  ;;  %v585_v23 = vpack.c.bf16 %v621_v0, %v618_v7  ;;  %v490_v26 = vmul.f32 %v621_v0, %v483_v15 }
 0x104   :  { %v512_v39 = vmul.f32 %v630_v8, %v493_v33 }
 0x105   :  { %v514_v27 = vadd.f32 %v513_v6, %v508_v22  ;;  %592 = vst [vmem:[%s931_s4 + $0x8] sm:$0xff] %v585_v23   ;;  %v496_v9 = vadd.f32 %v495_v21, %v490_v26  ;;  %v509_v31 = vmul.f32 %v621_v0, %v490_v26 }
 0x107   :  { %v497_v34 = vadd.f32 %v496_v9, %v491_v25  ;;  %v515_v35 = vadd.f32 %v514_v27, %v509_v31 }
 0x109   :  { %v498_v37 = vadd.f32 %v497_v34, %v492_v30  ;;  %v516_v38 = vadd.f32 %v515_v35, %v510_v32 }
 0x10b   :  { %v499_v41 = vadd.f32 %v498_v37, %v493_v33  ;;  %v517_v42 = vadd.f32 %v516_v38, %v511_v36 }
 0x10d   :  { %v500_v43 = vrot.slane %v499_v41, 4  ;;  %v518_v44 = vadd.f32 %v517_v42, %v512_v39 }
 0x10f   :  { %v501_v45 = vadd.f32 %v500_v43, %v499_v41  ;;  %v519_v46 = vrot.slane %v518_v44, 4 }
 0x111   :  { %v502_v47 = vrot.slane %v501_v45, 2  ;;  %v520_v48 = vadd.f32 %v519_v46, %v518_v44 }
 0x113   :  { %v503_v50 = vadd.f32 %v502_v47, %v501_v45  ;;  %v521_v51 = vrot.slane %v520_v48, 2 }
 0x115   :  { %v504_v52 = vrot.slane %v503_v50, 1  ;;  %v522_v28 = vadd.f32 %v521_v51, %v520_v48 }
 0x117   :  { %v505_v54 = vadd.f32 %v504_v52, %v503_v50  ;;  %v523_v56 = vrot.slane %v522_v28, 1 }
 0x119   :  { %v524_v60 = vadd.f32 %v523_v56, %v522_v28  ;;  %525 = vst [vmem:[%s932_s5] sm:$0xff] %v505_v54 }
 0x11b   :  { %526 = vst [vmem:[%s932_s5 + $0x8] sm:$0xff] %v524_v60 }

// kernel: generator_forward.12
= control target key start
LH: loop header
LB: loop body
LE: loop exit
PB: predicated region body
PF: predicated region fallthrough
CT: control target
= control target key end

     0   :  { %s200_s0 = inlined_call_operand.vmem [shape: bf16[56,128], index: 0, kind: input, shape index: {}]   ;;  %s201_s1 = inlined_call_operand.vmem [shape: f32[1,128], index: 1, kind: input, shape index: {}]   ;;  %s202_s2 = inlined_call_operand.vmem [shape: f32[1,128], index: 2, kind: input, shape index: {}]   ;;  %s203_s3 = inlined_call_operand.vmem [shape: bf16[56,128], index: 3, kind: output, shape index: {}]  }
   0x1   :  { %v120_v0 = vld [vmem:[%s200_s0] sm:$0xff]   ;;  %v146_v4 = vld [vmem:[%s200_s0 + $0x8] sm:$0xff]   ;;  %v147_v5 = vld [vmem:[%s200_s0 + $0x10] sm:$0xff]  }
   0x2   :  { %v103_v1 = vld [vmem:[%s201_s1] ss:$0 sm:$0xff]  ;;  %v121_v2 = vunpack.c.l.bf16 %v120_v0  ;;  %v122_v3 = vunpack.c.h.bf16 %v120_v0  ;;  %v20_v6 = vld [vmem:[%s200_s0 + $0x18] sm:$0xf]  ;;  %v125_v8 = vunpack.c.l.bf16 %v146_v4  ;;  %v126_v9 = vunpack.c.h.bf16 %v146_v4 }
   0x3   :  { %v104_v7 = vld [vmem:[%s202_s2] ss:$0 sm:$0xff]  ;;  %v129_v10 = vunpack.c.l.bf16 %v147_v5  ;;  %v130_v11 = vunpack.c.h.bf16 %v147_v5  ;;  %v27_v14 = vunpack.c.l.bf16 %v20_v6 }
   0x4   :  { %v35_v12 = vmul.f32 %v121_v2, %v103_v1  ;;  %v36_v13 = vmul.f32 %v122_v3, %v103_v1  ;;  %v37_v15 = vmul.f32 %v125_v8, %v103_v1  ;;  %v38_v16 = vmul.f32 %v126_v9, %v103_v1 }
   0x5   :  { %v39_v17 = vmul.f32 %v129_v10, %v103_v1  ;;  %v40_v18 = vmul.f32 %v130_v11, %v103_v1  ;;  %v41_v21 = vmul.f32 %v103_v1, %v27_v14 }
   0x6   :  { %v49_v19 = vadd.f32 %v104_v7, %v35_v12  ;;  %v50_v20 = vadd.f32 %v104_v7, %v36_v13  ;;  %v51_v22 = vadd.f32 %v104_v7, %v37_v15  ;;  %v52_v23 = vadd.f32 %v104_v7, %v38_v16 }
   0x7   :  { %v53_v24 = vadd.f32 %v104_v7, %v39_v17  ;;  %v54_v25 = vadd.f32 %v104_v7, %v40_v18  ;;  %v55_v28 = vadd.f32 %v104_v7, %v41_v21 }
   0x8   :  { %v56_v26 = vmax.f32 %v49_v19, 0.0  ;;  %v57_v27 = vmax.f32 %v50_v20, 0.0  ;;  %v58_v29 = vmax.f32 %v51_v22, 0.0  ;;  %v59_v30 = vmax.f32 %v52_v23, 0.0 }
   0x9   :  { %v60_v31 = vmax.f32 %v53_v24, 0.0  ;;  %v61_v32 = vmax.f32 %v54_v25, 0.0  ;;  %v62_v34 = vmax.f32 %v55_v28, 0.0 }
   0xa   :  { %v134_v33 = vpack.c.bf16 %v57_v27, %v56_v26  ;;  %v139_v35 = vpack.c.bf16 %v59_v30, %v58_v29 }
   0xb   :  { %v144_v36 = vpack.c.bf16 %v61_v32, %v60_v31  ;;  %v118_v37 = vpack.c.bf16 %v62_v34, %v62_v34 }
   0xc   :  { %135 = vst [vmem:[%s203_s3] sm:$0xff] %v134_v33   ;;  %148 = vst [vmem:[%s203_s3 + $0x8] sm:$0xff] %v139_v35  }
   0xd   :  { %149 = vst [vmem:[%s203_s3 + $0x10] sm:$0xff] %v144_v36   ;;  %98 = vst [vmem:[%s203_s3 + $0x18] sm:$0xf] %v118_v37 }

// kernel: generator_forward.14
= control target key start
LH: loop header
LB: loop body
LE: loop exit
PB: predicated region body
PF: predicated region fallthrough
CT: control target
= control target key end

     0   :  { %s533_s0 = inlined_call_operand.vmem [shape: bf16[168,128], index: 0, kind: input, shape index: {}]   ;;  %s534_s1 = inlined_call_operand.vmem [shape: f32[1,128], index: 1, kind: input, shape index: {}]   ;;  %s535_s2 = inlined_call_operand.vmem [shape: f32[1,128], index: 2, kind: input, shape index: {}]   ;;  %s536_s3 = inlined_call_operand.vmem [shape: bf16[168,128], index: 3, kind: output, shape index: {}]  }
   0x1   :  { %v288_v0 = vld [vmem:[%s533_s0] sm:$0xff]   ;;  %v377_v4 = vld [vmem:[%s533_s0 + $0x8] sm:$0xff]   ;;  %v378_v5 = vld [vmem:[%s533_s0 + $0x10] sm:$0xff]  }
   0x2   :  { %v421_v1 = vld [vmem:[%s534_s1] ss:$0 sm:$0xff]  ;;  %v289_v2 = vunpack.c.l.bf16 %v288_v0  ;;  %v290_v3 = vunpack.c.h.bf16 %v288_v0  ;;  %v379_v6 = vld [vmem:[%s533_s0 + $0x18] sm:$0xff]   ;;  %v293_v8 = vunpack.c.l.bf16 %v377_v4  ;;  %v294_v9 = vunpack.c.h.bf16 %v377_v4  ;;  %v381_v33 = vld [vmem:[%s533_s0 + $0x28] sm:$0xff]  }
   0x3   :  { %v435_v7 = vld [vmem:[%s535_s2] ss:$0 sm:$0xff]  ;;  %v297_v10 = vunpack.c.l.bf16 %v378_v5  ;;  %v298_v11 = vunpack.c.h.bf16 %v378_v5  ;;  %v301_v14 = vunpack.c.l.bf16 %v379_v6  ;;  %v302_v15 = vunpack.c.h.bf16 %v379_v6  ;;  %v382_v38 = vld [vmem:[%s533_s0 + $0x30] sm:$0xff]   ;;  %v383_v43 = vld [vmem:[%s533_s0 + $0x38] sm:$0xff]  }
   0x4   :  { %v63_v12 = vmul.f32 %v289_v2, %v421_v1  ;;  %v64_v13 = vmul.f32 %v290_v3, %v421_v1  ;;  %v65_v16 = vmul.f32 %v293_v8, %v421_v1  ;;  %v66_v17 = vmul.f32 %v294_v9, %v421_v1  ;;  %v380_v28 = vld [vmem:[%s533_s0 + $0x20] sm:$0xff]  }
   0x5   :  { %v67_v18 = vmul.f32 %v297_v10, %v421_v1  ;;  %v68_v19 = vmul.f32 %v298_v11, %v421_v1  ;;  %v69_v22 = vmul.f32 %v301_v14, %v421_v1  ;;  %v70_v23 = vmul.f32 %v302_v15, %v421_v1  ;;  %v384_v0 = vld [vmem:[%s533_s0 + $0x40] sm:$0xff]   ;;  %v385_v11 = vld [vmem:[%s533_s0 + $0x48] sm:$0xff]  }
   0x6   :  { %v91_v20 = vadd.f32 %v435_v7, %v63_v12  ;;  %v92_v21 = vadd.f32 %v435_v7, %v64_v13  ;;  %v93_v24 = vadd.f32 %v435_v7, %v65_v16  ;;  %v94_v25 = vadd.f32 %v435_v7, %v66_v17  ;;  %v34_v16 = vld [vmem:[%s533_s0 + $0x50] sm:$0xf] }
   0x7   :  { %v95_v26 = vadd.f32 %v435_v7, %v67_v18  ;;  %v96_v27 = vadd.f32 %v435_v7, %v68_v19  ;;  %v97_v31 = vadd.f32 %v435_v7, %v69_v22  ;;  %v98_v32 = vadd.f32 %v435_v7, %v70_v23 }
   0x8   :  { %v112_v29 = vmax.f32 %v91_v20, 0.0  ;;  %v113_v30 = vmax.f32 %v92_v21, 0.0  ;;  %v114_v34 = vmax.f32 %v93_v24, 0.0  ;;  %v115_v35 = vmax.f32 %v94_v25, 0.0 }
   0x9   :  { %v116_v36 = vmax.f32 %v95_v26, 0.0  ;;  %v117_v37 = vmax.f32 %v96_v27, 0.0  ;;  %v118_v40 = vmax.f32 %v97_v31, 0.0  ;;  %v119_v41 = vmax.f32 %v98_v32, 0.0 }
   0xa   :  { %v330_v39 = vpack.c.bf16 %v113_v30, %v112_v29  ;;  %v305_v42 = vunpack.c.l.bf16 %v380_v28  ;;  %v335_v44 = vpack.c.bf16 %v115_v35, %v114_v34  ;;  %v306_v46 = vunpack.c.h.bf16 %v380_v28 }
   0xb   :  { %v340_v45 = vpack.c.bf16 %v117_v37, %v116_v36  ;;  %v309_v47 = vunpack.c.l.bf16 %v381_v33  ;;  %v345_v48 = vpack.c.bf16 %v119_v41, %v118_v40  ;;  %v310_v50 = vunpack.c.h.bf16 %v381_v33 }
   0xc   :  { %331 = vst [vmem:[%s536_s3] sm:$0xff] %v330_v39   ;;  %v71_v49 = vmul.f32 %v305_v42, %v421_v1  ;;  %v313_v51 = vunpack.c.l.bf16 %v382_v38  ;;  %386 = vst [vmem:[%s536_s3 + $0x8] sm:$0xff] %v335_v44   ;;  %v72_v52 = vmul.f32 %v306_v46, %v421_v1  ;;  %v314_v54 = vunpack.c.h.bf16 %v382_v38 }
   0xd   :  { %387 = vst [vmem:[%s536_s3 + $0x10] sm:$0xff] %v340_v45   ;;  %v73_v53 = vmul.f32 %v309_v47, %v421_v1  ;;  %v317_v55 = vunpack.c.l.bf16 %v383_v43  ;;  %388 = vst [vmem:[%s536_s3 + $0x18] sm:$0xff] %v345_v48   ;;  %v74_v57 = vmul.f32 %v310_v50, %v421_v1  ;;  %v318_v59 = vunpack.c.h.bf16 %v383_v43 }
   0xe   :  { %v99_v56 = vadd.f32 %v435_v7, %v71_v49  ;;  %v75_v58 = vmul.f32 %v313_v51, %v421_v1  ;;  %v100_v60 = vadd.f32 %v435_v7, %v72_v52  ;;  %v76_v62 = vmul.f32 %v314_v54, %v421_v1 }
   0xf   :  { %v101_v61 = vadd.f32 %v435_v7, %v73_v53  ;;  %v77_v63 = vmul.f32 %v317_v55, %v421_v1  ;;  %v102_v3 = vadd.f32 %v435_v7, %v74_v57  ;;  %v78_v5 = vmul.f32 %v318_v59, %v421_v1 }
  0x10   :  { %v120_v2 = vmax.f32 %v99_v56, 0.0  ;;  %v103_v4 = vadd.f32 %v435_v7, %v75_v58  ;;  %v121_v6 = vmax.f32 %v100_v60, 0.0  ;;  %v104_v9 = vadd.f32 %v435_v7, %v76_v62 }
  0x11   :  { %v122_v8 = vmax.f32 %v101_v61, 0.0  ;;  %v105_v10 = vadd.f32 %v435_v7, %v77_v63  ;;  %v123_v12 = vmax.f32 %v102_v3, 0.0  ;;  %v106_v14 = vadd.f32 %v435_v7, %v78_v5 }
  0x12   :  { %v124_v13 = vmax.f32 %v103_v4, 0.0  ;;  %v321_v15 = vunpack.c.l.bf16 %v384_v0  ;;  %v350_v17 = vpack.c.bf16 %v121_v6, %v120_v2  ;;  %v125_v18 = vmax.f32 %v104_v9, 0.0 }
  0x13   :  { %v126_v19 = vmax.f32 %v105_v10, 0.0  ;;  %v322_v20 = vunpack.c.h.bf16 %v384_v0  ;;  %v355_v21 = vpack.c.bf16 %v123_v12, %v122_v8  ;;  %v127_v22 = vmax.f32 %v106_v14, 0.0 }
  0x14   :  { %v79_v23 = vmul.f32 %v321_v15, %v421_v1  ;;  %v325_v24 = vunpack.c.l.bf16 %v385_v11  ;;  %389 = vst [vmem:[%s536_s3 + $0x20] sm:$0xff] %v350_v17   ;;  %v360_v25 = vpack.c.bf16 %v125_v18, %v124_v13  ;;  %v326_v27 = vunpack.c.h.bf16 %v385_v11 }
  0x15   :  { %v80_v26 = vmul.f32 %v322_v20, %v421_v1  ;;  %v55_v28 = vunpack.c.l.bf16 %v34_v16  ;;  %390 = vst [vmem:[%s536_s3 + $0x28] sm:$0xff] %v355_v21   ;;  %v365_v29 = vpack.c.bf16 %v127_v22, %v126_v19 }
  0x16   :  { %v107_v30 = vadd.f32 %v435_v7, %v79_v23  ;;  %v81_v31 = vmul.f32 %v325_v24, %v421_v1  ;;  %391 = vst [vmem:[%s536_s3 + $0x30] sm:$0xff] %v360_v25   ;;  %v82_v33 = vmul.f32 %v326_v27, %v421_v1 }
  0x17   :  { %v108_v32 = vadd.f32 %v435_v7, %v80_v26  ;;  %v83_v34 = vmul.f32 %v421_v1, %v55_v28  ;;  %392 = vst [vmem:[%s536_s3 + $0x38] sm:$0xff] %v365_v29  }
  0x18   :  { %v128_v35 = vmax.f32 %v107_v30, 0.0  ;;  %v109_v36 = vadd.f32 %v435_v7, %v81_v31  ;;  %v110_v38 = vadd.f32 %v435_v7, %v82_v33 }
  0x19   :  { %v129_v37 = vmax.f32 %v108_v32, 0.0  ;;  %v111_v39 = vadd.f32 %v435_v7, %v83_v34 }
  0x1a   :  { %v130_v40 = vmax.f32 %v109_v36, 0.0  ;;  %v131_v42 = vmax.f32 %v110_v38, 0.0 }
  0x1b   :  { %v370_v41 = vpack.c.bf16 %v129_v37, %v128_v35  ;;  %v132_v43 = vmax.f32 %v111_v39, 0.0 }
  0x1c   :  { %v375_v1 = vpack.c.bf16 %v131_v42, %v130_v40 }
  0x1d   :  { %393 = vst [vmem:[%s536_s3 + $0x40] sm:$0xff] %v370_v41   ;;  %v286_v44 = vpack.c.bf16 %v132_v43, %v132_v43 }
  0x1e   :  { %394 = vst [vmem:[%s536_s3 + $0x48] sm:$0xff] %v375_v1  }
  0x1f   :  { %238 = vst [vmem:[%s536_s3 + $0x50] sm:$0xf] %v286_v44 }

// kernel: generator_forward.13
= control target key start
LH: loop header
LB: loop body
LE: loop exit
PB: predicated region body
PF: predicated region fallthrough
CT: control target
= control target key end

     0   :  { %v1305_v0 = vmov 0   ;;  %v1306_v5 = vmov 0.0   ;;  %vm1307_vm0 = vmmov 0   ;;  %v1308_v35 = vmov 1   ;;  %s1985_s2 = inlined_call_operand.vmem [shape: f32[168,8], index: 2, kind: input, shape index: {}]   ;;  %s1986_s1 = inlined_call_operand.vmem [shape: bf16[128,128], index: 1, kind: input, shape index: {}]   ;;  %s1987_s0 = inlined_call_operand.vmem [shape: bf16[168,128], index: 0, kind: input, shape index: {}]   ;;  %s1988_s3 = inlined_call_operand.vmem [shape: f32[8,128], index: 3, kind: input, shape index: {}]   ;;  %s1989_s4 = inlined_call_operand.vmem [shape: bf16[168,128], index: 4, kind: output, shape index: {0}]   ;;  %s1990_s5 = inlined_call_operand.vmem [shape: f32[8,256], index: 5, kind: output, shape index: {1}]  }
   0x1   :  { %1270 = vset.pattern.permute.xlu1 %v1305_v0  ;;  %1269 = vset.pattern.permute.xlu0 %v1305_v0  ;;  %v1344_v1 = vld [vmem:[%s1985_s2 + $0x10] sm:$0xff]  ;;  %v1349_v2 = vld [vmem:[%s1985_s2] sm:$0xff]  ;;  %v1359_v4 = vld [vmem:[%s1985_s2 + $0x18] sm:$0xff]  ;;  %v1309_v43 = vmov 2   ;;  %v1310_v44 = vmov 3  }
   0x2   :  { %429 = vperm.xlu1 %1270, %v1344_v1   ;;  %419 = vperm.xlu0 %1269, %v1349_v2   ;;  %v1286_v3 = vld [vmem:[%s1986_s1] sm:$0xff]   ;;  %v1365_v6 = vld [vmem:[%s1985_s2 + $0x8] sm:$0xff]  ;;  %v1288_v10 = vld [vmem:[%s1986_s1 + $0x10] sm:$0xff]  }
   0x3   :  { %1187 = vmatprep.subr.bf16.mxu0 %v1306_v5  ;;  %1247 = vmatprep.subr.bf16.mxu1 %v1306_v5  ;;  %v1287_v7 = vld [vmem:[%s1986_s1 + $0x8] sm:$0xff]   ;;  %v1383_v9 = vld [vmem:[%s1985_s2 + $0x20] sm:$0xff]  ;;  %v1399_v11 = vld [vmem:[%s1985_s2 + $0x38] sm:$0xff] }
   0x4   :  { %1188 = vmatpush3.bf16.msra.mxu0 %v1286_v3  ;;  %1255 = vmatpush3.bf16.msra.mxu1 %v1286_v3  ;;  %v1378_v8 = vld [vmem:[%s1985_s2 + $0x28] sm:$0xff]  ;;  %v1404_v12 = vld [vmem:[%s1985_s2 + $0x30] sm:$0xff]  ;;  %v1289_v13 = vld [vmem:[%s1986_s1 + $0x18] sm:$0xff]  }
   0x5   :  { %1189 = vmatprep.subr.bf16.mxu0 %v1306_v5  ;;  %1248 = vmatprep.subr.bf16.mxu1 %v1306_v5  ;;  %v1416_v14 = vld [vmem:[%s1985_s2 + $0x48] sm:$0xff]  ;;  %v1421_v15 = vld [vmem:[%s1985_s2 + $0x40] sm:$0xff]  ;;  %v1433_v17 = vld [vmem:[%s1985_s2 + $0x58] sm:$0xff] }
   0x6   :  { %434 = vperm.xlu1 %1270, %v1359_v4   ;;  %424 = vperm.xlu0 %1269, %v1365_v6   ;;  %v1290_v16 = vld [vmem:[%s1986_s1 + $0x20] sm:$0xff]   ;;  %v1438_v18 = vld [vmem:[%s1985_s2 + $0x50] sm:$0xff]  ;;  %v1291_v19 = vld [vmem:[%s1986_s1 + $0x28] sm:$0xff]  }
   0x7   :  { %1203 = vmatprep.mubr.msk.bf16.mxu0 %vm1307_vm0, %v1306_v5  ;;  %1227 = vmatprep.mubr.msk.bf16.mxu1 %vm1307_vm0, %v1306_v5  ;;  %v1450_v20 = vld [vmem:[%s1985_s2 + $0x68] sm:$0xff]  ;;  %v1455_v21 = vld [vmem:[%s1985_s2 + $0x60] sm:$0xff]  ;;  %v1292_v22 = vld [vmem:[%s1986_s1 + $0x30] sm:$0xff]  }
   0x8   :  { %1190 = vmatpush3.bf16.msra.mxu0 %v1287_v7  ;;  %1256 = vmatpush3.bf16.msra.mxu1 %v1287_v7  ;;  %v1467_v23 = vld [vmem:[%s1985_s2 + $0x78] sm:$0xff]  ;;  %v1472_v24 = vld [vmem:[%s1985_s2 + $0x70] sm:$0xff]  ;;  %v1484_v26 = vld [vmem:[%s1985_s2 + $0x88] sm:$0xff] }
   0x9   :  { %1191 = vmatprep.subr.bf16.mxu0 %v1306_v5  ;;  %1249 = vmatprep.subr.bf16.mxu1 %v1306_v5  ;;  %v1293_v25 = vld [vmem:[%s1986_s1 + $0x38] sm:$0xff]   ;;  %v1489_v27 = vld [vmem:[%s1985_s2 + $0x80] sm:$0xff]  ;;  %v1296_v29 = vld [vmem:[%s1987_s0 + $0x30] sm:$0xff]  }
   0xa   :  { %444 = vperm.xlu1 %1270, %v1378_v8   ;;  %439 = vperm.xlu0 %1269, %v1383_v9   ;;  %v1294_v28 = vld [vmem:[%s1987_s0] sm:$0xff]   ;;  %v1502_v30 = vld [vmem:[%s1985_s2 + $0x98] sm:$0xff]  ;;  %v1507_v31 = vld [vmem:[%s1985_s2 + $0x90] sm:$0xff] }
   0xb   :  { %v1518_v32 = vld [vmem:[%s1985_s2 + $0xa0] sm:$0xff]  ;;  %v1295_v33 = vld [vmem:[%s1987_s0 + $0x8] sm:$0xff]   ;;  %v1298_v34 = vld [vmem:[%s1987_s0 + $0x38] sm:$0xff]  }
   0xc   :  { %1192 = vmatpush3.bf16.msra.mxu0 %v1288_v10  ;;  %1257 = vmatpush3.bf16.msra.mxu1 %v1288_v10  ;;  %v1297_v36 = vld [vmem:[%s1987_s0 + $0x10] sm:$0xff]   ;;  %v1300_v37 = vld [vmem:[%s1987_s0 + $0x40] sm:$0xff]   ;;  %v1299_v38 = vld [vmem:[%s1987_s0 + $0x18] sm:$0xff]  }
   0xd   :  { %1193 = vmatprep.subr.bf16.mxu0 %v1306_v5  ;;  %1250 = vmatprep.subr.bf16.mxu1 %v1306_v5  ;;  %v1303_v39 = vld [vmem:[%s1987_s0 + $0x48] sm:$0xff]   ;;  %v1301_v40 = vld [vmem:[%s1987_s0 + $0x20] sm:$0xff]   ;;  %v1304_v41 = vld [vmem:[%s1987_s0 + $0x50] ss:$0 sps:$4 sm:$0xff]  }
   0xe   :  { %454 = vperm.xlu1 %1270, %v1399_v11   ;;  %449 = vperm.xlu0 %1269, %v1404_v12   ;;  %v1302_v42 = vld [vmem:[%s1987_s0 + $0x28] sm:$0xff]   ;;  %v1668_v3 = vld [vmem:[%s1988_s3] ss:$0 sm:$0xff] }
  0x10   :  { %1194 = vmatpush3.bf16.msra.mxu0 %v1289_v13  ;;  %1258 = vmatpush3.bf16.msra.mxu1 %v1289_v13 }
  0x11   :  { %1195 = vmatprep.subr.bf16.mxu0 %v1306_v5  ;;  %1251 = vmatprep.subr.bf16.mxu1 %v1306_v5 }
  0x12   :  { %464 = vperm.xlu1 %1270, %v1416_v14   ;;  %459 = vperm.xlu0 %1269, %v1421_v15  }
  0x14   :  { %1196 = vmatpush3.bf16.msra.mxu0 %v1290_v16  ;;  %1259 = vmatpush3.bf16.msra.mxu1 %v1290_v16 }
  0x15   :  { %1197 = vmatprep.subr.bf16.mxu0 %v1306_v5  ;;  %1252 = vmatprep.subr.bf16.mxu1 %v1306_v5 }
  0x16   :  { %474 = vperm.xlu1 %1270, %v1433_v17   ;;  %469 = vperm.xlu0 %1269, %v1438_v18  }
  0x18   :  { %1198 = vmatpush3.bf16.msra.mxu0 %v1291_v19  ;;  %1260 = vmatpush3.bf16.msra.mxu1 %v1291_v19 }
  0x19   :  { %1199 = vmatprep.subr.bf16.mxu0 %v1306_v5  ;;  %1253 = vmatprep.subr.bf16.mxu1 %v1306_v5 }
  0x1a   :  { %484 = vperm.xlu1 %1270, %v1450_v20   ;;  %479 = vperm.xlu0 %1269, %v1455_v21  }
  0x1c   :  { %1200 = vmatpush3.bf16.msra.mxu0 %v1292_v22  ;;  %1261 = vmatpush3.bf16.msra.mxu1 %v1292_v22 }
  0x1d   :  { %1201 = vmatprep.subr.bf16.mxu0 %v1306_v5  ;;  %1254 = vmatprep.subr.bf16.mxu1 %v1306_v5 }
  0x1e   :  { %494 = vperm.xlu1 %1270, %v1467_v23   ;;  %489 = vperm.xlu0 %1269, %v1472_v24  }
  0x20   :  { %1202 = vmatpush3.bf16.msra.mxu0 %v1293_v25  ;;  %1262 = vmatpush3.bf16.msra.mxu1 %v1293_v25 }
  0x22   :  { %504 = vperm.xlu1 %1270, %v1484_v26   ;;  %499 = vperm.xlu0 %1269, %v1489_v27  }
  0x23   :  { %1204 = vmatmul.mubr.bf16.vlgmr.msra.gmra.mrb[0].mxu0 %v1294_v28  ;;  %1228 = vmatmul.mubr.bf16.vlgmr.msra.gmra.mrb[0].mxu1 %v1296_v29 }
  0x24   :  { %1207 = vmatprep.mubr.msk.bf16.mxu0 %vm1307_vm0, %v1306_v5  ;;  %1231 = vmatprep.mubr.msk.bf16.mxu1 %vm1307_vm0, %v1306_v5 }
  0x26   :  { %514 = vperm.xlu1 %1270, %v1502_v30   ;;  %509 = vperm.xlu0 %1269, %v1507_v31  }
  0x2a   :  { %1271 = vset.pattern.permute.xlu1 %v1308_v35  ;;  %519 = vperm.xlu0 %1269, %v1518_v32  }
  0x2b   :  { %549 = vperm.xlu1 %1271, %v1349_v2   ;;  %1208 = vmatmul.mubr.bf16.gmra.mrb[4].mxu0 %v1295_v33 }
  0x2c   :  { %1211 = vmatprep.mubr.msk.bf16.mxu0 %vm1307_vm0, %v1306_v5  ;;  %1232 = vmatmul.mubr.bf16.gmra.mrb[4].mxu1 %v1298_v34 }
  0x2d   :  { %1235 = vmatprep.mubr.msk.bf16.mxu1 %vm1307_vm0, %v1306_v5 }
  0x2e   :  { %1272 = vset.pattern.permute.xlu0 %v1308_v35 }
  0x2f   :  { %557 = vperm.xlu1 %1271, %v1344_v1   ;;  %553 = vperm.xlu0 %1272, %v1365_v6  }
  0x33   :  { %561 = vperm.xlu1 %1271, %v1359_v4   ;;  %565 = vperm.xlu0 %1272, %v1383_v9  }
  0x34   :  { %1212 = vmatmul.mubr.bf16.gmra.mrb[8].mxu0 %v1297_v36  ;;  %1236 = vmatmul.mubr.bf16.gmra.mrb[8].mxu1 %v1300_v37 }
  0x35   :  { %1215 = vmatprep.mubr.msk.bf16.mxu0 %vm1307_vm0, %v1306_v5  ;;  %1239 = vmatprep.mubr.msk.bf16.mxu1 %vm1307_vm0, %v1306_v5 }
  0x37   :  { %569 = vperm.xlu1 %1271, %v1378_v8   ;;  %573 = vperm.xlu0 %1272, %v1404_v12  }
  0x3b   :  { %577 = vperm.xlu1 %1271, %v1399_v11   ;;  %581 = vperm.xlu0 %1272, %v1421_v15  }
  0x3c   :  { %1216 = vmatmul.mubr.bf16.gmra.mrb[12].mxu0 %v1299_v38  ;;  %1240 = vmatmul.mubr.bf16.gmra.mrb[12].mxu1 %v1303_v39 }
  0x3d   :  { %1219 = vmatprep.mubr.msk.bf16.mxu0 %vm1307_vm0, %v1306_v5  ;;  %1243 = vmatprep.mubr.msk.bf16.mxu1 %vm1307_vm0, %v1306_v5 }
  0x3f   :  { %585 = vperm.xlu1 %1271, %v1416_v14   ;;  %589 = vperm.xlu0 %1272, %v1438_v18  }
  0x43   :  { %593 = vperm.xlu1 %1271, %v1433_v17   ;;  %597 = vperm.xlu0 %1272, %v1455_v21  }
  0x44   :  { %1220 = vmatmul.mubr.bf16.gmra.mrb[16].mxu0 %v1301_v40  ;;  %1244 = vmatmul.mubr.bf16.gmra.mrb[16].mxu1 %v1304_v41 }
  0x45   :  { %1223 = vmatprep.mubr.msk.bf16.mxu0 %vm1307_vm0, %v1306_v5 }
  0x47   :  { %601 = vperm.xlu1 %1271, %v1450_v20   ;;  %605 = vperm.xlu0 %1272, %v1472_v24  }
  0x4b   :  { %609 = vperm.xlu1 %1271, %v1467_v23   ;;  %613 = vperm.xlu0 %1272, %v1489_v27  }
  0x4c   :  { %1224 = vmatmul.mubr.bf16.gmra.mrb[20].mxu0 %v1302_v42 }
  0x4f   :  { %617 = vperm.xlu1 %1271, %v1484_v26   ;;  %621 = vperm.xlu0 %1272, %v1507_v31  }
  0x53   :  { %625 = vperm.xlu1 %1271, %v1502_v30   ;;  %629 = vperm.xlu0 %1272, %v1518_v32  }
  0x57   :  { %1273 = vset.pattern.permute.xlu1 %v1309_v43  ;;  %1275 = vset.pattern.permute.xlu0 %v1310_v44 }
  0x58   :  { %680 = vperm.xlu1 %1273, %v1349_v2   ;;  %815 = vperm.xlu0 %1275, %v1365_v6  }
  0x5c   :  { %688 = vperm.xlu1 %1273, %v1344_v1   ;;  %827 = vperm.xlu0 %1275, %v1383_v9  }
  0x60   :  { %692 = vperm.xlu1 %1273, %v1359_v4   ;;  %835 = vperm.xlu0 %1275, %v1404_v12  }
  0x64   :  { %700 = vperm.xlu1 %1273, %v1378_v8   ;;  %843 = vperm.xlu0 %1275, %v1421_v15  }
  0x68   :  { %708 = vperm.xlu1 %1273, %v1399_v11   ;;  %1276 = vset.pattern.permute.xlu0 %v1309_v43 }
  0x69   :  { %684 = vperm.xlu0 %1276, %v1365_v6  }
  0x6c   :  { %716 = vperm.xlu1 %1273, %v1416_v14  }
  0x6d   :  { %696 = vperm.xlu0 %1276, %v1383_v9  }
  0x70   :  { %1274 = vset.pattern.permute.xlu1 %v1310_v44 }
  0x71   :  { %811 = vperm.xlu1 %1274, %v1349_v2   ;;  %704 = vperm.xlu0 %1276, %v1404_v12  }
  0x75   :  { %819 = vperm.xlu1 %1274, %v1344_v1   ;;  %712 = vperm.xlu0 %1276, %v1421_v15   ;;  %v1660_v1 = vld [vmem:[%s1988_s3 + $0x1] ss:$0 sm:$0xff] }
  0x79   :  { %823 = vperm.xlu1 %1274, %v1359_v4   ;;  %720 = vperm.xlu0 %1276, %v1438_v18  }
  0x7d   :  { %831 = vperm.xlu1 %1274, %v1378_v8   ;;  %724 = vperm.xlu0 %1276, %v1433_v17  }
  0x81   :  { %v430_v45 = vpop.permute.xlu1 %429  ;;  %839 = vperm.xlu1 %1274, %v1399_v11   ;;  %736 = vperm.xlu0 %1276, %v1472_v24   ;;  %v420_v46 = vpop.permute.xlu0 %419 }
  0x82   :  { %v526_v5 = vmul.f32 %v1668_v3, %v420_v46  ;;  %v528_v10 = vmul.f32 %v1668_v3, %v430_v45 }
  0x85   :  { %v435_v47 = vpop.permute.xlu1 %434  ;;  %847 = vperm.xlu1 %1274, %v1416_v14   ;;  %748 = vperm.xlu0 %1276, %v1484_v26   ;;  %v425_v48 = vpop.permute.xlu0 %424 }
  0x86   :  { %v527_v11 = vmul.f32 %v1668_v3, %v425_v48 }
  0x89   :  { %v1611_v49 = vpop.permute.xlu1 %444  ;;  %851 = vperm.xlu1 %1274, %v1438_v18   ;;  %1281 = vset.pattern.permute.xlu0 %v1310_v44  ;;  %v440_v50 = vpop.permute.xlu0 %439  ;;  %v529_v18 = vmul.f32 %v1668_v3, %v435_v47 }
  0x8a   :  { %855 = vperm.xlu0 %1281, %v1433_v17   ;;  %v530_v19 = vmul.f32 %v1668_v3, %v440_v50 }
  0x8d   :  { %v1616_v51 = vpop.permute.xlu1 %454  ;;  %1277 = vset.pattern.permute.xlu1 %v1309_v43  ;;  %v450_v52 = vpop.permute.xlu0 %449 }
  0x8e   :  { %728 = vperm.xlu1 %1277, %v1455_v21   ;;  %867 = vperm.xlu0 %1281, %v1472_v24   ;;  %v533_v37 = vmul.f32 %v1668_v3, %v1616_v51 }
  0x91   :  { %v1621_v53 = vpop.permute.xlu1 %464  ;;  %v1623_v54 = vpop.permute.xlu0 %459 }
  0x92   :  { %732 = vperm.xlu1 %1277, %v1450_v20   ;;  %879 = vperm.xlu0 %1281, %v1484_v26   ;;  %v531_v26 = vmul.f32 %v1668_v3, %v1611_v49  ;;  %v534_v38 = vmul.f32 %v1668_v3, %v1623_v54  ;;  %v535_v45 = vmul.f32 %v1668_v3, %v1621_v53 }
  0x95   :  { %v1627_v55 = vpop.permute.xlu1 %474  ;;  %v1629_v56 = vpop.permute.xlu0 %469 }
  0x96   :  { %1278 = vset.pattern.permute.xlu1 %v1310_v44  ;;  %1284 = vset.pattern.permute.xlu0 %v1309_v43  ;;  %v536_v46 = vmul.f32 %v1668_v3, %v1629_v56 }
  0x97   :  { %859 = vperm.xlu1 %1278, %v1455_v21   ;;  %760 = vperm.xlu0 %1284, %v1518_v32  }
  0x99   :  { %v1635_v57 = vpop.permute.xlu1 %484  ;;  %v1637_v58 = vpop.permute.xlu0 %479 }
  0x9a   :  { %v538_v53 = vmul.f32 %v1668_v3, %v1637_v58 }
  0x9b   :  { %863 = vperm.xlu1 %1278, %v1450_v20   ;;  %1285 = vset.pattern.permute.xlu0 %v1310_v44 }
  0x9d   :  { %v1641_v59 = vpop.permute.xlu1 %494  ;;  %v1643_v60 = vpop.permute.xlu0 %489 }
  0x9f   :  { %1279 = vset.pattern.permute.xlu1 %v1309_v43 }
  0xa0   :  { %740 = vperm.xlu1 %1279, %v1467_v23  }
  0xa1   :  { %v1647_v61 = vpop.permute.xlu1 %504  ;;  %v1649_v62 = vpop.permute.xlu0 %499 }
  0xa4   :  { %744 = vperm.xlu1 %1279, %v1489_v27  }
  0xa5   :  { %v1652_v63 = vpop.permute.xlu1 %514  ;;  %v1654_v0 = vpop.permute.xlu0 %509 }
  0xa8   :  { %1280 = vset.pattern.permute.xlu1 %v1310_v44 }
  0xa9   :  { %871 = vperm.xlu1 %1280, %v1467_v23   ;;  %v1663_v2 = vpop.permute.xlu0 %519 }
  0xaa   :  { %v550_v4 = vpop.permute.xlu1 %549 }
  0xab   :  { %v636_v6 = vmul.f32 %v1660_v1, %v550_v4 }
  0xad   :  { %v1672_v7 = vadd.f32 %v636_v6, %v526_v5  ;;  %875 = vperm.xlu1 %1280, %v1489_v27   ;;  %v532_v27 = vmul.f32 %v1668_v3, %v450_v52  ;;  %v537_v52 = vmul.f32 %v1668_v3, %v1627_v55  ;;  %v540_v55 = vmul.f32 %v1668_v3, %v1643_v60 }
  0xae   :  { %v558_v8 = vpop.permute.xlu1 %557  ;;  %v554_v9 = vpop.permute.xlu0 %553 }
  0xaf   :  { %v638_v12 = vmul.f32 %v1660_v1, %v558_v8  ;;  %v637_v13 = vmul.f32 %v1660_v1, %v554_v9  ;;  %v539_v8 = vmul.f32 %v1668_v3, %v1635_v57 }
  0xb1   :  { %v1679_v14 = vadd.f32 %v638_v12, %v528_v10  ;;  %v1681_v15 = vadd.f32 %v637_v13, %v527_v11  ;;  %1282 = vset.pattern.permute.xlu1 %v1309_v43  ;;  %v541_v13 = vmul.f32 %v1668_v3, %v1641_v59 }
  0xb2   :  { %752 = vperm.xlu1 %1282, %v1507_v31   ;;  %v562_v16 = vpop.permute.xlu1 %561  ;;  %v566_v17 = vpop.permute.xlu0 %565 }
  0xb3   :  { %v639_v20 = vmul.f32 %v1660_v1, %v562_v16  ;;  %v640_v21 = vmul.f32 %v1660_v1, %v566_v17  ;;  %v542_v16 = vmul.f32 %v1668_v3, %v1649_v62 }
  0xb5   :  { %v1689_v22 = vadd.f32 %v639_v20, %v529_v18  ;;  %v1691_v23 = vadd.f32 %v640_v21, %v530_v19  ;;  %v543_v21 = vmul.f32 %v1668_v3, %v1647_v61 }
  0xb6   :  { %756 = vperm.xlu1 %1282, %v1502_v30   ;;  %v570_v24 = vpop.permute.xlu1 %569  ;;  %v574_v25 = vpop.permute.xlu0 %573 }
  0xb7   :  { %v641_v28 = vmul.f32 %v1660_v1, %v570_v24  ;;  %v642_v29 = vmul.f32 %v1660_v1, %v574_v25  ;;  %v544_v24 = vmul.f32 %v1668_v3, %v1654_v0 }
  0xb9   :  { %v1699_v33 = vadd.f32 %v641_v28, %v531_v26  ;;  %v1701_v34 = vadd.f32 %v642_v29, %v532_v27  ;;  %v545_v29 = vmul.f32 %v1668_v3, %v1652_v63 }
  0xba   :  { %1283 = vset.pattern.permute.xlu1 %v1310_v44  ;;  %v578_v35 = vpop.permute.xlu1 %577  ;;  %v582_v36 = vpop.permute.xlu0 %581 }
  0xbb   :  { %v643_v39 = vmul.f32 %v1660_v1, %v578_v35  ;;  %v644_v40 = vmul.f32 %v1660_v1, %v582_v36  ;;  %883 = vperm.xlu1 %1283, %v1507_v31   ;;  %v546_v35 = vmul.f32 %v1668_v3, %v1663_v2 }
  0xbd   :  { %v1711_v41 = vadd.f32 %v643_v39, %v533_v37  ;;  %v1713_v42 = vadd.f32 %v644_v40, %v534_v38 }
  0xbe   :  { %v586_v43 = vpop.permute.xlu1 %585  ;;  %v590_v44 = vpop.permute.xlu0 %589 }
  0xbf   :  { %v645_v47 = vmul.f32 %v1660_v1, %v586_v43  ;;  %v646_v48 = vmul.f32 %v1660_v1, %v590_v44  ;;  %887 = vperm.xlu1 %1283, %v1502_v30  }
  0xc1   :  { %v1722_v49 = vadd.f32 %v645_v47, %v535_v45  ;;  %v1724_v31 = vadd.f32 %v646_v48, %v536_v46 }
  0xc2   :  { %v594_v50 = vpop.permute.xlu1 %593  ;;  %v598_v51 = vpop.permute.xlu0 %597 }
  0xc3   :  { %v647_v54 = vmul.f32 %v1660_v1, %v594_v50  ;;  %v648_v56 = vmul.f32 %v1660_v1, %v598_v51  ;;  %891 = vperm.xlu1 %1283, %v1518_v32   ;;  %v1796_v51 = vld [vmem:[%s1988_s3 + $0x3] ss:$0 sm:$0xff] }
  0xc5   :  { %v1733_v4 = vadd.f32 %v647_v54, %v537_v52  ;;  %v1735_v30 = vadd.f32 %v648_v56, %v538_v53 }
  0xc6   :  { %v602_v5 = vpop.permute.xlu1 %601  ;;  %v606_v6 = vpop.permute.xlu0 %605 }
  0xc7   :  { %v649_v58 = vmul.f32 %v1660_v1, %v602_v5  ;;  %v650_v9 = vmul.f32 %v1660_v1, %v606_v6 }
  0xc9   :  { %v1743_v10 = vadd.f32 %v649_v58, %v539_v8  ;;  %v1745_v11 = vadd.f32 %v650_v9, %v540_v55 }
  0xca   :  { %v610_v32 = vpop.permute.xlu1 %609  ;;  %v614_v12 = vpop.permute.xlu0 %613 }
  0xcb   :  { %v651_v57 = vmul.f32 %v1660_v1, %v610_v32  ;;  %v652_v60 = vmul.f32 %v1660_v1, %v614_v12 }
  0xcd   :  { %v1753_v17 = vadd.f32 %v651_v57, %v541_v13  ;;  %v1755_v18 = vadd.f32 %v652_v60, %v542_v16 }
  0xce   :  { %v618_v19 = vpop.permute.xlu1 %617  ;;  %v622_v20 = vpop.permute.xlu0 %621 }
  0xcf   :  { %v653_v59 = vmul.f32 %v1660_v1, %v618_v19  ;;  %v654_v62 = vmul.f32 %v1660_v1, %v622_v20 }
  0xd1   :  { %v1763_v25 = vadd.f32 %v653_v59, %v543_v21  ;;  %v1765_v26 = vadd.f32 %v654_v62, %v544_v24 }
  0xd2   :  { %v626_v27 = vpop.permute.xlu1 %625  ;;  %v630_v28 = vpop.permute.xlu0 %629 }
  0xd3   :  { %v655_v61 = vmul.f32 %v1660_v1, %v626_v27  ;;  %v656_v0 = vmul.f32 %v1660_v1, %v630_v28  ;;  %v1788_v1 = vld [vmem:[%s1988_s3 + $0x2] ss:$0 sm:$0xff] }
  0xd5   :  { %v1773_v36 = vadd.f32 %v655_v61, %v545_v29  ;;  %v1775_v37 = vadd.f32 %v656_v0, %v546_v35 }
  0xd7   :  { %v681_v38 = vpop.permute.xlu1 %680  ;;  %v816_v39 = vpop.permute.xlu0 %815 }
  0xd8   :  { %v767_v50 = vmul.f32 %v1788_v1, %v681_v38  ;;  %v899_v8 = vmul.f32 %v1796_v51, %v816_v39 }
  0xda   :  { %v788_v56 = vadd.f32 %v767_v50, %v1672_v7 }
  0xdb   :  { %v689_v40 = vpop.permute.xlu1 %688  ;;  %v828_v43 = vpop.permute.xlu0 %827 }
  0xdc   :  { %v769_v13 = vmul.f32 %v1788_v1, %v689_v40 }
  0xde   :  { %v790_v0 = vadd.f32 %v769_v13, %v1679_v14  ;;  %v902_v13 = vmul.f32 %v1796_v51, %v828_v43 }
  0xdf   :  { %v693_v44 = vpop.permute.xlu1 %692  ;;  %v1777_v45 = vpop.permute.xlu0 %835 }
  0xe0   :  { %v770_v62 = vmul.f32 %v1788_v1, %v693_v44 }
  0xe3   :  { %v1779_v46 = vpop.permute.xlu1 %700  ;;  %v1781_v63 = vpop.permute.xlu0 %843 }
  0xe7   :  { %v1783_v2 = vpop.permute.xlu1 %708 }
  0xe8   :  { %v685_v3 = vpop.permute.xlu0 %684 }
  0xe9   :  { %v768_v52 = vmul.f32 %v1788_v1, %v685_v3 }
  0xeb   :  { %v1790_v47 = vpop.permute.xlu1 %716  ;;  %v789_v55 = vadd.f32 %v768_v52, %v1681_v15  ;;  %v791_v52 = vadd.f32 %v770_v62, %v1689_v22  ;;  %v772_v22 = vmul.f32 %v1788_v1, %v1779_v46 }
  0xec   :  { %v697_v48 = vpop.permute.xlu0 %696 }
  0xed   :  { %v920_v19 = vadd.f32 %v899_v8, %v789_v55  ;;  %v771_v14 = vmul.f32 %v1788_v1, %v697_v48 }
  0xef   :  { %v792_v48 = vadd.f32 %v771_v14, %v1691_v23 }
  0xf0   :  { %v812_v53 = vpop.permute.xlu1 %811  ;;  %v1799_v54 = vpop.permute.xlu0 %704 }
  0xf1   :  { %v898_v5 = vmul.f32 %v1796_v51, %v812_v53 }
  0xf3   :  { %v919_v6 = vadd.f32 %v898_v5, %v788_v56 }
  0xf4   :  { %v820_v58 = vpop.permute.xlu1 %819  ;;  %v1805_v9 = vpop.permute.xlu0 %712 }
  0xf5   :  { %v900_v21 = vmul.f32 %v1796_v51, %v820_v58 }
  0xf6   :  { %v203_v32 = vpop.f32.mrb[0].mxu0  ;;  %v1807_v12 = vpop.f32.mrb[0].mxu1 }
  0xf7   :  { %v940_v16 = vmul.f32 %v919_v6, %v203_v32  ;;  %v1205_v57 = vpop.f32.mrb[1].mxu0  ;;  %v1229_v60 = vpop.f32.mrb[1].mxu1  ;;  %v921_v44 = vadd.f32 %v900_v21, %v790_v0  ;;  %v793_v0 = vadd.f32 %v772_v22, %v1699_v33  ;;  %v774_v22 = vmul.f32 %v1788_v1, %v1783_v2 }
  0xf8   :  { %v824_v7 = vpop.permute.xlu1 %823  ;;  %v1810_v20 = vpop.permute.xlu0 %720 }
  0xf9   :  { %v987_v24 = vmul.f32 %v940_v16, %v203_v32  ;;  %v206_v59 = vpop.f32.mrb[2].mxu0  ;;  %v1813_v15 = vpop.f32.mrb[2].mxu1  ;;  %v901_v38 = vmul.f32 %v1796_v51, %v824_v7 }
  0xfa   :  { %v1112_v27 = vpack.c.bf16 %v206_v59, %v203_v32  ;;  %v941_v28 = vmul.f32 %v920_v19, %v206_v59  ;;  %v1206_v29 = vpop.f32.mrb[3].mxu0  ;;  %v1142_v35 = vpack.c.bf16 %v1813_v15, %v1807_v12  ;;  %v1230_v61 = vpop.f32.mrb[3].mxu1 }
  0xfb   :  { %v922_v55 = vadd.f32 %v901_v38, %v791_v52  ;;  %v773_v61 = vmul.f32 %v1788_v1, %v1799_v54  ;;  %v923_v38 = vadd.f32 %v902_v13, %v792_v48 }
  0xfc   :  { %1113 = vst [vmem:[%s1989_s4] sm:$0xff] %v1112_v27   ;;  %v961_v39 = vadd.f32 %v941_v28, %v940_v16  ;;  %v988_v40 = vmul.f32 %v941_v28, %v206_v59  ;;  %v832_v3 = vpop.permute.xlu1 %831  ;;  %v1823_v50 = vpop.permute.xlu0 %724  ;;  %1164 = vst [vmem:[%s1989_s4 + $0x30] sm:$0xff] %v1142_v35  }
  0xfd   :  { %v903_v43 = vmul.f32 %v1796_v51, %v832_v3  ;;  %v794_v54 = vadd.f32 %v773_v61, %v1701_v34  ;;  %v795_v61 = vadd.f32 %v774_v22, %v1711_v41 }
  0xfe   :  { %v1008_v53 = vadd.f32 %v988_v40, %v987_v24  ;;  %v211_v56 = vpop.f32.mrb[4].mxu0 }
  0xff   :  { %v942_v5 = vmul.f32 %v921_v44, %v211_v56  ;;  %v1209_v6 = vpop.f32.mrb[5].mxu0  ;;  %v1830_v8 = vpop.f32.mrb[4].mxu1  ;;  %v924_v44 = vadd.f32 %v903_v43, %v793_v0 }
 0x100   :  { %v840_v58 = vpop.permute.xlu1 %839  ;;  %v737_v32 = vpop.permute.xlu0 %736 }
 0x101   :  { %v962_v16 = vadd.f32 %v961_v39, %v942_v5  ;;  %v989_v57 = vmul.f32 %v942_v5, %v211_v56  ;;  %v214_v60 = vpop.f32.mrb[6].mxu0  ;;  %v1233_v19 = vpop.f32.mrb[5].mxu1  ;;  %v781_v5 = vmul.f32 %v1788_v1, %v737_v32 }
 0x102   :  { %v1117_v7 = vpack.c.bf16 %v214_v60, %v211_v56  ;;  %v943_v21 = vmul.f32 %v922_v55, %v214_v60  ;;  %v1210_v24 = vpop.f32.mrb[7].mxu0  ;;  %v1836_v59 = vpop.f32.mrb[6].mxu1  ;;  %v904_v56 = vmul.f32 %v1796_v51, %v1777_v45 }
 0x103   :  { %v1009_v62 = vadd.f32 %v1008_v53, %v989_v57  ;;  %v1147_v27 = vpack.c.bf16 %v1836_v59, %v1830_v8  ;;  %v1234_v28 = vpop.f32.mrb[7].mxu1  ;;  %v775_v24 = vmul.f32 %v1788_v1, %v1805_v9  ;;  %v802_v43 = vadd.f32 %v781_v5, %v1745_v11 }
 0x104   :  { %1159 = vst [vmem:[%s1989_s4 + $0x8] sm:$0xff] %v1117_v7   ;;  %v963_v29 = vadd.f32 %v962_v16, %v943_v21  ;;  %v990_v46 = vmul.f32 %v943_v21, %v214_v60  ;;  %v1844_v35 = vpop.permute.xlu1 %847  ;;  %v749_v23 = vpop.permute.xlu0 %748  ;;  %v925_v28 = vadd.f32 %v904_v56, %v794_v54 }
 0x105   :  { %1165 = vst [vmem:[%s1989_s4 + $0x38] sm:$0xff] %v1147_v27   ;;  %v784_v0 = vmul.f32 %v1788_v1, %v749_v23 }
 0x106   :  { %v1010_v39 = vadd.f32 %v1009_v62, %v990_v46  ;;  %v905_v62 = vmul.f32 %v1796_v51, %v840_v58  ;;  %v906_v58 = vmul.f32 %v1796_v51, %v1781_v63 }
 0x107   :  { %v219_v40 = vpop.f32.mrb[8].mxu0  ;;  %v1852_v3 = vpop.f32.mrb[8].mxu1 }
 0x108   :  { %v944_v52 = vmul.f32 %v923_v38, %v219_v40  ;;  %v1213_v14 = vpop.f32.mrb[9].mxu0  ;;  %v1854_v53 = vpop.permute.xlu1 %851  ;;  %v926_v56 = vadd.f32 %v905_v62, %v795_v61 }
 0x109   :  { %v222_v6 = vpop.f32.mrb[10].mxu0  ;;  %v1860_v55 = vpop.permute.xlu0 %855  ;;  %v796_v14 = vadd.f32 %v775_v24, %v1713_v42  ;;  %v907_v42 = vmul.f32 %v1796_v51, %v1844_v35 }
 0x10a   :  { %v964_v33 = vadd.f32 %v963_v29, %v944_v52  ;;  %v991_v13 = vmul.f32 %v944_v52, %v219_v40  ;;  %v1122_v16 = vpack.c.bf16 %v222_v6, %v219_v40  ;;  %v945_v57 = vmul.f32 %v924_v44, %v222_v6  ;;  %v1214_v60 = vpop.f32.mrb[11].mxu0  ;;  %v1237_v19 = vpop.f32.mrb[9].mxu1 }
 0x10b   :  { %v1864_v48 = vpop.f32.mrb[10].mxu1  ;;  %v776_v52 = vmul.f32 %v1788_v1, %v1790_v47  ;;  %v927_v62 = vadd.f32 %v906_v58, %v796_v14 }
 0x10c   :  { %v1011_v7 = vadd.f32 %v1010_v39, %v991_v13  ;;  %1160 = vst [vmem:[%s1989_s4 + $0x10] sm:$0xff] %v1122_v16   ;;  %v965_v34 = vadd.f32 %v964_v33, %v945_v57  ;;  %v992_v45 = vmul.f32 %v945_v57, %v222_v6  ;;  %v1152_v32 = vpack.c.bf16 %v1864_v48, %v1852_v3  ;;  %v1238_v21 = vpop.f32.mrb[11].mxu1 }
 0x10d   :  { %v729_v27 = vpop.permute.xlu1 %728  ;;  %v868_v2 = vpop.permute.xlu0 %867  ;;  %v805_v57 = vadd.f32 %v784_v0, %v1763_v25  ;;  %v797_v24 = vadd.f32 %v776_v52, %v1722_v49  ;;  %v777_v49 = vmul.f32 %v1788_v1, %v1810_v20 }
 0x10e   :  { %v1012_v29 = vadd.f32 %v1011_v7, %v992_v45  ;;  %v912_v46 = vmul.f32 %v1796_v51, %v868_v2  ;;  %1166 = vst [vmem:[%s1989_s4 + $0x40] sm:$0xff] %v1152_v32   ;;  %v779_v41 = vmul.f32 %v1788_v1, %v729_v27 }
 0x10f   :  { %v227_v38 = vpop.f32.mrb[12].mxu0  ;;  %v1881_v9 = vpop.f32.mrb[12].mxu1 }
 0x110   :  { %v933_v39 = vadd.f32 %v912_v46, %v802_v43  ;;  %v946_v40 = vmul.f32 %v925_v28, %v227_v38  ;;  %v1217_v11 = vpop.f32.mrb[13].mxu0  ;;  %v1241_v44 = vpop.f32.mrb[13].mxu1  ;;  %v800_v35 = vadd.f32 %v779_v41, %v1735_v30  ;;  %v928_v30 = vadd.f32 %v907_v42, %v797_v24 }
 0x111   :  { %v230_v54 = vpop.f32.mrb[14].mxu0  ;;  %v733_v23 = vpop.permute.xlu1 %732 }
 0x112   :  { %v966_v5 = vadd.f32 %v965_v34, %v946_v40  ;;  %v993_v6 = vmul.f32 %v946_v40, %v227_v38  ;;  %v1890_v33 = vmul.f32 %v933_v39, %v1830_v8  ;;  %v1127_v63 = vpack.c.bf16 %v230_v54, %v227_v38  ;;  %v880_v13 = vpop.permute.xlu0 %879  ;;  %v1218_v16 = vpop.f32.mrb[15].mxu0 }
 0x113   :  { %v947_v60 = vmul.f32 %v926_v56, %v230_v54  ;;  %v915_v47 = vmul.f32 %v1796_v51, %v880_v13  ;;  %v1894_v19 = vpop.f32.mrb[14].mxu1  ;;  %v780_v2 = vmul.f32 %v1788_v1, %v733_v23  ;;  %v908_v39 = vmul.f32 %v1796_v51, %v1854_v53 }
 0x114   :  { %v1013_v22 = vadd.f32 %v1012_v29, %v993_v6  ;;  %v1900_v7 = vmul.f32 %v1890_v33, %v1830_v8  ;;  %1161 = vst [vmem:[%s1989_s4 + $0x18] sm:$0xff] %v1127_v63   ;;  %v1157_v25 = vpack.c.bf16 %v1894_v19, %v1881_v9  ;;  %v1242_v34 = vpop.f32.mrb[15].mxu1  ;;  %v778_v53 = vmul.f32 %v1788_v1, %v1823_v50 }
 0x115   :  { %v967_v45 = vadd.f32 %v966_v5, %v947_v60  ;;  %v994_v32 = vmul.f32 %v947_v60, %v230_v54  ;;  %v936_v21 = vadd.f32 %v915_v47, %v805_v57  ;;  %v801_v5 = vadd.f32 %v780_v2, %v1743_v10 }
 0x116   :  { %v860_v27 = vpop.permute.xlu1 %859  ;;  %1167 = vst [vmem:[%s1989_s4 + $0x48] sm:$0xff] %v1157_v25   ;;  %v798_v13 = vadd.f32 %v777_v49, %v1724_v31  ;;  %v909_v47 = vmul.f32 %v1796_v51, %v1860_v55  ;;  %v799_v25 = vadd.f32 %v778_v53, %v1733_v4 }
 0x117   :  { %v1014_v8 = vadd.f32 %v1013_v22, %v994_v32  ;;  %v1914_v28 = vmul.f32 %v936_v21, %v1864_v48  ;;  %v910_v43 = vmul.f32 %v1796_v51, %v860_v27  ;;  %v235_v29 = vpop.f32.mrb[16].mxu0  ;;  %v1917_v46 = vpop.f32.mrb[16].mxu1 }
 0x118   :  { %v948_v61 = vmul.f32 %v927_v62, %v235_v29  ;;  %v1221_v0 = vpop.f32.mrb[17].mxu0  ;;  %v1108_v38 = vpack.c.bf16 %v1917_v46, %v1917_v46  ;;  %v1245_v58 = vpop.f32.mrb[17].mxu1  ;;  %v929_v42 = vadd.f32 %v908_v39, %v798_v13  ;;  %v930_v24 = vadd.f32 %v909_v47, %v799_v25 }
 0x119   :  { %v1927_v40 = vmul.f32 %v1914_v28, %v1864_v48  ;;  %v931_v11 = vadd.f32 %v910_v43, %v800_v35  ;;  %v238_v44 = vpop.f32.mrb[18].mxu0  ;;  %v286_v52 = vpop.f32.mrb[18].mxu1 }
 0x11a   :  { %v968_v14 = vadd.f32 %v967_v45, %v948_v61  ;;  %v995_v56 = vmul.f32 %v948_v61, %v235_v29  ;;  %v1132_v20 = vpack.c.bf16 %v238_v44, %v235_v29  ;;  %v949_v41 = vmul.f32 %v928_v30, %v238_v44  ;;  %v864_v54 = vpop.permute.xlu1 %863  ;;  %v1222_v23 = vpop.f32.mrb[19].mxu0  ;;  %394 = vst [vmem:[%s1989_s4 + $0x50] sm:$0xf] %v1108_v38 }
 0x11b   :  { %v952_v48 = vmul.f32 %v931_v11, %v1807_v12  ;;  %v911_v6 = vmul.f32 %v1796_v51, %v864_v54  ;;  %v1246_v63 = vpop.f32.mrb[19].mxu1 }
 0x11c   :  { %v1015_v16 = vadd.f32 %v1014_v8, %v995_v56  ;;  %1162 = vst [vmem:[%s1989_s4 + $0x20] sm:$0xff] %v1132_v20   ;;  %v969_v57 = vadd.f32 %v968_v14, %v949_v41  ;;  %v996_v60 = vmul.f32 %v949_v41, %v238_v44 }
 0x11d   :  { %v999_v50 = vmul.f32 %v952_v48, %v1807_v12  ;;  %v932_v10 = vadd.f32 %v911_v6, %v801_v5 }
 0x11e   :  { %v1016_v22 = vadd.f32 %v1015_v16, %v996_v60 }
 0x11f   :  { %v953_v34 = vmul.f32 %v932_v10, %v1813_v15  ;;  %v243_v31 = vpop.f32.mrb[20].mxu0  ;;  %v741_v45 = vpop.permute.xlu1 %740 }
 0x120   :  { %v950_v32 = vmul.f32 %v929_v42, %v243_v31  ;;  %v1225_v21 = vpop.f32.mrb[21].mxu0  ;;  %v782_v49 = vmul.f32 %v1788_v1, %v741_v45 }
 0x121   :  { %v1000_v62 = vmul.f32 %v953_v34, %v1813_v15  ;;  %v246_v35 = vpop.f32.mrb[22].mxu0 }
 0x122   :  { %v970_v27 = vadd.f32 %v969_v57, %v950_v32  ;;  %v997_v8 = vmul.f32 %v950_v32, %v243_v31  ;;  %v1137_v55 = vpack.c.bf16 %v246_v35, %v243_v31  ;;  %v1226_v2 = vpop.f32.mrb[23].mxu0  ;;  %v951_v12 = vmul.f32 %v930_v24, %v246_v35 }
 0x123   :  { %v745_v43 = vpop.permute.xlu1 %744  ;;  %v803_v15 = vadd.f32 %v782_v49, %v1753_v17 }
 0x124   :  { %v1017_v29 = vadd.f32 %v1016_v22, %v997_v8  ;;  %1163 = vst [vmem:[%s1989_s4 + $0x28] sm:$0xff] %v1137_v55   ;;  %v971_v4 = vadd.f32 %v970_v27, %v951_v12  ;;  %v998_v30 = vmul.f32 %v951_v12, %v246_v35  ;;  %v783_v11 = vmul.f32 %v1788_v1, %v745_v43  ;;  %v761_v22 = vpop.permute.xlu0 %760 }
 0x126   :  { %v972_v61 = vadd.f32 %v971_v4, %v952_v48  ;;  %v1018_v0 = vadd.f32 %v1017_v29, %v998_v30  ;;  %v804_v41 = vadd.f32 %v783_v11, %v1755_v18 }
 0x128   :  { %v872_v38 = vpop.permute.xlu1 %871  ;;  %v973_v58 = vadd.f32 %v972_v61, %v953_v34  ;;  %v1019_v39 = vadd.f32 %v1018_v0, %v999_v50 }
 0x129   :  { %v913_v44 = vmul.f32 %v1796_v51, %v872_v38 }
 0x12a   :  { %v1020_v52 = vadd.f32 %v1019_v39, %v1000_v62  ;;  %v974_v56 = vadd.f32 %v973_v58, %v1890_v33 }
 0x12b   :  { %v934_v14 = vadd.f32 %v913_v44, %v803_v15 }
 0x12c   :  { %v876_v20 = vpop.permute.xlu1 %875  ;;  %v1021_v23 = vadd.f32 %v1020_v52, %v1900_v7 }
 0x12d   :  { %v955_v54 = vmul.f32 %v934_v14, %v1836_v59  ;;  %v914_v17 = vmul.f32 %v1796_v51, %v876_v20 }
 0x12f   :  { %v975_v53 = vadd.f32 %v974_v56, %v955_v54  ;;  %v1002_v5 = vmul.f32 %v955_v54, %v1836_v59  ;;  %v935_v48 = vadd.f32 %v914_v17, %v804_v41 }
 0x131   :  { %v1022_v6 = vadd.f32 %v1021_v23, %v1002_v5  ;;  %v956_v63 = vmul.f32 %v935_v48, %v1852_v3  ;;  %v753_v13 = vpop.permute.xlu1 %752 }
 0x132   :  { %v785_v47 = vmul.f32 %v1788_v1, %v753_v13 }
 0x133   :  { %v976_v16 = vadd.f32 %v975_v53, %v956_v63  ;;  %v1003_v33 = vmul.f32 %v956_v63, %v1852_v3  ;;  %v787_v3 = vmul.f32 %v1788_v1, %v761_v22 }
 0x134   :  { %v806_v10 = vadd.f32 %v785_v47, %v1765_v26 }
 0x135   :  { %v1023_v57 = vadd.f32 %v1022_v6, %v1003_v33  ;;  %v757_v60 = vpop.permute.xlu1 %756  ;;  %v977_v18 = vadd.f32 %v976_v16, %v1914_v28  ;;  %v808_v24 = vadd.f32 %v787_v3, %v1775_v37 }
 0x136   :  { %v786_v59 = vmul.f32 %v1788_v1, %v757_v60 }
 0x137   :  { %v1024_v7 = vadd.f32 %v1023_v57, %v1927_v40 }
 0x138   :  { %v807_v31 = vadd.f32 %v786_v59, %v1773_v36 }
 0x13a   :  { %v884_v50 = vpop.permute.xlu1 %883 }
 0x13b   :  { %v916_v42 = vmul.f32 %v1796_v51, %v884_v50 }
 0x13d   :  { %v937_v25 = vadd.f32 %v916_v42, %v806_v10 }
 0x13e   :  { %v888_v34 = vpop.permute.xlu1 %887 }
 0x13f   :  { %v958_v28 = vmul.f32 %v937_v25, %v1881_v9  ;;  %v917_v45 = vmul.f32 %v1796_v51, %v888_v34 }
 0x141   :  { %v978_v32 = vadd.f32 %v977_v18, %v958_v28  ;;  %v1005_v40 = vmul.f32 %v958_v28, %v1881_v9  ;;  %v938_v21 = vadd.f32 %v917_v45, %v807_v31 }
 0x142   :  { %v892_v26 = vpop.permute.xlu1 %891 }
 0x143   :  { %v1025_v62 = vadd.f32 %v1024_v7, %v1005_v40  ;;  %v959_v35 = vmul.f32 %v938_v21, %v1894_v19  ;;  %v918_v27 = vmul.f32 %v1796_v51, %v892_v26 }
 0x145   :  { %v979_v8 = vadd.f32 %v978_v32, %v959_v35  ;;  %v1006_v1 = vmul.f32 %v959_v35, %v1894_v19  ;;  %v939_v36 = vadd.f32 %v918_v27, %v808_v24 }
 0x147   :  { %v960_v55 = vmul.f32 %v939_v36, %v1917_v46  ;;  %v1026_v2 = vadd.f32 %v1025_v62, %v1006_v1 }
 0x149   :  { %v980_v12 = vadd.f32 %v979_v8, %v960_v55  ;;  %v1007_v43 = vmul.f32 %v960_v55, %v1917_v46 }
 0x14b   :  { %v981_v9 = vrot.slane %v980_v12, 4  ;;  %v1027_v29 = vadd.f32 %v1026_v2, %v1007_v43 }
 0x14d   :  { %v982_v49 = vadd.f32 %v981_v9, %v980_v12  ;;  %v1028_v4 = vrot.slane %v1027_v29, 4 }
 0x14f   :  { %v983_v37 = vrot.slane %v982_v49, 2  ;;  %v1029_v30 = vadd.f32 %v1028_v4, %v1027_v29 }
 0x151   :  { %v984_v61 = vadd.f32 %v983_v37, %v982_v49  ;;  %v1030_v0 = vrot.slane %v1029_v30, 2 }
 0x153   :  { %v985_v15 = vrot.slane %v984_v61, 1  ;;  %v1031_v51 = vadd.f32 %v1030_v0, %v1029_v30 }
 0x155   :  { %v986_v38 = vadd.f32 %v985_v15, %v984_v61  ;;  %v1032_v58 = vrot.slane %v1031_v51, 1 }
 0x157   :  { %v1033_v19 = vadd.f32 %v1032_v58, %v1031_v51  ;;  %1034 = vst [vmem:[%s1990_s5] sm:$0xff] %v986_v38 }
 0x159   :  { %1035 = vst [vmem:[%s1990_s5 + $0x8] sm:$0xff] %v1033_v19 }

// kernel: generator_forward.15
= control target key start
LH: loop header
LB: loop body
LE: loop exit
PB: predicated region body
PF: predicated region fallthrough
CT: control target
= control target key end

     0   :  { %v4008_v0 = vmov 0   ;;  %vm4011_vm0 = vmmov 0   ;;  %s7183_s2 = inlined_call_operand.vmem [shape: f32[584,8], index: 2, kind: input, shape index: {}]   ;;  %s7184_s1 = inlined_call_operand.vmem [shape: bf16[128,128], index: 1, kind: input, shape index: {}]   ;;  %s7185_s0 = inlined_call_operand.vmem [shape: bf16[584,128], index: 0, kind: input, shape index: {}]   ;;  %s7186_s4 = inlined_call_operand.vmem [shape: bf16[584,128], index: 4, kind: output, shape index: {0}]   ;;  %s7187_s3 = inlined_call_operand.vmem [shape: f32[8,128], index: 3, kind: input, shape index: {}]   ;;  %s7188_s5 = inlined_call_operand.vmem [shape: f32[8,256], index: 5, kind: output, shape index: {1}]  }
   0x1   :  { %3870 = vset.pattern.permute.xlu1 %v4008_v0  ;;  %3869 = vset.pattern.permute.xlu0 %v4008_v0  ;;  %v4047_v1 = vld [vmem:[%s7183_s2 + $0x10] sm:$0xff]  ;;  %v4052_v2 = vld [vmem:[%s7183_s2] sm:$0xff]  ;;  %v4059_v3 = vld [vmem:[%s7183_s2 + $0x18] sm:$0xff] }
   0x2   :  { %1157 = vperm.xlu1 %3870, %v4047_v1   ;;  %1147 = vperm.xlu0 %3869, %v4052_v2   ;;  %v4064_v4 = vld [vmem:[%s7183_s2 + $0x8] sm:$0xff]  ;;  %v4076_v6 = vld [vmem:[%s7183_s2 + $0x20] sm:$0xff]  ;;  %v4083_v7 = vld [vmem:[%s7183_s2 + $0x38] sm:$0xff] }
   0x3   :  { %v4071_v5 = vld [vmem:[%s7183_s2 + $0x28] sm:$0xff]  ;;  %v4088_v8 = vld [vmem:[%s7183_s2 + $0x30] sm:$0xff]  ;;  %v4100_v10 = vld [vmem:[%s7183_s2 + $0x40] sm:$0xff] }
   0x4   :  { %v4095_v9 = vld [vmem:[%s7183_s2 + $0x48] sm:$0xff]  ;;  %v4107_v11 = vld [vmem:[%s7183_s2 + $0x58] sm:$0xff]  ;;  %v4112_v12 = vld [vmem:[%s7183_s2 + $0x50] sm:$0xff] }
   0x5   :  { %v4119_v13 = vld [vmem:[%s7183_s2 + $0x68] sm:$0xff]  ;;  %v4124_v14 = vld [vmem:[%s7183_s2 + $0x60] sm:$0xff]  ;;  %v4131_v15 = vld [vmem:[%s7183_s2 + $0x78] sm:$0xff] }
   0x6   :  { %1162 = vperm.xlu1 %3870, %v4059_v3   ;;  %1152 = vperm.xlu0 %3869, %v4064_v4   ;;  %v4136_v16 = vld [vmem:[%s7183_s2 + $0x70] sm:$0xff]  ;;  %v4143_v17 = vld [vmem:[%s7183_s2 + $0x88] sm:$0xff]  ;;  %v4148_v18 = vld [vmem:[%s7183_s2 + $0x80] sm:$0xff] }
   0x7   :  { %v4155_v19 = vld [vmem:[%s7183_s2 + $0x98] sm:$0xff]  ;;  %v4160_v20 = vld [vmem:[%s7183_s2 + $0x90] sm:$0xff]  ;;  %v4167_v21 = vld [vmem:[%s7183_s2 + $0xa8] sm:$0xff] }
   0x8   :  { %v4172_v22 = vld [vmem:[%s7183_s2 + $0xa0] sm:$0xff]  ;;  %v4179_v23 = vld [vmem:[%s7183_s2 + $0xb8] sm:$0xff]  ;;  %v4184_v24 = vld [vmem:[%s7183_s2 + $0xb0] sm:$0xff] }
   0x9   :  { %v4191_v25 = vld [vmem:[%s7183_s2 + $0xc8] sm:$0xff]  ;;  %v4196_v26 = vld [vmem:[%s7183_s2 + $0xc0] sm:$0xff]  ;;  %v4203_v27 = vld [vmem:[%s7183_s2 + $0xd8] sm:$0xff] }
   0xa   :  { %1172 = vperm.xlu1 %3870, %v4071_v5   ;;  %1167 = vperm.xlu0 %3869, %v4076_v6   ;;  %v4208_v28 = vld [vmem:[%s7183_s2 + $0xd0] sm:$0xff]  ;;  %v4215_v29 = vld [vmem:[%s7183_s2 + $0xe8] sm:$0xff]  ;;  %v4220_v30 = vld [vmem:[%s7183_s2 + $0xe0] sm:$0xff] }
   0xb   :  { %v4227_v31 = vld [vmem:[%s7183_s2 + $0xf8] sm:$0xff]  ;;  %v4232_v32 = vld [vmem:[%s7183_s2 + $0xf0] sm:$0xff]  ;;  %v4239_v33 = vld [vmem:[%s7183_s2 + $0x108] sm:$0xff] }
   0xc   :  { %v4244_v34 = vld [vmem:[%s7183_s2 + $0x100] sm:$0xff]  ;;  %v4251_v35 = vld [vmem:[%s7183_s2 + $0x118] sm:$0xff]  ;;  %v4256_v36 = vld [vmem:[%s7183_s2 + $0x110] sm:$0xff] }
   0xd   :  { %v4263_v37 = vld [vmem:[%s7183_s2 + $0x128] sm:$0xff]  ;;  %v4268_v38 = vld [vmem:[%s7183_s2 + $0x120] sm:$0xff]  ;;  %v4275_v39 = vld [vmem:[%s7183_s2 + $0x138] sm:$0xff] }
   0xe   :  { %1182 = vperm.xlu1 %3870, %v4083_v7   ;;  %1177 = vperm.xlu0 %3869, %v4088_v8   ;;  %v4280_v40 = vld [vmem:[%s7183_s2 + $0x130] sm:$0xff]  ;;  %v4287_v41 = vld [vmem:[%s7183_s2 + $0x148] sm:$0xff]  ;;  %v4292_v42 = vld [vmem:[%s7183_s2 + $0x140] sm:$0xff] }
   0xf   :  { %v4299_v43 = vld [vmem:[%s7183_s2 + $0x158] sm:$0xff]  ;;  %v4304_v44 = vld [vmem:[%s7183_s2 + $0x150] sm:$0xff]  ;;  %v4311_v45 = vld [vmem:[%s7183_s2 + $0x168] sm:$0xff] }
  0x10   :  { %v4316_v46 = vld [vmem:[%s7183_s2 + $0x160] sm:$0xff]  ;;  %v4323_v47 = vld [vmem:[%s7183_s2 + $0x178] sm:$0xff]  ;;  %v4328_v48 = vld [vmem:[%s7183_s2 + $0x170] sm:$0xff] }
  0x11   :  { %v4335_v49 = vld [vmem:[%s7183_s2 + $0x188] sm:$0xff]  ;;  %v4340_v50 = vld [vmem:[%s7183_s2 + $0x180] sm:$0xff]  ;;  %v4347_v51 = vld [vmem:[%s7183_s2 + $0x198] sm:$0xff] }
  0x12   :  { %1192 = vperm.xlu1 %3870, %v4095_v9   ;;  %1187 = vperm.xlu0 %3869, %v4100_v10   ;;  %v4352_v52 = vld [vmem:[%s7183_s2 + $0x190] sm:$0xff]  ;;  %v4359_v53 = vld [vmem:[%s7183_s2 + $0x1a8] sm:$0xff]  ;;  %v4364_v54 = vld [vmem:[%s7183_s2 + $0x1a0] sm:$0xff] }
  0x13   :  { %v4371_v55 = vld [vmem:[%s7183_s2 + $0x1b8] sm:$0xff]  ;;  %v4376_v56 = vld [vmem:[%s7183_s2 + $0x1b0] sm:$0xff]  ;;  %v4383_v57 = vld [vmem:[%s7183_s2 + $0x1c8] sm:$0xff] }
  0x14   :  { %7372 = vst [vmem:[#allocation2_spill] sm:$0xff] %v4371_v55  ;;  %7373 = vst [vmem:[#allocation3_spill] sm:$0xff] %v4383_v57  ;;  %v4388_v58 = vld [vmem:[%s7183_s2 + $0x1c0] sm:$0xff]  ;;  %v4395_v59 = vld [vmem:[%s7183_s2 + $0x1d8] sm:$0xff] }
  0x15   :  { %7374 = vst [vmem:[#allocation4_spill] sm:$0xff] %v4388_v58  ;;  %7375 = vst [vmem:[#allocation5_spill] sm:$0xff] %v4395_v59  ;;  %v4400_v60 = vld [vmem:[%s7183_s2 + $0x1d0] sm:$0xff]  ;;  %v4407_v61 = vld [vmem:[%s7183_s2 + $0x1e8] sm:$0xff] }
  0x16   :  { %1202 = vperm.xlu1 %3870, %v4107_v11   ;;  %1197 = vperm.xlu0 %3869, %v4112_v12   ;;  %7376 = vst [vmem:[#allocation6_spill] sm:$0xff] %v4400_v60  ;;  %7377 = vst [vmem:[#allocation7_spill] sm:$0xff] %v4407_v61  ;;  %v4412_v62 = vld [vmem:[%s7183_s2 + $0x1e0] sm:$0xff]  ;;  %v4419_v63 = vld [vmem:[%s7183_s2 + $0x1f8] sm:$0xff] }
  0x17   :  { %7378 = vst [vmem:[#allocation8_spill] sm:$0xff] %v4412_v62  ;;  %7379 = vst [vmem:[#allocation9_spill] sm:$0xff] %v4419_v63  ;;  %v4424_v0 = vld [vmem:[%s7183_s2 + $0x1f0] sm:$0xff] }
  0x18   :  { %7380 = vst [vmem:[#allocation10_spill] sm:$0xff] %v4424_v0 }
  0x1a   :  { %1212 = vperm.xlu1 %3870, %v4119_v13   ;;  %1207 = vperm.xlu0 %3869, %v4124_v14  }
  0x1e   :  { %1222 = vperm.xlu1 %3870, %v4131_v15   ;;  %1217 = vperm.xlu0 %3869, %v4136_v16  }
  0x22   :  { %1232 = vperm.xlu1 %3870, %v4143_v17   ;;  %1227 = vperm.xlu0 %3869, %v4148_v18  }
  0x26   :  { %1242 = vperm.xlu1 %3870, %v4155_v19   ;;  %1237 = vperm.xlu0 %3869, %v4160_v20  }
  0x2a   :  { %1252 = vperm.xlu1 %3870, %v4167_v21   ;;  %1247 = vperm.xlu0 %3869, %v4172_v22  }
  0x2e   :  { %1262 = vperm.xlu1 %3870, %v4179_v23   ;;  %1257 = vperm.xlu0 %3869, %v4184_v24  }
  0x32   :  { %1272 = vperm.xlu1 %3870, %v4191_v25   ;;  %1267 = vperm.xlu0 %3869, %v4196_v26  }
  0x36   :  { %1282 = vperm.xlu1 %3870, %v4203_v27   ;;  %1277 = vperm.xlu0 %3869, %v4208_v28  }
  0x3a   :  { %1292 = vperm.xlu1 %3870, %v4215_v29   ;;  %1287 = vperm.xlu0 %3869, %v4220_v30  }
  0x3e   :  { %1302 = vperm.xlu1 %3870, %v4227_v31   ;;  %1297 = vperm.xlu0 %3869, %v4232_v32  }
  0x42   :  { %1312 = vperm.xlu1 %3870, %v4239_v33   ;;  %1307 = vperm.xlu0 %3869, %v4244_v34  }
  0x46   :  { %1322 = vperm.xlu1 %3870, %v4251_v35   ;;  %1317 = vperm.xlu0 %3869, %v4256_v36  }
  0x4a   :  { %1332 = vperm.xlu1 %3870, %v4263_v37   ;;  %1327 = vperm.xlu0 %3869, %v4268_v38  }
  0x4e   :  { %1342 = vperm.xlu1 %3870, %v4275_v39   ;;  %1337 = vperm.xlu0 %3869, %v4280_v40  }
  0x52   :  { %1352 = vperm.xlu1 %3870, %v4287_v41   ;;  %1347 = vperm.xlu0 %3869, %v4292_v42  }
  0x56   :  { %1362 = vperm.xlu1 %3870, %v4299_v43   ;;  %1357 = vperm.xlu0 %3869, %v4304_v44  }
  0x5a   :  { %1372 = vperm.xlu1 %3870, %v4311_v45   ;;  %1367 = vperm.xlu0 %3869, %v4316_v46  }
  0x5e   :  { %1382 = vperm.xlu1 %3870, %v4323_v47   ;;  %1377 = vperm.xlu0 %3869, %v4328_v48  }
  0x62   :  { %1392 = vperm.xlu1 %3870, %v4335_v49   ;;  %1387 = vperm.xlu0 %3869, %v4340_v50  }
  0x66   :  { %1402 = vperm.xlu1 %3870, %v4347_v51   ;;  %1397 = vperm.xlu0 %3869, %v4352_v52  }
  0x6a   :  { %1412 = vperm.xlu1 %3870, %v4359_v53   ;;  %1407 = vperm.xlu0 %3869, %v4364_v54  }
  0x6e   :  { %1422 = vperm.xlu1 %3870, %v4371_v55   ;;  %1417 = vperm.xlu0 %3869, %v4376_v56  }
  0x72   :  { %1432 = vperm.xlu1 %3870, %v4383_v57   ;;  %1427 = vperm.xlu0 %3869, %v4388_v58   ;;  %v3878_v57 = vld [vmem:[%s7184_s1 + $0x8] sm:$0xff]  }
  0x76   :  { %1442 = vperm.xlu1 %3870, %v4395_v59   ;;  %1437 = vperm.xlu0 %3869, %v4400_v60   ;;  %v7206_v59 = vmov 0.0   ;;  %v3877_v60 = vld [vmem:[%s7184_s1] sm:$0xff]  }
  0x77   :  { %3683 = vmatprep.subr.bf16.mxu0 %v7206_v59  ;;  %3847 = vmatprep.subr.bf16.mxu1 %v7206_v59 }
  0x78   :  { %3684 = vmatpush3.bf16.msra.mxu0 %v3877_v60  ;;  %3855 = vmatpush3.bf16.msra.mxu1 %v3877_v60  ;;  %v4457_v60 = vld [vmem:[%s7183_s2 + $0x218] sm:$0xff] }
  0x79   :  { %3685 = vmatprep.subr.bf16.mxu0 %v7206_v59  ;;  %3848 = vmatprep.subr.bf16.mxu1 %v7206_v59  ;;  %7385 = vst [vmem:[#allocation15_spill] sm:$0xff] %v4457_v60 }
  0x7a   :  { %1452 = vperm.xlu1 %3870, %v4407_v61   ;;  %1447 = vperm.xlu0 %3869, %v4412_v62   ;;  %v4434_v61 = vld [vmem:[%s7183_s2 + $0x208] sm:$0xff]  ;;  %v4439_v62 = vld [vmem:[%s7183_s2 + $0x200] sm:$0xff] }
  0x7b   :  { %7381 = vst [vmem:[#allocation11_spill] sm:$0xff] %v4434_v61  ;;  %7382 = vst [vmem:[#allocation12_spill] sm:$0xff] %v4439_v62  ;;  %3699 = vmatprep.mubr.msk.bf16.mxu0 %vm4011_vm0, %v7206_v59  ;;  %3775 = vmatprep.mubr.msk.bf16.mxu1 %vm4011_vm0, %v7206_v59 }
  0x7c   :  { %3686 = vmatpush3.bf16.msra.mxu0 %v3878_v57  ;;  %3856 = vmatpush3.bf16.msra.mxu1 %v3878_v57  ;;  %v4478_v57 = vld [vmem:[%s7183_s2 + $0x228] sm:$0xff] }
  0x7d   :  { %3687 = vmatprep.subr.bf16.mxu0 %v7206_v59  ;;  %3849 = vmatprep.subr.bf16.mxu1 %v7206_v59  ;;  %7389 = vst [vmem:[#allocation19_spill] sm:$0xff] %v4478_v57 }
  0x7e   :  { %1462 = vperm.xlu1 %3870, %v4419_v63   ;;  %1457 = vperm.xlu0 %3869, %v4424_v0   ;;  %v4462_v63 = vld [vmem:[%s7183_s2 + $0x210] sm:$0xff] }
  0x7f   :  { %7386 = vst [vmem:[#allocation16_spill] sm:$0xff] %v4462_v63 }
  0x81   :  { %v4448_v58 = vpop.permute.xlu1 %1157  ;;  %v4450_v55 = vpop.permute.xlu0 %1147 }
  0x82   :  { %7383 = vst [vmem:[#allocation13_spill] sm:$0xff] %v4448_v58  ;;  %7384 = vst [vmem:[#allocation14_spill] sm:$0xff] %v4450_v55  ;;  %1472 = vperm.xlu1 %3870, %v4434_v61   ;;  %1467 = vperm.xlu0 %3869, %v4439_v62   ;;  %v3879_v55 = vld [vmem:[%s7184_s1 + $0x10] sm:$0xff]   ;;  %v4483_v62 = vld [vmem:[%s7183_s2 + $0x220] sm:$0xff] }
  0x83   :  { %7390 = vst [vmem:[#allocation20_spill] sm:$0xff] %v4483_v62  ;;  %3688 = vmatpush3.bf16.msra.mxu0 %v3879_v55  ;;  %3857 = vmatpush3.bf16.msra.mxu1 %v3879_v55  ;;  %v4499_v55 = vld [vmem:[%s7183_s2 + $0x238] sm:$0xff] }
  0x84   :  { %3689 = vmatprep.subr.bf16.mxu0 %v7206_v59  ;;  %3850 = vmatprep.subr.bf16.mxu1 %v7206_v59  ;;  %7393 = vst [vmem:[#allocation23_spill] sm:$0xff] %v4499_v55 }
  0x85   :  { %v4469_v58 = vpop.permute.xlu1 %1162  ;;  %v4471_v61 = vpop.permute.xlu0 %1152 }
  0x86   :  { %7387 = vst [vmem:[#allocation17_spill] sm:$0xff] %v4469_v58  ;;  %7388 = vst [vmem:[#allocation18_spill] sm:$0xff] %v4471_v61  ;;  %1482 = vperm.xlu1 %3870, %v4457_v60   ;;  %1477 = vperm.xlu0 %3869, %v4462_v63   ;;  %v3880_v61 = vld [vmem:[%s7184_s1 + $0x18] sm:$0xff]   ;;  %v4504_v63 = vld [vmem:[%s7183_s2 + $0x230] sm:$0xff] }
  0x87   :  { %7394 = vst [vmem:[#allocation24_spill] sm:$0xff] %v4504_v63  ;;  %3690 = vmatpush3.bf16.msra.mxu0 %v3880_v61  ;;  %3858 = vmatpush3.bf16.msra.mxu1 %v3880_v61  ;;  %v4520_v61 = vld [vmem:[%s7183_s2 + $0x240] sm:$0xff] }
  0x88   :  { %3691 = vmatprep.subr.bf16.mxu0 %v7206_v59  ;;  %3851 = vmatprep.subr.bf16.mxu1 %v7206_v59 }
  0x89   :  { %v4490_v58 = vpop.permute.xlu1 %1172  ;;  %v4492_v60 = vpop.permute.xlu0 %1167 }
  0x8a   :  { %7391 = vst [vmem:[#allocation21_spill] sm:$0xff] %v4490_v58  ;;  %7392 = vst [vmem:[#allocation22_spill] sm:$0xff] %v4492_v60  ;;  %1492 = vperm.xlu1 %3870, %v4478_v57   ;;  %1487 = vperm.xlu0 %3869, %v4483_v62   ;;  %v3881_v60 = vld [vmem:[%s7184_s1 + $0x20] sm:$0xff]   ;;  %v3882_v62 = vld [vmem:[%s7184_s1 + $0x28] sm:$0xff]  }
  0x8b   :  { %3692 = vmatpush3.bf16.msra.mxu0 %v3881_v60  ;;  %3859 = vmatpush3.bf16.msra.mxu1 %v3881_v60  ;;  %v3883_v60 = vld [vmem:[%s7184_s1 + $0x30] sm:$0xff]  }
  0x8c   :  { %3693 = vmatprep.subr.bf16.mxu0 %v7206_v59  ;;  %3852 = vmatprep.subr.bf16.mxu1 %v7206_v59 }
  0x8d   :  { %v4511_v58 = vpop.permute.xlu1 %1182  ;;  %v4513_v57 = vpop.permute.xlu0 %1177 }
  0x8e   :  { %7395 = vst [vmem:[#allocation25_spill] sm:$0xff] %v4511_v58  ;;  %7396 = vst [vmem:[#allocation26_spill] sm:$0xff] %v4513_v57  ;;  %1502 = vperm.xlu1 %3870, %v4499_v55   ;;  %1497 = vperm.xlu0 %3869, %v4504_v63   ;;  %v4010_v55 = vmov 1  }
  0x8f   :  { %3694 = vmatpush3.bf16.msra.mxu0 %v3882_v62  ;;  %3860 = vmatpush3.bf16.msra.mxu1 %v3882_v62 }
  0x90   :  { %3695 = vmatprep.subr.bf16.mxu0 %v7206_v59  ;;  %3853 = vmatprep.subr.bf16.mxu1 %v7206_v59 }
  0x91   :  { %v4527_v57 = vpop.permute.xlu1 %1192  ;;  %v4529_v58 = vpop.permute.xlu0 %1187 }
  0x92   :  { %7397 = vst [vmem:[#allocation27_spill] sm:$0xff] %v4529_v58  ;;  %3871 = vset.pattern.permute.xlu1 %v4010_v55  ;;  %1507 = vperm.xlu0 %3869, %v4520_v61  }
  0x93   :  { %1589 = vperm.xlu1 %3871, %v4052_v2   ;;  %3696 = vmatpush3.bf16.msra.mxu0 %v3883_v60  ;;  %v3884_v2 = vld [vmem:[%s7184_s1 + $0x38] sm:$0xff]  }
  0x94   :  { %3861 = vmatpush3.bf16.msra.mxu1 %v3883_v60  ;;  %3697 = vmatprep.subr.bf16.mxu0 %v7206_v59  ;;  %v3886_v60 = vld [vmem:[%s7185_s0 + $0x8] sm:$0xff]  }
  0x95   :  { %v4537_v63 = vpop.permute.xlu1 %1202  ;;  %v4539_v0 = vpop.permute.xlu0 %1197  ;;  %3854 = vmatprep.subr.bf16.mxu1 %v7206_v59 }
  0x96   :  { %3872 = vset.pattern.permute.xlu0 %v4010_v55 }
  0x97   :  { %1597 = vperm.xlu1 %3871, %v4047_v1   ;;  %1593 = vperm.xlu0 %3872, %v4064_v4   ;;  %v3885_v1 = vld [vmem:[%s7185_s0] sm:$0xff]  }
  0x98   :  { %3698 = vmatpush3.bf16.msra.mxu0 %v3884_v2  ;;  %3862 = vmatpush3.bf16.msra.mxu1 %v3884_v2 }
  0x99   :  { %v4547_v58 = vpop.permute.xlu1 %1212  ;;  %v4549_v62 = vpop.permute.xlu0 %1207 }
  0x9b   :  { %1601 = vperm.xlu1 %3871, %v4059_v3   ;;  %1605 = vperm.xlu0 %3872, %v4076_v6  }
  0x9c   :  { %3700 = vmatmul.mubr.bf16.vlgmr.msra.gmra.mrb[0].mxu0 %v3885_v1 }
  0x9d   :  { %v4560_v4 = vpop.permute.xlu1 %1222  ;;  %v4562_v55 = vpop.permute.xlu0 %1217  ;;  %3703 = vmatprep.mubr.msk.bf16.mxu0 %vm4011_vm0, %v7206_v59 }
  0x9f   :  { %1609 = vperm.xlu1 %3871, %v4071_v5   ;;  %1613 = vperm.xlu0 %3872, %v4088_v8  }
  0xa1   :  { %v4568_v3 = vpop.permute.xlu1 %1232  ;;  %v4570_v6 = vpop.permute.xlu0 %1227 }
  0xa3   :  { %1617 = vperm.xlu1 %3871, %v4083_v7   ;;  %1621 = vperm.xlu0 %3872, %v4100_v10   ;;  %v3887_v7 = vld [vmem:[%s7185_s0 + $0x10] sm:$0xff]  }
  0xa4   :  { %3704 = vmatmul.mubr.bf16.gmra.mrb[4].mxu0 %v3886_v60 }
  0xa5   :  { %v4579_v2 = vpop.permute.xlu1 %1242  ;;  %v4581_v5 = vpop.permute.xlu0 %1237  ;;  %3707 = vmatprep.mubr.msk.bf16.mxu0 %vm4011_vm0, %v7206_v59 }
  0xa7   :  { %1625 = vperm.xlu1 %3871, %v4095_v9   ;;  %1629 = vperm.xlu0 %3872, %v4112_v12  }
  0xa9   :  { %v4585_v8 = vpop.permute.xlu1 %1252  ;;  %v4587_v1 = vpop.permute.xlu0 %1247 }
  0xab   :  { %1633 = vperm.xlu1 %3871, %v4107_v11   ;;  %1637 = vperm.xlu0 %3872, %v4124_v14   ;;  %v3888_v11 = vld [vmem:[%s7185_s0 + $0x18] sm:$0xff]  }
  0xac   :  { %3708 = vmatmul.mubr.bf16.gmra.mrb[8].mxu0 %v3887_v7 }
  0xad   :  { %v4596_v10 = vpop.permute.xlu1 %1262  ;;  %v4598_v9 = vpop.permute.xlu0 %1257  ;;  %3711 = vmatprep.mubr.msk.bf16.mxu0 %vm4011_vm0, %v7206_v59 }
  0xaf   :  { %1641 = vperm.xlu1 %3871, %v4119_v13   ;;  %1645 = vperm.xlu0 %3872, %v4136_v16  }
  0xb1   :  { %v4602_v12 = vpop.permute.xlu1 %1272  ;;  %v4604_v60 = vpop.permute.xlu0 %1267 }
  0xb2   :  { %7398 = vst [vmem:[#allocation28_spill] sm:$0xff] %v4604_v60 }
  0xb3   :  { %1649 = vperm.xlu1 %3871, %v4131_v15   ;;  %1653 = vperm.xlu0 %3872, %v4148_v18   ;;  %v3889_v15 = vld [vmem:[%s7185_s0 + $0x20] sm:$0xff]  }
  0xb4   :  { %3712 = vmatmul.mubr.bf16.gmra.mrb[12].mxu0 %v3888_v11 }
  0xb5   :  { %v4613_v14 = vpop.permute.xlu1 %1282  ;;  %v4615_v13 = vpop.permute.xlu0 %1277  ;;  %3715 = vmatprep.mubr.msk.bf16.mxu0 %vm4011_vm0, %v7206_v59 }
  0xb6   :  { %7399 = vst [vmem:[#allocation29_spill] sm:$0xff] %v4613_v14  ;;  %7400 = vst [vmem:[#allocation30_spill] sm:$0xff] %v4615_v13 }
  0xb7   :  { %1657 = vperm.xlu1 %3871, %v4143_v17   ;;  %1661 = vperm.xlu0 %3872, %v4160_v20  }
  0xb9   :  { %v4619_v16 = vpop.permute.xlu1 %1292  ;;  %v4621_v7 = vpop.permute.xlu0 %1287 }
  0xba   :  { %7401 = vst [vmem:[#allocation31_spill] sm:$0xff] %v4619_v16  ;;  %7402 = vst [vmem:[#allocation32_spill] sm:$0xff] %v4621_v7  ;;  %v5273_v16 = vld [vmem:[%s7183_s2 + $0x138] sm:$0xff] }
  0xbb   :  { %1665 = vperm.xlu1 %3871, %v4155_v19   ;;  %1669 = vperm.xlu0 %3872, %v4172_v22   ;;  %v3890_v19 = vld [vmem:[%s7185_s0 + $0x28] sm:$0xff]   ;;  %7517 = vst [vmem:[#allocation112_spill] sm:$0xff] %v5273_v16 }
  0xbc   :  { %3716 = vmatmul.mubr.bf16.gmra.mrb[16].mxu0 %v3889_v15 }
  0xbd   :  { %v4630_v18 = vpop.permute.xlu1 %1302  ;;  %v4632_v17 = vpop.permute.xlu0 %1297  ;;  %3719 = vmatprep.mubr.msk.bf16.mxu0 %vm4011_vm0, %v7206_v59 }
  0xbe   :  { %7403 = vst [vmem:[#allocation33_spill] sm:$0xff] %v4630_v18  ;;  %7404 = vst [vmem:[#allocation34_spill] sm:$0xff] %v4632_v17  ;;  %v5242_v17 = vld [vmem:[%s7183_s2 + $0x130] sm:$0xff]  ;;  %v5261_v18 = vld [vmem:[%s7183_s2 + $0x140] sm:$0xff] }
  0xbf   :  { %1673 = vperm.xlu1 %3871, %v4167_v21   ;;  %1677 = vperm.xlu0 %3872, %v4184_v24  }
  0xc1   :  { %v4636_v20 = vpop.permute.xlu1 %1312  ;;  %v4638_v11 = vpop.permute.xlu0 %1307 }
  0xc2   :  { %7405 = vst [vmem:[#allocation35_spill] sm:$0xff] %v4636_v20  ;;  %7406 = vst [vmem:[#allocation36_spill] sm:$0xff] %v4638_v11  ;;  %v5224_v11 = vld [vmem:[%s7183_s2 + $0x120] sm:$0xff]  ;;  %v5236_v20 = vld [vmem:[%s7183_s2 + $0x118] sm:$0xff] }
  0xc3   :  { %1681 = vperm.xlu1 %3871, %v4179_v23   ;;  %1685 = vperm.xlu0 %3872, %v4196_v26   ;;  %v3891_v23 = vld [vmem:[%s7185_s0 + $0x30] sm:$0xff]  }
  0xc4   :  { %3720 = vmatmul.mubr.bf16.gmra.mrb[20].mxu0 %v3890_v19 }
  0xc5   :  { %v4647_v22 = vpop.permute.xlu1 %1322  ;;  %v4649_v21 = vpop.permute.xlu0 %1317  ;;  %3723 = vmatprep.mubr.msk.bf16.mxu0 %vm4011_vm0, %v7206_v59 }
  0xc6   :  { %7407 = vst [vmem:[#allocation37_spill] sm:$0xff] %v4647_v22  ;;  %7408 = vst [vmem:[#allocation38_spill] sm:$0xff] %v4649_v21  ;;  %v5205_v21 = vld [vmem:[%s7183_s2 + $0x110] sm:$0xff]  ;;  %v5218_v22 = vld [vmem:[%s7183_s2 + $0x108] sm:$0xff] }
  0xc7   :  { %1689 = vperm.xlu1 %3871, %v4191_v25   ;;  %1693 = vperm.xlu0 %3872, %v4208_v28  }
  0xc9   :  { %v4653_v24 = vpop.permute.xlu1 %1332  ;;  %v4655_v15 = vpop.permute.xlu0 %1327 }
  0xca   :  { %7409 = vst [vmem:[#allocation39_spill] sm:$0xff] %v4653_v24  ;;  %7410 = vst [vmem:[#allocation40_spill] sm:$0xff] %v4655_v15  ;;  %v5187_v15 = vld [vmem:[%s7183_s2 + $0x100] sm:$0xff]  ;;  %v5199_v24 = vld [vmem:[%s7183_s2 + $0xf8] sm:$0xff] }
  0xcb   :  { %1697 = vperm.xlu1 %3871, %v4203_v27   ;;  %1701 = vperm.xlu0 %3872, %v4220_v30   ;;  %v3892_v27 = vld [vmem:[%s7185_s0 + $0x38] sm:$0xff]  }
  0xcc   :  { %3724 = vmatmul.mubr.bf16.gmra.mrb[24].mxu0 %v3891_v23 }
  0xcd   :  { %v4664_v26 = vpop.permute.xlu1 %1342  ;;  %v4666_v25 = vpop.permute.xlu0 %1337  ;;  %3727 = vmatprep.mubr.msk.bf16.mxu0 %vm4011_vm0, %v7206_v59 }
  0xce   :  { %7411 = vst [vmem:[#allocation41_spill] sm:$0xff] %v4664_v26  ;;  %7412 = vst [vmem:[#allocation42_spill] sm:$0xff] %v4666_v25  ;;  %v5168_v25 = vld [vmem:[%s7183_s2 + $0xf0] sm:$0xff]  ;;  %v5181_v26 = vld [vmem:[%s7183_s2 + $0xe8] sm:$0xff] }
  0xcf   :  { %1705 = vperm.xlu1 %3871, %v4215_v29   ;;  %1709 = vperm.xlu0 %3872, %v4232_v32  }
  0xd1   :  { %v4670_v28 = vpop.permute.xlu1 %1352  ;;  %v4672_v19 = vpop.permute.xlu0 %1347 }
  0xd2   :  { %7413 = vst [vmem:[#allocation43_spill] sm:$0xff] %v4670_v28  ;;  %7414 = vst [vmem:[#allocation44_spill] sm:$0xff] %v4672_v19  ;;  %v5150_v19 = vld [vmem:[%s7183_s2 + $0xe0] sm:$0xff]  ;;  %v5162_v28 = vld [vmem:[%s7183_s2 + $0xd8] sm:$0xff] }
  0xd3   :  { %1713 = vperm.xlu1 %3871, %v4227_v31   ;;  %1717 = vperm.xlu0 %3872, %v4244_v34   ;;  %v3893_v31 = vld [vmem:[%s7185_s0 + $0x40] sm:$0xff]  }
  0xd4   :  { %3728 = vmatmul.mubr.bf16.gmra.mrb[28].mxu0 %v3892_v27 }
  0xd5   :  { %v4681_v30 = vpop.permute.xlu1 %1362  ;;  %v4683_v29 = vpop.permute.xlu0 %1357  ;;  %3731 = vmatprep.mubr.msk.bf16.mxu0 %vm4011_vm0, %v7206_v59 }
  0xd6   :  { %7415 = vst [vmem:[#allocation45_spill] sm:$0xff] %v4681_v30  ;;  %7416 = vst [vmem:[#allocation46_spill] sm:$0xff] %v4683_v29  ;;  %v5131_v29 = vld [vmem:[%s7183_s2 + $0xd0] sm:$0xff]  ;;  %v5144_v30 = vld [vmem:[%s7183_s2 + $0xc8] sm:$0xff] }
  0xd7   :  { %1721 = vperm.xlu1 %3871, %v4239_v33   ;;  %1725 = vperm.xlu0 %3872, %v4256_v36  }
  0xd9   :  { %v4687_v32 = vpop.permute.xlu1 %1372  ;;  %v4689_v23 = vpop.permute.xlu0 %1367 }
  0xda   :  { %7417 = vst [vmem:[#allocation47_spill] sm:$0xff] %v4687_v32  ;;  %7418 = vst [vmem:[#allocation48_spill] sm:$0xff] %v4689_v23  ;;  %v5113_v23 = vld [vmem:[%s7183_s2 + $0xc0] sm:$0xff]  ;;  %v5125_v32 = vld [vmem:[%s7183_s2 + $0xb8] sm:$0xff] }
  0xdb   :  { %1729 = vperm.xlu1 %3871, %v4251_v35   ;;  %1733 = vperm.xlu0 %3872, %v4268_v38   ;;  %v3894_v35 = vld [vmem:[%s7185_s0 + $0x48] sm:$0xff]  }
  0xdc   :  { %3732 = vmatmul.mubr.bf16.gmra.mrb[32].mxu0 %v3893_v31 }
  0xdd   :  { %v4698_v34 = vpop.permute.xlu1 %1382  ;;  %v4700_v33 = vpop.permute.xlu0 %1377  ;;  %3735 = vmatprep.mubr.msk.bf16.mxu0 %vm4011_vm0, %v7206_v59 }
  0xde   :  { %7419 = vst [vmem:[#allocation49_spill] sm:$0xff] %v4698_v34  ;;  %7420 = vst [vmem:[#allocation50_spill] sm:$0xff] %v4700_v33  ;;  %v5094_v33 = vld [vmem:[%s7183_s2 + $0xb0] sm:$0xff]  ;;  %v5107_v34 = vld [vmem:[%s7183_s2 + $0xa8] sm:$0xff] }
  0xdf   :  { %1737 = vperm.xlu1 %3871, %v4263_v37   ;;  %1741 = vperm.xlu0 %3872, %v4280_v40  }
  0xe1   :  { %v4704_v36 = vpop.permute.xlu1 %1392  ;;  %v4706_v27 = vpop.permute.xlu0 %1387 }
  0xe2   :  { %7421 = vst [vmem:[#allocation51_spill] sm:$0xff] %v4704_v36  ;;  %7422 = vst [vmem:[#allocation52_spill] sm:$0xff] %v4706_v27  ;;  %v5076_v27 = vld [vmem:[%s7183_s2 + $0xa0] sm:$0xff]  ;;  %v5088_v36 = vld [vmem:[%s7183_s2 + $0x98] sm:$0xff] }
  0xe3   :  { %1745 = vperm.xlu1 %3871, %v4275_v39   ;;  %1749 = vperm.xlu0 %3872, %v4292_v42   ;;  %v3896_v39 = vld [vmem:[%s7185_s0 + $0x98] sm:$0xff]  }
  0xe4   :  { %3736 = vmatmul.mubr.bf16.gmra.mrb[36].mxu0 %v3894_v35  ;;  %3776 = vmatmul.mubr.bf16.vlgmr.msra.gmra.mrb[0].mxu1 %v3896_v39  ;;  %v3898_v35 = vld [vmem:[%s7185_s0 + $0xa0] sm:$0xff]  }
  0xe5   :  { %v4715_v38 = vpop.permute.xlu1 %1402  ;;  %v4717_v37 = vpop.permute.xlu0 %1397  ;;  %3739 = vmatprep.mubr.msk.bf16.mxu0 %vm4011_vm0, %v7206_v59  ;;  %3779 = vmatprep.mubr.msk.bf16.mxu1 %vm4011_vm0, %v7206_v59 }
  0xe6   :  { %7423 = vst [vmem:[#allocation53_spill] sm:$0xff] %v4715_v38  ;;  %7424 = vst [vmem:[#allocation54_spill] sm:$0xff] %v4717_v37  ;;  %v5057_v37 = vld [vmem:[%s7183_s2 + $0x90] sm:$0xff]  ;;  %v5070_v38 = vld [vmem:[%s7183_s2 + $0x88] sm:$0xff] }
  0xe7   :  { %1753 = vperm.xlu1 %3871, %v4287_v41   ;;  %1757 = vperm.xlu0 %3872, %v4304_v44   ;;  %v3895_v41 = vld [vmem:[%s7185_s0 + $0x50] sm:$0xff]  }
  0xe9   :  { %v4721_v40 = vpop.permute.xlu1 %1412  ;;  %v4723_v31 = vpop.permute.xlu0 %1407 }
  0xea   :  { %7425 = vst [vmem:[#allocation55_spill] sm:$0xff] %v4721_v40  ;;  %7426 = vst [vmem:[#allocation56_spill] sm:$0xff] %v4723_v31  ;;  %v5039_v31 = vld [vmem:[%s7183_s2 + $0x80] sm:$0xff]  ;;  %v5051_v40 = vld [vmem:[%s7183_s2 + $0x78] sm:$0xff] }
  0xeb   :  { %1761 = vperm.xlu1 %3871, %v4299_v43   ;;  %1765 = vperm.xlu0 %3872, %v4316_v46  }
  0xec   :  { %3740 = vmatmul.mubr.bf16.gmra.mrb[40].mxu0 %v3895_v41  ;;  %3780 = vmatmul.mubr.bf16.gmra.mrb[4].mxu1 %v3898_v35  ;;  %v3900_v41 = vld [vmem:[%s7185_s0 + $0xa8] sm:$0xff]  }
  0xed   :  { %v4735_v42 = vpop.permute.xlu1 %1422  ;;  %v4737_v44 = vpop.permute.xlu0 %1417  ;;  %3743 = vmatprep.mubr.msk.bf16.mxu0 %vm4011_vm0, %v7206_v59  ;;  %3783 = vmatprep.mubr.msk.bf16.mxu1 %vm4011_vm0, %v7206_v59 }
  0xee   :  { %7427 = vst [vmem:[#allocation57_spill] sm:$0xff] %v4735_v42  ;;  %7428 = vst [vmem:[#allocation58_spill] sm:$0xff] %v4737_v44  ;;  %v5020_v44 = vld [vmem:[%s7183_s2 + $0x70] sm:$0xff]  ;;  %v5033_v42 = vld [vmem:[%s7183_s2 + $0x68] sm:$0xff] }
  0xef   :  { %1769 = vperm.xlu1 %3871, %v4311_v45   ;;  %1773 = vperm.xlu0 %3872, %v4328_v48   ;;  %v3897_v45 = vld [vmem:[%s7185_s0 + $0x58] sm:$0xff]  }
  0xf1   :  { %v4743_v43 = vpop.permute.xlu1 %1432  ;;  %v4745_v46 = vpop.permute.xlu0 %1427 }
  0xf2   :  { %7429 = vst [vmem:[#allocation59_spill] sm:$0xff] %v4743_v43  ;;  %7430 = vst [vmem:[#allocation60_spill] sm:$0xff] %v4745_v46  ;;  %v5002_v46 = vld [vmem:[%s7183_s2 + $0x60] sm:$0xff]  ;;  %v5014_v43 = vld [vmem:[%s7183_s2 + $0x58] sm:$0xff] }
  0xf3   :  { %1777 = vperm.xlu1 %3871, %v4323_v47   ;;  %1781 = vperm.xlu0 %3872, %v4340_v50  }
  0xf4   :  { %3744 = vmatmul.mubr.bf16.gmra.mrb[44].mxu0 %v3897_v45  ;;  %3784 = vmatmul.mubr.bf16.gmra.mrb[8].mxu1 %v3900_v41  ;;  %v7439_v45 = vld [vmem:[#allocation2_spill] sm:$0xff]  ;;  %v3902_v41 = vld [vmem:[%s7185_s0 + $0xb0] sm:$0xff]  }
  0xf5   :  { %v4757_v48 = vpop.permute.xlu1 %1442  ;;  %v4759_v39 = vpop.permute.xlu0 %1437  ;;  %3747 = vmatprep.mubr.msk.bf16.mxu0 %vm4011_vm0, %v7206_v59  ;;  %3787 = vmatprep.mubr.msk.bf16.mxu1 %vm4011_vm0, %v7206_v59 }
  0xf6   :  { %7431 = vst [vmem:[#allocation61_spill] sm:$0xff] %v4757_v48  ;;  %7432 = vst [vmem:[#allocation62_spill] sm:$0xff] %v4759_v39  ;;  %v4983_v39 = vld [vmem:[%s7183_s2 + $0x50] sm:$0xff]  ;;  %v4996_v48 = vld [vmem:[%s7183_s2 + $0x48] sm:$0xff] }
  0xf7   :  { %1785 = vperm.xlu1 %3871, %v4335_v49   ;;  %1789 = vperm.xlu0 %3872, %v4352_v52   ;;  %v3899_v49 = vld [vmem:[%s7185_s0 + $0x60] sm:$0xff]  }
  0xf9   :  { %v4765_v47 = vpop.permute.xlu1 %1452  ;;  %v4767_v50 = vpop.permute.xlu0 %1447 }
  0xfa   :  { %7433 = vst [vmem:[#allocation63_spill] sm:$0xff] %v4765_v47  ;;  %7434 = vst [vmem:[#allocation64_spill] sm:$0xff] %v4767_v50  ;;  %v4959_v50 = vld [vmem:[%s7183_s2 + $0x28] sm:$0xff]  ;;  %v4965_v47 = vld [vmem:[%s7183_s2 + $0x40] sm:$0xff] }
  0xfb   :  { %1793 = vperm.xlu1 %3871, %v4347_v51   ;;  %1797 = vperm.xlu0 %3872, %v4364_v54  }
  0xfc   :  { %3748 = vmatmul.mubr.bf16.gmra.mrb[48].mxu0 %v3899_v49  ;;  %3788 = vmatmul.mubr.bf16.gmra.mrb[12].mxu1 %v3902_v41  ;;  %v3904_v41 = vld [vmem:[%s7185_s0 + $0xb8] sm:$0xff]  }
  0xfd   :  { %v4779_v52 = vpop.permute.xlu1 %1462  ;;  %v4781_v35 = vpop.permute.xlu0 %1457  ;;  %3751 = vmatprep.mubr.msk.bf16.mxu0 %vm4011_vm0, %v7206_v59  ;;  %3791 = vmatprep.mubr.msk.bf16.mxu1 %vm4011_vm0, %v7206_v59 }
  0xfe   :  { %7435 = vst [vmem:[#allocation65_spill] sm:$0xff] %v4779_v52  ;;  %7436 = vst [vmem:[#allocation66_spill] sm:$0xff] %v4781_v35  ;;  %v7440_v52 = vld [vmem:[#allocation4_spill] sm:$0xff]  ;;  %v7447_v35 = vld [vmem:[#allocation5_spill] sm:$0xff] }
  0xff   :  { %1801 = vperm.xlu1 %3871, %v4359_v53   ;;  %1805 = vperm.xlu0 %3872, %v4376_v56   ;;  %v3901_v53 = vld [vmem:[%s7185_s0 + $0x68] sm:$0xff]  }
 0x101   :  { %v4787_v51 = vpop.permute.xlu1 %1472  ;;  %v4789_v54 = vpop.permute.xlu0 %1467 }
 0x102   :  { %7437 = vst [vmem:[#allocation67_spill] sm:$0xff] %v4787_v51  ;;  %7438 = vst [vmem:[#allocation68_spill] sm:$0xff] %v4789_v54  ;;  %v7443_v54 = vld [vmem:[#allocation3_spill] sm:$0xff] }
 0x103   :  { %1809 = vperm.xlu1 %3871, %v7439_v45   ;;  %1813 = vperm.xlu0 %3872, %v7440_v52   ;;  %v7444_v45 = vld [vmem:[#allocation6_spill] sm:$0xff] }
 0x104   :  { %3752 = vmatmul.mubr.bf16.gmra.mrb[52].mxu0 %v3901_v53  ;;  %3792 = vmatmul.mubr.bf16.gmra.mrb[16].mxu1 %v3904_v41  ;;  %v3906_v41 = vld [vmem:[%s7185_s0 + $0xc0] sm:$0xff]  }
 0x105   :  { %v4801_v56 = vpop.permute.xlu1 %1482  ;;  %v4803_v49 = vpop.permute.xlu0 %1477  ;;  %3755 = vmatprep.mubr.msk.bf16.mxu0 %vm4011_vm0, %v7206_v59  ;;  %3795 = vmatprep.mubr.msk.bf16.mxu1 %vm4011_vm0, %v7206_v59 }
 0x106   :  { %7441 = vst [vmem:[#allocation2_spill] sm:$0xff] %v4801_v56  ;;  %7442 = vst [vmem:[#allocation4_spill] sm:$0xff] %v4803_v49  ;;  %v7448_v56 = vld [vmem:[#allocation8_spill] sm:$0xff]  ;;  %v7455_v49 = vld [vmem:[#allocation9_spill] sm:$0xff] }
 0x107   :  { %1817 = vperm.xlu1 %3871, %v7443_v54   ;;  %1821 = vperm.xlu0 %3872, %v7444_v45   ;;  %v3903_v54 = vld [vmem:[%s7185_s0 + $0x70] sm:$0xff]  }
 0x109   :  { %v4809_v52 = vpop.permute.xlu1 %1492  ;;  %v4811_v51 = vpop.permute.xlu0 %1487 }
 0x10a   :  { %7445 = vst [vmem:[#allocation3_spill] sm:$0xff] %v4809_v52  ;;  %7446 = vst [vmem:[#allocation6_spill] sm:$0xff] %v4811_v51  ;;  %v7451_v51 = vld [vmem:[#allocation7_spill] sm:$0xff] }
 0x10b   :  { %1825 = vperm.xlu1 %3871, %v7447_v35   ;;  %1829 = vperm.xlu0 %3872, %v7448_v56   ;;  %v7452_v35 = vld [vmem:[#allocation10_spill] sm:$0xff] }
 0x10c   :  { %3756 = vmatmul.mubr.bf16.gmra.mrb[56].mxu0 %v3903_v54  ;;  %3796 = vmatmul.mubr.bf16.gmra.mrb[20].mxu1 %v3906_v41  ;;  %v7463_v41 = vld [vmem:[#allocation15_spill] sm:$0xff] }
 0x10d   :  { %v4823_v53 = vpop.permute.xlu1 %1502  ;;  %v4825_v45 = vpop.permute.xlu0 %1497  ;;  %3759 = vmatprep.mubr.msk.bf16.mxu0 %vm4011_vm0, %v7206_v59  ;;  %3799 = vmatprep.mubr.msk.bf16.mxu1 %vm4011_vm0, %v7206_v59 }
 0x10e   :  { %7449 = vst [vmem:[#allocation5_spill] sm:$0xff] %v4823_v53  ;;  %7450 = vst [vmem:[#allocation8_spill] sm:$0xff] %v4825_v45  ;;  %v7456_v53 = vld [vmem:[#allocation12_spill] sm:$0xff] }
 0x10f   :  { %1833 = vperm.xlu1 %3871, %v7451_v51   ;;  %1837 = vperm.xlu0 %3872, %v7452_v35   ;;  %v3905_v51 = vld [vmem:[%s7185_s0 + $0x78] sm:$0xff]  }
 0x111   :  { %v4831_v56 = vpop.permute.xlu0 %1507 }
 0x112   :  { %7453 = vst [vmem:[#allocation7_spill] sm:$0xff] %v4831_v56  ;;  %v4835_v52 = vpop.permute.xlu1 %1589  ;;  %v7459_v56 = vld [vmem:[#allocation11_spill] sm:$0xff] }
 0x113   :  { %7454 = vst [vmem:[#allocation10_spill] sm:$0xff] %v4835_v52  ;;  %1841 = vperm.xlu1 %3871, %v7455_v49   ;;  %1845 = vperm.xlu0 %3872, %v7456_v53   ;;  %v7460_v49 = vld [vmem:[#allocation16_spill] sm:$0xff] }
 0x114   :  { %3760 = vmatmul.mubr.bf16.gmra.mrb[60].mxu0 %v3905_v51  ;;  %v4946_v52 = vld [vmem:[%s7183_s2 + $0x30] sm:$0xff] }
 0x115   :  { %3763 = vmatprep.mubr.msk.bf16.mxu0 %vm4011_vm0, %v7206_v59 }
 0x116   :  { %v4845_v54 = vpop.permute.xlu1 %1597  ;;  %v4847_v35 = vpop.permute.xlu0 %1593 }
 0x117   :  { %7457 = vst [vmem:[#allocation9_spill] sm:$0xff] %v4845_v54  ;;  %7458 = vst [vmem:[#allocation12_spill] sm:$0xff] %v4847_v35  ;;  %1849 = vperm.xlu1 %3871, %v7459_v56   ;;  %1853 = vperm.xlu0 %3872, %v7460_v49   ;;  %v7464_v54 = vld [vmem:[#allocation20_spill] sm:$0xff]  ;;  %v3908_v35 = vld [vmem:[%s7185_s0 + $0xc8] sm:$0xff]  }
 0x118   :  { %v3907_v56 = vld [vmem:[%s7185_s0 + $0x80] sm:$0xff]   ;;  %3800 = vmatmul.mubr.bf16.gmra.mrb[24].mxu1 %v3908_v35  ;;  %v7471_v35 = vld [vmem:[#allocation23_spill] sm:$0xff] }
 0x119   :  { %3803 = vmatprep.mubr.msk.bf16.mxu1 %vm4011_vm0, %v7206_v59 }
 0x11a   :  { %v4855_v53 = vpop.permute.xlu1 %1601  ;;  %v4857_v45 = vpop.permute.xlu0 %1605 }
 0x11b   :  { %7461 = vst [vmem:[#allocation11_spill] sm:$0xff] %v4855_v53  ;;  %7462 = vst [vmem:[#allocation16_spill] sm:$0xff] %v4857_v45  ;;  %1857 = vperm.xlu1 %3871, %v7463_v41   ;;  %1861 = vperm.xlu0 %3872, %v7464_v54   ;;  %v7467_v45 = vld [vmem:[#allocation19_spill] sm:$0xff]  ;;  %v7468_v41 = vld [vmem:[#allocation24_spill] sm:$0xff] }
 0x11c   :  { %3764 = vmatmul.mubr.bf16.gmra.mrb[64].mxu0 %v3907_v56 }
 0x11d   :  { %3767 = vmatprep.mubr.msk.bf16.mxu0 %vm4011_vm0, %v7206_v59 }
 0x11e   :  { %v4867_v51 = vpop.permute.xlu1 %1609  ;;  %v4869_v49 = vpop.permute.xlu0 %1613 }
 0x11f   :  { %7465 = vst [vmem:[#allocation15_spill] sm:$0xff] %v4867_v51  ;;  %7466 = vst [vmem:[#allocation20_spill] sm:$0xff] %v4869_v49  ;;  %1865 = vperm.xlu1 %3871, %v7467_v45   ;;  %1869 = vperm.xlu0 %3872, %v7468_v41   ;;  %v3910_v49 = vld [vmem:[%s7185_s0 + $0xd0] sm:$0xff]   ;;  %v3909_v45 = vld [vmem:[%s7185_s0 + $0x88] sm:$0xff]  }
 0x120   :  { %3804 = vmatmul.mubr.bf16.gmra.mrb[28].mxu1 %v3910_v49  ;;  %v4904_v49 = vld [vmem:[%s7183_s2 + $0x8] sm:$0xff]  ;;  %v4940_v51 = vld [vmem:[%s7183_s2 + $0x18] sm:$0xff] }
 0x121   :  { %3807 = vmatprep.mubr.msk.bf16.mxu1 %vm4011_vm0, %v7206_v59 }
 0x122   :  { %v4877_v54 = vpop.permute.xlu1 %1617  ;;  %v4879_v53 = vpop.permute.xlu0 %1621 }
 0x123   :  { %7469 = vst [vmem:[#allocation19_spill] sm:$0xff] %v4877_v54  ;;  %7470 = vst [vmem:[#allocation24_spill] sm:$0xff] %v4879_v53  ;;  %1873 = vperm.xlu1 %3871, %v7471_v35   ;;  %1877 = vperm.xlu0 %3872, %v4520_v61   ;;  %v4012_v53 = vmov 2   ;;  %v4898_v61 = vld [vmem:[%s7183_s2] sm:$0xff] }
 0x124   :  { %3768 = vmatmul.mubr.bf16.gmra.mrb[68].mxu0 %v3909_v45  ;;  %v4925_v45 = vld [vmem:[%s7183_s2 + $0x20] sm:$0xff] }
 0x126   :  { %v4889_v56 = vpop.permute.xlu1 %1625  ;;  %v4891_v41 = vpop.permute.xlu0 %1629 }
 0x127   :  { %7472 = vst [vmem:[#allocation23_spill] sm:$0xff] %v4889_v56  ;;  %7473 = vst [vmem:[#allocation69_spill] sm:$0xff] %v4891_v41  ;;  %3873 = vset.pattern.permute.xlu1 %v4012_v53  ;;  %3874 = vset.pattern.permute.xlu0 %v4012_v53  ;;  %v7476_v53 = vmov 0.0   ;;  %v3912_v41 = vld [vmem:[%s7185_s0 + $0xd8] sm:$0xff]   ;;  %v4919_v56 = vld [vmem:[%s7183_s2 + $0x10] sm:$0xff] }
 0x128   :  { %2032 = vperm.xlu1 %3873, %v4898_v61   ;;  %2036 = vperm.xlu0 %3874, %v4904_v49  }
 0x129   :  { %3771 = vmatprep.mubr.msk.bf16.mxu0 %vm4011_vm0, %v7476_v53  ;;  %3808 = vmatmul.mubr.bf16.gmra.mrb[32].mxu1 %v3912_v41 }
 0x12a   :  { %v4907_v35 = vpop.permute.xlu1 %1633  ;;  %v4909_v59 = vpop.permute.xlu0 %1637  ;;  %3811 = vmatprep.mubr.msk.bf16.mxu1 %vm4011_vm0, %v7476_v53 }
 0x12b   :  { %7474 = vst [vmem:[#allocation70_spill] sm:$0xff] %v4907_v35  ;;  %7475 = vst [vmem:[#allocation71_spill] sm:$0xff] %v4909_v59  ;;  %v3911_v59 = vld [vmem:[%s7185_s0 + $0x90] sm:$0xff]  }
 0x12c   :  { %2040 = vperm.xlu1 %3873, %v4919_v56   ;;  %2048 = vperm.xlu0 %3874, %v4925_v45  }
 0x12d   :  { %3772 = vmatmul.mubr.bf16.gmra.mrb[72].mxu0 %v3911_v59 }
 0x12e   :  { %v4931_v35 = vpop.permute.xlu1 %1641  ;;  %v4933_v54 = vpop.permute.xlu0 %1645 }
 0x12f   :  { %7477 = vst [vmem:[#allocation72_spill] sm:$0xff] %v4931_v35  ;;  %7478 = vst [vmem:[#allocation73_spill] sm:$0xff] %v4933_v54  ;;  %v3913_v35 = vld [vmem:[%s7185_s0 + $0xe0] sm:$0xff]  }
 0x130   :  { %2044 = vperm.xlu1 %3873, %v4940_v51   ;;  %2056 = vperm.xlu0 %3874, %v4946_v52  }
 0x131   :  { %3812 = vmatmul.mubr.bf16.gmra.mrb[36].mxu1 %v3913_v35 }
 0x132   :  { %v4949_v41 = vpop.permute.xlu1 %1649  ;;  %v4951_v54 = vpop.permute.xlu0 %1653  ;;  %3815 = vmatprep.mubr.msk.bf16.mxu1 %vm4011_vm0, %v7476_v53 }
 0x133   :  { %7479 = vst [vmem:[#allocation74_spill] sm:$0xff] %v4949_v41  ;;  %7480 = vst [vmem:[#allocation75_spill] sm:$0xff] %v4951_v54  ;;  %v4977_v41 = vld [vmem:[%s7183_s2 + $0x38] sm:$0xff] }
 0x134   :  { %2052 = vperm.xlu1 %3873, %v4959_v50   ;;  %2064 = vperm.xlu0 %3874, %v4965_v47  }
 0x136   :  { %v4968_v59 = vpop.permute.xlu1 %1657  ;;  %v4970_v54 = vpop.permute.xlu0 %1661 }
 0x137   :  { %7481 = vst [vmem:[#allocation76_spill] sm:$0xff] %v4968_v59  ;;  %7482 = vst [vmem:[#allocation77_spill] sm:$0xff] %v4970_v54  ;;  %v3914_v59 = vld [vmem:[%s7185_s0 + $0xe8] sm:$0xff]  }
 0x138   :  { %2060 = vperm.xlu1 %3873, %v4977_v41   ;;  %2072 = vperm.xlu0 %3874, %v4983_v39  }
 0x139   :  { %3816 = vmatmul.mubr.bf16.gmra.mrb[40].mxu1 %v3914_v59 }
 0x13a   :  { %v4986_v35 = vpop.permute.xlu1 %1665  ;;  %v4988_v54 = vpop.permute.xlu0 %1669  ;;  %3819 = vmatprep.mubr.msk.bf16.mxu1 %vm4011_vm0, %v7476_v53 }
 0x13b   :  { %7483 = vst [vmem:[#allocation78_spill] sm:$0xff] %v4986_v35  ;;  %7484 = vst [vmem:[#allocation79_spill] sm:$0xff] %v4988_v54 }
 0x13c   :  { %2068 = vperm.xlu1 %3873, %v4996_v48   ;;  %2080 = vperm.xlu0 %3874, %v5002_v46  }
 0x13e   :  { %v5005_v54 = vpop.permute.xlu1 %1673  ;;  %v5007_v35 = vpop.permute.xlu0 %1677 }
 0x13f   :  { %7485 = vst [vmem:[#allocation80_spill] sm:$0xff] %v5005_v54  ;;  %7486 = vst [vmem:[#allocation81_spill] sm:$0xff] %v5007_v35  ;;  %v3915_v54 = vld [vmem:[%s7185_s0 + $0xf0] sm:$0xff]  }
 0x140   :  { %2076 = vperm.xlu1 %3873, %v5014_v43   ;;  %2088 = vperm.xlu0 %3874, %v5020_v44  }
 0x141   :  { %3820 = vmatmul.mubr.bf16.gmra.mrb[44].mxu1 %v3915_v54 }
 0x142   :  { %v5023_v59 = vpop.permute.xlu1 %1681  ;;  %v5025_v35 = vpop.permute.xlu0 %1685  ;;  %3823 = vmatprep.mubr.msk.bf16.mxu1 %vm4011_vm0, %v7476_v53 }
 0x143   :  { %7487 = vst [vmem:[#allocation82_spill] sm:$0xff] %v5023_v59  ;;  %7488 = vst [vmem:[#allocation83_spill] sm:$0xff] %v5025_v35 }
 0x144   :  { %2084 = vperm.xlu1 %3873, %v5033_v42   ;;  %2096 = vperm.xlu0 %3874, %v5039_v31  }
 0x146   :  { %v5042_v35 = vpop.permute.xlu1 %1689  ;;  %v5044_v59 = vpop.permute.xlu0 %1693 }
 0x147   :  { %7489 = vst [vmem:[#allocation84_spill] sm:$0xff] %v5042_v35  ;;  %7490 = vst [vmem:[#allocation85_spill] sm:$0xff] %v5044_v59  ;;  %v3916_v35 = vld [vmem:[%s7185_s0 + $0xf8] sm:$0xff]  }
 0x148   :  { %2092 = vperm.xlu1 %3873, %v5051_v40   ;;  %2104 = vperm.xlu0 %3874, %v5057_v37  }
 0x149   :  { %3824 = vmatmul.mubr.bf16.gmra.mrb[48].mxu1 %v3916_v35 }
 0x14a   :  { %v5060_v54 = vpop.permute.xlu1 %1697  ;;  %v5062_v59 = vpop.permute.xlu0 %1701  ;;  %3827 = vmatprep.mubr.msk.bf16.mxu1 %vm4011_vm0, %v7476_v53 }
 0x14b   :  { %7491 = vst [vmem:[#allocation86_spill] sm:$0xff] %v5060_v54  ;;  %7492 = vst [vmem:[#allocation87_spill] sm:$0xff] %v5062_v59 }
 0x14c   :  { %2100 = vperm.xlu1 %3873, %v5070_v38   ;;  %2112 = vperm.xlu0 %3874, %v5076_v27  }
 0x14e   :  { %v5079_v59 = vpop.permute.xlu1 %1705  ;;  %v5081_v54 = vpop.permute.xlu0 %1709 }
 0x14f   :  { %7493 = vst [vmem:[#allocation88_spill] sm:$0xff] %v5079_v59  ;;  %7494 = vst [vmem:[#allocation89_spill] sm:$0xff] %v5081_v54  ;;  %v3917_v59 = vld [vmem:[%s7185_s0 + $0x100] sm:$0xff]  }
 0x150   :  { %2108 = vperm.xlu1 %3873, %v5088_v36   ;;  %2120 = vperm.xlu0 %3874, %v5094_v33  }
 0x151   :  { %3828 = vmatmul.mubr.bf16.gmra.mrb[52].mxu1 %v3917_v59 }
 0x152   :  { %v5097_v35 = vpop.permute.xlu1 %1713  ;;  %v5099_v54 = vpop.permute.xlu0 %1717  ;;  %3831 = vmatprep.mubr.msk.bf16.mxu1 %vm4011_vm0, %v7476_v53 }
 0x153   :  { %7495 = vst [vmem:[#allocation90_spill] sm:$0xff] %v5097_v35  ;;  %7496 = vst [vmem:[#allocation91_spill] sm:$0xff] %v5099_v54 }
 0x154   :  { %2116 = vperm.xlu1 %3873, %v5107_v34   ;;  %2128 = vperm.xlu0 %3874, %v5113_v23  }
 0x156   :  { %v5116_v54 = vpop.permute.xlu1 %1721  ;;  %v5118_v35 = vpop.permute.xlu0 %1725 }
 0x157   :  { %7497 = vst [vmem:[#allocation92_spill] sm:$0xff] %v5116_v54  ;;  %7498 = vst [vmem:[#allocation93_spill] sm:$0xff] %v5118_v35  ;;  %v3918_v54 = vld [vmem:[%s7185_s0 + $0x108] sm:$0xff]  }
 0x158   :  { %2124 = vperm.xlu1 %3873, %v5125_v32   ;;  %2136 = vperm.xlu0 %3874, %v5131_v29  }
 0x159   :  { %3832 = vmatmul.mubr.bf16.gmra.mrb[56].mxu1 %v3918_v54 }
 0x15a   :  { %v5134_v59 = vpop.permute.xlu1 %1729  ;;  %v5136_v35 = vpop.permute.xlu0 %1733  ;;  %3835 = vmatprep.mubr.msk.bf16.mxu1 %vm4011_vm0, %v7476_v53 }
 0x15b   :  { %7499 = vst [vmem:[#allocation94_spill] sm:$0xff] %v5134_v59  ;;  %7500 = vst [vmem:[#allocation95_spill] sm:$0xff] %v5136_v35 }
 0x15c   :  { %2132 = vperm.xlu1 %3873, %v5144_v30   ;;  %2144 = vperm.xlu0 %3874, %v5150_v19  }
 0x15e   :  { %v5153_v35 = vpop.permute.xlu1 %1737  ;;  %v5155_v59 = vpop.permute.xlu0 %1741 }
 0x15f   :  { %7501 = vst [vmem:[#allocation96_spill] sm:$0xff] %v5153_v35  ;;  %7502 = vst [vmem:[#allocation97_spill] sm:$0xff] %v5155_v59  ;;  %v3919_v35 = vld [vmem:[%s7185_s0 + $0x110] sm:$0xff]  }
 0x160   :  { %2140 = vperm.xlu1 %3873, %v5162_v28   ;;  %2152 = vperm.xlu0 %3874, %v5168_v25  }
 0x161   :  { %3836 = vmatmul.mubr.bf16.gmra.mrb[60].mxu1 %v3919_v35 }
 0x162   :  { %v5171_v54 = vpop.permute.xlu1 %1745  ;;  %v5173_v59 = vpop.permute.xlu0 %1749  ;;  %3839 = vmatprep.mubr.msk.bf16.mxu1 %vm4011_vm0, %v7476_v53 }
 0x163   :  { %7503 = vst [vmem:[#allocation98_spill] sm:$0xff] %v5171_v54  ;;  %7504 = vst [vmem:[#allocation99_spill] sm:$0xff] %v5173_v59 }
 0x164   :  { %2148 = vperm.xlu1 %3873, %v5181_v26   ;;  %2160 = vperm.xlu0 %3874, %v5187_v15  }
 0x166   :  { %v5190_v59 = vpop.permute.xlu1 %1753  ;;  %v5192_v54 = vpop.permute.xlu0 %1757 }
 0x167   :  { %7505 = vst [vmem:[#allocation100_spill] sm:$0xff] %v5190_v59  ;;  %7506 = vst [vmem:[#allocation101_spill] sm:$0xff] %v5192_v54  ;;  %v3920_v59 = vld [vmem:[%s7185_s0 + $0x118] sm:$0xff]  }
 0x168   :  { %2156 = vperm.xlu1 %3873, %v5199_v24   ;;  %2168 = vperm.xlu0 %3874, %v5205_v21  }
 0x169   :  { %3840 = vmatmul.mubr.bf16.gmra.mrb[64].mxu1 %v3920_v59 }
 0x16a   :  { %v5208_v35 = vpop.permute.xlu1 %1761  ;;  %v5210_v54 = vpop.permute.xlu0 %1765  ;;  %3843 = vmatprep.mubr.msk.bf16.mxu1 %vm4011_vm0, %v7476_v53  ;;  %v3921_v53 = vld [vmem:[%s7185_s0 + $0x120] ss:$0 sps:$4 sm:$0xff]  }
 0x16b   :  { %7507 = vst [vmem:[#allocation102_spill] sm:$0xff] %v5208_v35  ;;  %7508 = vst [vmem:[#allocation103_spill] sm:$0xff] %v5210_v54 }
 0x16c   :  { %2164 = vperm.xlu1 %3873, %v5218_v22   ;;  %2176 = vperm.xlu0 %3874, %v5224_v11  }
 0x16e   :  { %v5227_v54 = vpop.permute.xlu1 %1769  ;;  %v5229_v35 = vpop.permute.xlu0 %1773 }
 0x16f   :  { %7509 = vst [vmem:[#allocation104_spill] sm:$0xff] %v5227_v54  ;;  %7510 = vst [vmem:[#allocation105_spill] sm:$0xff] %v5229_v35  ;;  %v5255_v54 = vld [vmem:[%s7183_s2 + $0x128] sm:$0xff]  ;;  %v5268_v7 = vpop.f32.mrb[0].mxu0 }
 0x170   :  { %2172 = vperm.xlu1 %3873, %v5236_v20   ;;  %2184 = vperm.xlu0 %3874, %v5242_v17   ;;  %7513 = vst [vmem:[#allocation108_spill] sm:$0xff] %v5255_v54  ;;  %7516 = vst [vmem:[#allocation111_spill] sm:$0xff] %v5268_v7 }
 0x171   :  { %3844 = vmatmul.mubr.bf16.gmra.mrb[68].mxu1 %v3921_v53  ;;  %v3701_v53 = vpop.f32.mrb[1].mxu0 }
 0x172   :  { %v5245_v59 = vpop.permute.xlu1 %1777  ;;  %v5247_v35 = vpop.permute.xlu0 %1781  ;;  %v5299_v53 = vld [vmem:[%s7183_s2 + $0x160] sm:$0xff] }
 0x173   :  { %7511 = vst [vmem:[#allocation106_spill] sm:$0xff] %v5245_v59  ;;  %7512 = vst [vmem:[#allocation107_spill] sm:$0xff] %v5247_v35 }
 0x174   :  { %2180 = vperm.xlu1 %3873, %v5255_v54   ;;  %2192 = vperm.xlu0 %3874, %v5261_v18   ;;  %v5279_v54 = vld [vmem:[%s7183_s2 + $0x150] sm:$0xff]  ;;  %7523 = vst [vmem:[#allocation118_spill] sm:$0xff] %v5299_v53 }
 0x175   :  { %7518 = vst [vmem:[#allocation113_spill] sm:$0xff] %v5279_v54 }
 0x176   :  { %v5264_v35 = vpop.permute.xlu1 %1785  ;;  %v5266_v59 = vpop.permute.xlu0 %1789 }
 0x177   :  { %7514 = vst [vmem:[#allocation109_spill] sm:$0xff] %v5264_v35  ;;  %7515 = vst [vmem:[#allocation110_spill] sm:$0xff] %v5266_v59  ;;  %v5282_v35 = vpop.f32.mrb[2].mxu0 }
 0x178   :  { %2188 = vperm.xlu1 %3873, %v5273_v16   ;;  %2200 = vperm.xlu0 %3874, %v5279_v54   ;;  %7519 = vst [vmem:[#allocation114_spill] sm:$0xff] %v5282_v35  ;;  %v3426_v14 = vpack.c.bf16 %v5282_v35, %v5268_v7  ;;  %v3702_v60 = vpop.f32.mrb[3].mxu0  ;;  %v5293_v16 = vld [vmem:[%s7183_s2 + $0x148] sm:$0xff] }
 0x179   :  { %7522 = vst [vmem:[#allocation117_spill] sm:$0xff] %v5293_v16  ;;  %v5309_v35 = vpop.f32.mrb[4].mxu0 }
 0x17a   :  { %v5284_v59 = vpop.permute.xlu1 %1793  ;;  %v5286_v13 = vpop.permute.xlu0 %1797  ;;  %3427 = vst [vmem:[%s7186_s4] sm:$0xff] %v3426_v14   ;;  %7526 = vst [vmem:[#allocation121_spill] sm:$0xff] %v5309_v35 }
 0x17b   :  { %7520 = vst [vmem:[#allocation115_spill] sm:$0xff] %v5284_v59  ;;  %7521 = vst [vmem:[#allocation116_spill] sm:$0xff] %v5286_v13  ;;  %v5314_v13 = vld [vmem:[%s7183_s2 + $0x158] sm:$0xff]  ;;  %v5320_v59 = vld [vmem:[%s7183_s2 + $0x170] sm:$0xff]  ;;  %v3705_v14 = vpop.f32.mrb[5].mxu0 }
 0x17c   :  { %2196 = vperm.xlu1 %3873, %v5293_v16   ;;  %2208 = vperm.xlu0 %3874, %v5299_v53   ;;  %7527 = vst [vmem:[#allocation122_spill] sm:$0xff] %v5314_v13  ;;  %7528 = vst [vmem:[#allocation123_spill] sm:$0xff] %v5320_v59  ;;  %v5340_v14 = vld [vmem:[%s7183_s2 + $0x180] sm:$0xff] }
 0x17d   :  { %7533 = vst [vmem:[#allocation128_spill] sm:$0xff] %v5340_v14 }
 0x17e   :  { %v5305_v7 = vpop.permute.xlu1 %1801  ;;  %v5307_v60 = vpop.permute.xlu0 %1805 }
 0x17f   :  { %7524 = vst [vmem:[#allocation119_spill] sm:$0xff] %v5305_v7  ;;  %7525 = vst [vmem:[#allocation120_spill] sm:$0xff] %v5307_v60  ;;  %v5323_v7 = vpop.f32.mrb[6].mxu0 }
 0x180   :  { %2204 = vperm.xlu1 %3873, %v5314_v13   ;;  %2216 = vperm.xlu0 %3874, %v5320_v59   ;;  %7529 = vst [vmem:[#allocation124_spill] sm:$0xff] %v5323_v7  ;;  %v3431_v53 = vpack.c.bf16 %v5323_v7, %v5309_v35  ;;  %v3706_v54 = vpop.f32.mrb[7].mxu0  ;;  %v5334_v13 = vld [vmem:[%s7183_s2 + $0x168] sm:$0xff] }
 0x181   :  { %7532 = vst [vmem:[#allocation127_spill] sm:$0xff] %v5334_v13  ;;  %v5350_v35 = vpop.f32.mrb[8].mxu0 }
 0x182   :  { %v5325_v60 = vpop.permute.xlu1 %1809  ;;  %v5327_v16 = vpop.permute.xlu0 %1813  ;;  %3603 = vst [vmem:[%s7186_s4 + $0x8] sm:$0xff] %v3431_v53   ;;  %7536 = vst [vmem:[#allocation131_spill] sm:$0xff] %v5350_v35 }
 0x183   :  { %7530 = vst [vmem:[#allocation125_spill] sm:$0xff] %v5325_v60  ;;  %7531 = vst [vmem:[#allocation126_spill] sm:$0xff] %v5327_v16  ;;  %v5355_v16 = vld [vmem:[%s7183_s2 + $0x178] sm:$0xff]  ;;  %v5361_v60 = vld [vmem:[%s7183_s2 + $0x190] sm:$0xff]  ;;  %v3709_v53 = vpop.f32.mrb[9].mxu0 }
 0x184   :  { %2212 = vperm.xlu1 %3873, %v5334_v13   ;;  %2224 = vperm.xlu0 %3874, %v5340_v14   ;;  %7537 = vst [vmem:[#allocation132_spill] sm:$0xff] %v5355_v16  ;;  %7538 = vst [vmem:[#allocation133_spill] sm:$0xff] %v5361_v60  ;;  %v5381_v53 = vld [vmem:[%s7183_s2 + $0x1a0] sm:$0xff] }
 0x185   :  { %7543 = vst [vmem:[#allocation138_spill] sm:$0xff] %v5381_v53 }
 0x186   :  { %v5346_v7 = vpop.permute.xlu1 %1817  ;;  %v5348_v54 = vpop.permute.xlu0 %1821 }
 0x187   :  { %7534 = vst [vmem:[#allocation129_spill] sm:$0xff] %v5346_v7  ;;  %7535 = vst [vmem:[#allocation130_spill] sm:$0xff] %v5348_v54  ;;  %v5364_v7 = vpop.f32.mrb[10].mxu0 }
 0x188   :  { %2220 = vperm.xlu1 %3873, %v5355_v16   ;;  %2232 = vperm.xlu0 %3874, %v5361_v60   ;;  %7539 = vst [vmem:[#allocation134_spill] sm:$0xff] %v5364_v7  ;;  %v3436_v14 = vpack.c.bf16 %v5364_v7, %v5350_v35  ;;  %v3710_v59 = vpop.f32.mrb[11].mxu0  ;;  %v5375_v16 = vld [vmem:[%s7183_s2 + $0x188] sm:$0xff] }
 0x189   :  { %7542 = vst [vmem:[#allocation137_spill] sm:$0xff] %v5375_v16  ;;  %v5391_v35 = vpop.f32.mrb[12].mxu0 }
 0x18a   :  { %v5366_v54 = vpop.permute.xlu1 %1825  ;;  %v5368_v13 = vpop.permute.xlu0 %1829  ;;  %3604 = vst [vmem:[%s7186_s4 + $0x10] sm:$0xff] %v3436_v14   ;;  %7546 = vst [vmem:[#allocation141_spill] sm:$0xff] %v5391_v35 }
 0x18b   :  { %7540 = vst [vmem:[#allocation135_spill] sm:$0xff] %v5366_v54  ;;  %7541 = vst [vmem:[#allocation136_spill] sm:$0xff] %v5368_v13  ;;  %v5396_v13 = vld [vmem:[%s7183_s2 + $0x198] sm:$0xff]  ;;  %v5402_v54 = vld [vmem:[%s7183_s2 + $0x1b0] sm:$0xff]  ;;  %v3713_v14 = vpop.f32.mrb[13].mxu0 }
 0x18c   :  { %2228 = vperm.xlu1 %3873, %v5375_v16   ;;  %2240 = vperm.xlu0 %3874, %v5381_v53   ;;  %7547 = vst [vmem:[#allocation142_spill] sm:$0xff] %v5396_v13  ;;  %7548 = vst [vmem:[#allocation143_spill] sm:$0xff] %v5402_v54  ;;  %v5422_v14 = vld [vmem:[%s7183_s2 + $0x1c0] sm:$0xff] }
 0x18d   :  { %7553 = vst [vmem:[#allocation148_spill] sm:$0xff] %v5422_v14 }
 0x18e   :  { %v5387_v7 = vpop.permute.xlu1 %1833  ;;  %v5389_v59 = vpop.permute.xlu0 %1837 }
 0x18f   :  { %7544 = vst [vmem:[#allocation139_spill] sm:$0xff] %v5387_v7  ;;  %7545 = vst [vmem:[#allocation140_spill] sm:$0xff] %v5389_v59  ;;  %v5405_v7 = vpop.f32.mrb[14].mxu0 }
 0x190   :  { %2236 = vperm.xlu1 %3873, %v5396_v13   ;;  %2248 = vperm.xlu0 %3874, %v5402_v54   ;;  %7549 = vst [vmem:[#allocation144_spill] sm:$0xff] %v5405_v7  ;;  %v3441_v53 = vpack.c.bf16 %v5405_v7, %v5391_v35  ;;  %v3714_v60 = vpop.f32.mrb[15].mxu0  ;;  %v5416_v13 = vld [vmem:[%s7183_s2 + $0x1a8] sm:$0xff] }
 0x191   :  { %7552 = vst [vmem:[#allocation147_spill] sm:$0xff] %v5416_v13  ;;  %v5432_v35 = vpop.f32.mrb[16].mxu0 }
 0x192   :  { %v5407_v59 = vpop.permute.xlu1 %1841  ;;  %v5409_v16 = vpop.permute.xlu0 %1845  ;;  %3605 = vst [vmem:[%s7186_s4 + $0x18] sm:$0xff] %v3441_v53   ;;  %7556 = vst [vmem:[#allocation151_spill] sm:$0xff] %v5432_v35 }
 0x193   :  { %7550 = vst [vmem:[#allocation145_spill] sm:$0xff] %v5407_v59  ;;  %7551 = vst [vmem:[#allocation146_spill] sm:$0xff] %v5409_v16  ;;  %v5437_v16 = vld [vmem:[%s7183_s2 + $0x1b8] sm:$0xff]  ;;  %v5443_v59 = vld [vmem:[%s7183_s2 + $0x1d0] sm:$0xff]  ;;  %v3717_v53 = vpop.f32.mrb[17].mxu0 }
 0x194   :  { %2244 = vperm.xlu1 %3873, %v5416_v13   ;;  %2256 = vperm.xlu0 %3874, %v5422_v14   ;;  %7557 = vst [vmem:[#allocation152_spill] sm:$0xff] %v5437_v16  ;;  %7558 = vst [vmem:[#allocation153_spill] sm:$0xff] %v5443_v59  ;;  %v5463_v53 = vld [vmem:[%s7183_s2 + $0x1e0] sm:$0xff] }
 0x195   :  { %7563 = vst [vmem:[#allocation158_spill] sm:$0xff] %v5463_v53 }
 0x196   :  { %v5428_v7 = vpop.permute.xlu1 %1849  ;;  %v5430_v60 = vpop.permute.xlu0 %1853 }
 0x197   :  { %7554 = vst [vmem:[#allocation149_spill] sm:$0xff] %v5428_v7  ;;  %7555 = vst [vmem:[#allocation150_spill] sm:$0xff] %v5430_v60  ;;  %v5446_v7 = vpop.f32.mrb[18].mxu0 }
 0x198   :  { %2252 = vperm.xlu1 %3873, %v5437_v16   ;;  %2264 = vperm.xlu0 %3874, %v5443_v59   ;;  %7559 = vst [vmem:[#allocation154_spill] sm:$0xff] %v5446_v7  ;;  %v3446_v14 = vpack.c.bf16 %v5446_v7, %v5432_v35  ;;  %v3718_v54 = vpop.f32.mrb[19].mxu0  ;;  %v5457_v16 = vld [vmem:[%s7183_s2 + $0x1c8] sm:$0xff] }
 0x199   :  { %7562 = vst [vmem:[#allocation157_spill] sm:$0xff] %v5457_v16  ;;  %v5473_v35 = vpop.f32.mrb[20].mxu0 }
 0x19a   :  { %v5448_v60 = vpop.permute.xlu1 %1857  ;;  %v5450_v13 = vpop.permute.xlu0 %1861  ;;  %3606 = vst [vmem:[%s7186_s4 + $0x20] sm:$0xff] %v3446_v14   ;;  %7566 = vst [vmem:[#allocation161_spill] sm:$0xff] %v5473_v35 }
 0x19b   :  { %7560 = vst [vmem:[#allocation155_spill] sm:$0xff] %v5448_v60  ;;  %7561 = vst [vmem:[#allocation156_spill] sm:$0xff] %v5450_v13  ;;  %v5478_v13 = vld [vmem:[%s7183_s2 + $0x1d8] sm:$0xff]  ;;  %v5484_v60 = vld [vmem:[%s7183_s2 + $0x1f0] sm:$0xff]  ;;  %v3721_v14 = vpop.f32.mrb[21].mxu0 }
 0x19c   :  { %2260 = vperm.xlu1 %3873, %v5457_v16   ;;  %2272 = vperm.xlu0 %3874, %v5463_v53   ;;  %7567 = vst [vmem:[#allocation162_spill] sm:$0xff] %v5478_v13  ;;  %7568 = vst [vmem:[#allocation163_spill] sm:$0xff] %v5484_v60 }
 0x19e   :  { %v5469_v7 = vpop.permute.xlu1 %1865  ;;  %v5471_v54 = vpop.permute.xlu0 %1869 }
 0x19f   :  { %7564 = vst [vmem:[#allocation159_spill] sm:$0xff] %v5469_v7  ;;  %7565 = vst [vmem:[#allocation160_spill] sm:$0xff] %v5471_v54  ;;  %v5487_v7 = vpop.f32.mrb[22].mxu0 }
 0x1a0   :  { %2268 = vperm.xlu1 %3873, %v5478_v13   ;;  %2280 = vperm.xlu0 %3874, %v5484_v60   ;;  %7569 = vst [vmem:[#allocation164_spill] sm:$0xff] %v5487_v7  ;;  %v3451_v53 = vpack.c.bf16 %v5487_v7, %v5473_v35  ;;  %v3722_v59 = vpop.f32.mrb[23].mxu0  ;;  %v3984_v13 = vld [vmem:[%s7183_s2 + $0x1e8] sm:$0xff]  ;;  %v5501_v60 = vld [vmem:[%s7183_s2 + $0x200] sm:$0xff] }
 0x1a1   :  { %7572 = vst [vmem:[#allocation167_spill] sm:$0xff] %v5501_v60  ;;  %v3986_v59 = vld [vmem:[%s7183_s2 + $0x1f8] sm:$0xff]  ;;  %v5517_v7 = vpop.f32.mrb[24].mxu0 }
 0x1a2   :  { %v5489_v54 = vpop.permute.xlu1 %1873  ;;  %v5491_v16 = vpop.permute.xlu0 %1877  ;;  %3607 = vst [vmem:[%s7186_s4 + $0x28] sm:$0xff] %v3451_v53   ;;  %7575 = vst [vmem:[#allocation170_spill] sm:$0xff] %v5517_v7 }
 0x1a3   :  { %7570 = vst [vmem:[#allocation165_spill] sm:$0xff] %v5489_v54  ;;  %7571 = vst [vmem:[#allocation166_spill] sm:$0xff] %v5491_v16  ;;  %v3725_v35 = vpop.f32.mrb[25].mxu0 }
 0x1a4   :  { %2276 = vperm.xlu1 %3873, %v3984_v13   ;;  %2288 = vperm.xlu0 %3874, %v5501_v60   ;;  %v3987_v13 = vld [vmem:[%s7183_s2 + $0x210] sm:$0xff]  ;;  %v5519_v16 = vpop.f32.mrb[26].mxu0 }
 0x1a5   :  { %7576 = vst [vmem:[#allocation171_spill] sm:$0xff] %v5519_v16  ;;  %v3456_v60 = vpack.c.bf16 %v5519_v16, %v5517_v7  ;;  %v3726_v35 = vpop.f32.mrb[27].mxu0  ;;  %v3990_v16 = vld [vmem:[%s7183_s2 + $0x218] sm:$0xff] }
 0x1a7   :  { %v5507_v14 = vpop.permute.xlu1 %2032  ;;  %v5509_v54 = vpop.permute.xlu0 %2036  ;;  %3608 = vst [vmem:[%s7186_s4 + $0x30] sm:$0xff] %v3456_v60  }
 0x1a8   :  { %7573 = vst [vmem:[#allocation168_spill] sm:$0xff] %v5507_v14  ;;  %7574 = vst [vmem:[#allocation169_spill] sm:$0xff] %v5509_v54  ;;  %2284 = vperm.xlu1 %3873, %v3986_v59   ;;  %2296 = vperm.xlu0 %3874, %v3987_v13   ;;  %v3988_v59 = vld [vmem:[%s7183_s2 + $0x208] sm:$0xff]  ;;  %v3989_v13 = vld [vmem:[%s7183_s2 + $0x220] sm:$0xff] }
 0x1ab   :  { %v5521_v53 = vpop.permute.xlu1 %2040  ;;  %v5523_v14 = vpop.permute.xlu0 %2048 }
 0x1ac   :  { %7577 = vst [vmem:[#allocation172_spill] sm:$0xff] %v5521_v53  ;;  %7578 = vst [vmem:[#allocation173_spill] sm:$0xff] %v5523_v14  ;;  %2292 = vperm.xlu1 %3873, %v3988_v59   ;;  %2304 = vperm.xlu0 %3874, %v3989_v13   ;;  %v3991_v59 = vld [vmem:[%s7183_s2 + $0x230] sm:$0xff]  ;;  %v5546_v13 = vpop.f32.mrb[28].mxu0 }
 0x1ad   :  { %7581 = vst [vmem:[#allocation176_spill] sm:$0xff] %v5546_v13  ;;  %v3729_v35 = vpop.f32.mrb[29].mxu0 }
 0x1ae   :  { %v5548_v7 = vpop.f32.mrb[30].mxu0 }
 0x1af   :  { %v5536_v53 = vpop.permute.xlu1 %2044  ;;  %v5538_v14 = vpop.permute.xlu0 %2056  ;;  %7582 = vst [vmem:[#allocation177_spill] sm:$0xff] %v5548_v7 }
 0x1b0   :  { %7579 = vst [vmem:[#allocation174_spill] sm:$0xff] %v5536_v53  ;;  %7580 = vst [vmem:[#allocation175_spill] sm:$0xff] %v5538_v14  ;;  %2300 = vperm.xlu1 %3873, %v3990_v16   ;;  %2312 = vperm.xlu0 %3874, %v3991_v59   ;;  %v3461_v14 = vpack.c.bf16 %v5548_v7, %v5546_v13  ;;  %v3992_v16 = vld [vmem:[%s7183_s2 + $0x228] sm:$0xff]  ;;  %v3993_v59 = vld [vmem:[%s7183_s2 + $0x240] sm:$0xff]  ;;  %v3730_v35 = vpop.f32.mrb[31].mxu0 }
 0x1b1   :  { %v3994_v7 = vld [vmem:[%s7183_s2 + $0x238] sm:$0xff]  ;;  %v5572_v13 = vpop.f32.mrb[32].mxu0 }
 0x1b2   :  { %3609 = vst [vmem:[%s7186_s4 + $0x38] sm:$0xff] %v3461_v14   ;;  %7587 = vst [vmem:[#allocation182_spill] sm:$0xff] %v5572_v13 }
 0x1b3   :  { %v5550_v60 = vpop.permute.xlu1 %2052  ;;  %v5552_v53 = vpop.permute.xlu0 %2064 }
 0x1b4   :  { %7583 = vst [vmem:[#allocation178_spill] sm:$0xff] %v5550_v60  ;;  %7584 = vst [vmem:[#allocation179_spill] sm:$0xff] %v5552_v53  ;;  %2308 = vperm.xlu1 %3873, %v3992_v16   ;;  %2320 = vperm.xlu0 %3874, %v3993_v59   ;;  %v4013_v16 = vmov 3   ;;  %v3733_v59 = vpop.f32.mrb[33].mxu0 }
 0x1b5   :  { %v5575_v35 = vpop.f32.mrb[34].mxu0 }
 0x1b6   :  { %7588 = vst [vmem:[#allocation183_spill] sm:$0xff] %v5575_v35 }
 0x1b7   :  { %v5565_v60 = vpop.permute.xlu1 %2060  ;;  %v5567_v53 = vpop.permute.xlu0 %2072 }
 0x1b8   :  { %7585 = vst [vmem:[#allocation180_spill] sm:$0xff] %v5565_v60  ;;  %7586 = vst [vmem:[#allocation181_spill] sm:$0xff] %v5567_v53  ;;  %2316 = vperm.xlu1 %3873, %v3994_v7   ;;  %3876 = vset.pattern.permute.xlu0 %v4013_v16  ;;  %v3466_v53 = vpack.c.bf16 %v5575_v35, %v5572_v13  ;;  %v3734_v60 = vpop.f32.mrb[35].mxu0  ;;  %v5615_v13 = vpop.f32.mrb[0].mxu1 }
 0x1b9   :  { %2479 = vperm.xlu0 %3876, %v4904_v49   ;;  %v5592_v59 = vpop.f32.mrb[36].mxu0  ;;  %7600 = vst [vmem:[#allocation195_spill] sm:$0xff] %v5615_v13 }
 0x1ba   :  { %3610 = vst [vmem:[%s7186_s4 + $0x40] sm:$0xff] %v3466_v53   ;;  %7593 = vst [vmem:[#allocation188_spill] sm:$0xff] %v5592_v59 }
 0x1bb   :  { %v5577_v54 = vpop.permute.xlu1 %2068  ;;  %v5579_v14 = vpop.permute.xlu0 %2080 }
 0x1bc   :  { %7589 = vst [vmem:[#allocation184_spill] sm:$0xff] %v5577_v54  ;;  %7590 = vst [vmem:[#allocation185_spill] sm:$0xff] %v5579_v14  ;;  %3875 = vset.pattern.permute.xlu1 %v4013_v16  ;;  %v3737_v16 = vpop.f32.mrb[37].mxu0  ;;  %v7726_v14 = vld [vmem:[#allocation58_spill] sm:$0xff]  ;;  %v7728_v54 = vld [vmem:[#allocation59_spill] sm:$0xff] }
 0x1bd   :  { %2475 = vperm.xlu1 %3875, %v4898_v61   ;;  %2491 = vperm.xlu0 %3876, %v4925_v45   ;;  %v5596_v60 = vpop.f32.mrb[38].mxu0 }
 0x1be   :  { %7594 = vst [vmem:[#allocation189_spill] sm:$0xff] %v5596_v60  ;;  %v3471_v53 = vpack.c.bf16 %v5596_v60, %v5592_v59  ;;  %v3738_v35 = vpop.f32.mrb[39].mxu0 }
 0x1bf   :  { %v5588_v7 = vpop.permute.xlu1 %2076  ;;  %v5590_v49 = vpop.permute.xlu0 %2088 }
 0x1c0   :  { %7591 = vst [vmem:[#allocation186_spill] sm:$0xff] %v5588_v7  ;;  %7592 = vst [vmem:[#allocation187_spill] sm:$0xff] %v5590_v49  ;;  %v5613_v16 = vpop.f32.mrb[40].mxu0  ;;  %v7724_v7 = vld [vmem:[#allocation57_spill] sm:$0xff] }
 0x1c1   :  { %2483 = vperm.xlu1 %3875, %v4919_v56   ;;  %2499 = vperm.xlu0 %3876, %v4946_v52   ;;  %3611 = vst [vmem:[%s7186_s4 + $0x48] sm:$0xff] %v3471_v53   ;;  %7599 = vst [vmem:[#allocation194_spill] sm:$0xff] %v5613_v16  ;;  %v3741_v35 = vpop.f32.mrb[41].mxu0 }
 0x1c2   :  { %v5619_v60 = vpop.f32.mrb[42].mxu0 }
 0x1c3   :  { %v5598_v61 = vpop.permute.xlu1 %2084  ;;  %v5600_v45 = vpop.permute.xlu0 %2096  ;;  %7601 = vst [vmem:[#allocation196_spill] sm:$0xff] %v5619_v60 }
 0x1c4   :  { %7595 = vst [vmem:[#allocation190_spill] sm:$0xff] %v5598_v61  ;;  %7596 = vst [vmem:[#allocation191_spill] sm:$0xff] %v5600_v45  ;;  %v3742_v45 = vpop.f32.mrb[43].mxu0 }
 0x1c5   :  { %2487 = vperm.xlu1 %3875, %v4940_v51   ;;  %2507 = vperm.xlu0 %3876, %v4965_v47   ;;  %v3777_v51 = vpop.f32.mrb[1].mxu1 }
 0x1c6   :  { %v5621_v47 = vpop.f32.mrb[2].mxu1 }
 0x1c7   :  { %v5609_v52 = vpop.permute.xlu1 %2092  ;;  %v5611_v56 = vpop.permute.xlu0 %2104  ;;  %7602 = vst [vmem:[#allocation197_spill] sm:$0xff] %v5621_v47 }
 0x1c8   :  { %7597 = vst [vmem:[#allocation192_spill] sm:$0xff] %v5609_v52  ;;  %7598 = vst [vmem:[#allocation193_spill] sm:$0xff] %v5611_v56  ;;  %v3476_v56 = vpack.c.bf16 %v5619_v60, %v5613_v16  ;;  %v3521_v52 = vpack.c.bf16 %v5621_v47, %v5615_v13  ;;  %v5643_v51 = vpop.f32.mrb[44].mxu0 }
 0x1c9   :  { %2495 = vperm.xlu1 %3875, %v4959_v50   ;;  %2515 = vperm.xlu0 %3876, %v4983_v39   ;;  %v3778_v50 = vpop.f32.mrb[3].mxu1  ;;  %7607 = vst [vmem:[#allocation202_spill] sm:$0xff] %v5643_v51 }
 0x1ca   :  { %3612 = vst [vmem:[%s7186_s4 + $0x50] sm:$0xff] %v3476_v56   ;;  %3621 = vst [vmem:[%s7186_s4 + $0x98] sm:$0xff] %v3521_v52   ;;  %v5645_v45 = vpop.f32.mrb[4].mxu1 }
 0x1cb   :  { %v5623_v59 = vpop.permute.xlu1 %2100  ;;  %v5625_v53 = vpop.permute.xlu0 %2112  ;;  %7608 = vst [vmem:[#allocation203_spill] sm:$0xff] %v5645_v45 }
 0x1cc   :  { %7603 = vst [vmem:[#allocation198_spill] sm:$0xff] %v5623_v59  ;;  %7604 = vst [vmem:[#allocation199_spill] sm:$0xff] %v5625_v53  ;;  %v7702_v53 = vld [vmem:[#allocation112_spill] sm:$0xff]  ;;  %v7718_v59 = vld [vmem:[#allocation55_spill] sm:$0xff] }
 0x1cd   :  { %2503 = vperm.xlu1 %3875, %v4977_v41   ;;  %2523 = vperm.xlu0 %3876, %v5002_v46   ;;  %v3745_v46 = vpop.f32.mrb[45].mxu0  ;;  %v3781_v41 = vpop.f32.mrb[5].mxu1 }
 0x1ce   :  { %v5649_v50 = vpop.f32.mrb[46].mxu0  ;;  %v5651_v56 = vpop.f32.mrb[6].mxu1 }
 0x1cf   :  { %v5639_v39 = vpop.permute.xlu1 %2108  ;;  %v5641_v35 = vpop.permute.xlu0 %2120  ;;  %7609 = vst [vmem:[#allocation204_spill] sm:$0xff] %v5649_v50  ;;  %7610 = vst [vmem:[#allocation205_spill] sm:$0xff] %v5651_v56  ;;  %v3481_v13 = vpack.c.bf16 %v5649_v50, %v5643_v51  ;;  %v3526_v60 = vpack.c.bf16 %v5651_v56, %v5645_v45 }
 0x1d0   :  { %7605 = vst [vmem:[#allocation200_spill] sm:$0xff] %v5639_v39  ;;  %7606 = vst [vmem:[#allocation201_spill] sm:$0xff] %v5641_v35  ;;  %v3746_v16 = vpop.f32.mrb[47].mxu0  ;;  %v7697_v35 = vld [vmem:[#allocation45_spill] sm:$0xff]  ;;  %v7700_v39 = vld [vmem:[#allocation47_spill] sm:$0xff] }
 0x1d1   :  { %2511 = vperm.xlu1 %3875, %v4996_v48   ;;  %2531 = vperm.xlu0 %3876, %v5020_v44   ;;  %v3782_v48 = vpop.f32.mrb[7].mxu1  ;;  %3613 = vst [vmem:[%s7186_s4 + $0x58] sm:$0xff] %v3481_v13   ;;  %3622 = vst [vmem:[%s7186_s4 + $0xa0] sm:$0xff] %v3526_v60   ;;  %v5673_v41 = vpop.f32.mrb[48].mxu0 }
 0x1d2   :  { %7615 = vst [vmem:[#allocation210_spill] sm:$0xff] %v5673_v41  ;;  %v5675_v16 = vpop.f32.mrb[8].mxu1 }
 0x1d3   :  { %v5653_v47 = vpop.permute.xlu1 %2116  ;;  %v5655_v52 = vpop.permute.xlu0 %2128  ;;  %7616 = vst [vmem:[#allocation211_spill] sm:$0xff] %v5675_v16 }
 0x1d4   :  { %7611 = vst [vmem:[#allocation206_spill] sm:$0xff] %v5653_v47  ;;  %7612 = vst [vmem:[#allocation207_spill] sm:$0xff] %v5655_v52 }
 0x1d5   :  { %2519 = vperm.xlu1 %3875, %v5014_v43   ;;  %2539 = vperm.xlu0 %3876, %v5039_v31   ;;  %v3749_v31 = vpop.f32.mrb[49].mxu0  ;;  %v3785_v43 = vpop.f32.mrb[9].mxu1 }
 0x1d6   :  { %v5679_v48 = vpop.f32.mrb[50].mxu0  ;;  %v5681_v13 = vpop.f32.mrb[10].mxu1 }
 0x1d7   :  { %v5669_v44 = vpop.permute.xlu1 %2124  ;;  %v5671_v46 = vpop.permute.xlu0 %2136  ;;  %7617 = vst [vmem:[#allocation212_spill] sm:$0xff] %v5679_v48  ;;  %7618 = vst [vmem:[#allocation213_spill] sm:$0xff] %v5681_v13  ;;  %v3486_v45 = vpack.c.bf16 %v5679_v48, %v5673_v41  ;;  %v3531_v50 = vpack.c.bf16 %v5681_v13, %v5675_v16 }
 0x1d8   :  { %7613 = vst [vmem:[#allocation208_spill] sm:$0xff] %v5669_v44  ;;  %7614 = vst [vmem:[#allocation209_spill] sm:$0xff] %v5671_v46  ;;  %v3750_v51 = vpop.f32.mrb[51].mxu0  ;;  %v7695_v46 = vld [vmem:[#allocation43_spill] sm:$0xff]  ;;  %v7696_v44 = vld [vmem:[#allocation44_spill] sm:$0xff] }
 0x1d9   :  { %2527 = vperm.xlu1 %3875, %v5033_v42   ;;  %2547 = vperm.xlu0 %3876, %v5057_v37   ;;  %v3786_v42 = vpop.f32.mrb[11].mxu1  ;;  %3614 = vst [vmem:[%s7186_s4 + $0x60] sm:$0xff] %v3486_v45   ;;  %3623 = vst [vmem:[%s7186_s4 + $0xa8] sm:$0xff] %v3531_v50   ;;  %v5703_v43 = vpop.f32.mrb[52].mxu0 }
 0x1da   :  { %7623 = vst [vmem:[#allocation218_spill] sm:$0xff] %v5703_v43  ;;  %v5705_v51 = vpop.f32.mrb[12].mxu1 }
 0x1db   :  { %v5683_v56 = vpop.permute.xlu1 %2132  ;;  %v5685_v60 = vpop.permute.xlu0 %2144  ;;  %7624 = vst [vmem:[#allocation219_spill] sm:$0xff] %v5705_v51 }
 0x1dc   :  { %7619 = vst [vmem:[#allocation214_spill] sm:$0xff] %v5683_v56  ;;  %7620 = vst [vmem:[#allocation215_spill] sm:$0xff] %v5685_v60 }
 0x1dd   :  { %2535 = vperm.xlu1 %3875, %v5051_v40   ;;  %2555 = vperm.xlu0 %3876, %v5076_v27   ;;  %v3753_v27 = vpop.f32.mrb[53].mxu0  ;;  %v3789_v40 = vpop.f32.mrb[13].mxu1 }
 0x1de   :  { %v5709_v42 = vpop.f32.mrb[54].mxu0  ;;  %v5711_v45 = vpop.f32.mrb[14].mxu1 }
 0x1df   :  { %v5699_v37 = vpop.permute.xlu1 %2140  ;;  %v5701_v31 = vpop.permute.xlu0 %2152  ;;  %7625 = vst [vmem:[#allocation220_spill] sm:$0xff] %v5709_v42  ;;  %7626 = vst [vmem:[#allocation221_spill] sm:$0xff] %v5711_v45  ;;  %v3491_v16 = vpack.c.bf16 %v5709_v42, %v5703_v43  ;;  %v3536_v48 = vpack.c.bf16 %v5711_v45, %v5705_v51 }
 0x1e0   :  { %7621 = vst [vmem:[#allocation216_spill] sm:$0xff] %v5699_v37  ;;  %7622 = vst [vmem:[#allocation217_spill] sm:$0xff] %v5701_v31  ;;  %v3754_v41 = vpop.f32.mrb[55].mxu0  ;;  %v7691_v31 = vld [vmem:[#allocation41_spill] sm:$0xff]  ;;  %v7692_v37 = vld [vmem:[#allocation42_spill] sm:$0xff] }
 0x1e1   :  { %2543 = vperm.xlu1 %3875, %v5070_v38   ;;  %2563 = vperm.xlu0 %3876, %v5094_v33   ;;  %v3790_v38 = vpop.f32.mrb[15].mxu1  ;;  %3615 = vst [vmem:[%s7186_s4 + $0x68] sm:$0xff] %v3491_v16   ;;  %3624 = vst [vmem:[%s7186_s4 + $0xb0] sm:$0xff] %v3536_v48   ;;  %v5733_v40 = vpop.f32.mrb[56].mxu0 }
 0x1e2   :  { %7631 = vst [vmem:[#allocation226_spill] sm:$0xff] %v5733_v40  ;;  %v5735_v41 = vpop.f32.mrb[16].mxu1 }
 0x1e3   :  { %v5713_v13 = vpop.permute.xlu1 %2148  ;;  %v5715_v50 = vpop.permute.xlu0 %2160  ;;  %7632 = vst [vmem:[#allocation227_spill] sm:$0xff] %v5735_v41 }
 0x1e4   :  { %7627 = vst [vmem:[#allocation222_spill] sm:$0xff] %v5713_v13  ;;  %7628 = vst [vmem:[#allocation223_spill] sm:$0xff] %v5715_v50  ;;  %v7686_v50 = vld [vmem:[#allocation38_spill] sm:$0xff]  ;;  %v7690_v13 = vld [vmem:[#allocation40_spill] sm:$0xff] }
 0x1e5   :  { %2551 = vperm.xlu1 %3875, %v5088_v36   ;;  %2571 = vperm.xlu0 %3876, %v5113_v23   ;;  %v3757_v23 = vpop.f32.mrb[57].mxu0  ;;  %v3793_v36 = vpop.f32.mrb[17].mxu1 }
 0x1e6   :  { %v5739_v38 = vpop.f32.mrb[58].mxu0  ;;  %v5741_v16 = vpop.f32.mrb[18].mxu1 }
 0x1e7   :  { %v5729_v33 = vpop.permute.xlu1 %2156  ;;  %v5731_v27 = vpop.permute.xlu0 %2168  ;;  %7633 = vst [vmem:[#allocation228_spill] sm:$0xff] %v5739_v38  ;;  %7634 = vst [vmem:[#allocation229_spill] sm:$0xff] %v5741_v16  ;;  %v3496_v51 = vpack.c.bf16 %v5739_v38, %v5733_v40  ;;  %v3541_v42 = vpack.c.bf16 %v5741_v16, %v5735_v41  ;;  %v7682_v40 = vld [vmem:[#allocation113_spill] sm:$0xff] }
 0x1e8   :  { %7629 = vst [vmem:[#allocation224_spill] sm:$0xff] %v5729_v33  ;;  %7630 = vst [vmem:[#allocation225_spill] sm:$0xff] %v5731_v27  ;;  %v3758_v43 = vpop.f32.mrb[59].mxu0  ;;  %v7684_v27 = vld [vmem:[#allocation36_spill] sm:$0xff]  ;;  %v7685_v33 = vld [vmem:[#allocation37_spill] sm:$0xff] }
 0x1e9   :  { %2559 = vperm.xlu1 %3875, %v5107_v34   ;;  %2579 = vperm.xlu0 %3876, %v5131_v29   ;;  %v3794_v34 = vpop.f32.mrb[19].mxu1  ;;  %3616 = vst [vmem:[%s7186_s4 + $0x70] sm:$0xff] %v3496_v51   ;;  %3625 = vst [vmem:[%s7186_s4 + $0xb8] sm:$0xff] %v3541_v42   ;;  %v5763_v36 = vpop.f32.mrb[60].mxu0 }
 0x1ea   :  { %7639 = vst [vmem:[#allocation234_spill] sm:$0xff] %v5763_v36  ;;  %v5765_v43 = vpop.f32.mrb[20].mxu1 }
 0x1eb   :  { %v5743_v45 = vpop.permute.xlu1 %2164  ;;  %v5745_v48 = vpop.permute.xlu0 %2176  ;;  %7640 = vst [vmem:[#allocation235_spill] sm:$0xff] %v5765_v43 }
 0x1ec   :  { %7635 = vst [vmem:[#allocation230_spill] sm:$0xff] %v5743_v45  ;;  %7636 = vst [vmem:[#allocation231_spill] sm:$0xff] %v5745_v48  ;;  %v7683_v48 = vld [vmem:[#allocation35_spill] sm:$0xff] }
 0x1ed   :  { %2567 = vperm.xlu1 %3875, %v5125_v32   ;;  %2587 = vperm.xlu0 %3876, %v5150_v19   ;;  %v3761_v19 = vpop.f32.mrb[61].mxu0  ;;  %v3797_v32 = vpop.f32.mrb[21].mxu1 }
 0x1ee   :  { %v5769_v34 = vpop.f32.mrb[62].mxu0  ;;  %v5771_v51 = vpop.f32.mrb[22].mxu1 }
 0x1ef   :  { %v5759_v29 = vpop.permute.xlu1 %2172  ;;  %v5761_v23 = vpop.permute.xlu0 %2184  ;;  %7641 = vst [vmem:[#allocation236_spill] sm:$0xff] %v5769_v34  ;;  %7642 = vst [vmem:[#allocation237_spill] sm:$0xff] %v5771_v51  ;;  %v3501_v41 = vpack.c.bf16 %v5769_v34, %v5763_v36  ;;  %v3546_v38 = vpack.c.bf16 %v5771_v51, %v5765_v43 }
 0x1f0   :  { %7637 = vst [vmem:[#allocation232_spill] sm:$0xff] %v5759_v29  ;;  %7638 = vst [vmem:[#allocation233_spill] sm:$0xff] %v5761_v23  ;;  %v3762_v23 = vpop.f32.mrb[63].mxu0 }
 0x1f1   :  { %2575 = vperm.xlu1 %3875, %v5144_v30   ;;  %2595 = vperm.xlu0 %3876, %v5168_v25   ;;  %v3798_v30 = vpop.f32.mrb[23].mxu1  ;;  %3617 = vst [vmem:[%s7186_s4 + $0x78] sm:$0xff] %v3501_v41   ;;  %3626 = vst [vmem:[%s7186_s4 + $0xc0] sm:$0xff] %v3546_v38   ;;  %v5793_v32 = vpop.f32.mrb[64].mxu0 }
 0x1f2   :  { %7647 = vst [vmem:[#allocation242_spill] sm:$0xff] %v5793_v32  ;;  %v5795_v23 = vpop.f32.mrb[24].mxu1 }
 0x1f3   :  { %v5773_v16 = vpop.permute.xlu1 %2180  ;;  %v5775_v42 = vpop.permute.xlu0 %2192  ;;  %7648 = vst [vmem:[#allocation243_spill] sm:$0xff] %v5795_v23 }
 0x1f4   :  { %7643 = vst [vmem:[#allocation238_spill] sm:$0xff] %v5773_v16  ;;  %7644 = vst [vmem:[#allocation239_spill] sm:$0xff] %v5775_v42 }
 0x1f5   :  { %2583 = vperm.xlu1 %3875, %v5162_v28   ;;  %2603 = vperm.xlu0 %3876, %v5187_v15   ;;  %v3765_v15 = vpop.f32.mrb[65].mxu0  ;;  %v3801_v28 = vpop.f32.mrb[25].mxu1 }
 0x1f6   :  { %v5799_v30 = vpop.f32.mrb[66].mxu0  ;;  %v5801_v41 = vpop.f32.mrb[26].mxu1 }
 0x1f7   :  { %v5789_v25 = vpop.permute.xlu1 %2188  ;;  %v5791_v19 = vpop.permute.xlu0 %2200  ;;  %7649 = vst [vmem:[#allocation244_spill] sm:$0xff] %v5799_v30  ;;  %7650 = vst [vmem:[#allocation245_spill] sm:$0xff] %v5801_v41  ;;  %v3506_v43 = vpack.c.bf16 %v5799_v30, %v5793_v32  ;;  %v7662_v30 = vld [vmem:[#allocation21_spill] sm:$0xff] }
 0x1f8   :  { %7645 = vst [vmem:[#allocation240_spill] sm:$0xff] %v5789_v25  ;;  %7646 = vst [vmem:[#allocation241_spill] sm:$0xff] %v5791_v19  ;;  %v3551_v19 = vpack.c.bf16 %v5801_v41, %v5795_v23  ;;  %v3766_v25 = vpop.f32.mrb[67].mxu0  ;;  %v7656_v41 = vld [vmem:[#allocation13_spill] sm:$0xff] }
 0x1f9   :  { %2591 = vperm.xlu1 %3875, %v5181_v26   ;;  %2611 = vperm.xlu0 %3876, %v5205_v21   ;;  %v3802_v26 = vpop.f32.mrb[27].mxu1  ;;  %v5814_v21 = vld [vmem:[%s7187_s3] ss:$0 sm:$0xff]  ;;  %v5818_v15 = vpop.f32.mrb[68].mxu0  ;;  %3618 = vst [vmem:[%s7186_s4 + $0x80] sm:$0xff] %v3506_v43  }
 0x1fa   :  { %7653 = vst [vmem:[#allocation248_spill] sm:$0xff] %v5818_v15  ;;  %3627 = vst [vmem:[%s7186_s4 + $0xc8] sm:$0xff] %v3551_v19   ;;  %v3769_v25 = vpop.f32.mrb[69].mxu0  ;;  %v5836_v23 = vpop.f32.mrb[28].mxu1  ;;  %v5854_v34 = vmul.f32 %v5814_v21, %v7662_v30  ;;  %v7667_v30 = vld [vmem:[#allocation27_spill] sm:$0xff]  ;;  %v5994_v45 = vmul.f32 %v5814_v21, %v7683_v48  ;;  %v6094_v61 = vmul.f32 %v5814_v21, %v7718_v59 }
 0x1fb   :  { %v5803_v51 = vpop.permute.xlu1 %2196  ;;  %v5805_v38 = vpop.permute.xlu0 %2208  ;;  %7658 = vst [vmem:[#allocation251_spill] sm:$0xff] %v5836_v23  ;;  %v7661_v25 = vld [vmem:[#allocation18_spill] sm:$0xff]  ;;  %v6114_v59 = vmul.f32 %v5814_v21, %v7728_v54  ;;  %v7737_v54 = vld [vmem:[#allocation117_spill] sm:$0xff] }
 0x1fc   :  { %7651 = vst [vmem:[#allocation246_spill] sm:$0xff] %v5803_v51  ;;  %7652 = vst [vmem:[#allocation247_spill] sm:$0xff] %v5805_v38  ;;  %v7659_v38 = vld [vmem:[#allocation14_spill] sm:$0xff]  ;;  %v7660_v51 = vld [vmem:[#allocation17_spill] sm:$0xff] }
 0x1fd   :  { %2599 = vperm.xlu1 %3875, %v5199_v24   ;;  %2619 = vperm.xlu0 %3876, %v5224_v11   ;;  %v5832_v24 = vmul.f32 %v5814_v21, %v7656_v41  ;;  %v5834_v11 = vpop.f32.mrb[70].mxu0  ;;  %v5840_v43 = vmul.f32 %v5814_v21, %v7659_v38  ;;  %v5844_v19 = vmul.f32 %v5814_v21, %v7660_v51  ;;  %v7663_v38 = vld [vmem:[#allocation22_spill] sm:$0xff]  ;;  %v7664_v51 = vld [vmem:[#allocation25_spill] sm:$0xff] }
 0x1fe   :  { %7657 = vst [vmem:[#allocation13_spill] sm:$0xff] %v5834_v11  ;;  %v3770_v41 = vpop.f32.mrb[71].mxu0  ;;  %v5858_v32 = vmul.f32 %v5814_v21, %v7663_v38  ;;  %v5862_v42 = vmul.f32 %v5814_v21, %v7664_v51  ;;  %v5884_v38 = vmul.f32 %v5814_v21, %v4539_v0  ;;  %7719 = vst [vmem:[#allocation38_spill] sm:$0xff] %v6094_v61 }
 0x1ff   :  { %v5826_v28 = vpop.permute.xlu1 %2204  ;;  %v5828_v26 = vpop.permute.xlu0 %2216  ;;  %v5880_v41 = vmul.f32 %v5814_v21, %v4537_v63  ;;  %v3511_v63 = vpack.c.bf16 %v5834_v11, %v5818_v15  ;;  %7729 = vst [vmem:[#allocation44_spill] sm:$0xff] %v6114_v59  ;;  %v7738_v59 = vld [vmem:[#allocation123_spill] sm:$0xff] }
 0x200   :  { %7654 = vst [vmem:[#allocation249_spill] sm:$0xff] %v5826_v28  ;;  %7655 = vst [vmem:[#allocation250_spill] sm:$0xff] %v5828_v26  ;;  %v5848_v28 = vmul.f32 %v5814_v21, %v7661_v25  ;;  %v3805_v26 = vpop.f32.mrb[29].mxu1  ;;  %v7665_v25 = vld [vmem:[#allocation26_spill] sm:$0xff]  ;;  %v5900_v36 = vpop.f32.mrb[72].mxu0 }
 0x201   :  { %2607 = vperm.xlu1 %3875, %v5218_v22   ;;  %2627 = vperm.xlu0 %3876, %v5242_v17   ;;  %v5866_v16 = vmul.f32 %v5814_v21, %v7665_v25  ;;  %v5868_v22 = vpop.f32.mrb[30].mxu1  ;;  %v5872_v17 = vmul.f32 %v5814_v21, %v4527_v57  ;;  %v5876_v26 = vmul.f32 %v5814_v21, %v7667_v30 }
 0x202   :  { %7666 = vst [vmem:[#allocation14_spill] sm:$0xff] %v5868_v22  ;;  %v5892_v57 = vmul.f32 %v5814_v21, %v4547_v58  ;;  %v5896_v30 = vmul.f32 %v5814_v21, %v4549_v62  ;;  %7670 = vst [vmem:[#allocation21_spill] sm:$0xff] %v5900_v36  ;;  %v3556_v0 = vpack.c.bf16 %v5868_v22, %v5836_v23  ;;  %v3806_v29 = vpop.f32.mrb[31].mxu1  ;;  %v7676_v22 = vld [vmem:[#allocation31_spill] sm:$0xff] }
 0x203   :  { %v5886_v51 = vpop.permute.xlu1 %2212  ;;  %v5888_v25 = vpop.permute.xlu0 %2224  ;;  %v5910_v58 = vmul.f32 %v5814_v21, %v4562_v55  ;;  %v5914_v62 = vmul.f32 %v5814_v21, %v4568_v3  ;;  %v5920_v29 = vmul.f32 %v5814_v21, %v4570_v6  ;;  %v5928_v55 = vmul.f32 %v5814_v21, %v4581_v5  ;;  %3619 = vst [vmem:[%s7186_s4 + $0x88] sm:$0xff] %v3511_v63   ;;  %v7674_v63 = vld [vmem:[#allocation29_spill] sm:$0xff] }
 0x204   :  { %7668 = vst [vmem:[#allocation17_spill] sm:$0xff] %v5886_v51  ;;  %7669 = vst [vmem:[#allocation18_spill] sm:$0xff] %v5888_v25  ;;  %v5906_v25 = vmul.f32 %v5814_v21, %v4560_v4  ;;  %v3773_v51 = vpop.f32.mrb[73].mxu0  ;;  %v5924_v4 = vmul.f32 %v5814_v21, %v4579_v2  ;;  %v5932_v3 = vmul.f32 %v5814_v21, %v4585_v8  ;;  %v5976_v23 = vpop.f32.mrb[32].mxu1 }
 0x205   :  { %2615 = vperm.xlu1 %3875, %v5236_v20   ;;  %2635 = vperm.xlu0 %3876, %v5261_v18   ;;  %3628 = vst [vmem:[%s7186_s4 + $0xd0] sm:$0xff] %v3556_v0   ;;  %v5942_v6 = vmul.f32 %v5814_v21, %v4587_v1  ;;  %v5946_v2 = vmul.f32 %v5814_v21, %v4596_v10  ;;  %v7673_v51 = vld [vmem:[#allocation28_spill] sm:$0xff]  ;;  %v7675_v0 = vld [vmem:[#allocation30_spill] sm:$0xff]  ;;  %7677 = vst [vmem:[#allocation26_spill] sm:$0xff] %v5976_v23 }
 0x206   :  { %v5950_v5 = vmul.f32 %v5814_v21, %v4598_v9  ;;  %v5954_v8 = vmul.f32 %v5814_v21, %v4602_v12  ;;  %v5962_v1 = vmul.f32 %v5814_v21, %v7673_v51  ;;  %v5966_v10 = vmul.f32 %v5814_v21, %v7674_v63  ;;  %v7679_v51 = vld [vmem:[#allocation33_spill] sm:$0xff]  ;;  %v7680_v63 = vld [vmem:[#allocation34_spill] sm:$0xff] }
 0x207   :  { %v5956_v18 = vpop.permute.xlu1 %2220  ;;  %v5958_v20 = vpop.permute.xlu0 %2232  ;;  %v5970_v9 = vmul.f32 %v5814_v21, %v7675_v0  ;;  %v5974_v12 = vmul.f32 %v5814_v21, %v7676_v22  ;;  %v5984_v11 = vmul.f32 %v5814_v21, %v7679_v51  ;;  %v5988_v15 = vmul.f32 %v5814_v21, %v7680_v63  ;;  %v7681_v0 = vld [vmem:[#allocation108_spill] sm:$0xff] }
 0x208   :  { %7671 = vst [vmem:[#allocation22_spill] sm:$0xff] %v5956_v18  ;;  %7672 = vst [vmem:[#allocation25_spill] sm:$0xff] %v5958_v20  ;;  %v7678_v18 = vld [vmem:[#allocation32_spill] sm:$0xff]  ;;  %v3809_v22 = vpop.f32.mrb[33].mxu1  ;;  %v6002_v51 = vmul.f32 %v5814_v21, %v7685_v33  ;;  %v6006_v63 = vmul.f32 %v5814_v21, %v7686_v50  ;;  %v6022_v33 = vmul.f32 %v5814_v21, %v7691_v31 }
 0x209   :  { %v5980_v20 = vmul.f32 %v5814_v21, %v7678_v18  ;;  %2623 = vperm.xlu1 %3875, %v7681_v0   ;;  %2643 = vperm.xlu0 %3876, %v7682_v40   ;;  %v5998_v18 = vmul.f32 %v5814_v21, %v7684_v27  ;;  %v6008_v0 = vpop.f32.mrb[74].mxu0  ;;  %v6010_v40 = vpop.f32.mrb[34].mxu1  ;;  %v7689_v22 = vld [vmem:[#allocation39_spill] sm:$0xff]  ;;  %v6018_v27 = vmul.f32 %v5814_v21, %v7690_v13 }
 0x20a   :  { %7687 = vst [vmem:[#allocation27_spill] sm:$0xff] %v6008_v0  ;;  %7688 = vst [vmem:[#allocation28_spill] sm:$0xff] %v6010_v40  ;;  %v6014_v48 = vmul.f32 %v5814_v21, %v7689_v22  ;;  %v6026_v50 = vmul.f32 %v5814_v21, %v7692_v37  ;;  %v6034_v22 = vmul.f32 %v5814_v21, %v7695_v46  ;;  %v3774_v37 = vpop.f32.mrb[75].mxu0  ;;  %v3810_v47 = vpop.f32.mrb[35].mxu1 }
 0x20b   :  { %v6028_v60 = vpop.permute.xlu1 %2228  ;;  %v6030_v56 = vpop.permute.xlu0 %2240  ;;  %v6038_v13 = vmul.f32 %v5814_v21, %v7696_v44  ;;  %v3516_v31 = vpack.c.bf16 %v6008_v0, %v5900_v36  ;;  %v3561_v52 = vpack.c.bf16 %v6010_v40, %v5976_v23  ;;  %v6054_v44 = vmul.f32 %v5814_v21, %v7700_v39  ;;  %v7703_v0 = vld [vmem:[#allocation118_spill] sm:$0xff]  ;;  %v7704_v36 = vld [vmem:[#allocation48_spill] sm:$0xff]  ;;  %v7706_v47 = vld [vmem:[#allocation49_spill] sm:$0xff] }
 0x20c   :  { %7693 = vst [vmem:[#allocation29_spill] sm:$0xff] %v6028_v60  ;;  %7694 = vst [vmem:[#allocation30_spill] sm:$0xff] %v6030_v56  ;;  %v6046_v60 = vmul.f32 %v5814_v21, %v7697_v35  ;;  %v7699_v56 = vld [vmem:[#allocation46_spill] sm:$0xff]  ;;  %v6060_v37 = vmul.f32 %v5814_v21, %v7704_v36  ;;  %v6064_v35 = vmul.f32 %v5814_v21, %v7706_v47  ;;  %v7710_v23 = vld [vmem:[#allocation51_spill] sm:$0xff] }
 0x20d   :  { %v6050_v46 = vmul.f32 %v5814_v21, %v7699_v56  ;;  %7701 = vst [vmem:[#allocation32_spill] sm:$0xff] %v6054_v44  ;;  %2631 = vperm.xlu1 %3875, %v7702_v53   ;;  %2651 = vperm.xlu0 %3876, %v7703_v0   ;;  %v7708_v40 = vld [vmem:[#allocation50_spill] sm:$0xff]  ;;  %v6072_v39 = vmul.f32 %v5814_v21, %v7710_v23  ;;  %3620 = vst [vmem:[%s7186_s4 + $0x90] sm:$0xff] %v3516_v31   ;;  %v7712_v53 = vld [vmem:[#allocation52_spill] sm:$0xff] }
 0x20e   :  { %7698 = vst [vmem:[#allocation31_spill] sm:$0xff] %v6046_v60  ;;  %7705 = vst [vmem:[#allocation33_spill] sm:$0xff] %v6060_v37  ;;  %v6068_v56 = vmul.f32 %v5814_v21, %v7708_v40  ;;  %v6082_v36 = vmul.f32 %v5814_v21, %v7712_v53  ;;  %v7714_v0 = vld [vmem:[#allocation53_spill] sm:$0xff]  ;;  %v7716_v47 = vld [vmem:[#allocation54_spill] sm:$0xff] }
 0x20f   :  { %7707 = vst [vmem:[#allocation34_spill] sm:$0xff] %v6064_v35  ;;  %7711 = vst [vmem:[#allocation113_spill] sm:$0xff] %v6072_v39  ;;  %v6086_v40 = vmul.f32 %v5814_v21, %v7714_v0  ;;  %v6090_v23 = vmul.f32 %v5814_v21, %v7716_v47  ;;  %v6096_v31 = vpop.permute.xlu1 %2236  ;;  %v6098_v49 = vpop.permute.xlu0 %2248  ;;  %v6106_v0 = vmul.f32 %v5814_v21, %v7724_v7  ;;  %v7733_v7 = vld [vmem:[#allocation61_spill] sm:$0xff]  ;;  %v7741_v39 = vld [vmem:[#allocation64_spill] sm:$0xff] }
 0x210   :  { %7709 = vst [vmem:[#allocation108_spill] sm:$0xff] %v6068_v56  ;;  %3629 = vst [vmem:[%s7186_s4 + $0xd8] sm:$0xff] %v3561_v52   ;;  %v7722_v52 = vld [vmem:[#allocation56_spill] sm:$0xff]  ;;  %v6110_v47 = vmul.f32 %v5814_v21, %v7726_v14  ;;  %v7735_v14 = vld [vmem:[#allocation62_spill] sm:$0xff] }
 0x211   :  { %7713 = vst [vmem:[#allocation35_spill] sm:$0xff] %v6082_v36  ;;  %7715 = vst [vmem:[#allocation36_spill] sm:$0xff] %v6086_v40  ;;  %v6102_v53 = vmul.f32 %v5814_v21, %v7722_v52  ;;  %v7731_v52 = vld [vmem:[#allocation60_spill] sm:$0xff]  ;;  %2639 = vperm.xlu1 %3875, %v7737_v54   ;;  %2659 = vperm.xlu0 %3876, %v7738_v59   ;;  %v7739_v40 = vld [vmem:[#allocation63_spill] sm:$0xff] }
 0x212   :  { %7717 = vst [vmem:[#allocation37_spill] sm:$0xff] %v6090_v23  ;;  %7720 = vst [vmem:[#allocation39_spill] sm:$0xff] %v6096_v31  ;;  %v6119_v31 = vld [vmem:[%s7187_s3 + $0x1] ss:$0 sm:$0xff]  ;;  %v6125_v61 = vmul.f32 %v5814_v21, %v7731_v52  ;;  %v6139_v23 = vmul.f32 %v5814_v21, %v7739_v40  ;;  %v6143_v52 = vmul.f32 %v5814_v21, %v7741_v39  ;;  %v7748_v59 = vld [vmem:[#allocation67_spill] sm:$0xff] }
 0x213   :  { %7721 = vst [vmem:[#allocation40_spill] sm:$0xff] %v6098_v49  ;;  %7723 = vst [vmem:[#allocation41_spill] sm:$0xff] %v6102_v53  ;;  %v6121_v49 = vpop.f32.mrb[36].mxu1  ;;  %v7750_v40 = vld [vmem:[#allocation10_spill] sm:$0xff]  ;;  %v6167_v36 = vpop.permute.xlu0 %2256  ;;  %v7756_v35 = vld [vmem:[#allocation16_spill] sm:$0xff] }
 0x214   :  { %7725 = vst [vmem:[#allocation42_spill] sm:$0xff] %v6106_v0  ;;  %7727 = vst [vmem:[#allocation43_spill] sm:$0xff] %v6110_v47  ;;  %v6129_v0 = vmul.f32 %v5814_v21, %v7733_v7  ;;  %v6133_v47 = vmul.f32 %v5814_v21, %v7735_v14  ;;  %v3813_v53 = vpop.f32.mrb[37].mxu1  ;;  %v7758_v44 = vld [vmem:[#allocation68_spill] sm:$0xff] }
 0x215   :  { %7730 = vst [vmem:[#allocation45_spill] sm:$0xff] %v6121_v49  ;;  %7732 = vst [vmem:[#allocation46_spill] sm:$0xff] %v6125_v61  ;;  %v7743_v61 = vld [vmem:[#allocation65_spill] sm:$0xff]  ;;  %v6153_v54 = vpop.f32.mrb[38].mxu1  ;;  %v6157_v53 = vmul.f32 %v5814_v21, %v7748_v59  ;;  %v1888_v59 = vmul.f32 %v6119_v31, %v7756_v35  ;;  %v7762_v37 = vld [vmem:[#allocation4_spill] sm:$0xff] }
 0x216   :  { %7734 = vst [vmem:[#allocation47_spill] sm:$0xff] %v6129_v0  ;;  %7736 = vst [vmem:[#allocation112_spill] sm:$0xff] %v6133_v47  ;;  %v6147_v7 = vmul.f32 %v5814_v21, %v7743_v61  ;;  %v7745_v0 = vld [vmem:[#allocation66_spill] sm:$0xff]  ;;  %v7751_v47 = vld [vmem:[#allocation9_spill] sm:$0xff] }
 0x217   :  { %7740 = vst [vmem:[#allocation118_spill] sm:$0xff] %v6139_v23  ;;  %7742 = vst [vmem:[#allocation48_spill] sm:$0xff] %v6143_v52  ;;  %v6151_v14 = vmul.f32 %v5814_v21, %v7745_v0  ;;  %v1884_v23 = vmul.f32 %v6119_v31, %v7750_v40  ;;  %v1886_v39 = vmul.f32 %v6119_v31, %v7751_v47  ;;  %v7752_v52 = vld [vmem:[#allocation12_spill] sm:$0xff]  ;;  %v7755_v0 = vld [vmem:[#allocation11_spill] sm:$0xff]  ;;  %v3814_v47 = vpop.f32.mrb[39].mxu1 }
 0x218   :  { %7744 = vst [vmem:[#allocation49_spill] sm:$0xff] %v6147_v7  ;;  %7747 = vst [vmem:[#allocation51_spill] sm:$0xff] %v6153_v54  ;;  %v1885_v61 = vmul.f32 %v6119_v31, %v7752_v52  ;;  %v6165_v7 = vpop.permute.xlu1 %2244  ;;  %v3566_v40 = vpack.c.bf16 %v6153_v54, %v6121_v49  ;;  %v6179_v52 = vmul.f32 %v5814_v21, %v7758_v44  ;;  %v7764_v35 = vld [vmem:[#allocation122_spill] sm:$0xff]  ;;  %v7765_v60 = vld [vmem:[#allocation128_spill] sm:$0xff] }
 0x219   :  { %7746 = vst [vmem:[#allocation50_spill] sm:$0xff] %v6151_v14  ;;  %7749 = vst [vmem:[#allocation52_spill] sm:$0xff] %v6157_v53  ;;  %v1887_v14 = vmul.f32 %v6119_v31, %v7755_v0  ;;  %v7757_v53 = vld [vmem:[#allocation15_spill] sm:$0xff]  ;;  %v6187_v0 = vmul.f32 %v5814_v21, %v7762_v37  ;;  %2647 = vperm.xlu1 %3875, %v7764_v35   ;;  %2667 = vperm.xlu0 %3876, %v7765_v60   ;;  %v7768_v47 = vld [vmem:[#allocation6_spill] sm:$0xff] }
 0x21a   :  { %7753 = vst [vmem:[#allocation53_spill] sm:$0xff] %v6165_v7  ;;  %7754 = vst [vmem:[#allocation54_spill] sm:$0xff] %v6167_v36  ;;  %v1889_v56 = vmul.f32 %v6119_v31, %v7757_v53  ;;  %v7760_v7 = vld [vmem:[#allocation2_spill] sm:$0xff]  ;;  %v7766_v53 = vld [vmem:[#allocation3_spill] sm:$0xff]  ;;  %v6197_v44 = vmul.f32 %v5814_v21, %v7768_v47  ;;  %v6218_v47 = vadd.f32 %v1886_v39, %v5832_v24 }
 0x21b   :  { %7759 = vst [vmem:[#allocation55_spill] sm:$0xff] %v6179_v52  ;;  %v6183_v36 = vmul.f32 %v5814_v21, %v7760_v7  ;;  %7763 = vst [vmem:[#allocation57_spill] sm:$0xff] %v6187_v0  ;;  %v6193_v54 = vmul.f32 %v5814_v21, %v7766_v53  ;;  %v7770_v49 = vld [vmem:[#allocation5_spill] sm:$0xff]  ;;  %v7774_v60 = vld [vmem:[#allocation7_spill] sm:$0xff]  ;;  %v6215_v53 = vadd.f32 %v1884_v23, %v5840_v43  ;;  %v6238_v23 = vpop.f32.mrb[40].mxu1 }
 0x21c   :  { %7769 = vst [vmem:[#allocation59_spill] sm:$0xff] %v6197_v44  ;;  %v6201_v7 = vmul.f32 %v5814_v21, %v7770_v49  ;;  %3630 = vst [vmem:[%s7186_s4 + $0xe0] sm:$0xff] %v3566_v40   ;;  %v6212_v35 = vmul.f32 %v5814_v21, %v7774_v60  ;;  %v6221_v49 = vadd.f32 %v1885_v61, %v5848_v28  ;;  %v7784_v43 = vld [vmem:[#allocation20_spill] sm:$0xff]  ;;  %v7786_v28 = vld [vmem:[#allocation19_spill] sm:$0xff] }
 0x21d   :  { %7761 = vst [vmem:[#allocation56_spill] sm:$0xff] %v6183_v36  ;;  %7767 = vst [vmem:[#allocation58_spill] sm:$0xff] %v6193_v54  ;;  %v7772_v36 = vld [vmem:[#allocation8_spill] sm:$0xff]  ;;  %v6231_v40 = vadd.f32 %v1888_v59, %v5858_v32  ;;  %v1890_v24 = vmul.f32 %v6119_v31, %v7784_v43  ;;  %v1891_v39 = vmul.f32 %v6119_v31, %v7786_v28  ;;  %v7790_v32 = vld [vmem:[#allocation133_spill] sm:$0xff] }
 0x21e   :  { %7771 = vst [vmem:[#allocation60_spill] sm:$0xff] %v6201_v7  ;;  %v6205_v37 = vmul.f32 %v5814_v21, %v7772_v36  ;;  %7775 = vst [vmem:[#allocation62_spill] sm:$0xff] %v6212_v35  ;;  %v6223_v7 = vpop.permute.xlu1 %2252  ;;  %v6225_v36 = vpop.permute.xlu0 %2264  ;;  %v6234_v21 = vadd.f32 %v1889_v56, %v5854_v34  ;;  %v7787_v61 = vld [vmem:[#allocation24_spill] sm:$0xff]  ;;  %2675 = vperm.xlu0 %3876, %v7790_v32   ;;  %v7791_v56 = vld [vmem:[#allocation69_spill] sm:$0xff] }
 0x21f   :  { %7776 = vst [vmem:[#allocation117_spill] sm:$0xff] %v6215_v53  ;;  %7777 = vst [vmem:[#allocation123_spill] sm:$0xff] %v6218_v47  ;;  %v1892_v60 = vmul.f32 %v6119_v31, %v7787_v61  ;;  %v3817_v34 = vpop.f32.mrb[41].mxu1  ;;  %v1894_v59 = vmul.f32 %v6119_v31, %v7791_v56  ;;  %v7792_v43 = vld [vmem:[#allocation70_spill] sm:$0xff]  ;;  %v7799_v35 = vld [vmem:[#allocation76_spill] sm:$0xff] }
 0x220   :  { %7773 = vst [vmem:[#allocation61_spill] sm:$0xff] %v6205_v37  ;;  %7778 = vst [vmem:[#allocation63_spill] sm:$0xff] %v6221_v49  ;;  %v6228_v37 = vadd.f32 %v1887_v14, %v5844_v19  ;;  %v7789_v14 = vld [vmem:[#allocation127_spill] sm:$0xff]  ;;  %v7797_v47 = vld [vmem:[#allocation74_spill] sm:$0xff]  ;;  %v6279_v49 = vadd.f32 %v1890_v24, %v5866_v16 }
 0x221   :  { %7779 = vst [vmem:[#allocation64_spill] sm:$0xff] %v6223_v7  ;;  %7780 = vst [vmem:[#allocation65_spill] sm:$0xff] %v6225_v36  ;;  %v7788_v7 = vld [vmem:[#allocation23_spill] sm:$0xff]  ;;  %2655 = vperm.xlu1 %3875, %v7789_v14   ;;  %v1895_v36 = vmul.f32 %v6119_v31, %v7792_v43  ;;  %v1899_v32 = vmul.f32 %v6119_v31, %v7797_v47  ;;  %v1901_v43 = vmul.f32 %v6119_v31, %v7799_v35  ;;  %v7802_v44 = vld [vmem:[#allocation77_spill] sm:$0xff] }
 0x222   :  { %7781 = vst [vmem:[#allocation66_spill] sm:$0xff] %v6228_v37  ;;  %7782 = vst [vmem:[#allocation67_spill] sm:$0xff] %v6231_v40  ;;  %v1893_v19 = vmul.f32 %v6119_v31, %v7788_v7  ;;  %v7794_v37 = vld [vmem:[#allocation72_spill] sm:$0xff]  ;;  %v6256_v40 = vpop.f32.mrb[42].mxu1  ;;  %v7796_v7 = vld [vmem:[#allocation73_spill] sm:$0xff]  ;;  %v6266_v54 = vpop.permute.xlu1 %2260  ;;  %v6282_v35 = vadd.f32 %v1891_v39, %v5862_v42 }
 0x223   :  { %7783 = vst [vmem:[#allocation10_spill] sm:$0xff] %v6234_v21  ;;  %7785 = vst [vmem:[#allocation9_spill] sm:$0xff] %v6238_v23  ;;  %v7793_v21 = vld [vmem:[#allocation71_spill] sm:$0xff]  ;;  %v1897_v61 = vmul.f32 %v6119_v31, %v7794_v37  ;;  %v1898_v14 = vmul.f32 %v6119_v31, %v7796_v7  ;;  %v1902_v37 = vmul.f32 %v6119_v31, %v7802_v44  ;;  %v7803_v0 = vld [vmem:[#allocation78_spill] sm:$0xff] }
 0x224   :  { %v1896_v28 = vmul.f32 %v6119_v31, %v7793_v21  ;;  %7795 = vst [vmem:[#allocation12_spill] sm:$0xff] %v6256_v40  ;;  %v7798_v34 = vld [vmem:[#allocation75_spill] sm:$0xff]  ;;  %7800 = vst [vmem:[#allocation11_spill] sm:$0xff] %v6266_v54  ;;  %v6268_v21 = vpop.permute.xlu0 %2272  ;;  %v1903_v53 = vmul.f32 %v6119_v31, %v7803_v0  ;;  %v3571_v47 = vpack.c.bf16 %v6256_v40, %v6238_v23  ;;  %v7805_v44 = vld [vmem:[#allocation132_spill] sm:$0xff] }
 0x225   :  { %v1900_v56 = vmul.f32 %v6119_v31, %v7798_v34  ;;  %7801 = vst [vmem:[#allocation16_spill] sm:$0xff] %v6268_v21  ;;  %v7804_v7 = vld [vmem:[#allocation79_spill] sm:$0xff]  ;;  %v3818_v34 = vpop.f32.mrb[43].mxu1  ;;  %v6285_v54 = vadd.f32 %v1892_v60, %v5876_v26  ;;  %2663 = vperm.xlu1 %3875, %v7805_v44   ;;  %v7806_v21 = vld [vmem:[#allocation138_spill] sm:$0xff]  ;;  %v6290_v0 = vadd.f32 %v1893_v19, %v5872_v17  ;;  %v7811_v60 = vld [vmem:[#allocation81_spill] sm:$0xff] }
 0x226   :  { %v1904_v52 = vmul.f32 %v6119_v31, %v7804_v7  ;;  %2683 = vperm.xlu0 %3876, %v7806_v21   ;;  %v6293_v7 = vadd.f32 %v1894_v59, %v5884_v38  ;;  %v6296_v34 = vadd.f32 %v1895_v36, %v5880_v41  ;;  %v6299_v16 = vadd.f32 %v1896_v28, %v5896_v30  ;;  %v6316_v41 = vpop.permute.xlu1 %2268  ;;  %v7812_v59 = vld [vmem:[#allocation82_spill] sm:$0xff]  ;;  %v7813_v28 = vld [vmem:[#allocation137_spill] sm:$0xff]  ;;  %v7821_v44 = vld [vmem:[#allocation88_spill] sm:$0xff] }
 0x227   :  { %3631 = vst [vmem:[%s7186_s4 + $0xe8] sm:$0xff] %v3571_v47   ;;  %v6305_v42 = vadd.f32 %v1897_v61, %v5892_v57  ;;  %v6308_v26 = vadd.f32 %v1898_v14, %v5910_v58  ;;  %v6311_v17 = vadd.f32 %v1899_v32, %v5906_v25  ;;  %v6314_v38 = vadd.f32 %v1900_v56, %v5920_v29  ;;  %v6332_v25 = vpop.f32.mrb[44].mxu1  ;;  %v7810_v29 = vld [vmem:[#allocation80_spill] sm:$0xff]  ;;  %v7817_v14 = vld [vmem:[#allocation85_spill] sm:$0xff]  ;;  %v7818_v56 = vld [vmem:[#allocation86_spill] sm:$0xff] }
 0x228   :  { %7807 = vst [vmem:[#allocation15_spill] sm:$0xff] %v6316_v41  ;;  %v6318_v30 = vpop.permute.xlu0 %2280  ;;  %v6321_v36 = vadd.f32 %v1901_v43, %v5914_v62  ;;  %v6324_v24 = vadd.f32 %v1902_v37, %v5928_v55  ;;  %v6327_v57 = vadd.f32 %v1903_v53, %v5924_v4  ;;  %v6330_v58 = vadd.f32 %v1904_v52, %v5942_v6  ;;  %v7814_v55 = vld [vmem:[#allocation143_spill] sm:$0xff]  ;;  %v3821_v4 = vpop.f32.mrb[45].mxu1  ;;  %v7816_v52 = vld [vmem:[#allocation84_spill] sm:$0xff] }
 0x229   :  { %7808 = vst [vmem:[#allocation68_spill] sm:$0xff] %v6318_v30  ;;  %7809 = vst [vmem:[#allocation2_spill] sm:$0xff] %v6332_v25  ;;  %v1905_v39 = vmul.f32 %v6119_v31, %v7810_v29  ;;  %v1906_v19 = vmul.f32 %v6119_v31, %v7811_v60  ;;  %v1907_v62 = vmul.f32 %v6119_v31, %v7812_v59  ;;  %2671 = vperm.xlu1 %3875, %v7813_v28   ;;  %v7815_v53 = vld [vmem:[#allocation83_spill] sm:$0xff]  ;;  %v6350_v21 = vpop.f32.mrb[46].mxu1  ;;  %v7822_v60 = vld [vmem:[#allocation89_spill] sm:$0xff] }
 0x22a   :  { %2691 = vperm.xlu0 %3876, %v7814_v55   ;;  %v1908_v6 = vmul.f32 %v6119_v31, %v7815_v53  ;;  %v1909_v61 = vmul.f32 %v6119_v31, %v7816_v52  ;;  %v1910_v32 = vmul.f32 %v6119_v31, %v7817_v14  ;;  %v1911_v43 = vmul.f32 %v6119_v31, %v7818_v56  ;;  %v7820_v37 = vld [vmem:[#allocation87_spill] sm:$0xff]  ;;  %v7823_v28 = vld [vmem:[#allocation90_spill] sm:$0xff]  ;;  %v6360_v4 = vpop.permute.xlu1 %2276  ;;  %v7827_v56 = vld [vmem:[#allocation92_spill] sm:$0xff] }
 0x22b   :  { %7819 = vst [vmem:[#allocation4_spill] sm:$0xff] %v6350_v21  ;;  %v1912_v47 = vmul.f32 %v6119_v31, %v7820_v37  ;;  %v1913_v29 = vmul.f32 %v6119_v31, %v7821_v44  ;;  %v1914_v59 = vmul.f32 %v6119_v31, %v7822_v60  ;;  %v1915_v55 = vmul.f32 %v6119_v31, %v7823_v28  ;;  %v7826_v52 = vld [vmem:[#allocation91_spill] sm:$0xff]  ;;  %v7828_v37 = vld [vmem:[#allocation93_spill] sm:$0xff]  ;;  %v3822_v60 = vpop.f32.mrb[47].mxu1  ;;  %v7831_v30 = vld [vmem:[#allocation148_spill] sm:$0xff] }
 0x22c   :  { %7824 = vst [vmem:[#allocation122_spill] sm:$0xff] %v6360_v4  ;;  %v6362_v53 = vpop.permute.xlu0 %2288  ;;  %v1916_v14 = vmul.f32 %v6119_v31, %v7826_v52  ;;  %v1917_v40 = vmul.f32 %v6119_v31, %v7827_v56  ;;  %v1918_v41 = vmul.f32 %v6119_v31, %v7828_v37  ;;  %v3576_v44 = vpack.c.bf16 %v6350_v21, %v6332_v25  ;;  %v7829_v4 = vld [vmem:[#allocation94_spill] sm:$0xff] }
 0x22d   :  { %7825 = vst [vmem:[#allocation128_spill] sm:$0xff] %v6362_v53  ;;  %v6373_v23 = vadd.f32 %v1905_v39, %v5932_v3  ;;  %v6376_v28 = vadd.f32 %v1906_v19, %v5950_v5  ;;  %v1919_v53 = vmul.f32 %v6119_v31, %v7829_v4  ;;  %v7830_v52 = vld [vmem:[#allocation142_spill] sm:$0xff]  ;;  %v6383_v56 = vadd.f32 %v1907_v62, %v5946_v2  ;;  %v7835_v62 = vld [vmem:[#allocation95_spill] sm:$0xff]  ;;  %v7844_v4 = vld [vmem:[#allocation101_spill] sm:$0xff] }
 0x22e   :  { %2679 = vperm.xlu1 %3875, %v7830_v52   ;;  %2699 = vperm.xlu0 %3876, %v7831_v30   ;;  %v6386_v37 = vadd.f32 %v1908_v6, %v5962_v1  ;;  %v6389_v60 = vadd.f32 %v1909_v61, %v5954_v8  ;;  %v6392_v3 = vadd.f32 %v1910_v32, %v5970_v9  ;;  %v6409_v8 = vpop.permute.xlu1 %2284  ;;  %v7836_v61 = vld [vmem:[#allocation96_spill] sm:$0xff]  ;;  %v7837_v32 = vld [vmem:[#allocation147_spill] sm:$0xff] }
 0x22f   :  { %3632 = vst [vmem:[%s7186_s4 + $0xf0] sm:$0xff] %v3576_v44   ;;  %v6398_v5 = vadd.f32 %v1911_v43, %v5966_v10  ;;  %v6401_v30 = vadd.f32 %v1912_v47, %v5980_v20  ;;  %v6404_v2 = vadd.f32 %v1913_v29, %v5974_v12  ;;  %v6407_v1 = vadd.f32 %v1914_v59, %v5988_v15  ;;  %v6425_v12 = vpop.f32.mrb[48].mxu1  ;;  %v7841_v47 = vld [vmem:[#allocation99_spill] sm:$0xff]  ;;  %v7842_v29 = vld [vmem:[#allocation100_spill] sm:$0xff] }
 0x230   :  { %7832 = vst [vmem:[#allocation3_spill] sm:$0xff] %v6409_v8  ;;  %v6411_v9 = vpop.permute.xlu0 %2296  ;;  %v6414_v39 = vadd.f32 %v1915_v55, %v5984_v11  ;;  %v6417_v19 = vadd.f32 %v1916_v14, %v5998_v18  ;;  %v6420_v10 = vadd.f32 %v1917_v40, %v5994_v45  ;;  %v6423_v20 = vadd.f32 %v1918_v41, %v6006_v63  ;;  %v7838_v18 = vld [vmem:[#allocation153_spill] sm:$0xff]  ;;  %v3825_v45 = vpop.f32.mrb[49].mxu1  ;;  %v7840_v41 = vld [vmem:[#allocation98_spill] sm:$0xff]  ;;  %v7846_v52 = vld [vmem:[#allocation103_spill] sm:$0xff] }
 0x231   :  { %7833 = vst [vmem:[#allocation6_spill] sm:$0xff] %v6411_v9  ;;  %7834 = vst [vmem:[#allocation5_spill] sm:$0xff] %v6425_v12  ;;  %v6428_v15 = vadd.f32 %v1919_v53, %v6002_v51  ;;  %v1920_v6 = vmul.f32 %v6119_v31, %v7835_v62  ;;  %v1921_v11 = vmul.f32 %v6119_v31, %v7836_v61  ;;  %v7839_v40 = vld [vmem:[#allocation97_spill] sm:$0xff]  ;;  %v6444_v55 = vpop.f32.mrb[50].mxu1  ;;  %v7845_v14 = vld [vmem:[#allocation102_spill] sm:$0xff] }
 0x232   :  { %2687 = vperm.xlu1 %3875, %v7837_v32   ;;  %2707 = vperm.xlu0 %3876, %v7838_v18   ;;  %v1922_v63 = vmul.f32 %v6119_v31, %v7839_v40  ;;  %v1923_v43 = vmul.f32 %v6119_v31, %v7840_v41  ;;  %v1924_v51 = vmul.f32 %v6119_v31, %v7841_v47  ;;  %v7847_v61 = vld [vmem:[#allocation104_spill] sm:$0xff]  ;;  %v6454_v18 = vpop.permute.xlu1 %2292  ;;  %v7850_v40 = vld [vmem:[#allocation105_spill] sm:$0xff]  ;;  %v7851_v47 = vld [vmem:[#allocation106_spill] sm:$0xff] }
 0x233   :  { %v1925_v59 = vmul.f32 %v6119_v31, %v7842_v29  ;;  %7843 = vst [vmem:[#allocation8_spill] sm:$0xff] %v6444_v55  ;;  %v1926_v53 = vmul.f32 %v6119_v31, %v7844_v4  ;;  %v1927_v44 = vmul.f32 %v6119_v31, %v7845_v14  ;;  %v1928_v62 = vmul.f32 %v6119_v31, %v7846_v52  ;;  %v7852_v4 = vld [vmem:[#allocation107_spill] sm:$0xff]  ;;  %v3826_v52 = vpop.f32.mrb[51].mxu1  ;;  %v7856_v9 = vld [vmem:[#allocation158_spill] sm:$0xff] }
 0x234   :  { %v1929_v32 = vmul.f32 %v6119_v31, %v7847_v61  ;;  %7848 = vst [vmem:[#allocation7_spill] sm:$0xff] %v6454_v18  ;;  %v6456_v45 = vpop.permute.xlu0 %2304  ;;  %v1930_v41 = vmul.f32 %v6119_v31, %v7850_v40  ;;  %v1931_v29 = vmul.f32 %v6119_v31, %v7851_v47  ;;  %v1932_v21 = vmul.f32 %v6119_v31, %v7852_v4  ;;  %v7854_v18 = vld [vmem:[#allocation109_spill] sm:$0xff]  ;;  %v7855_v40 = vld [vmem:[#allocation152_spill] sm:$0xff] }
 0x235   :  { %7849 = vst [vmem:[#allocation20_spill] sm:$0xff] %v6456_v45  ;;  %v3581_v14 = vpack.c.bf16 %v6444_v55, %v6425_v12  ;;  %v6467_v8 = vadd.f32 %v1920_v6, %v6018_v27  ;;  %v6470_v61 = vadd.f32 %v1921_v11, %v6014_v48  ;;  %v1933_v45 = vmul.f32 %v6119_v31, %v7854_v18  ;;  %v7860_v27 = vld [vmem:[#allocation110_spill] sm:$0xff]  ;;  %v7881_v55 = vld [vmem:[#allocation116_spill] sm:$0xff] }
 0x236   :  { %2695 = vperm.xlu1 %3875, %v7855_v40   ;;  %2715 = vperm.xlu0 %3876, %v7856_v9   ;;  %v6477_v47 = vadd.f32 %v1922_v63, %v6026_v50  ;;  %v6480_v4 = vadd.f32 %v1923_v43, %v6022_v33  ;;  %v6483_v52 = vadd.f32 %v1924_v51, %v6038_v13  ;;  %v7863_v50 = vld [vmem:[#allocation31_spill] sm:$0xff]  ;;  %v7865_v33 = vld [vmem:[#allocation33_spill] sm:$0xff]  ;;  %v6502_v13 = vpop.permute.xlu1 %2300  ;;  %v7869_v51 = vld [vmem:[#allocation32_spill] sm:$0xff] }
 0x237   :  { %7853 = vst [vmem:[#allocation19_spill] sm:$0xff] %v6470_v61  ;;  %v1934_v48 = vmul.f32 %v6119_v31, %v7860_v27  ;;  %3633 = vst [vmem:[%s7186_s4 + $0xf8] sm:$0xff] %v3581_v14   ;;  %v6491_v6 = vadd.f32 %v1925_v59, %v6034_v22  ;;  %v6494_v9 = vadd.f32 %v1926_v53, %v6050_v46  ;;  %v7871_v14 = vld [vmem:[#allocation108_spill] sm:$0xff]  ;;  %v7873_v22 = vld [vmem:[#allocation34_spill] sm:$0xff] }
 0x238   :  { %7857 = vst [vmem:[#allocation24_spill] sm:$0xff] %v6477_v47  ;;  %7858 = vst [vmem:[#allocation23_spill] sm:$0xff] %v6480_v4  ;;  %v6497_v11 = vadd.f32 %v1927_v44, %v7863_v50  ;;  %v6500_v63 = vadd.f32 %v1928_v62, %v7865_v33  ;;  %v6504_v43 = vpop.permute.xlu0 %2312  ;;  %v6507_v18 = vadd.f32 %v1929_v32, %v7869_v51  ;;  %v7875_v46 = vld [vmem:[#allocation35_spill] sm:$0xff]  ;;  %v6518_v44 = vpop.f32.mrb[52].mxu1  ;;  %v7878_v62 = vld [vmem:[#allocation113_spill] sm:$0xff] }
 0x239   :  { %7859 = vst [vmem:[#allocation127_spill] sm:$0xff] %v6483_v52  ;;  %7861 = vst [vmem:[#allocation133_spill] sm:$0xff] %v6491_v6  ;;  %v6510_v40 = vadd.f32 %v1930_v41, %v7871_v14  ;;  %v6513_v59 = vadd.f32 %v1931_v29, %v7873_v22  ;;  %v6516_v53 = vadd.f32 %v1932_v21, %v7875_v46  ;;  %v7880_v50 = vld [vmem:[#allocation115_spill] sm:$0xff]  ;;  %v7882_v51 = vld [vmem:[#allocation157_spill] sm:$0xff]  ;;  %v3829_v29 = vpop.f32.mrb[53].mxu1 }
 0x23a   :  { %7862 = vst [vmem:[#allocation69_spill] sm:$0xff] %v6494_v9  ;;  %7864 = vst [vmem:[#allocation70_spill] sm:$0xff] %v6497_v11  ;;  %v6521_v27 = vadd.f32 %v1933_v45, %v7878_v62  ;;  %v1935_v33 = vmul.f32 %v6119_v31, %v7880_v50  ;;  %v1936_v32 = vmul.f32 %v6119_v31, %v7881_v55  ;;  %2703 = vperm.xlu1 %3875, %v7882_v51   ;;  %v7883_v41 = vld [vmem:[#allocation163_spill] sm:$0xff]  ;;  %v7884_v14 = vld [vmem:[#allocation37_spill] sm:$0xff]  ;;  %v6543_v51 = vpop.f32.mrb[54].mxu1 }
 0x23b   :  { %7866 = vst [vmem:[#allocation71_spill] sm:$0xff] %v6500_v63  ;;  %7867 = vst [vmem:[#allocation72_spill] sm:$0xff] %v6502_v13  ;;  %2723 = vperm.xlu0 %3876, %v7883_v41   ;;  %v6530_v22 = vadd.f32 %v1934_v48, %v7884_v14  ;;  %v7886_v21 = vld [vmem:[#allocation119_spill] sm:$0xff]  ;;  %v7887_v13 = vld [vmem:[#allocation120_spill] sm:$0xff] }
 0x23c   :  { %7868 = vst [vmem:[#allocation73_spill] sm:$0xff] %v6504_v43  ;;  %7870 = vst [vmem:[#allocation74_spill] sm:$0xff] %v6507_v18  ;;  %v1937_v46 = vmul.f32 %v6119_v31, %v7886_v21  ;;  %v1938_v45 = vmul.f32 %v6119_v31, %v7887_v13  ;;  %v7888_v62 = vld [vmem:[#allocation125_spill] sm:$0xff]  ;;  %v6541_v55 = vld [vmem:[%s7187_s3 + $0x2] ss:$0 sm:$0xff]  ;;  %v6555_v25 = vpop.permute.xlu0 %2320 }
 0x23d   :  { %7872 = vst [vmem:[#allocation75_spill] sm:$0xff] %v6510_v40  ;;  %7874 = vst [vmem:[#allocation76_spill] sm:$0xff] %v6513_v59  ;;  %v1939_v50 = vmul.f32 %v6119_v31, %v7888_v62  ;;  %v7890_v41 = vld [vmem:[#allocation126_spill] sm:$0xff]  ;;  %v7891_v29 = vld [vmem:[#allocation129_spill] sm:$0xff]  ;;  %v6553_v62 = vpop.permute.xlu1 %2308 }
 0x23e   :  { %7876 = vst [vmem:[#allocation77_spill] sm:$0xff] %v6516_v53  ;;  %7877 = vst [vmem:[#allocation78_spill] sm:$0xff] %v6518_v44  ;;  %v1940_v48 = vmul.f32 %v6119_v31, %v7890_v41  ;;  %v1941_v14 = vmul.f32 %v6119_v31, %v7891_v29  ;;  %v7892_v21 = vld [vmem:[#allocation130_spill] sm:$0xff]  ;;  %v7893_v13 = vld [vmem:[#allocation135_spill] sm:$0xff]  ;;  %v3586_v29 = vpack.c.bf16 %v6543_v51, %v6518_v44 }
 0x23f   :  { %7879 = vst [vmem:[#allocation79_spill] sm:$0xff] %v6521_v27  ;;  %7885 = vst [vmem:[#allocation132_spill] sm:$0xff] %v6530_v22  ;;  %v1942_v43 = vmul.f32 %v6119_v31, %v7892_v21  ;;  %v1943_v12 = vmul.f32 %v6119_v31, %v7893_v13  ;;  %v7896_v27 = vld [vmem:[#allocation136_spill] sm:$0xff]  ;;  %v7897_v59 = vld [vmem:[#allocation139_spill] sm:$0xff]  ;;  %v3830_v21 = vpop.f32.mrb[55].mxu1 }
 0x240   :  { %7889 = vst [vmem:[#allocation138_spill] sm:$0xff] %v6543_v51  ;;  %7894 = vst [vmem:[#allocation80_spill] sm:$0xff] %v6553_v62  ;;  %v1944_v22 = vmul.f32 %v6119_v31, %v7896_v27  ;;  %v1945_v53 = vmul.f32 %v6119_v31, %v7897_v59  ;;  %v7898_v41 = vld [vmem:[#allocation140_spill] sm:$0xff]  ;;  %v7901_v13 = vld [vmem:[#allocation41_spill] sm:$0xff] }
 0x241   :  { %7895 = vst [vmem:[#allocation81_spill] sm:$0xff] %v6555_v25  ;;  %v1946_v18 = vmul.f32 %v6119_v31, %v7898_v41  ;;  %v7899_v40 = vld [vmem:[#allocation36_spill] sm:$0xff]  ;;  %v6569_v62 = vadd.f32 %v1936_v32, %v7901_v13  ;;  %v7903_v25 = vld [vmem:[#allocation169_spill] sm:$0xff]  ;;  %v7904_v27 = vld [vmem:[#allocation162_spill] sm:$0xff] }
 0x242   :  { %v6566_v11 = vadd.f32 %v1935_v33, %v7899_v40  ;;  %v2328_v63 = vmul.f32 %v6541_v55, %v7903_v25  ;;  %2711 = vperm.xlu1 %3875, %v7904_v27   ;;  %v7905_v6 = vld [vmem:[#allocation167_spill] sm:$0xff]  ;;  %v7906_v59 = vld [vmem:[#allocation38_spill] sm:$0xff]  ;;  %v7910_v21 = vld [vmem:[#allocation145_spill] sm:$0xff]  ;;  %3634 = vst [vmem:[%s7186_s4 + $0x100] sm:$0xff] %v3586_v29  }
 0x243   :  { %7902 = vst [vmem:[#allocation137_spill] sm:$0xff] %v6569_v62  ;;  %2731 = vperm.xlu0 %3876, %v7905_v6   ;;  %v6576_v9 = vadd.f32 %v1937_v46, %v7906_v59  ;;  %v7908_v41 = vld [vmem:[#allocation43_spill] sm:$0xff]  ;;  %v1947_v40 = vmul.f32 %v6119_v31, %v7910_v21  ;;  %v7911_v33 = vld [vmem:[#allocation146_spill] sm:$0xff]  ;;  %v7916_v27 = vld [vmem:[#allocation44_spill] sm:$0xff] }
 0x244   :  { %7900 = vst [vmem:[#allocation82_spill] sm:$0xff] %v6566_v11  ;;  %v6579_v4 = vadd.f32 %v1938_v45, %v7908_v41  ;;  %v1948_v32 = vmul.f32 %v6119_v31, %v7911_v33  ;;  %v6588_v25 = vld [vmem:[%s7187_s3 + $0x3] ss:$0 sm:$0xff]  ;;  %v6600_v59 = vadd.f32 %v1941_v14, %v7916_v27  ;;  %v7918_v41 = vld [vmem:[#allocation112_spill] sm:$0xff]  ;;  %v6605_v33 = vpop.permute.xlu1 %2316  ;;  %v7921_v51 = vld [vmem:[#allocation47_spill] sm:$0xff]  ;;  %v6619_v14 = vpop.f32.mrb[56].mxu1 }
 0x245   :  { %7907 = vst [vmem:[#allocation143_spill] sm:$0xff] %v6576_v9  ;;  %v7912_v6 = vld [vmem:[#allocation42_spill] sm:$0xff]  ;;  %v6603_v21 = vadd.f32 %v1942_v43, %v7918_v41  ;;  %7920 = vst [vmem:[#allocation88_spill] sm:$0xff] %v6605_v33  ;;  %v6608_v44 = vadd.f32 %v1943_v12, %v7921_v51  ;;  %v7923_v9 = vld [vmem:[#allocation48_spill] sm:$0xff] }
 0x246   :  { %7909 = vst [vmem:[#allocation83_spill] sm:$0xff] %v6579_v4  ;;  %v6594_v46 = vadd.f32 %v1939_v50, %v7912_v6  ;;  %v7914_v45 = vld [vmem:[#allocation46_spill] sm:$0xff]  ;;  %7917 = vst [vmem:[#allocation86_spill] sm:$0xff] %v6600_v59  ;;  %v6611_v11 = vadd.f32 %v1944_v22, %v7923_v9  ;;  %v7930_v27 = vld [vmem:[#allocation168_spill] sm:$0xff] }
 0x247   :  { %v6597_v13 = vadd.f32 %v1940_v48, %v7914_v45  ;;  %7919 = vst [vmem:[#allocation87_spill] sm:$0xff] %v6603_v21  ;;  %7922 = vst [vmem:[#allocation89_spill] sm:$0xff] %v6608_v44  ;;  %v7925_v29 = vld [vmem:[#allocation118_spill] sm:$0xff]  ;;  %v2480_v45 = vpop.permute.xlu0 %2479  ;;  %v2327_v43 = vmul.f32 %v6541_v55, %v7930_v27  ;;  %v7931_v41 = vld [vmem:[#allocation63_spill] sm:$0xff] }
 0x248   :  { %7913 = vst [vmem:[#allocation84_spill] sm:$0xff] %v6594_v46  ;;  %7924 = vst [vmem:[#allocation90_spill] sm:$0xff] %v6611_v11  ;;  %v6614_v50 = vadd.f32 %v1945_v53, %v7925_v29  ;;  %v7927_v6 = vld [vmem:[#allocation50_spill] sm:$0xff]  ;;  %v2401_v33 = vadd.f32 %v2328_v63, %v7931_v41  ;;  %v2771_v12 = vmul.f32 %v6588_v25, %v2480_v45  ;;  %v3995_v9 = vld [vmem:[%s7183_s2 + $0x1e8] sm:$0xff]  ;;  %v3833_v53 = vpop.f32.mrb[57].mxu1  ;;  %v2476_v11 = vpop.permute.xlu1 %2475 }
 0x249   :  { %7915 = vst [vmem:[#allocation85_spill] sm:$0xff] %v6597_v13  ;;  %v6617_v48 = vadd.f32 %v1946_v18, %v7927_v6  ;;  %7929 = vst [vmem:[#allocation93_spill] sm:$0xff] %v6619_v14  ;;  %2719 = vperm.xlu1 %3875, %v3995_v9   ;;  %v3996_v18 = vld [vmem:[%s7183_s2 + $0x210] sm:$0xff]  ;;  %v7932_v22 = vld [vmem:[#allocation49_spill] sm:$0xff] }
 0x24a   :  { %7926 = vst [vmem:[#allocation91_spill] sm:$0xff] %v6614_v50  ;;  %2739 = vperm.xlu0 %3876, %v3996_v18   ;;  %v6632_v51 = vadd.f32 %v1947_v40, %v7932_v22  ;;  %v7934_v29 = vld [vmem:[#allocation55_spill] sm:$0xff]  ;;  %v7936_v63 = vld [vmem:[#allocation149_spill] sm:$0xff]  ;;  %v7937_v27 = vld [vmem:[#allocation150_spill] sm:$0xff]  ;;  %v6641_v50 = vpop.f32.mrb[58].mxu1  ;;  %v2844_v22 = vadd.f32 %v2771_v12, %v2401_v33  ;;  %v2770_v12 = vmul.f32 %v6588_v25, %v2476_v11 }
 0x24b   :  { %7928 = vst [vmem:[#allocation92_spill] sm:$0xff] %v6617_v48  ;;  %v6635_v6 = vadd.f32 %v1948_v32, %v7934_v29  ;;  %v1949_v45 = vmul.f32 %v6119_v31, %v7936_v63  ;;  %v1950_v41 = vmul.f32 %v6119_v31, %v7937_v27  ;;  %7938 = vst [vmem:[#allocation148_spill] sm:$0xff] %v6641_v50  ;;  %v7939_v9 = vld [vmem:[#allocation155_spill] sm:$0xff]  ;;  %v7940_v48 = vld [vmem:[#allocation156_spill] sm:$0xff]  ;;  %v3834_v32 = vpop.f32.mrb[59].mxu1  ;;  %v2492_v46 = vpop.permute.xlu0 %2491 }
 0x24c   :  { %7933 = vst [vmem:[#allocation94_spill] sm:$0xff] %v6632_v51  ;;  %v1951_v44 = vmul.f32 %v6119_v31, %v7939_v9  ;;  %v1952_v18 = vmul.f32 %v6119_v31, %v7940_v48  ;;  %v7941_v53 = vld [vmem:[#allocation159_spill] sm:$0xff]  ;;  %v7942_v29 = vld [vmem:[#allocation160_spill] sm:$0xff]  ;;  %v7943_v63 = vld [vmem:[#allocation166_spill] sm:$0xff]  ;;  %v3591_v9 = vpack.c.bf16 %v6641_v50, %v6619_v14  ;;  %v2484_v62 = vpop.permute.xlu1 %2483 }
 0x24d   :  { %7935 = vst [vmem:[#allocation142_spill] sm:$0xff] %v6635_v6  ;;  %v1953_v40 = vmul.f32 %v6119_v31, %v7941_v53  ;;  %v1954_v51 = vmul.f32 %v6119_v31, %v7942_v29  ;;  %v1956_v6 = vmul.f32 %v6119_v31, %v7943_v63  ;;  %v7944_v27 = vld [vmem:[#allocation172_spill] sm:$0xff]  ;;  %v7945_v48 = vld [vmem:[#allocation117_spill] sm:$0xff]  ;;  %v3998_v31 = vld [vmem:[%s7183_s2 + $0x220] sm:$0xff] }
 0x24e   :  { %v2329_v59 = vmul.f32 %v6541_v55, %v7944_v27  ;;  %v2400_v21 = vadd.f32 %v2327_v43, %v7945_v48  ;;  %v7946_v13 = vld [vmem:[#allocation173_spill] sm:$0xff]  ;;  %2747 = vperm.xlu0 %3876, %v3998_v31   ;;  %v7947_v32 = vld [vmem:[#allocation52_spill] sm:$0xff]  ;;  %v7951_v27 = vld [vmem:[#allocation174_spill] sm:$0xff]  ;;  %3635 = vst [vmem:[%s7186_s4 + $0x108] sm:$0xff] %v3591_v9  }
 0x24f   :  { %v2331_v33 = vmul.f32 %v6541_v55, %v7946_v13  ;;  %v3997_v53 = vld [vmem:[%s7183_s2 + $0x1f8] sm:$0xff]  ;;  %v6668_v29 = vadd.f32 %v1949_v45, %v7947_v32  ;;  %v2330_v13 = vmul.f32 %v6541_v55, %v7951_v27  ;;  %v7952_v11 = vld [vmem:[#allocation114_spill] sm:$0xff]  ;;  %v7955_v14 = vld [vmem:[#allocation59_spill] sm:$0xff]  ;;  %v2774_v32 = vmul.f32 %v6588_v25, %v2492_v46 }
 0x250   :  { %2727 = vperm.xlu1 %3875, %v3997_v53   ;;  %v7949_v63 = vld [vmem:[#allocation57_spill] sm:$0xff]  ;;  %v2917_v48 = vmul.f32 %v2844_v22, %v7952_v11  ;;  %v7953_v53 = vld [vmem:[#allocation56_spill] sm:$0xff]  ;;  %v6683_v31 = vadd.f32 %v1952_v18, %v7955_v14  ;;  %v2843_v45 = vadd.f32 %v2770_v12, %v2400_v21  ;;  %v7961_v22 = vld [vmem:[#allocation62_spill] sm:$0xff] }
 0x251   :  { %7948 = vst [vmem:[#allocation95_spill] sm:$0xff] %v6668_v29  ;;  %v6671_v43 = vadd.f32 %v1950_v41, %v7949_v63  ;;  %v6680_v50 = vadd.f32 %v1951_v44, %v7953_v53  ;;  %v7957_v41 = vld [vmem:[#allocation58_spill] sm:$0xff]  ;;  %v7959_v29 = vld [vmem:[#allocation61_spill] sm:$0xff]  ;;  %v7963_v4 = vld [vmem:[#allocation123_spill] sm:$0xff]  ;;  %v2500_v44 = vpop.permute.xlu0 %2499 }
 0x252   :  { %7956 = vst [vmem:[#allocation153_spill] sm:$0xff] %v6683_v31  ;;  %v6687_v63 = vadd.f32 %v1953_v40, %v7957_v41  ;;  %v6690_v27 = vadd.f32 %v1954_v51, %v7959_v29  ;;  %v2402_v9 = vadd.f32 %v2329_v59, %v7963_v4  ;;  %v7964_v53 = vld [vmem:[#allocation67_spill] sm:$0xff]  ;;  %v2772_v40 = vmul.f32 %v6588_v25, %v2484_v62  ;;  %v7968_v12 = vld [vmem:[#allocation66_spill] sm:$0xff]  ;;  %v4000_v62 = vld [vmem:[%s7183_s2 + $0x230] sm:$0xff] }
 0x253   :  { %7950 = vst [vmem:[#allocation96_spill] sm:$0xff] %v6671_v43  ;;  %7954 = vst [vmem:[#allocation147_spill] sm:$0xff] %v6680_v50  ;;  %v6693_v43 = vadd.f32 %v1956_v6, %v7961_v22  ;;  %v2404_v50 = vadd.f32 %v2331_v33, %v7964_v53  ;;  %v7965_v14 = vld [vmem:[#allocation175_spill] sm:$0xff]  ;;  %v6704_v6 = vpop.f32.mrb[60].mxu1  ;;  %v2403_v4 = vadd.f32 %v2330_v13, %v7968_v12  ;;  %v7969_v59 = vld [vmem:[#allocation178_spill] sm:$0xff]  ;;  %2755 = vperm.xlu0 %3876, %v4000_v62  }
 0x254   :  { %7958 = vst [vmem:[#allocation97_spill] sm:$0xff] %v6687_v63  ;;  %7960 = vst [vmem:[#allocation98_spill] sm:$0xff] %v6690_v27  ;;  %v2333_v21 = vmul.f32 %v6541_v55, %v7965_v14  ;;  %v7966_v18 = vld [vmem:[#allocation111_spill] sm:$0xff]  ;;  %v2332_v29 = vmul.f32 %v6541_v55, %v7969_v59  ;;  %v3068_v22 = vmul.f32 %v2917_v48, %v7952_v11  ;;  %v7972_v12 = vld [vmem:[#allocation180_spill] sm:$0xff]  ;;  %v2488_v27 = vpop.permute.xlu1 %2487 }
 0x255   :  { %7962 = vst [vmem:[#allocation99_spill] sm:$0xff] %v6693_v43  ;;  %v2916_v46 = vmul.f32 %v2843_v45, %v7966_v18  ;;  %v3999_v51 = vld [vmem:[%s7183_s2 + $0x208] sm:$0xff]  ;;  %7967 = vst [vmem:[#allocation100_spill] sm:$0xff] %v6704_v6  ;;  %v3837_v45 = vpop.f32.mrb[61].mxu1  ;;  %v2845_v63 = vadd.f32 %v2772_v40, %v2402_v9  ;;  %v2334_v59 = vmul.f32 %v6541_v55, %v7972_v12  ;;  %v7973_v43 = vld [vmem:[#allocation181_spill] sm:$0xff]  ;;  %v2508_v31 = vpop.permute.xlu0 %2507 }
 0x256   :  { %2735 = vperm.xlu1 %3875, %v3999_v51   ;;  %v7970_v33 = vld [vmem:[#allocation179_spill] sm:$0xff]  ;;  %v2847_v51 = vadd.f32 %v2774_v32, %v2404_v50  ;;  %v6716_v13 = vpop.f32.mrb[62].mxu1  ;;  %v2776_v11 = vmul.f32 %v6588_v25, %v2500_v44  ;;  %v7975_v32 = vld [vmem:[#allocation121_spill] sm:$0xff]  ;;  %v2406_v44 = vadd.f32 %v2333_v21, %v6279_v49  ;;  %v7976_v45 = vld [vmem:[#allocation10_spill] sm:$0xff] }
 0x257   :  { %v2335_v41 = vmul.f32 %v6541_v55, %v7970_v33  ;;  %v2989_v53 = vadd.f32 %v2917_v48, %v2916_v46  ;;  %v3067_v14 = vmul.f32 %v2916_v46, %v7966_v18  ;;  %7971 = vst [vmem:[#allocation101_spill] sm:$0xff] %v6716_v13  ;;  %v2337_v33 = vmul.f32 %v6541_v55, %v7973_v43  ;;  %v7974_v48 = vld [vmem:[#allocation184_spill] sm:$0xff]  ;;  %v4001_v40 = vld [vmem:[%s7183_s2 + $0x218] sm:$0xff]  ;;  %v3838_v43 = vpop.f32.mrb[63].mxu1 }
 0x258   :  { %v3596_v62 = vpack.c.bf16 %v6716_v13, %v6704_v6  ;;  %v2336_v18 = vmul.f32 %v6541_v55, %v7974_v48  ;;  %v2918_v9 = vmul.f32 %v2845_v63, %v7975_v32  ;;  %v2773_v46 = vmul.f32 %v6588_v25, %v2488_v27  ;;  %v7977_v6 = vld [vmem:[#allocation185_spill] sm:$0xff]  ;;  %v4002_v63 = vld [vmem:[%s7183_s2 + $0x240] sm:$0xff]  ;;  %v6743_v27 = vpop.f32.mrb[64].mxu1  ;;  %v7979_v61 = vld [vmem:[#allocation124_spill] sm:$0xff] }
 0x259   :  { %v3140_v50 = vadd.f32 %v3068_v22, %v3067_v14  ;;  %v2405_v12 = vadd.f32 %v2332_v29, %v7976_v45  ;;  %v2408_v13 = vadd.f32 %v2335_v41, %v6285_v54  ;;  %v2339_v48 = vmul.f32 %v6541_v55, %v7977_v6  ;;  %2763 = vperm.xlu0 %3876, %v4002_v63   ;;  %v7978_v22 = vld [vmem:[#allocation131_spill] sm:$0xff]  ;;  %v3841_v41 = vpop.f32.mrb[65].mxu1  ;;  %v2496_v45 = vpop.permute.xlu1 %2495 }
 0x25a   :  { %2743 = vperm.xlu1 %3875, %v4001_v40   ;;  %3636 = vst [vmem:[%s7186_s4 + $0x110] sm:$0xff] %v3596_v62   ;;  %v2920_v49 = vmul.f32 %v2847_v51, %v7978_v22  ;;  %v2990_v21 = vadd.f32 %v2989_v53, %v2918_v9  ;;  %v3069_v29 = vmul.f32 %v2918_v9, %v7975_v32  ;;  %v2516_v63 = vpop.permute.xlu0 %2515  ;;  %v7980_v51 = vld [vmem:[#allocation186_spill] sm:$0xff] }
 0x25b   :  { %v2846_v54 = vadd.f32 %v2773_v46, %v2403_v4  ;;  %v2407_v6 = vadd.f32 %v2334_v59, %v6282_v35  ;;  %v2410_v14 = vadd.f32 %v2337_v33, %v6293_v7  ;;  %v2849_v40 = vadd.f32 %v2776_v11, %v2406_v44  ;;  %v4003_v4 = vld [vmem:[%s7183_s2 + $0x228] sm:$0xff]  ;;  %v6756_v35 = vpop.f32.mrb[66].mxu1  ;;  %v7982_v33 = vld [vmem:[#allocation190_spill] sm:$0xff] }
 0x25c   :  { %v2778_v43 = vmul.f32 %v6588_v25, %v2508_v31  ;;  %v2409_v62 = vadd.f32 %v2336_v18, %v6290_v0  ;;  %v3141_v52 = vadd.f32 %v3140_v50, %v3069_v29  ;;  %v2775_v53 = vmul.f32 %v6588_v25, %v2496_v45  ;;  %v7981_v59 = vld [vmem:[#allocation187_spill] sm:$0xff]  ;;  %v3842_v18 = vpop.f32.mrb[67].mxu1  ;;  %v7983_v29 = vld [vmem:[#allocation141_spill] sm:$0xff] }
 0x25d   :  { %v2919_v47 = vmul.f32 %v2846_v54, %v7979_v61  ;;  %v2412_v7 = vadd.f32 %v2339_v48, %v6299_v16  ;;  %v2338_v31 = vmul.f32 %v6541_v55, %v7980_v51  ;;  %v2341_v0 = vmul.f32 %v6541_v55, %v7981_v59  ;;  %v6767_v44 = vpop.f32.mrb[68].mxu1  ;;  %v2504_v41 = vpop.permute.xlu1 %2503  ;;  %v7984_v59 = vld [vmem:[#allocation134_spill] sm:$0xff] }
 0x25e   :  { %2751 = vperm.xlu1 %3875, %v4003_v4   ;;  %v2340_v11 = vmul.f32 %v6541_v55, %v7982_v33  ;;  %v3071_v50 = vmul.f32 %v2920_v49, %v7978_v22  ;;  %v2848_v46 = vadd.f32 %v2775_v53, %v2405_v12  ;;  %v2922_v16 = vmul.f32 %v2849_v40, %v7983_v29  ;;  %v2524_v45 = vpop.permute.xlu0 %2523 }
 0x25f   :  { %v2991_v32 = vadd.f32 %v2990_v21, %v2919_v47  ;;  %v3070_v9 = vmul.f32 %v2919_v47, %v7979_v61  ;;  %v2851_v48 = vadd.f32 %v2778_v43, %v2408_v13  ;;  %v2780_v54 = vmul.f32 %v6588_v25, %v2516_v63  ;;  %v4004_v61 = vld [vmem:[%s7183_s2 + $0x238] sm:$0xff]  ;;  %v3845_v47 = vpop.f32.mrb[69].mxu1  ;;  %v7985_v43 = vld [vmem:[#allocation191_spill] sm:$0xff] }
 0x260   :  { %v3601_v4 = vpack.c.bf16 %v6756_v35, %v6743_v27  ;;  %v2921_v33 = vmul.f32 %v2848_v46, %v7984_v59  ;;  %v2777_v21 = vmul.f32 %v6588_v25, %v2504_v41  ;;  %v2411_v13 = vadd.f32 %v2338_v31, %v6296_v34 }
 0x261   :  { %v3142_v51 = vadd.f32 %v3141_v52, %v3070_v9  ;;  %v2992_v22 = vadd.f32 %v2991_v32, %v2920_v49  ;;  %v2414_v12 = vadd.f32 %v2341_v0, %v6308_v26  ;;  %v6781_v40 = vadd.f32 %v2340_v11, %v6305_v42  ;;  %v702_v49 = vpop.f32.mrb[70].mxu1  ;;  %v7986_v26 = vld [vmem:[#allocation151_spill] sm:$0xff]  ;;  %v2512_v11 = vpop.permute.xlu1 %2511 }
 0x262   :  { %2759 = vperm.xlu1 %3875, %v4004_v61   ;;  %v2343_v52 = vmul.f32 %v6541_v55, %v7985_v43  ;;  %3637 = vst [vmem:[%s7186_s4 + $0x118] sm:$0xff] %v3601_v4   ;;  %v3072_v53 = vmul.f32 %v2921_v33, %v7984_v59  ;;  %v2850_v32 = vadd.f32 %v2777_v21, %v2407_v6  ;;  %v3846_v9 = vpop.f32.mrb[71].mxu1  ;;  %v2532_v46 = vpop.permute.xlu0 %2531  ;;  %v7987_v61 = vld [vmem:[#allocation144_spill] sm:$0xff]  ;;  %v7990_v21 = vld [vmem:[#allocation161_spill] sm:$0xff] }
 0x263   :  { %v2993_v63 = vadd.f32 %v2992_v22, %v2921_v33  ;;  %v3143_v18 = vadd.f32 %v3142_v51, %v3071_v50  ;;  %v3073_v34 = vmul.f32 %v2922_v16, %v7983_v29  ;;  %v2924_v31 = vmul.f32 %v2851_v48, %v7986_v26  ;;  %v7988_v50 = vld [vmem:[#allocation192_spill] sm:$0xff]  ;;  %v7989_v51 = vld [vmem:[#allocation193_spill] sm:$0xff] }
 0x264   :  { %v2853_v42 = vadd.f32 %v2780_v54, %v2410_v14  ;;  %v2782_v0 = vmul.f32 %v6588_v25, %v2524_v45  ;;  %v2923_v47 = vmul.f32 %v2850_v32, %v7987_v61  ;;  %v2779_v22 = vmul.f32 %v6588_v25, %v2512_v11 }
 0x265   :  { %v3144_v41 = vadd.f32 %v3143_v18, %v3072_v53  ;;  %v2994_v4 = vadd.f32 %v2993_v63, %v2922_v16  ;;  %v2416_v59 = vadd.f32 %v2343_v52, %v6314_v38  ;;  %v2342_v6 = vmul.f32 %v6541_v55, %v7988_v50  ;;  %v2520_v52 = vpop.permute.xlu1 %2519  ;;  %v7991_v18 = vld [vmem:[#allocation154_spill] sm:$0xff] }
 0x266   :  { %v2345_v29 = vmul.f32 %v6541_v55, %v7989_v51  ;;  %v3422_v14 = vpack.c.bf16 %v6767_v44, %v6767_v44  ;;  %v3074_v54 = vmul.f32 %v2923_v47, %v7987_v61  ;;  %v2852_v33 = vadd.f32 %v2779_v22, %v2409_v62  ;;  %v2540_v63 = vpop.permute.xlu0 %2539 }
 0x267   :  { %v2995_v48 = vadd.f32 %v2994_v4, %v2923_v47  ;;  %v3145_v45 = vadd.f32 %v3144_v41, %v3073_v34  ;;  %v3075_v16 = vmul.f32 %v2924_v31, %v7986_v26  ;;  %v2926_v43 = vmul.f32 %v2853_v42, %v7990_v21  ;;  %v7992_v42 = vld [vmem:[#allocation198_spill] sm:$0xff] }
 0x268   :  { %v2855_v49 = vadd.f32 %v2782_v0, %v2412_v7  ;;  %v2784_v38 = vmul.f32 %v6588_v25, %v2532_v46  ;;  %1070 = vst [vmem:[%s7186_s4 + $0x120] sm:$0xf] %v3422_v14  ;;  %v2925_v32 = vmul.f32 %v2852_v33, %v7991_v18  ;;  %v2781_v34 = vmul.f32 %v6588_v25, %v2520_v52  ;;  %v7993_v0 = vld [vmem:[#allocation199_spill] sm:$0xff] }
 0x269   :  { %v3146_v53 = vadd.f32 %v3145_v45, %v3074_v54  ;;  %v2996_v9 = vadd.f32 %v2995_v48, %v2924_v31  ;;  %v2415_v62 = vadd.f32 %v2342_v6, %v6311_v17  ;;  %v2418_v26 = vadd.f32 %v2345_v29, %v6324_v24  ;;  %v7994_v31 = vld [vmem:[#allocation170_spill] sm:$0xff]  ;;  %v2528_v6 = vpop.permute.xlu1 %2527  ;;  %v7995_v29 = vld [vmem:[#allocation164_spill] sm:$0xff] }
 0x26a   :  { %v2344_v7 = vmul.f32 %v6541_v55, %v7992_v42  ;;  %v2347_v11 = vmul.f32 %v6541_v55, %v7993_v0  ;;  %v3076_v41 = vmul.f32 %v2925_v32, %v7991_v18  ;;  %v2854_v47 = vadd.f32 %v2781_v34, %v2411_v13  ;;  %v2548_v24 = vpop.permute.xlu0 %2547  ;;  %v7996_v13 = vld [vmem:[#allocation200_spill] sm:$0xff]  ;;  %v7999_v42 = vld [vmem:[#allocation171_spill] sm:$0xff] }
 0x26b   :  { %v2997_v46 = vadd.f32 %v2996_v9, %v2925_v32  ;;  %v3147_v61 = vadd.f32 %v3146_v53, %v3075_v16  ;;  %v3077_v4 = vmul.f32 %v2926_v43, %v7990_v21  ;;  %v2928_v22 = vmul.f32 %v2855_v49, %v7994_v31  ;;  %v7997_v21 = vld [vmem:[#allocation201_spill] sm:$0xff]  ;;  %v7998_v53 = vld [vmem:[#allocation176_spill] sm:$0xff] }
 0x26c   :  { %v2857_v50 = vadd.f32 %v2784_v38, %v2414_v12  ;;  %v2786_v17 = vmul.f32 %v6588_v25, %v2540_v63  ;;  %v2927_v14 = vmul.f32 %v2854_v47, %v7995_v29  ;;  %v2783_v54 = vmul.f32 %v6588_v25, %v2528_v6  ;;  %v8001_v47 = vld [vmem:[#allocation207_spill] sm:$0xff] }
 0x26d   :  { %v3148_v51 = vadd.f32 %v3147_v61, %v3076_v41  ;;  %v2998_v48 = vadd.f32 %v2997_v46, %v2926_v43  ;;  %v2417_v45 = vadd.f32 %v2344_v7, %v6321_v36  ;;  %v2420_v33 = vadd.f32 %v2347_v11, %v6330_v58  ;;  %v2536_v58 = vpop.permute.xlu1 %2535 }
 0x26e   :  { %v2346_v16 = vmul.f32 %v6541_v55, %v7996_v13  ;;  %v2349_v12 = vmul.f32 %v6541_v55, %v7997_v21  ;;  %v3078_v38 = vmul.f32 %v2927_v14, %v7995_v29  ;;  %v2856_v63 = vadd.f32 %v2783_v54, %v6781_v40  ;;  %v2556_v9 = vpop.permute.xlu0 %2555  ;;  %v8000_v40 = vld [vmem:[#allocation206_spill] sm:$0xff] }
 0x26f   :  { %v2999_v49 = vadd.f32 %v2998_v48, %v2927_v14  ;;  %v3149_v52 = vadd.f32 %v3148_v51, %v3077_v4  ;;  %v3079_v43 = vmul.f32 %v2928_v22, %v7994_v31  ;;  %v2930_v18 = vmul.f32 %v2857_v50, %v7998_v53  ;;  %v8003_v48 = vld [vmem:[#allocation177_spill] sm:$0xff] }
 0x270   :  { %v2859_v32 = vadd.f32 %v2786_v17, %v2416_v59  ;;  %v2788_v36 = vmul.f32 %v6588_v25, %v2548_v24  ;;  %v2929_v7 = vmul.f32 %v2856_v63, %v7999_v42  ;;  %v2785_v11 = vmul.f32 %v6588_v25, %v2536_v58 }
 0x271   :  { %v3150_v34 = vadd.f32 %v3149_v52, %v3078_v38  ;;  %v3000_v0 = vadd.f32 %v2999_v49, %v2928_v22  ;;  %v2419_v46 = vadd.f32 %v2346_v16, %v6327_v57  ;;  %v2422_v41 = vadd.f32 %v2349_v12, %v6376_v28  ;;  %v8002_v22 = vld [vmem:[#allocation182_spill] sm:$0xff]  ;;  %v2544_v29 = vpop.permute.xlu1 %2543  ;;  %v8005_v38 = vld [vmem:[#allocation209_spill] sm:$0xff] }
 0x272   :  { %v2348_v61 = vmul.f32 %v6541_v55, %v8000_v40  ;;  %v2351_v59 = vmul.f32 %v6541_v55, %v8001_v47  ;;  %v3080_v31 = vmul.f32 %v2929_v7, %v7999_v42  ;;  %v2858_v17 = vadd.f32 %v2785_v11, %v2415_v62  ;;  %v2564_v28 = vpop.permute.xlu0 %2563  ;;  %v8004_v62 = vld [vmem:[#allocation208_spill] sm:$0xff]  ;;  %v8007_v42 = vld [vmem:[#allocation183_spill] sm:$0xff] }
 0x273   :  { %v3001_v4 = vadd.f32 %v3000_v0, %v2929_v7  ;;  %v3151_v50 = vadd.f32 %v3150_v34, %v3079_v43  ;;  %v3081_v6 = vmul.f32 %v2930_v18, %v7998_v53  ;;  %v2932_v24 = vmul.f32 %v2859_v32, %v8002_v22 }
 0x274   :  { %v2861_v51 = vadd.f32 %v2788_v36, %v2418_v26  ;;  %v2790_v57 = vmul.f32 %v6588_v25, %v2556_v9  ;;  %v2931_v54 = vmul.f32 %v2858_v17, %v8003_v48  ;;  %v2787_v16 = vmul.f32 %v6588_v25, %v2544_v29 }
 0x275   :  { %v3152_v14 = vadd.f32 %v3151_v50, %v3080_v31  ;;  %v3002_v13 = vadd.f32 %v3001_v4, %v2930_v18  ;;  %v2421_v21 = vadd.f32 %v2348_v61, %v6373_v23  ;;  %v2424_v12 = vadd.f32 %v2351_v59, %v6386_v37  ;;  %v8006_v18 = vld [vmem:[#allocation188_spill] sm:$0xff]  ;;  %v2552_v9 = vpop.permute.xlu1 %2551  ;;  %v8009_v59 = vld [vmem:[#allocation215_spill] sm:$0xff] }
 0x276   :  { %v2350_v49 = vmul.f32 %v6541_v55, %v8004_v62  ;;  %v2353_v26 = vmul.f32 %v6541_v55, %v8005_v38  ;;  %v3082_v63 = vmul.f32 %v2931_v54, %v8003_v48  ;;  %v2860_v53 = vadd.f32 %v2787_v16, %v2417_v45  ;;  %v2572_v37 = vpop.permute.xlu0 %2571  ;;  %v8008_v45 = vld [vmem:[#allocation214_spill] sm:$0xff] }
 0x277   :  { %v3003_v52 = vadd.f32 %v3002_v13, %v2931_v54  ;;  %v3153_v43 = vadd.f32 %v3152_v14, %v3081_v6  ;;  %v3083_v32 = vmul.f32 %v2932_v24, %v8002_v22  ;;  %v2934_v36 = vmul.f32 %v2861_v51, %v8006_v18  ;;  %v8010_v22 = vld [vmem:[#allocation194_spill] sm:$0xff] }
 0x278   :  { %v2863_v58 = vadd.f32 %v2790_v57, %v2420_v33  ;;  %v2792_v23 = vmul.f32 %v6588_v25, %v2564_v28  ;;  %v2933_v7 = vmul.f32 %v2860_v53, %v8007_v42  ;;  %v2789_v11 = vmul.f32 %v6588_v25, %v2552_v9  ;;  %v8011_v28 = vld [vmem:[#allocation189_spill] sm:$0xff]  ;;  %v8014_v53 = vld [vmem:[#allocation202_spill] sm:$0xff] }
 0x279   :  { %v3154_v34 = vadd.f32 %v3153_v43, %v3082_v63  ;;  %v3004_v0 = vadd.f32 %v3003_v52, %v2932_v24  ;;  %v2423_v40 = vadd.f32 %v2350_v49, %v6383_v56  ;;  %v2426_v61 = vadd.f32 %v2353_v26, %v6392_v3  ;;  %v2560_v57 = vpop.permute.xlu1 %2559  ;;  %v8013_v49 = vld [vmem:[#allocation217_spill] sm:$0xff] }
 0x27a   :  { %v2352_v47 = vmul.f32 %v6541_v55, %v8008_v45  ;;  %v2355_v33 = vmul.f32 %v6541_v55, %v8009_v59  ;;  %v3084_v31 = vmul.f32 %v2933_v7, %v8007_v42  ;;  %v2862_v17 = vadd.f32 %v2789_v11, %v2419_v46  ;;  %v2580_v3 = vpop.permute.xlu0 %2579  ;;  %v8012_v46 = vld [vmem:[#allocation216_spill] sm:$0xff]  ;;  %v8017_v11 = vld [vmem:[#allocation223_spill] sm:$0xff] }
 0x27b   :  { %v3005_v4 = vadd.f32 %v3004_v0, %v2933_v7  ;;  %v3155_v50 = vadd.f32 %v3154_v34, %v3083_v32  ;;  %v3085_v6 = vmul.f32 %v2934_v36, %v8006_v18  ;;  %v2936_v24 = vmul.f32 %v2863_v58, %v8010_v22 }
 0x27c   :  { %v2865_v51 = vadd.f32 %v2792_v23, %v2422_v41  ;;  %v2794_v56 = vmul.f32 %v6588_v25, %v2572_v37  ;;  %v2935_v14 = vmul.f32 %v2862_v17, %v8011_v28  ;;  %v2791_v54 = vmul.f32 %v6588_v25, %v2560_v57  ;;  %v8015_v23 = vld [vmem:[#allocation196_spill] sm:$0xff] }
 0x27d   :  { %v3156_v29 = vadd.f32 %v3155_v50, %v3084_v31  ;;  %v3006_v48 = vadd.f32 %v3005_v4, %v2934_v36  ;;  %v2425_v13 = vadd.f32 %v2352_v47, %v6389_v60  ;;  %v2428_v16 = vadd.f32 %v2355_v33, %v6401_v30  ;;  %v2568_v36 = vpop.permute.xlu1 %2567  ;;  %v8018_v31 = vld [vmem:[#allocation210_spill] sm:$0xff] }
 0x27e   :  { %v2354_v62 = vmul.f32 %v6541_v55, %v8012_v46  ;;  %v2357_v41 = vmul.f32 %v6541_v55, %v8013_v49  ;;  %v3086_v26 = vmul.f32 %v2935_v14, %v8011_v28  ;;  %v2864_v63 = vadd.f32 %v2791_v54, %v2421_v21  ;;  %v2588_v30 = vpop.permute.xlu0 %2587  ;;  %v8016_v21 = vld [vmem:[#allocation222_spill] sm:$0xff] }
 0x27f   :  { %v3007_v38 = vadd.f32 %v3006_v48, %v2935_v14  ;;  %v3157_v52 = vadd.f32 %v3156_v29, %v3085_v6  ;;  %v3087_v43 = vmul.f32 %v2936_v24, %v8010_v22  ;;  %v2938_v32 = vmul.f32 %v2865_v51, %v8014_v53  ;;  %v8021_v14 = vld [vmem:[#allocation225_spill] sm:$0xff] }
 0x280   :  { %v2867_v18 = vadd.f32 %v2794_v56, %v2424_v12  ;;  %v2796_v60 = vmul.f32 %v6588_v25, %v2580_v3  ;;  %v2937_v9 = vmul.f32 %v2864_v63, %v8015_v23  ;;  %v2793_v34 = vmul.f32 %v6588_v25, %v2568_v36 }
 0x281   :  { %v3158_v58 = vadd.f32 %v3157_v52, %v3086_v26  ;;  %v3008_v37 = vadd.f32 %v3007_v38, %v2936_v24  ;;  %v2427_v42 = vadd.f32 %v2354_v62, %v6398_v5  ;;  %v2430_v7 = vadd.f32 %v2357_v41, %v6407_v1  ;;  %v2576_v6 = vpop.permute.xlu1 %2575  ;;  %v8019_v24 = vld [vmem:[#allocation204_spill] sm:$0xff]  ;;  %v8022_v41 = vld [vmem:[#allocation218_spill] sm:$0xff] }
 0x282   :  { %v2356_v0 = vmul.f32 %v6541_v55, %v8016_v21  ;;  %v2359_v12 = vmul.f32 %v6541_v55, %v8017_v11  ;;  %v3088_v47 = vmul.f32 %v2937_v9, %v8015_v23  ;;  %v2866_v33 = vadd.f32 %v2793_v34, %v2423_v40  ;;  %v2596_v1 = vpop.permute.xlu0 %2595  ;;  %v8020_v40 = vld [vmem:[#allocation224_spill] sm:$0xff] }
 0x283   :  { %v3009_v45 = vadd.f32 %v3008_v37, %v2937_v9  ;;  %v3159_v59 = vadd.f32 %v3158_v58, %v3087_v43  ;;  %v3089_v4 = vmul.f32 %v2938_v32, %v8014_v53  ;;  %v2940_v50 = vmul.f32 %v2867_v18, %v8018_v31  ;;  %v8023_v43 = vld [vmem:[#allocation212_spill] sm:$0xff]  ;;  %v8025_v58 = vld [vmem:[#allocation231_spill] sm:$0xff] }
 0x284   :  { %v2869_v17 = vadd.f32 %v2796_v60, %v2426_v61  ;;  %v2798_v5 = vmul.f32 %v6588_v25, %v2588_v30  ;;  %v2939_v51 = vmul.f32 %v2866_v33, %v8019_v24  ;;  %v2795_v57 = vmul.f32 %v6588_v25, %v2576_v6  ;;  %v8029_v6 = vld [vmem:[#allocation233_spill] sm:$0xff] }
 0x285   :  { %v3160_v22 = vadd.f32 %v3159_v59, %v3088_v47  ;;  %v3010_v56 = vadd.f32 %v3009_v45, %v2938_v32  ;;  %v2429_v3 = vadd.f32 %v2356_v0, %v6404_v2  ;;  %v2432_v29 = vadd.f32 %v2359_v12, %v6417_v19  ;;  %v2584_v52 = vpop.permute.xlu1 %2583  ;;  %v8026_v0 = vld [vmem:[#allocation226_spill] sm:$0xff]  ;;  %v8027_v59 = vld [vmem:[#allocation220_spill] sm:$0xff] }
 0x286   :  { %v2358_v28 = vmul.f32 %v6541_v55, %v8020_v40  ;;  %v2361_v61 = vmul.f32 %v6541_v55, %v8021_v14  ;;  %v3090_v54 = vmul.f32 %v2939_v51, %v8019_v24  ;;  %v2868_v62 = vadd.f32 %v2795_v57, %v2425_v13  ;;  %v2604_v19 = vpop.permute.xlu0 %2603  ;;  %v8024_v13 = vld [vmem:[#allocation230_spill] sm:$0xff] }
 0x287   :  { %v3011_v48 = vadd.f32 %v3010_v56, %v2939_v51  ;;  %v3161_v46 = vadd.f32 %v3160_v22, %v3089_v4  ;;  %v3091_v49 = vmul.f32 %v2940_v50, %v8018_v31  ;;  %v2942_v38 = vmul.f32 %v2869_v17, %v8022_v41  ;;  %v8030_v57 = vld [vmem:[#allocation234_spill] sm:$0xff] }
 0x288   :  { %v2871_v26 = vadd.f32 %v2798_v5, %v2428_v16  ;;  %v2800_v2 = vmul.f32 %v6588_v25, %v2596_v1  ;;  %v2941_v53 = vmul.f32 %v2868_v62, %v8023_v43  ;;  %v2797_v18 = vmul.f32 %v6588_v25, %v2584_v52 }
 0x289   :  { %v3162_v63 = vadd.f32 %v3161_v46, %v3090_v54  ;;  %v3012_v32 = vadd.f32 %v3011_v48, %v2940_v50  ;;  %v2431_v60 = vadd.f32 %v2358_v28, %v6414_v39  ;;  %v2434_v36 = vadd.f32 %v2361_v61, %v6423_v20  ;;  %v2592_v45 = vpop.permute.xlu1 %2591  ;;  %v8031_v48 = vld [vmem:[#allocation228_spill] sm:$0xff] }
 0x28a   :  { %v2360_v30 = vmul.f32 %v6541_v55, %v8024_v13  ;;  %v2363_v16 = vmul.f32 %v6541_v55, %v8025_v58  ;;  %v3092_v9 = vmul.f32 %v2941_v53, %v8023_v43  ;;  %v2870_v34 = vadd.f32 %v2797_v18, %v2427_v42  ;;  %v2612_v20 = vpop.permute.xlu0 %2611  ;;  %v8028_v42 = vld [vmem:[#allocation232_spill] sm:$0xff] }
 0x28b   :  { %v3013_v23 = vadd.f32 %v3012_v32, %v2941_v53  ;;  %v3163_v37 = vadd.f32 %v3162_v63, %v3091_v49  ;;  %v3093_v21 = vmul.f32 %v2942_v38, %v8022_v41  ;;  %v2944_v11 = vmul.f32 %v2871_v26, %v8026_v0  ;;  %v8032_v41 = vld [vmem:[#allocation24_spill] sm:$0xff]  ;;  %v8035_v32 = vld [vmem:[#allocation242_spill] sm:$0xff] }
 0x28c   :  { %v2873_v12 = vadd.f32 %v2800_v2, %v2430_v7  ;;  %v2802_v39 = vmul.f32 %v6588_v25, %v2604_v19  ;;  %v2943_v33 = vmul.f32 %v2870_v34, %v8027_v59  ;;  %v2799_v31 = vmul.f32 %v6588_v25, %v2592_v45  ;;  %v8034_v2 = vld [vmem:[#allocation239_spill] sm:$0xff]  ;;  %v8040_v45 = vld [vmem:[#allocation241_spill] sm:$0xff] }
 0x28d   :  { %v3164_v47 = vadd.f32 %v3163_v37, %v3092_v9  ;;  %v3014_v4 = vadd.f32 %v3013_v23, %v2942_v38  ;;  %v2433_v50 = vadd.f32 %v2360_v30, %v6420_v10  ;;  %v2436_v17 = vadd.f32 %v2363_v16, %v6467_v8  ;;  %v2600_v14 = vpop.permute.xlu1 %2599  ;;  %v8036_v23 = vld [vmem:[#allocation236_spill] sm:$0xff] }
 0x28e   :  { %v2362_v5 = vmul.f32 %v6541_v55, %v8028_v42  ;;  %v2365_v7 = vmul.f32 %v6541_v55, %v8029_v6  ;;  %v3094_v22 = vmul.f32 %v2943_v33, %v8027_v59  ;;  %v2872_v51 = vadd.f32 %v2799_v31, %v2429_v3  ;;  %v2620_v8 = vpop.permute.xlu0 %2619  ;;  %v8033_v3 = vld [vmem:[#allocation238_spill] sm:$0xff]  ;;  %v8041_v42 = vld [vmem:[#allocation248_spill] sm:$0xff] }
 0x28f   :  { %v3015_v1 = vadd.f32 %v3014_v4, %v2943_v33  ;;  %v3165_v24 = vadd.f32 %v3164_v47, %v3093_v21  ;;  %v3095_v56 = vmul.f32 %v2944_v11, %v8026_v0  ;;  %v2946_v40 = vmul.f32 %v2873_v12, %v8030_v57  ;;  %v8037_v21 = vld [vmem:[#allocation19_spill] sm:$0xff] }
 0x290   :  { %v2875_v28 = vadd.f32 %v2802_v39, %v2432_v29  ;;  %v2804_v10 = vmul.f32 %v6588_v25, %v2612_v20  ;;  %v2945_v54 = vmul.f32 %v2872_v51, %v8031_v48  ;;  %v2801_v62 = vmul.f32 %v6588_v25, %v2600_v14 }
 0x291   :  { %v3166_v61 = vadd.f32 %v3165_v24, %v3094_v22  ;;  %v3016_v46 = vadd.f32 %v3015_v1, %v2944_v11  ;;  %v2435_v49 = vadd.f32 %v2362_v5, %v6428_v15  ;;  %v2438_v38 = vadd.f32 %v2365_v7, %v8032_v41  ;;  %v2608_v30 = vpop.permute.xlu1 %2607  ;;  %v8038_v11 = vld [vmem:[#allocation127_spill] sm:$0xff]  ;;  %v8042_v24 = vld [vmem:[#allocation244_spill] sm:$0xff] }
 0x292   :  { %v2364_v26 = vmul.f32 %v6541_v55, %v8033_v3  ;;  %v2367_v29 = vmul.f32 %v6541_v55, %v8034_v2  ;;  %v3096_v19 = vmul.f32 %v2945_v54, %v8031_v48  ;;  %v2874_v43 = vadd.f32 %v2801_v62, %v2431_v60  ;;  %v2628_v58 = vpop.permute.xlu0 %2627  ;;  %v8039_v60 = vld [vmem:[#allocation240_spill] sm:$0xff] }
 0x293   :  { %v3017_v52 = vadd.f32 %v3016_v46, %v2945_v54  ;;  %v3167_v63 = vadd.f32 %v3166_v61, %v3095_v56  ;;  %v3097_v53 = vmul.f32 %v2946_v40, %v8030_v57  ;;  %v2948_v18 = vmul.f32 %v2875_v28, %v8035_v32 }
 0x294   :  { %v2877_v13 = vadd.f32 %v2804_v10, %v2434_v36  ;;  %v2806_v15 = vmul.f32 %v6588_v25, %v2620_v8  ;;  %v2947_v9 = vmul.f32 %v2874_v43, %v8036_v23  ;;  %v2803_v34 = vmul.f32 %v6588_v25, %v2608_v30  ;;  %v8044_v10 = vld [vmem:[#allocation69_spill] sm:$0xff]  ;;  %v8050_v30 = vld [vmem:[#allocation71_spill] sm:$0xff] }
 0x295   :  { %v3168_v16 = vadd.f32 %v3167_v63, %v3096_v19  ;;  %v3018_v37 = vadd.f32 %v3017_v52, %v2946_v40  ;;  %v2437_v0 = vadd.f32 %v2364_v26, %v8037_v21  ;;  %v2440_v12 = vadd.f32 %v2367_v29, %v8038_v11  ;;  %v2616_v7 = vpop.permute.xlu1 %2615  ;;  %v8043_v40 = vld [vmem:[#allocation23_spill] sm:$0xff]  ;;  %v8047_v26 = vld [vmem:[#allocation21_spill] sm:$0xff] }
 0x296   :  { %v2366_v39 = vmul.f32 %v6541_v55, %v8039_v60  ;;  %v2369_v36 = vmul.f32 %v6541_v55, %v8040_v45  ;;  %v3098_v47 = vmul.f32 %v2947_v9, %v8036_v23  ;;  %v2876_v33 = vadd.f32 %v2803_v34, %v2433_v50  ;;  %v2636_v1 = vpop.permute.xlu0 %2635  ;;  %v8045_v50 = vld [vmem:[#allocation246_spill] sm:$0xff]  ;;  %v8048_v43 = vld [vmem:[#allocation13_spill] sm:$0xff]  ;;  %v8053_v11 = vld [vmem:[#allocation195_spill] sm:$0xff] }
 0x297   :  { %v3019_v20 = vadd.f32 %v3018_v37, %v2947_v9  ;;  %v3169_v59 = vadd.f32 %v3168_v16, %v3097_v53  ;;  %v3099_v4 = vmul.f32 %v2948_v18, %v8035_v32  ;;  %v2879_v31 = vadd.f32 %v2806_v15, %v2436_v17  ;;  %v8046_v17 = vld [vmem:[#allocation247_spill] sm:$0xff] }
 0x298   :  { %v2950_v5 = vmul.f32 %v2877_v13, %v8041_v42  ;;  %v2808_v6 = vmul.f32 %v6588_v25, %v2628_v58  ;;  %v2949_v51 = vmul.f32 %v2876_v33, %v8042_v24  ;;  %v2805_v57 = vmul.f32 %v6588_v25, %v2616_v7  ;;  %v8049_v13 = vld [vmem:[#allocation133_spill] sm:$0xff]  ;;  %v8054_v33 = vld [vmem:[#allocation27_spill] sm:$0xff] }
 0x299   :  { %v3170_v22 = vadd.f32 %v3169_v59, %v3098_v47  ;;  %v3020_v56 = vadd.f32 %v3019_v20, %v2948_v18  ;;  %v2439_v28 = vadd.f32 %v2366_v39, %v8043_v40  ;;  %v2442_v14 = vadd.f32 %v2369_v36, %v8044_v10  ;;  %v2624_v52 = vpop.permute.xlu1 %2623  ;;  %v8056_v7 = vld [vmem:[#allocation75_spill] sm:$0xff] }
 0x29a   :  { %v2368_v8 = vmul.f32 %v6541_v55, %v8045_v50  ;;  %v2371_v61 = vmul.f32 %v6541_v55, %v8046_v17  ;;  %v3100_v54 = vmul.f32 %v2949_v51, %v8042_v24  ;;  %v2878_v62 = vadd.f32 %v2805_v57, %v2435_v49  ;;  %v2644_v19 = vpop.permute.xlu0 %2643  ;;  %v8051_v49 = vld [vmem:[#allocation249_spill] sm:$0xff]  ;;  %v8058_v24 = vld [vmem:[#allocation18_spill] sm:$0xff]  ;;  %v8059_v50 = vld [vmem:[#allocation203_spill] sm:$0xff] }
 0x29b   :  { %v3021_v48 = vadd.f32 %v3020_v56, %v2949_v51  ;;  %v3171_v46 = vadd.f32 %v3170_v22, %v3099_v4  ;;  %v3101_v41 = vmul.f32 %v2950_v5, %v8041_v42  ;;  %v2881_v3 = vadd.f32 %v2808_v6, %v2438_v38  ;;  %v8052_v38 = vld [vmem:[#allocation250_spill] sm:$0xff] }
 0x29c   :  { %v2952_v2 = vmul.f32 %v2879_v31, %v8047_v26  ;;  %v2810_v29 = vmul.f32 %v6588_v25, %v2636_v1  ;;  %v2951_v53 = vmul.f32 %v2878_v62, %v8048_v43  ;;  %v2807_v18 = vmul.f32 %v6588_v25, %v2624_v52  ;;  %v8062_v52 = vld [vmem:[#allocation77_spill] sm:$0xff] }
 0x29d   :  { %v3172_v63 = vadd.f32 %v3171_v46, %v3100_v54  ;;  %v3022_v32 = vadd.f32 %v3021_v48, %v2950_v5  ;;  %v2441_v15 = vadd.f32 %v2368_v8, %v8049_v13  ;;  %v2444_v58 = vadd.f32 %v2371_v61, %v8050_v30  ;;  %v2632_v20 = vpop.permute.xlu1 %2631  ;;  %v8055_v5 = vld [vmem:[#allocation70_spill] sm:$0xff] }
 0x29e   :  { %v2370_v16 = vmul.f32 %v6541_v55, %v8051_v49  ;;  %v2373_v23 = vmul.f32 %v6541_v55, %v8052_v38  ;;  %v3102_v37 = vmul.f32 %v2951_v53, %v8048_v43  ;;  %v2880_v21 = vadd.f32 %v2807_v18, %v2437_v0  ;;  %v2652_v47 = vpop.permute.xlu0 %2651  ;;  %v8057_v0 = vld [vmem:[#allocation17_spill] sm:$0xff]  ;;  %v8065_v49 = vld [vmem:[#allocation211_spill] sm:$0xff] }
 0x29f   :  { %v3023_v9 = vadd.f32 %v3022_v32, %v2951_v53  ;;  %v3173_v34 = vadd.f32 %v3172_v63, %v3101_v41  ;;  %v2954_v60 = vmul.f32 %v2881_v3, %v8053_v11  ;;  %v3103_v39 = vmul.f32 %v2952_v2, %v8047_v26  ;;  %v8060_v41 = vld [vmem:[#allocation197_spill] sm:$0xff] }
 0x2a0   :  { %v2883_v45 = vadd.f32 %v2810_v29, %v2440_v12  ;;  %v2812_v36 = vmul.f32 %v6588_v25, %v2644_v19  ;;  %v2953_v4 = vmul.f32 %v2880_v21, %v8054_v33  ;;  %v2809_v42 = vmul.f32 %v6588_v25, %v2632_v20  ;;  %v8064_v43 = vld [vmem:[#allocation25_spill] sm:$0xff]  ;;  %v8068_v20 = vld [vmem:[#allocation132_spill] sm:$0xff] }
 0x2a1   :  { %v3174_v59 = vadd.f32 %v3173_v34, %v3102_v37  ;;  %v3024_v31 = vadd.f32 %v3023_v9, %v2952_v2  ;;  %v2443_v6 = vadd.f32 %v2370_v16, %v8055_v5  ;;  %v2446_v1 = vadd.f32 %v2373_v23, %v8056_v7  ;;  %v2640_v48 = vpop.permute.xlu1 %2639  ;;  %v8061_v2 = vld [vmem:[#allocation74_spill] sm:$0xff]  ;;  %v8066_v21 = vld [vmem:[#allocation205_spill] sm:$0xff]  ;;  %v8070_v7 = vld [vmem:[#allocation219_spill] sm:$0xff] }
 0x2a2   :  { %v2372_v22 = vmul.f32 %v6541_v55, %v8057_v0  ;;  %v2375_v12 = vmul.f32 %v6541_v55, %v8058_v24  ;;  %v3104_v56 = vmul.f32 %v2953_v4, %v8054_v33  ;;  %v2882_v40 = vadd.f32 %v2809_v42, %v2439_v28  ;;  %v2660_v54 = vpop.permute.xlu0 %2659  ;;  %v8063_v28 = vld [vmem:[#allocation22_spill] sm:$0xff] }
 0x2a3   :  { %v3025_v51 = vadd.f32 %v3024_v31, %v2953_v4  ;;  %v3175_v57 = vadd.f32 %v3174_v59, %v3103_v39  ;;  %v3105_v10 = vmul.f32 %v2954_v60, %v8053_v11  ;;  %v2956_v8 = vmul.f32 %v2883_v45, %v8059_v50  ;;  %v8067_v45 = vld [vmem:[#allocation76_spill] sm:$0xff] }
 0x2a4   :  { %v2885_v17 = vadd.f32 %v2812_v36, %v2442_v14  ;;  %v2814_v61 = vmul.f32 %v6588_v25, %v2652_v47  ;;  %v2955_v3 = vmul.f32 %v2882_v40, %v8060_v41  ;;  %v2811_v26 = vmul.f32 %v6588_v25, %v2640_v48 }
 0x2a5   :  { %v3026_v46 = vadd.f32 %v3025_v51, %v2954_v60  ;;  %v3176_v62 = vadd.f32 %v3175_v57, %v3104_v56  ;;  %v2445_v29 = vadd.f32 %v2372_v22, %v8061_v2  ;;  %v2448_v19 = vadd.f32 %v2375_v12, %v8062_v52  ;;  %v2648_v9 = vpop.permute.xlu1 %2647  ;;  %v8071_v57 = vld [vmem:[#allocation213_spill] sm:$0xff]  ;;  %v8075_v2 = vld [vmem:[#allocation227_spill] sm:$0xff] }
 0x2a6   :  { %v2374_v63 = vmul.f32 %v6541_v55, %v8063_v28  ;;  %v2377_v14 = vmul.f32 %v6541_v55, %v8064_v43  ;;  %v3106_v18 = vmul.f32 %v2955_v3, %v8060_v41  ;;  %v2884_v13 = vadd.f32 %v2811_v26, %v2441_v15  ;;  %v2668_v37 = vpop.permute.xlu0 %2667  ;;  %v8069_v15 = vld [vmem:[#allocation29_spill] sm:$0xff] }
 0x2a7   :  { %v3177_v53 = vadd.f32 %v3176_v62, %v3105_v10  ;;  %v3027_v32 = vadd.f32 %v3026_v46, %v2955_v3  ;;  %v3107_v30 = vmul.f32 %v2956_v8, %v8059_v50  ;;  %v2958_v16 = vmul.f32 %v2885_v17, %v8065_v49 }
 0x2a8   :  { %v2887_v38 = vadd.f32 %v2814_v61, %v2444_v58  ;;  %v2816_v23 = vmul.f32 %v6588_v25, %v2660_v54  ;;  %v2957_v11 = vmul.f32 %v2884_v13, %v8066_v21  ;;  %v2813_v39 = vmul.f32 %v6588_v25, %v2648_v9  ;;  %v8073_v61 = vld [vmem:[#allocation30_spill] sm:$0xff]  ;;  %v8077_v13 = vld [vmem:[#allocation137_spill] sm:$0xff] }
 0x2a9   :  { %v3178_v34 = vadd.f32 %v3177_v53, %v3106_v18  ;;  %v3028_v60 = vadd.f32 %v3027_v32, %v2956_v8  ;;  %v2447_v36 = vadd.f32 %v2374_v63, %v8067_v45  ;;  %v2450_v47 = vadd.f32 %v2377_v14, %v8068_v20  ;;  %v2656_v12 = vpop.permute.xlu1 %2655  ;;  %v8072_v8 = vld [vmem:[#allocation79_spill] sm:$0xff] }
 0x2aa   :  { %v2376_v59 = vmul.f32 %v6541_v55, %v8069_v15  ;;  %v2818_v33 = vmul.f32 %v6588_v25, %v2668_v37  ;;  %v3108_v4 = vmul.f32 %v2957_v11, %v8066_v21  ;;  %v2886_v42 = vadd.f32 %v2813_v39, %v2443_v6  ;;  %v2676_v51 = vpop.permute.xlu0 %2675  ;;  %v8074_v6 = vld [vmem:[#allocation235_spill] sm:$0xff] }
 0x2ab   :  { %v3029_v58 = vadd.f32 %v3028_v60, %v2957_v11  ;;  %v3179_v31 = vadd.f32 %v3178_v34, %v3107_v30  ;;  %v3109_v5 = vmul.f32 %v2958_v16, %v8065_v49  ;;  %v2960_v0 = vmul.f32 %v2887_v38, %v8070_v7  ;;  %v8078_v49 = vld [vmem:[#allocation40_spill] sm:$0xff]  ;;  %v8079_v38 = vld [vmem:[#allocation243_spill] sm:$0xff] }
 0x2ac   :  { %v2889_v22 = vadd.f32 %v2816_v23, %v2446_v1  ;;  %v2891_v24 = vadd.f32 %v2818_v33, %v2448_v19  ;;  %v2959_v40 = vmul.f32 %v2886_v42, %v8071_v57  ;;  %v2815_v50 = vmul.f32 %v6588_v25, %v2656_v12  ;;  %v8080_v60 = vld [vmem:[#allocation39_spill] sm:$0xff]  ;;  %v7048_v12 = vld [vmem:[%s7187_s3 + $0x3] ss:$0 sm:$0xff] }
 0x2ad   :  { %v3180_v56 = vadd.f32 %v3179_v31, %v3108_v4  ;;  %v3030_v10 = vadd.f32 %v3029_v58, %v2958_v16  ;;  %v2449_v17 = vadd.f32 %v2376_v59, %v8072_v8  ;;  %v2379_v48 = vmul.f32 %v6541_v55, %v8073_v61  ;;  %v2664_v63 = vpop.permute.xlu1 %2663  ;;  %v8076_v55 = vld [vmem:[#allocation221_spill] sm:$0xff] }
 0x2ae   :  { %v2964_v54 = vmul.f32 %v2891_v24, %v8074_v6  ;;  %v2820_v46 = vmul.f32 %v6588_v25, %v2676_v51  ;;  %v3110_v1 = vmul.f32 %v2959_v40, %v8071_v57  ;;  %v2888_v3 = vadd.f32 %v2815_v50, %v2445_v29  ;;  %v2684_v43 = vpop.permute.xlu0 %2683  ;;  %v7028_v29 = vld [vmem:[%s7187_s3 + $0x2] ss:$0 sm:$0xff]  ;;  %v8081_v58 = vld [vmem:[#allocation229_spill] sm:$0xff] }
 0x2af   :  { %v3031_v62 = vadd.f32 %v3030_v10, %v2959_v40  ;;  %v3181_v41 = vadd.f32 %v3180_v56, %v3109_v5  ;;  %v3111_v26 = vmul.f32 %v2960_v0, %v8070_v7  ;;  %v2962_v52 = vmul.f32 %v2889_v22, %v8075_v2  ;;  %v8082_v5 = vld [vmem:[#allocation83_spill] sm:$0xff]  ;;  %v8086_v8 = vld [vmem:[#allocation53_spill] sm:$0xff] }
 0x2b0   :  { %v3115_v19 = vmul.f32 %v2964_v54, %v8074_v6  ;;  %v2893_v28 = vadd.f32 %v2820_v46, %v2450_v47  ;;  %v2961_v53 = vmul.f32 %v2888_v3, %v8076_v55  ;;  %v2817_v18 = vmul.f32 %v6588_v25, %v2664_v63  ;;  %v8084_v22 = vld [vmem:[#allocation251_spill] sm:$0xff]  ;;  %v8089_v63 = vld [vmem:[#allocation65_spill] sm:$0xff] }
 0x2b1   :  { %v3182_v14 = vadd.f32 %v3181_v41, %v3110_v1  ;;  %v3032_v32 = vadd.f32 %v3031_v62, %v2960_v0  ;;  %v2452_v30 = vadd.f32 %v2379_v48, %v8077_v13  ;;  %v2381_v16 = vmul.f32 %v7028_v29, %v8078_v49  ;;  %v2672_v15 = vpop.permute.xlu1 %2671  ;;  %v8083_v0 = vld [vmem:[#allocation54_spill] sm:$0xff]  ;;  %v8087_v41 = vld [vmem:[#allocation237_spill] sm:$0xff] }
 0x2b2   :  { %v2966_v23 = vmul.f32 %v2893_v28, %v8079_v38  ;;  %v2822_v9 = vmul.f32 %v6588_v25, %v2684_v43  ;;  %v3112_v34 = vmul.f32 %v2961_v53, %v8076_v55  ;;  %v2890_v11 = vadd.f32 %v2817_v18, %v2447_v36  ;;  %v2692_v59 = vpop.permute.xlu0 %2691  ;;  %v8090_v43 = vld [vmem:[#allocation26_spill] sm:$0xff] }
 0x2b3   :  { %v3033_v37 = vadd.f32 %v3032_v32, %v2961_v53  ;;  %v3183_v21 = vadd.f32 %v3182_v14, %v3111_v26  ;;  %v2378_v39 = vmul.f32 %v7028_v29, %v8080_v60  ;;  %v3113_v45 = vmul.f32 %v2962_v52, %v8075_v2 }
 0x2b4   :  { %v3117_v20 = vmul.f32 %v2966_v23, %v8079_v38  ;;  %v2895_v47 = vadd.f32 %v2822_v9, %v2452_v30  ;;  %v2963_v4 = vmul.f32 %v2890_v11, %v8081_v58  ;;  %v2819_v42 = vmul.f32 %v6588_v25, %v2672_v15  ;;  %v8085_v25 = vld [vmem:[#allocation82_spill] sm:$0xff]  ;;  %v8091_v30 = vld [vmem:[#allocation143_spill] sm:$0xff]  ;;  %v8093_v11 = vld [vmem:[#allocation245_spill] sm:$0xff] }
 0x2b5   :  { %v3184_v33 = vadd.f32 %v3183_v21, %v3112_v34  ;;  %v3034_v31 = vadd.f32 %v3033_v37, %v2962_v52  ;;  %v2454_v7 = vadd.f32 %v2381_v16, %v8082_v5  ;;  %v2383_v36 = vmul.f32 %v7028_v29, %v8083_v0  ;;  %v2680_v46 = vpop.permute.xlu1 %2679  ;;  %v8088_v52 = vld [vmem:[#allocation85_spill] sm:$0xff]  ;;  %v8092_v16 = vld [vmem:[#allocation64_spill] sm:$0xff] }
 0x2b6   :  { %v2968_v24 = vmul.f32 %v2895_v47, %v8084_v22  ;;  %v2824_v51 = vmul.f32 %v7048_v12, %v2692_v59  ;;  %v3114_v57 = vmul.f32 %v2963_v4, %v8081_v58  ;;  %v2892_v10 = vadd.f32 %v2819_v42, %v2449_v17  ;;  %v2700_v62 = vpop.permute.xlu0 %2699  ;;  %v8094_v47 = vld [vmem:[#allocation87_spill] sm:$0xff]  ;;  %v8097_v0 = vld [vmem:[#allocation84_spill] sm:$0xff] }
 0x2b7   :  { %v3035_v56 = vadd.f32 %v3034_v31, %v2963_v4  ;;  %v3185_v40 = vadd.f32 %v3184_v33, %v3113_v45  ;;  %v2451_v50 = vadd.f32 %v2378_v39, %v8085_v25  ;;  %v2380_v61 = vmul.f32 %v7028_v29, %v8086_v8  ;;  %v8096_v33 = vld [vmem:[#allocation45_spill] sm:$0xff]  ;;  %v8099_v25 = vld [vmem:[#allocation14_spill] sm:$0xff] }
 0x2b8   :  { %v3119_v48 = vmul.f32 %v2968_v24, %v8084_v22  ;;  %v2897_v6 = vadd.f32 %v2824_v51, %v2454_v7  ;;  %v2965_v3 = vmul.f32 %v2892_v10, %v8087_v41  ;;  %v2821_v2 = vmul.f32 %v7048_v12, %v2680_v46  ;;  %v8098_v22 = vld [vmem:[#allocation11_spill] sm:$0xff] }
 0x2b9   :  { %v3186_v1 = vadd.f32 %v3185_v40, %v3114_v57  ;;  %v3036_v26 = vadd.f32 %v3035_v56, %v2964_v54  ;;  %v2456_v28 = vadd.f32 %v2383_v36, %v8088_v52  ;;  %v2385_v17 = vmul.f32 %v7028_v29, %v8089_v63  ;;  %v2688_v37 = vpop.permute.xlu1 %2687  ;;  %v8103_v63 = vld [vmem:[#allocation86_spill] sm:$0xff] }
 0x2ba   :  { %v2970_v14 = vmul.f32 %v2897_v6, %v8090_v43  ;;  %v2826_v55 = vmul.f32 %v7048_v12, %v2700_v62  ;;  %v3116_v32 = vmul.f32 %v2965_v3, %v8087_v41  ;;  %v2894_v13 = vadd.f32 %v2821_v2, %v2451_v50  ;;  %v2708_v34 = vpop.permute.xlu0 %2707  ;;  %v8100_v6 = vld [vmem:[#allocation90_spill] sm:$0xff] }
 0x2bb   :  { %v3037_v53 = vadd.f32 %v3036_v26, %v2965_v3  ;;  %v3187_v18 = vadd.f32 %v3186_v1, %v3115_v19  ;;  %v2453_v49 = vadd.f32 %v2380_v61, %v8091_v30  ;;  %v2382_v54 = vmul.f32 %v7028_v29, %v8092_v16  ;;  %v8095_v19 = vld [vmem:[#allocation16_spill] sm:$0xff]  ;;  %v8102_v1 = vld [vmem:[#allocation9_spill] sm:$0xff] }
 0x2bc   :  { %v3121_v38 = vmul.f32 %v2970_v14, %v8090_v43  ;;  %v2899_v9 = vadd.f32 %v2826_v55, %v2456_v28  ;;  %v2967_v60 = vmul.f32 %v2894_v13, %v8093_v11  ;;  %v2823_v45 = vmul.f32 %v7048_v12, %v2688_v37  ;;  %v8104_v43 = vld [vmem:[#allocation15_spill] sm:$0xff]  ;;  %v8105_v30 = vld [vmem:[#allocation28_spill] sm:$0xff] }
 0x2bd   :  { %v3188_v21 = vadd.f32 %v3187_v18, %v3116_v32  ;;  %v3038_v39 = vadd.f32 %v3037_v53, %v2966_v23  ;;  %v2458_v15 = vadd.f32 %v2385_v17, %v8094_v47  ;;  %v2387_v59 = vmul.f32 %v7028_v29, %v8095_v19  ;;  %v2696_v57 = vpop.permute.xlu1 %2695  ;;  %v8109_v19 = vld [vmem:[#allocation89_spill] sm:$0xff] }
 0x2be   :  { %v2972_v58 = vmul.f32 %v2899_v9, %v8096_v33  ;;  %v2828_v4 = vmul.f32 %v7048_v12, %v2708_v34  ;;  %v3118_v42 = vmul.f32 %v2967_v60, %v8093_v11  ;;  %v2896_v7 = vadd.f32 %v2823_v45, %v2453_v49  ;;  %v2716_v40 = vpop.permute.xlu0 %2715  ;;  %v8106_v9 = vld [vmem:[#allocation92_spill] sm:$0xff] }
 0x2bf   :  { %v3039_v31 = vadd.f32 %v3038_v39, %v2967_v60  ;;  %v3189_v5 = vadd.f32 %v3188_v21, %v3117_v20  ;;  %v2455_v36 = vadd.f32 %v2382_v54, %v8097_v0  ;;  %v2384_v23 = vmul.f32 %v7028_v29, %v8098_v22  ;;  %v8101_v20 = vld [vmem:[#allocation68_spill] sm:$0xff]  ;;  %v8108_v21 = vld [vmem:[#allocation2_spill] sm:$0xff]  ;;  %v8111_v0 = vld [vmem:[#allocation51_spill] sm:$0xff] }
 0x2c0   :  { %v3123_v51 = vmul.f32 %v2972_v58, %v8096_v33  ;;  %v2901_v56 = vadd.f32 %v2828_v4, %v2458_v15  ;;  %v2969_v50 = vmul.f32 %v2896_v7, %v8099_v25  ;;  %v2825_v61 = vmul.f32 %v7048_v12, %v2696_v57  ;;  %v8110_v33 = vld [vmem:[#allocation122_spill] sm:$0xff] }
 0x2c1   :  { %v3190_v10 = vadd.f32 %v3189_v5, %v3118_v42  ;;  %v3040_v8 = vadd.f32 %v3039_v31, %v2968_v24  ;;  %v2460_v46 = vadd.f32 %v2387_v59, %v8100_v6  ;;  %v2389_v62 = vmul.f32 %v7028_v29, %v8101_v20  ;;  %v2704_v32 = vpop.permute.xlu1 %2703  ;;  %v8115_v20 = vld [vmem:[#allocation91_spill] sm:$0xff] }
 0x2c2   :  { %v2974_v41 = vmul.f32 %v2901_v56, %v8102_v1  ;;  %v2830_v3 = vmul.f32 %v7048_v12, %v2716_v40  ;;  %v3120_v2 = vmul.f32 %v2969_v50, %v8099_v25  ;;  %v2898_v28 = vadd.f32 %v2825_v61, %v2455_v36  ;;  %v2724_v18 = vpop.permute.xlu0 %2723  ;;  %v8112_v56 = vld [vmem:[#allocation142_spill] sm:$0xff] }
 0x2c3   :  { %v3041_v26 = vadd.f32 %v3040_v8, %v2969_v50  ;;  %v3191_v52 = vadd.f32 %v3190_v10, %v3119_v48  ;;  %v2457_v17 = vadd.f32 %v2384_v23, %v8103_v63  ;;  %v2386_v24 = vmul.f32 %v7028_v29, %v8104_v43  ;;  %v8107_v48 = vld [vmem:[#allocation128_spill] sm:$0xff]  ;;  %v8114_v10 = vld [vmem:[#allocation5_spill] sm:$0xff] }
 0x2c4   :  { %v3125_v55 = vmul.f32 %v2974_v41, %v8102_v1  ;;  %v2903_v53 = vadd.f32 %v2830_v3, %v2460_v46  ;;  %v2971_v49 = vmul.f32 %v2898_v28, %v8105_v30  ;;  %v2827_v54 = vmul.f32 %v7048_v12, %v2704_v32  ;;  %v8116_v1 = vld [vmem:[#allocation3_spill] sm:$0xff]  ;;  %v8117_v63 = vld [vmem:[#allocation12_spill] sm:$0xff] }
 0x2c5   :  { %v3192_v13 = vadd.f32 %v3191_v52, %v3120_v2  ;;  %v3042_v16 = vadd.f32 %v3041_v26, %v2970_v14  ;;  %v2462_v37 = vadd.f32 %v2389_v62, %v8106_v9  ;;  %v2391_v34 = vmul.f32 %v7028_v29, %v8107_v48  ;;  %v2712_v42 = vpop.permute.xlu1 %2711  ;;  %v8121_v48 = vld [vmem:[#allocation94_spill] sm:$0xff] }
 0x2c6   :  { %v2976_v11 = vmul.f32 %v2903_v53, %v8108_v21  ;;  %v2832_v60 = vmul.f32 %v7048_v12, %v2724_v18  ;;  %v3122_v45 = vmul.f32 %v2971_v49, %v8105_v30  ;;  %v2900_v15 = vadd.f32 %v2827_v54, %v2457_v17  ;;  %v2732_v5 = vpop.permute.xlu0 %2731  ;;  %v8118_v53 = vld [vmem:[#allocation96_spill] sm:$0xff] }
 0x2c7   :  { %v3043_v39 = vadd.f32 %v3042_v16, %v2971_v49  ;;  %v3193_v47 = vadd.f32 %v3192_v13, %v3121_v38  ;;  %v2459_v59 = vadd.f32 %v2386_v24, %v8109_v19  ;;  %v2388_v14 = vmul.f32 %v7028_v29, %v8110_v33  ;;  %v8113_v38 = vld [vmem:[#allocation6_spill] sm:$0xff]  ;;  %v8123_v19 = vld [vmem:[#allocation4_spill] sm:$0xff] }
 0x2c8   :  { %v3127_v4 = vmul.f32 %v2976_v11, %v8108_v21  ;;  %v2905_v31 = vadd.f32 %v2832_v60, %v2462_v37  ;;  %v2973_v36 = vmul.f32 %v2900_v15, %v8111_v0  ;;  %v2829_v23 = vmul.f32 %v7048_v12, %v2712_v42  ;;  %v8120_v13 = vld [vmem:[#allocation78_spill] sm:$0xff]  ;;  %v8122_v21 = vld [vmem:[#allocation7_spill] sm:$0xff] }
 0x2c9   :  { %v3194_v7 = vadd.f32 %v3193_v47, %v3122_v45  ;;  %v3044_v22 = vadd.f32 %v3043_v39, %v2972_v58  ;;  %v2464_v57 = vadd.f32 %v2391_v34, %v8112_v56  ;;  %v2393_v40 = vmul.f32 %v7028_v29, %v8113_v38  ;;  %v2720_v2 = vpop.permute.xlu1 %2719  ;;  %v8127_v38 = vld [vmem:[#allocation95_spill] sm:$0xff] }
 0x2ca   :  { %v2978_v25 = vmul.f32 %v2905_v31, %v8114_v10  ;;  %v2834_v50 = vmul.f32 %v7048_v12, %v2732_v5  ;;  %v3124_v61 = vmul.f32 %v2973_v36, %v8111_v0  ;;  %v2902_v46 = vadd.f32 %v2829_v23, %v2459_v59  ;;  %v2740_v52 = vpop.permute.xlu0 %2739  ;;  %v8124_v31 = vld [vmem:[#allocation153_spill] sm:$0xff] }
 0x2cb   :  { %v3045_v8 = vadd.f32 %v3044_v22, %v2973_v36  ;;  %v3195_v6 = vadd.f32 %v3194_v7, %v3123_v51  ;;  %v2461_v62 = vadd.f32 %v2388_v14, %v8115_v20  ;;  %v2390_v58 = vmul.f32 %v7028_v29, %v8116_v1  ;;  %v8119_v51 = vld [vmem:[#allocation20_spill] sm:$0xff]  ;;  %v8126_v7 = vld [vmem:[#allocation93_spill] sm:$0xff] }
 0x2cc   :  { %v3129_v3 = vmul.f32 %v2978_v25, %v8114_v10  ;;  %v2907_v26 = vadd.f32 %v2834_v50, %v2464_v57  ;;  %v2975_v17 = vmul.f32 %v2902_v46, %v8117_v63  ;;  %v2831_v24 = vmul.f32 %v7048_v12, %v2720_v2  ;;  %v8128_v10 = vld [vmem:[#allocation72_spill] sm:$0xff] }
 0x2cd   :  { %v3196_v28 = vadd.f32 %v3195_v6, %v3124_v61  ;;  %v3046_v43 = vadd.f32 %v3045_v8, %v2974_v41  ;;  %v2466_v32 = vadd.f32 %v2393_v40, %v8118_v53  ;;  %v2395_v18 = vmul.f32 %v7028_v29, %v8119_v51  ;;  %v8129_v46 = vld [vmem:[#allocation8_spill] sm:$0xff]  ;;  %v8133_v51 = vld [vmem:[#allocation147_spill] sm:$0xff] }
 0x2ce   :  { %v2980_v30 = vmul.f32 %v2907_v26, %v8120_v13  ;;  %v2836_v49 = vmul.f32 %v7048_v12, %v2740_v52  ;;  %v3126_v54 = vmul.f32 %v2975_v17, %v8117_v63  ;;  %v2904_v37 = vadd.f32 %v2831_v24, %v2461_v62  ;;  %v2748_v47 = vpop.permute.xlu0 %2747  ;;  %v8130_v26 = vld [vmem:[#allocation98_spill] sm:$0xff] }
 0x2cf   :  { %v3047_v16 = vadd.f32 %v3046_v43, %v2975_v17  ;;  %v3197_v9 = vadd.f32 %v3196_v28, %v3125_v55  ;;  %v2463_v34 = vadd.f32 %v2390_v58, %v8121_v48  ;;  %v2392_v41 = vmul.f32 %v7028_v29, %v8122_v21  ;;  %v2728_v45 = vpop.permute.xlu1 %2727  ;;  %v8125_v55 = vld [vmem:[#allocation73_spill] sm:$0xff]  ;;  %v8132_v28 = vld [vmem:[#allocation100_spill] sm:$0xff] }
 0x2d0   :  { %v3131_v60 = vmul.f32 %v2980_v30, %v8120_v13  ;;  %v2909_v39 = vadd.f32 %v2836_v49, %v2466_v32  ;;  %v2977_v59 = vmul.f32 %v2904_v37, %v8123_v19  ;;  %v2833_v14 = vmul.f32 %v7048_v12, %v2728_v45  ;;  %v8135_v37 = vld [vmem:[#allocation138_spill] sm:$0xff] }
 0x2d1   :  { %v3198_v15 = vadd.f32 %v3197_v9, %v3126_v54  ;;  %v3048_v33 = vadd.f32 %v3047_v16, %v2976_v11  ;;  %v2468_v42 = vadd.f32 %v2395_v18, %v8124_v31  ;;  %v2397_v5 = vmul.f32 %v7028_v29, %v8125_v55 }
 0x2d2   :  { %v2982_v0 = vmul.f32 %v2909_v39, %v8126_v7  ;;  %v2838_v36 = vmul.f32 %v7048_v12, %v2748_v47  ;;  %v3128_v23 = vmul.f32 %v2977_v59, %v8123_v19  ;;  %v2906_v57 = vadd.f32 %v2833_v14, %v2463_v34  ;;  %v2756_v58 = vpop.permute.xlu0 %2755  ;;  %v8136_v39 = vld [vmem:[#allocation165_spill] sm:$0xff]  ;;  %v8137_v47 = vld [vmem:[#allocation99_spill] sm:$0xff] }
 0x2d3   :  { %v3049_v22 = vadd.f32 %v3048_v33, %v2977_v59  ;;  %v3199_v56 = vadd.f32 %v3198_v15, %v3127_v4  ;;  %v2465_v40 = vadd.f32 %v2392_v41, %v8127_v38  ;;  %v2394_v11 = vmul.f32 %v7028_v29, %v8128_v10  ;;  %v8131_v4 = vld [vmem:[#allocation81_spill] sm:$0xff] }
 0x2d4   :  { %v3133_v50 = vmul.f32 %v2982_v0, %v8126_v7  ;;  %v2911_v8 = vadd.f32 %v2838_v36, %v2468_v42  ;;  %v2979_v20 = vmul.f32 %v2906_v57, %v8129_v46  ;;  %v2470_v2 = vadd.f32 %v2397_v5, %v8130_v26  ;;  %v8138_v42 = vld [vmem:[#allocation97_spill] sm:$0xff]  ;;  %v8139_v5 = vld [vmem:[#allocation88_spill] sm:$0xff] }
 0x2d5   :  { %v2736_v61 = vpop.permute.xlu1 %2735  ;;  %v3200_v6 = vadd.f32 %v3199_v56, %v3128_v23  ;;  %v3050_v62 = vadd.f32 %v3049_v22, %v2978_v25  ;;  %v2399_v52 = vmul.f32 %v7028_v29, %v8131_v4  ;;  %v2840_v17 = vmul.f32 %v7048_v12, %v2756_v58  ;;  %v8134_v25 = vld [vmem:[#allocation80_spill] sm:$0xff]  ;;  %v8142_v58 = vld [vmem:[#allocation101_spill] sm:$0xff] }
 0x2d6   :  { %v2835_v1 = vmul.f32 %v7048_v12, %v2736_v61  ;;  %v2984_v63 = vmul.f32 %v2911_v8, %v8132_v28  ;;  %v3130_v24 = vmul.f32 %v2979_v20, %v8129_v46  ;;  %v2467_v18 = vadd.f32 %v2394_v11, %v8133_v51  ;;  %v8140_v57 = vld [vmem:[#allocation148_spill] sm:$0xff] }
 0x2d7   :  { %v3051_v43 = vadd.f32 %v3050_v62, %v2979_v20  ;;  %v3201_v53 = vadd.f32 %v3200_v6, %v3129_v3  ;;  %v2396_v13 = vmul.f32 %v7028_v29, %v8134_v25  ;;  %v2913_v16 = vadd.f32 %v2840_v17, %v2470_v2  ;;  %v4007_v3 = vld [vmem:[%s7187_s3 + $0x1] ss:$0 sm:$0xff]  ;;  %v8141_v11 = vld [vmem:[#allocation60_spill] sm:$0xff] }
 0x2d8   :  { %v2908_v32 = vadd.f32 %v2835_v1, %v2465_v40  ;;  %v3135_v49 = vmul.f32 %v2984_v63, %v8132_v28  ;;  %v2764_v41 = vpop.permute.xlu0 %2763  ;;  %v1955_v45 = vmul.f32 %v4007_v3, %v8136_v39  ;;  %v2472_v15 = vadd.f32 %v2399_v52, %v8137_v47 }
 0x2d9   :  { %v2744_v54 = vpop.permute.xlu1 %2743  ;;  %v3202_v9 = vadd.f32 %v3201_v53, %v3130_v24  ;;  %v3052_v34 = vadd.f32 %v3051_v43, %v2980_v30  ;;  %v2842_v19 = vmul.f32 %v7048_v12, %v2764_v41  ;;  %v2986_v59 = vmul.f32 %v2913_v16, %v6743_v27 }
 0x2da   :  { %v2981_v48 = vmul.f32 %v2908_v32, %v8135_v37  ;;  %v2837_v21 = vmul.f32 %v7048_v12, %v2744_v54  ;;  %v2469_v55 = vadd.f32 %v2396_v13, %v8138_v42  ;;  %v2398_v7 = vmul.f32 %v7028_v29, %v8139_v5 }
 0x2db   :  { %v3203_v31 = vadd.f32 %v3202_v9, %v3131_v60  ;;  %v2915_v36 = vadd.f32 %v2842_v19, %v2472_v15  ;;  %v3137_v22 = vmul.f32 %v2986_v59, %v6743_v27  ;;  %v2028_v8 = vadd.f32 %v1955_v45, %v8141_v11 }
 0x2dc   :  { %v3053_v33 = vadd.f32 %v3052_v34, %v2981_v48  ;;  %v3132_v14 = vmul.f32 %v2981_v48, %v8135_v37  ;;  %v2910_v30 = vadd.f32 %v2837_v21, %v2467_v18 }
 0x2dd   :  { %v2752_v23 = vpop.permute.xlu1 %2751  ;;  %v2988_v60 = vmul.f32 %v2915_v36, %v6767_v44  ;;  %v2471_v29 = vadd.f32 %v2398_v7, %v2028_v8 }
 0x2de   :  { %v3204_v56 = vadd.f32 %v3203_v31, %v3132_v14  ;;  %v2983_v38 = vmul.f32 %v2910_v30, %v8140_v57  ;;  %v3054_v40 = vadd.f32 %v3053_v33, %v2982_v0  ;;  %v2839_v10 = vmul.f32 %v7048_v12, %v2752_v23 }
 0x2df   :  { %v3139_v62 = vmul.f32 %v2988_v60, %v6767_v44 }
 0x2e0   :  { %v3055_v61 = vadd.f32 %v3054_v40, %v2983_v38  ;;  %v3134_v6 = vmul.f32 %v2983_v38, %v8140_v57  ;;  %v3205_v46 = vadd.f32 %v3204_v56, %v3133_v50  ;;  %v2912_v20 = vadd.f32 %v2839_v10, %v2469_v55 }
 0x2e1   :  { %v2760_v27 = vpop.permute.xlu1 %2759 }
 0x2e2   :  { %v3206_v1 = vadd.f32 %v3205_v46, %v3134_v6  ;;  %v2985_v26 = vmul.f32 %v2912_v20, %v8142_v58  ;;  %v3056_v2 = vadd.f32 %v3055_v61, %v2984_v63  ;;  %v2841_v0 = vmul.f32 %v7048_v12, %v2760_v27 }
 0x2e4   :  { %v3057_v4 = vadd.f32 %v3056_v2, %v2985_v26  ;;  %v3136_v52 = vmul.f32 %v2985_v26, %v8142_v58  ;;  %v3207_v28 = vadd.f32 %v3206_v1, %v3135_v49  ;;  %v2914_v17 = vadd.f32 %v2841_v0, %v2471_v29 }
 0x2e6   :  { %v3208_v43 = vadd.f32 %v3207_v28, %v3136_v52  ;;  %v2987_v24 = vmul.f32 %v2914_v17, %v6756_v35  ;;  %v3058_v50 = vadd.f32 %v3057_v4, %v2986_v59 }
 0x2e8   :  { %v3059_v53 = vadd.f32 %v3058_v50, %v2987_v24  ;;  %v3138_v32 = vmul.f32 %v2987_v24, %v6756_v35  ;;  %v3209_v44 = vadd.f32 %v3208_v43, %v3137_v22 }
 0x2ea   :  { %v3060_v51 = vadd.f32 %v3059_v53, %v2988_v60  ;;  %v3210_v18 = vadd.f32 %v3209_v44, %v3138_v32 }
 0x2ec   :  { %v3061_v25 = vrot.slane %v3060_v51, 4  ;;  %v3211_v13 = vadd.f32 %v3210_v18, %v3139_v62 }
 0x2ee   :  { %v3062_v63 = vadd.f32 %v3061_v25, %v3060_v51  ;;  %v3212_v16 = vrot.slane %v3211_v13, 4 }
 0x2f0   :  { %v3063_v12 = vrot.slane %v3062_v63, 2  ;;  %v3213_v54 = vadd.f32 %v3212_v16, %v3211_v13 }
 0x2f2   :  { %v3064_v9 = vadd.f32 %v3063_v12, %v3062_v63  ;;  %v3214_v37 = vrot.slane %v3213_v54, 2 }
 0x2f4   :  { %v3065_v49 = vrot.slane %v3064_v9, 1  ;;  %v3215_v48 = vadd.f32 %v3214_v37, %v3213_v54 }
 0x2f6   :  { %v3066_v34 = vadd.f32 %v3065_v49, %v3064_v9  ;;  %v3216_v21 = vrot.slane %v3215_v48, 1 }
 0x2f8   :  { %v3217_v41 = vadd.f32 %v3216_v21, %v3215_v48  ;;  %3218 = vst [vmem:[%s7188_s5] sm:$0xff] %v3066_v34 }
 0x2fa   :  { %3219 = vst [vmem:[%s7188_s5 + $0x8] sm:$0xff] %v3217_v41 }

// kernel: generator_forward.16
= control target key start
LH: loop header
LB: loop body
LE: loop exit
PB: predicated region body
PF: predicated region fallthrough
CT: control target
= control target key end

     0   :  { %s1703_s0 = inlined_call_operand.vmem [shape: bf16[584,128], index: 0, kind: input, shape index: {}]   ;;  %s1704_s1 = inlined_call_operand.vmem [shape: f32[1,128], index: 1, kind: input, shape index: {}]   ;;  %s1705_s2 = inlined_call_operand.vmem [shape: f32[1,128], index: 2, kind: input, shape index: {}]   ;;  %s1706_s3 = inlined_call_operand.vmem [shape: bf16[584,128], index: 3, kind: output, shape index: {}]  }
   0x1   :  { %v912_v0 = vld [vmem:[%s1703_s0] sm:$0xff]   ;;  %v1235_v4 = vld [vmem:[%s1703_s0 + $0x8] sm:$0xff]   ;;  %v1236_v5 = vld [vmem:[%s1703_s0 + $0x10] sm:$0xff]  }
   0x2   :  { %v1331_v1 = vld [vmem:[%s1704_s1] ss:$0 sm:$0xff]  ;;  %v913_v2 = vunpack.c.l.bf16 %v912_v0  ;;  %v914_v3 = vunpack.c.h.bf16 %v912_v0  ;;  %v1237_v6 = vld [vmem:[%s1703_s0 + $0x18] sm:$0xff]   ;;  %v917_v8 = vunpack.c.l.bf16 %v1235_v4  ;;  %v918_v9 = vunpack.c.h.bf16 %v1235_v4  ;;  %v1239_v33 = vld [vmem:[%s1703_s0 + $0x28] sm:$0xff]  }
   0x3   :  { %v1345_v7 = vld [vmem:[%s1705_s2] ss:$0 sm:$0xff]  ;;  %v921_v10 = vunpack.c.l.bf16 %v1236_v5  ;;  %v922_v11 = vunpack.c.h.bf16 %v1236_v5  ;;  %v925_v14 = vunpack.c.l.bf16 %v1237_v6  ;;  %v926_v15 = vunpack.c.h.bf16 %v1237_v6  ;;  %v1240_v38 = vld [vmem:[%s1703_s0 + $0x30] sm:$0xff]   ;;  %v1241_v43 = vld [vmem:[%s1703_s0 + $0x38] sm:$0xff]  }
   0x4   :  { %v167_v12 = vmul.f32 %v913_v2, %v1331_v1  ;;  %v168_v13 = vmul.f32 %v914_v3, %v1331_v1  ;;  %v169_v16 = vmul.f32 %v917_v8, %v1331_v1  ;;  %v170_v17 = vmul.f32 %v918_v9, %v1331_v1  ;;  %v1238_v28 = vld [vmem:[%s1703_s0 + $0x20] sm:$0xff]  }
   0x5   :  { %v171_v18 = vmul.f32 %v921_v10, %v1331_v1  ;;  %v172_v19 = vmul.f32 %v922_v11, %v1331_v1  ;;  %v173_v22 = vmul.f32 %v925_v14, %v1331_v1  ;;  %v174_v23 = vmul.f32 %v926_v15, %v1331_v1  ;;  %v1242_v0 = vld [vmem:[%s1703_s0 + $0x40] sm:$0xff]   ;;  %v1243_v11 = vld [vmem:[%s1703_s0 + $0x48] sm:$0xff]  }
   0x6   :  { %v247_v20 = vadd.f32 %v1345_v7, %v167_v12  ;;  %v248_v21 = vadd.f32 %v1345_v7, %v168_v13  ;;  %v249_v24 = vadd.f32 %v1345_v7, %v169_v16  ;;  %v250_v25 = vadd.f32 %v1345_v7, %v170_v17  ;;  %v1244_v16 = vld [vmem:[%s1703_s0 + $0x50] sm:$0xff]  }
   0x7   :  { %v251_v26 = vadd.f32 %v1345_v7, %v171_v18  ;;  %v252_v27 = vadd.f32 %v1345_v7, %v172_v19  ;;  %v253_v31 = vadd.f32 %v1345_v7, %v173_v22  ;;  %v254_v32 = vadd.f32 %v1345_v7, %v174_v23 }
   0x8   :  { %v320_v29 = vmax.f32 %v247_v20, 0.0  ;;  %v321_v30 = vmax.f32 %v248_v21, 0.0  ;;  %v322_v34 = vmax.f32 %v249_v24, 0.0  ;;  %v323_v35 = vmax.f32 %v250_v25, 0.0  ;;  %v1245_v25 = vld [vmem:[%s1703_s0 + $0x58] sm:$0xff]  }
   0x9   :  { %v324_v36 = vmax.f32 %v251_v26, 0.0  ;;  %v325_v37 = vmax.f32 %v252_v27, 0.0  ;;  %v326_v40 = vmax.f32 %v253_v31, 0.0  ;;  %v327_v41 = vmax.f32 %v254_v32, 0.0 }
   0xa   :  { %v1058_v39 = vpack.c.bf16 %v321_v30, %v320_v29  ;;  %v929_v42 = vunpack.c.l.bf16 %v1238_v28  ;;  %v1063_v44 = vpack.c.bf16 %v323_v35, %v322_v34  ;;  %v930_v46 = vunpack.c.h.bf16 %v1238_v28 }
   0xb   :  { %v1068_v45 = vpack.c.bf16 %v325_v37, %v324_v36  ;;  %v933_v47 = vunpack.c.l.bf16 %v1239_v33  ;;  %v1073_v48 = vpack.c.bf16 %v327_v41, %v326_v40  ;;  %v934_v50 = vunpack.c.h.bf16 %v1239_v33 }
   0xc   :  { %1059 = vst [vmem:[%s1706_s3] sm:$0xff] %v1058_v39   ;;  %v175_v49 = vmul.f32 %v929_v42, %v1331_v1  ;;  %v937_v51 = vunpack.c.l.bf16 %v1240_v38  ;;  %1270 = vst [vmem:[%s1706_s3 + $0x8] sm:$0xff] %v1063_v44   ;;  %v176_v52 = vmul.f32 %v930_v46, %v1331_v1  ;;  %v938_v54 = vunpack.c.h.bf16 %v1240_v38  ;;  %v1246_v38 = vld [vmem:[%s1703_s0 + $0x60] sm:$0xff]  }
   0xd   :  { %1271 = vst [vmem:[%s1706_s3 + $0x10] sm:$0xff] %v1068_v45   ;;  %v177_v53 = vmul.f32 %v933_v47, %v1331_v1  ;;  %v941_v55 = vunpack.c.l.bf16 %v1241_v43  ;;  %1272 = vst [vmem:[%s1706_s3 + $0x18] sm:$0xff] %v1073_v48   ;;  %v178_v57 = vmul.f32 %v934_v50, %v1331_v1  ;;  %v942_v59 = vunpack.c.h.bf16 %v1241_v43 }
   0xe   :  { %v255_v56 = vadd.f32 %v1345_v7, %v175_v49  ;;  %v179_v58 = vmul.f32 %v937_v51, %v1331_v1  ;;  %v256_v60 = vadd.f32 %v1345_v7, %v176_v52  ;;  %v180_v62 = vmul.f32 %v938_v54, %v1331_v1  ;;  %v1247_v51 = vld [vmem:[%s1703_s0 + $0x68] sm:$0xff]  }
   0xf   :  { %v257_v61 = vadd.f32 %v1345_v7, %v177_v53  ;;  %v181_v63 = vmul.f32 %v941_v55, %v1331_v1  ;;  %v258_v3 = vadd.f32 %v1345_v7, %v178_v57  ;;  %v182_v5 = vmul.f32 %v942_v59, %v1331_v1 }
  0x10   :  { %v328_v2 = vmax.f32 %v255_v56, 0.0  ;;  %v259_v4 = vadd.f32 %v1345_v7, %v179_v58  ;;  %v329_v6 = vmax.f32 %v256_v60, 0.0  ;;  %v260_v9 = vadd.f32 %v1345_v7, %v180_v62  ;;  %v1248_v60 = vld [vmem:[%s1703_s0 + $0x70] sm:$0xff]  }
  0x11   :  { %v330_v8 = vmax.f32 %v257_v61, 0.0  ;;  %v261_v10 = vadd.f32 %v1345_v7, %v181_v63  ;;  %v331_v12 = vmax.f32 %v258_v3, 0.0  ;;  %v262_v14 = vadd.f32 %v1345_v7, %v182_v5 }
  0x12   :  { %v332_v13 = vmax.f32 %v259_v4, 0.0  ;;  %v945_v15 = vunpack.c.l.bf16 %v1242_v0  ;;  %v1078_v17 = vpack.c.bf16 %v329_v6, %v328_v2  ;;  %v333_v18 = vmax.f32 %v260_v9, 0.0  ;;  %v1249_v2 = vld [vmem:[%s1703_s0 + $0x78] sm:$0xff]  }
  0x13   :  { %v334_v19 = vmax.f32 %v261_v10, 0.0  ;;  %v946_v20 = vunpack.c.h.bf16 %v1242_v0  ;;  %v1083_v21 = vpack.c.bf16 %v331_v12, %v330_v8  ;;  %v335_v22 = vmax.f32 %v262_v14, 0.0  ;;  %v1250_v12 = vld [vmem:[%s1703_s0 + $0x80] sm:$0xff]  }
  0x14   :  { %v183_v23 = vmul.f32 %v945_v15, %v1331_v1  ;;  %v949_v24 = vunpack.c.l.bf16 %v1243_v11  ;;  %1273 = vst [vmem:[%s1706_s3 + $0x20] sm:$0xff] %v1078_v17   ;;  %v1088_v26 = vpack.c.bf16 %v333_v18, %v332_v13  ;;  %v950_v28 = vunpack.c.h.bf16 %v1243_v11 }
  0x15   :  { %v184_v27 = vmul.f32 %v946_v20, %v1331_v1  ;;  %v953_v29 = vunpack.c.l.bf16 %v1244_v16  ;;  %1274 = vst [vmem:[%s1706_s3 + $0x28] sm:$0xff] %v1083_v21   ;;  %v1093_v30 = vpack.c.bf16 %v335_v22, %v334_v19  ;;  %v954_v33 = vunpack.c.h.bf16 %v1244_v16 }
  0x16   :  { %v263_v31 = vadd.f32 %v1345_v7, %v183_v23  ;;  %v185_v32 = vmul.f32 %v949_v24, %v1331_v1  ;;  %1275 = vst [vmem:[%s1706_s3 + $0x30] sm:$0xff] %v1088_v26   ;;  %v186_v35 = vmul.f32 %v950_v28, %v1331_v1  ;;  %v957_v37 = vunpack.c.l.bf16 %v1245_v25 }
  0x17   :  { %v264_v34 = vadd.f32 %v1345_v7, %v184_v27  ;;  %v187_v36 = vmul.f32 %v953_v29, %v1331_v1  ;;  %1276 = vst [vmem:[%s1706_s3 + $0x38] sm:$0xff] %v1093_v30   ;;  %v188_v41 = vmul.f32 %v954_v33, %v1331_v1  ;;  %v958_v42 = vunpack.c.h.bf16 %v1245_v25  ;;  %v1251_v29 = vld [vmem:[%s1703_s0 + $0x88] sm:$0xff]  }
  0x18   :  { %v336_v39 = vmax.f32 %v263_v31, 0.0  ;;  %v265_v40 = vadd.f32 %v1345_v7, %v185_v32  ;;  %v266_v44 = vadd.f32 %v1345_v7, %v186_v35  ;;  %v189_v46 = vmul.f32 %v957_v37, %v1331_v1 }
  0x19   :  { %v337_v43 = vmax.f32 %v264_v34, 0.0  ;;  %v267_v45 = vadd.f32 %v1345_v7, %v187_v36  ;;  %v268_v48 = vadd.f32 %v1345_v7, %v188_v41  ;;  %v190_v49 = vmul.f32 %v958_v42, %v1331_v1  ;;  %v1252_v34 = vld [vmem:[%s1703_s0 + $0x90] sm:$0xff]  }
  0x1a   :  { %v338_v47 = vmax.f32 %v265_v40, 0.0  ;;  %v961_v50 = vunpack.c.l.bf16 %v1246_v38  ;;  %v339_v53 = vmax.f32 %v266_v44, 0.0  ;;  %v269_v55 = vadd.f32 %v1345_v7, %v189_v46 }
  0x1b   :  { %v1098_v52 = vpack.c.bf16 %v337_v43, %v336_v39  ;;  %v340_v54 = vmax.f32 %v267_v45, 0.0  ;;  %v341_v56 = vmax.f32 %v268_v48, 0.0  ;;  %v270_v57 = vadd.f32 %v1345_v7, %v190_v49  ;;  %v1253_v43 = vld [vmem:[%s1703_s0 + $0x98] sm:$0xff]  }
  0x1c   :  { %v962_v58 = vunpack.c.h.bf16 %v1246_v38  ;;  %v191_v59 = vmul.f32 %v961_v50, %v1331_v1  ;;  %v1103_v61 = vpack.c.bf16 %v339_v53, %v338_v47  ;;  %v342_v62 = vmax.f32 %v269_v55, 0.0 }
  0x1d   :  { %1277 = vst [vmem:[%s1706_s3 + $0x40] sm:$0xff] %v1098_v52   ;;  %v965_v63 = vunpack.c.l.bf16 %v1247_v51  ;;  %v966_v0 = vunpack.c.h.bf16 %v1247_v51  ;;  %v1108_v3 = vpack.c.bf16 %v341_v56, %v340_v54  ;;  %v343_v4 = vmax.f32 %v270_v57, 0.0  ;;  %v1254_v56 = vld [vmem:[%s1703_s0 + $0xa0] sm:$0xff]  }
  0x1e   :  { %v192_v5 = vmul.f32 %v962_v58, %v1331_v1  ;;  %v271_v6 = vadd.f32 %v1345_v7, %v191_v59  ;;  %1278 = vst [vmem:[%s1706_s3 + $0x48] sm:$0xff] %v1103_v61   ;;  %v969_v10 = vunpack.c.l.bf16 %v1248_v60  ;;  %v970_v11 = vunpack.c.h.bf16 %v1248_v60 }
  0x1f   :  { %v193_v8 = vmul.f32 %v965_v63, %v1331_v1  ;;  %v194_v9 = vmul.f32 %v966_v0, %v1331_v1  ;;  %1279 = vst [vmem:[%s1706_s3 + $0x50] sm:$0xff] %v1108_v3   ;;  %v1113_v13 = vpack.c.bf16 %v343_v4, %v342_v62  ;;  %v973_v16 = vunpack.c.l.bf16 %v1249_v2 }
  0x20   :  { %v272_v14 = vadd.f32 %v1345_v7, %v192_v5  ;;  %v344_v15 = vmax.f32 %v271_v6, 0.0  ;;  %v195_v19 = vmul.f32 %v969_v10, %v1331_v1  ;;  %v196_v20 = vmul.f32 %v970_v11, %v1331_v1 }
  0x21   :  { %v273_v17 = vadd.f32 %v1345_v7, %v193_v8  ;;  %v274_v18 = vadd.f32 %v1345_v7, %v194_v9  ;;  %1280 = vst [vmem:[%s1706_s3 + $0x58] sm:$0xff] %v1113_v13   ;;  %v974_v22 = vunpack.c.h.bf16 %v1249_v2  ;;  %v197_v23 = vmul.f32 %v973_v16, %v1331_v1  ;;  %v1255_v2 = vld [vmem:[%s1703_s0 + $0xa8] sm:$0xff]   ;;  %v1256_v16 = vld [vmem:[%s1703_s0 + $0xb0] sm:$0xff]  }
  0x22   :  { %v345_v21 = vmax.f32 %v272_v14, 0.0  ;;  %v977_v24 = vunpack.c.l.bf16 %v1250_v12  ;;  %v275_v27 = vadd.f32 %v1345_v7, %v195_v19  ;;  %v276_v28 = vadd.f32 %v1345_v7, %v196_v20 }
  0x23   :  { %v346_v25 = vmax.f32 %v273_v17, 0.0  ;;  %v347_v26 = vmax.f32 %v274_v18, 0.0  ;;  %v198_v31 = vmul.f32 %v974_v22, %v1331_v1  ;;  %v277_v32 = vadd.f32 %v1345_v7, %v197_v23 }
  0x24   :  { %v1118_v30 = vpack.c.bf16 %v345_v21, %v344_v15  ;;  %v978_v33 = vunpack.c.h.bf16 %v1250_v12  ;;  %v348_v36 = vmax.f32 %v275_v27, 0.0  ;;  %v349_v37 = vmax.f32 %v276_v28, 0.0  ;;  %v1257_v21 = vld [vmem:[%s1703_s0 + $0xb8] sm:$0xff]  }
  0x25   :  { %v1123_v35 = vpack.c.bf16 %v347_v26, %v346_v25  ;;  %v199_v38 = vmul.f32 %v977_v24, %v1331_v1  ;;  %v278_v39 = vadd.f32 %v1345_v7, %v198_v31  ;;  %v350_v40 = vmax.f32 %v277_v32, 0.0 }
  0x26   :  { %1281 = vst [vmem:[%s1706_s3 + $0x60] sm:$0xff] %v1118_v30   ;;  %v200_v41 = vmul.f32 %v978_v33, %v1331_v1  ;;  %v981_v42 = vunpack.c.l.bf16 %v1251_v29  ;;  %v1128_v44 = vpack.c.bf16 %v349_v37, %v348_v36  ;;  %v982_v46 = vunpack.c.h.bf16 %v1251_v29 }
  0x27   :  { %1282 = vst [vmem:[%s1706_s3 + $0x68] sm:$0xff] %v1123_v35   ;;  %v279_v45 = vadd.f32 %v1345_v7, %v199_v38  ;;  %v985_v47 = vunpack.c.l.bf16 %v1252_v34  ;;  %v351_v48 = vmax.f32 %v278_v39, 0.0  ;;  %v986_v51 = vunpack.c.h.bf16 %v1252_v34  ;;  %v1258_v34 = vld [vmem:[%s1703_s0 + $0xc0] sm:$0xff]  }
  0x28   :  { %v280_v49 = vadd.f32 %v1345_v7, %v200_v41  ;;  %v201_v50 = vmul.f32 %v981_v42, %v1331_v1  ;;  %1283 = vst [vmem:[%s1706_s3 + $0x70] sm:$0xff] %v1128_v44   ;;  %v202_v53 = vmul.f32 %v982_v46, %v1331_v1  ;;  %v989_v55 = vunpack.c.l.bf16 %v1253_v43 }
  0x29   :  { %v352_v52 = vmax.f32 %v279_v45, 0.0  ;;  %v203_v54 = vmul.f32 %v985_v47, %v1331_v1  ;;  %v1133_v57 = vpack.c.bf16 %v351_v48, %v350_v40  ;;  %v204_v60 = vmul.f32 %v986_v51, %v1331_v1  ;;  %v1259_v47 = vld [vmem:[%s1703_s0 + $0xc8] sm:$0xff]  }
  0x2a   :  { %v353_v58 = vmax.f32 %v280_v49, 0.0  ;;  %v281_v59 = vadd.f32 %v1345_v7, %v201_v50  ;;  %v282_v61 = vadd.f32 %v1345_v7, %v202_v53  ;;  %v990_v63 = vunpack.c.h.bf16 %v1253_v43 }
  0x2b   :  { %v283_v62 = vadd.f32 %v1345_v7, %v203_v54  ;;  %v205_v0 = vmul.f32 %v989_v55, %v1331_v1  ;;  %1284 = vst [vmem:[%s1706_s3 + $0x78] sm:$0xff] %v1133_v57   ;;  %v284_v5 = vadd.f32 %v1345_v7, %v204_v60  ;;  %v993_v6 = vunpack.c.l.bf16 %v1254_v56 }
  0x2c   :  { %v1138_v3 = vpack.c.bf16 %v353_v58, %v352_v52  ;;  %v354_v4 = vmax.f32 %v281_v59, 0.0  ;;  %v355_v8 = vmax.f32 %v282_v61, 0.0  ;;  %v206_v10 = vmul.f32 %v990_v63, %v1331_v1  ;;  %v1260_v52 = vld [vmem:[%s1703_s0 + $0xd0] sm:$0xff]   ;;  %v1261_v61 = vld [vmem:[%s1703_s0 + $0xd8] sm:$0xff]  }
  0x2d   :  { %v356_v9 = vmax.f32 %v283_v62, 0.0  ;;  %v285_v11 = vadd.f32 %v1345_v7, %v205_v0  ;;  %v357_v12 = vmax.f32 %v284_v5, 0.0  ;;  %v994_v13 = vunpack.c.h.bf16 %v1254_v56 }
  0x2e   :  { %1285 = vst [vmem:[%s1706_s3 + $0x80] sm:$0xff] %v1138_v3   ;;  %v207_v14 = vmul.f32 %v993_v6, %v1331_v1  ;;  %v997_v15 = vunpack.c.l.bf16 %v1255_v2  ;;  %v1143_v17 = vpack.c.bf16 %v355_v8, %v354_v4  ;;  %v286_v18 = vadd.f32 %v1345_v7, %v206_v10 }
  0x2f   :  { %v358_v19 = vmax.f32 %v285_v11, 0.0  ;;  %v998_v20 = vunpack.c.h.bf16 %v1255_v2  ;;  %v1148_v22 = vpack.c.bf16 %v357_v12, %v356_v9  ;;  %v208_v23 = vmul.f32 %v994_v13, %v1331_v1  ;;  %v1262_v12 = vld [vmem:[%s1703_s0 + $0xe0] sm:$0xff]  }
  0x30   :  { %v287_v24 = vadd.f32 %v1345_v7, %v207_v14  ;;  %v209_v25 = vmul.f32 %v997_v15, %v1331_v1  ;;  %1286 = vst [vmem:[%s1706_s3 + $0x88] sm:$0xff] %v1143_v17   ;;  %v359_v26 = vmax.f32 %v286_v18, 0.0  ;;  %v1001_v28 = vunpack.c.l.bf16 %v1256_v16 }
  0x31   :  { %v210_v27 = vmul.f32 %v998_v20, %v1331_v1  ;;  %v1002_v29 = vunpack.c.h.bf16 %v1256_v16  ;;  %1287 = vst [vmem:[%s1706_s3 + $0x90] sm:$0xff] %v1148_v22   ;;  %v288_v30 = vadd.f32 %v1345_v7, %v208_v23  ;;  %v1005_v33 = vunpack.c.l.bf16 %v1257_v21 }
  0x32   :  { %v360_v31 = vmax.f32 %v287_v24, 0.0  ;;  %v289_v32 = vadd.f32 %v1345_v7, %v209_v25  ;;  %v1153_v35 = vpack.c.bf16 %v359_v26, %v358_v19  ;;  %v211_v37 = vmul.f32 %v1001_v28, %v1331_v1 }
  0x33   :  { %v290_v36 = vadd.f32 %v1345_v7, %v210_v27  ;;  %v212_v38 = vmul.f32 %v1002_v29, %v1331_v1  ;;  %v361_v39 = vmax.f32 %v288_v30, 0.0  ;;  %v1006_v41 = vunpack.c.h.bf16 %v1257_v21  ;;  %v1263_v21 = vld [vmem:[%s1703_s0 + $0xe8] sm:$0xff]  }
  0x34   :  { %v362_v40 = vmax.f32 %v289_v32, 0.0  ;;  %v213_v42 = vmul.f32 %v1005_v33, %v1331_v1  ;;  %1288 = vst [vmem:[%s1706_s3 + $0x98] sm:$0xff] %v1153_v35   ;;  %v291_v44 = vadd.f32 %v1345_v7, %v211_v37  ;;  %v1009_v46 = vunpack.c.l.bf16 %v1258_v34 }
  0x35   :  { %v363_v43 = vmax.f32 %v290_v36, 0.0  ;;  %v292_v45 = vadd.f32 %v1345_v7, %v212_v38  ;;  %v1158_v48 = vpack.c.bf16 %v361_v39, %v360_v31  ;;  %v214_v49 = vmul.f32 %v1006_v41, %v1331_v1  ;;  %v1265_v39 = vld [vmem:[%s1703_s0 + $0xf8] sm:$0xff]  }
  0x36   :  { %v293_v50 = vadd.f32 %v1345_v7, %v213_v42  ;;  %v1010_v51 = vunpack.c.h.bf16 %v1258_v34  ;;  %v364_v54 = vmax.f32 %v291_v44, 0.0  ;;  %v215_v56 = vmul.f32 %v1009_v46, %v1331_v1  ;;  %v1264_v34 = vld [vmem:[%s1703_s0 + $0xf0] sm:$0xff]  }
  0x37   :  { %v1163_v53 = vpack.c.bf16 %v363_v43, %v362_v40  ;;  %v365_v55 = vmax.f32 %v292_v45, 0.0  ;;  %1289 = vst [vmem:[%s1706_s3 + $0xa0] sm:$0xff] %v1158_v48   ;;  %v294_v57 = vadd.f32 %v1345_v7, %v214_v49  ;;  %v1013_v60 = vunpack.c.l.bf16 %v1259_v47 }
  0x38   :  { %v366_v58 = vmax.f32 %v293_v50, 0.0  ;;  %v216_v59 = vmul.f32 %v1010_v51, %v1331_v1  ;;  %v295_v63 = vadd.f32 %v1345_v7, %v215_v56  ;;  %v1014_v0 = vunpack.c.h.bf16 %v1259_v47 }
  0x39   :  { %1290 = vst [vmem:[%s1706_s3 + $0xa8] sm:$0xff] %v1163_v53   ;;  %v1168_v62 = vpack.c.bf16 %v365_v55, %v364_v54  ;;  %v1017_v2 = vunpack.c.l.bf16 %v1260_v52  ;;  %v367_v3 = vmax.f32 %v294_v57, 0.0  ;;  %v217_v5 = vmul.f32 %v1013_v60, %v1331_v1 }
  0x3a   :  { %v296_v4 = vadd.f32 %v1345_v7, %v216_v59  ;;  %v1018_v6 = vunpack.c.h.bf16 %v1260_v52  ;;  %v368_v8 = vmax.f32 %v295_v63, 0.0  ;;  %v218_v9 = vmul.f32 %v1014_v0, %v1331_v1  ;;  %v1266_v52 = vld [vmem:[%s1703_s0 + $0x100] sm:$0xff]  }
  0x3b   :  { %1291 = vst [vmem:[%s1706_s3 + $0xb0] sm:$0xff] %v1168_v62   ;;  %v219_v10 = vmul.f32 %v1017_v2, %v1331_v1  ;;  %v1021_v11 = vunpack.c.l.bf16 %v1261_v61  ;;  %v1173_v13 = vpack.c.bf16 %v367_v3, %v366_v58  ;;  %v297_v15 = vadd.f32 %v1345_v7, %v217_v5  ;;  %v1267_v2 = vld [vmem:[%s1703_s0 + $0x108] sm:$0xff]  }
  0x3c   :  { %v369_v14 = vmax.f32 %v296_v4, 0.0  ;;  %v220_v16 = vmul.f32 %v1018_v6, %v1331_v1  ;;  %v298_v17 = vadd.f32 %v1345_v7, %v218_v9  ;;  %v1022_v19 = vunpack.c.h.bf16 %v1261_v61 }
  0x3d   :  { %v299_v18 = vadd.f32 %v1345_v7, %v219_v10  ;;  %v221_v20 = vmul.f32 %v1021_v11, %v1331_v1  ;;  %1292 = vst [vmem:[%s1706_s3 + $0xb8] sm:$0xff] %v1173_v13   ;;  %v370_v23 = vmax.f32 %v297_v15, 0.0  ;;  %v1025_v25 = vunpack.c.l.bf16 %v1262_v12 }
  0x3e   :  { %v1178_v22 = vpack.c.bf16 %v369_v14, %v368_v8  ;;  %v300_v24 = vadd.f32 %v1345_v7, %v220_v16  ;;  %v371_v26 = vmax.f32 %v298_v17, 0.0  ;;  %v222_v28 = vmul.f32 %v1022_v19, %v1331_v1  ;;  %v1268_v8 = vld [vmem:[%s1703_s0 + $0x110] sm:$0xff]   ;;  %v1269_v17 = vld [vmem:[%s1703_s0 + $0x118] sm:$0xff]  }
  0x3f   :  { %v372_v27 = vmax.f32 %v299_v18, 0.0  ;;  %v301_v29 = vadd.f32 %v1345_v7, %v221_v20  ;;  %v1026_v31 = vunpack.c.h.bf16 %v1262_v12  ;;  %v223_v32 = vmul.f32 %v1025_v25, %v1331_v1 }
  0x40   :  { %1293 = vst [vmem:[%s1706_s3 + $0xc0] sm:$0xff] %v1178_v22   ;;  %v373_v30 = vmax.f32 %v300_v24, 0.0  ;;  %v1029_v33 = vunpack.c.l.bf16 %v1263_v21  ;;  %v1183_v35 = vpack.c.bf16 %v371_v26, %v370_v23  ;;  %v302_v36 = vadd.f32 %v1345_v7, %v222_v28 }
  0x41   :  { %v374_v37 = vmax.f32 %v301_v29, 0.0  ;;  %v1030_v38 = vunpack.c.h.bf16 %v1263_v21  ;;  %v224_v41 = vmul.f32 %v1026_v31, %v1331_v1  ;;  %v303_v42 = vadd.f32 %v1345_v7, %v223_v32 }
  0x42   :  { %v1188_v40 = vpack.c.bf16 %v373_v30, %v372_v27  ;;  %v225_v43 = vmul.f32 %v1029_v33, %v1331_v1  ;;  %1294 = vst [vmem:[%s1706_s3 + $0xc8] sm:$0xff] %v1183_v35   ;;  %v375_v44 = vmax.f32 %v302_v36, 0.0  ;;  %v1033_v46 = vunpack.c.l.bf16 %v1264_v34  ;;  %v86_v30 = vld [vmem:[%s1703_s0 + $0x120] sm:$0xf] }
  0x43   :  { %v226_v45 = vmul.f32 %v1030_v38, %v1331_v1  ;;  %v1034_v47 = vunpack.c.h.bf16 %v1264_v34  ;;  %v304_v48 = vadd.f32 %v1345_v7, %v224_v41  ;;  %v376_v49 = vmax.f32 %v303_v42, 0.0 }
  0x44   :  { %1295 = vst [vmem:[%s1706_s3 + $0xd0] sm:$0xff] %v1188_v40   ;;  %v305_v50 = vadd.f32 %v1345_v7, %v225_v43  ;;  %v1037_v51 = vunpack.c.l.bf16 %v1265_v39  ;;  %v1193_v53 = vpack.c.bf16 %v375_v44, %v374_v37  ;;  %v227_v55 = vmul.f32 %v1033_v46, %v1331_v1 }
  0x45   :  { %v306_v54 = vadd.f32 %v1345_v7, %v226_v45  ;;  %v228_v56 = vmul.f32 %v1034_v47, %v1331_v1  ;;  %v377_v57 = vmax.f32 %v304_v48, 0.0  ;;  %v1038_v59 = vunpack.c.h.bf16 %v1265_v39 }
  0x46   :  { %v378_v58 = vmax.f32 %v305_v50, 0.0  ;;  %v229_v60 = vmul.f32 %v1037_v51, %v1331_v1  ;;  %1296 = vst [vmem:[%s1706_s3 + $0xd8] sm:$0xff] %v1193_v53   ;;  %v307_v62 = vadd.f32 %v1345_v7, %v227_v55  ;;  %v1041_v0 = vunpack.c.l.bf16 %v1266_v52 }
  0x47   :  { %v379_v61 = vmax.f32 %v306_v54, 0.0  ;;  %v308_v63 = vadd.f32 %v1345_v7, %v228_v56  ;;  %v1198_v3 = vpack.c.bf16 %v377_v57, %v376_v49  ;;  %v230_v4 = vmul.f32 %v1038_v59, %v1331_v1 }
  0x48   :  { %v309_v5 = vadd.f32 %v1345_v7, %v229_v60  ;;  %v1042_v6 = vunpack.c.h.bf16 %v1266_v52  ;;  %v380_v10 = vmax.f32 %v307_v62, 0.0  ;;  %v231_v12 = vmul.f32 %v1041_v0, %v1331_v1 }
  0x49   :  { %v1203_v9 = vpack.c.bf16 %v379_v61, %v378_v58  ;;  %v381_v11 = vmax.f32 %v308_v63, 0.0  ;;  %1297 = vst [vmem:[%s1706_s3 + $0xe0] sm:$0xff] %v1198_v3   ;;  %v310_v13 = vadd.f32 %v1345_v7, %v230_v4  ;;  %v1045_v16 = vunpack.c.l.bf16 %v1267_v2 }
  0x4a   :  { %v382_v14 = vmax.f32 %v309_v5, 0.0  ;;  %v232_v15 = vmul.f32 %v1042_v6, %v1331_v1  ;;  %v311_v19 = vadd.f32 %v1345_v7, %v231_v12  ;;  %v1046_v20 = vunpack.c.h.bf16 %v1267_v2 }
  0x4b   :  { %1298 = vst [vmem:[%s1706_s3 + $0xe8] sm:$0xff] %v1203_v9   ;;  %v1208_v18 = vpack.c.bf16 %v381_v11, %v380_v10  ;;  %v1049_v21 = vunpack.c.l.bf16 %v1268_v8  ;;  %v383_v22 = vmax.f32 %v310_v13, 0.0  ;;  %v233_v24 = vmul.f32 %v1045_v16, %v1331_v1 }
  0x4c   :  { %v312_v23 = vadd.f32 %v1345_v7, %v232_v15  ;;  %v1050_v25 = vunpack.c.h.bf16 %v1268_v8  ;;  %v384_v26 = vmax.f32 %v311_v19, 0.0  ;;  %v234_v27 = vmul.f32 %v1046_v20, %v1331_v1 }
  0x4d   :  { %1299 = vst [vmem:[%s1706_s3 + $0xf0] sm:$0xff] %v1208_v18   ;;  %v235_v28 = vmul.f32 %v1049_v21, %v1331_v1  ;;  %v1053_v29 = vunpack.c.l.bf16 %v1269_v17  ;;  %v1213_v31 = vpack.c.bf16 %v383_v22, %v382_v14  ;;  %v313_v33 = vadd.f32 %v1345_v7, %v233_v24 }
  0x4e   :  { %v385_v32 = vmax.f32 %v312_v23, 0.0  ;;  %v236_v34 = vmul.f32 %v1050_v25, %v1331_v1  ;;  %v314_v35 = vadd.f32 %v1345_v7, %v234_v27  ;;  %v1054_v37 = vunpack.c.h.bf16 %v1269_v17 }
  0x4f   :  { %v315_v36 = vadd.f32 %v1345_v7, %v235_v28  ;;  %v237_v38 = vmul.f32 %v1053_v29, %v1331_v1  ;;  %1300 = vst [vmem:[%s1706_s3 + $0xf8] sm:$0xff] %v1213_v31   ;;  %v386_v40 = vmax.f32 %v313_v33, 0.0  ;;  %v159_v42 = vunpack.c.l.bf16 %v86_v30 }
  0x50   :  { %v1218_v39 = vpack.c.bf16 %v385_v32, %v384_v26  ;;  %v316_v41 = vadd.f32 %v1345_v7, %v236_v34  ;;  %v387_v43 = vmax.f32 %v314_v35, 0.0  ;;  %v238_v45 = vmul.f32 %v1054_v37, %v1331_v1 }
  0x51   :  { %v388_v44 = vmax.f32 %v315_v36, 0.0  ;;  %v317_v46 = vadd.f32 %v1345_v7, %v237_v38  ;;  %v239_v48 = vmul.f32 %v1331_v1, %v159_v42 }
  0x52   :  { %1301 = vst [vmem:[%s1706_s3 + $0x100] sm:$0xff] %v1218_v39   ;;  %v389_v47 = vmax.f32 %v316_v41, 0.0  ;;  %v1223_v49 = vpack.c.bf16 %v387_v43, %v386_v40  ;;  %v318_v50 = vadd.f32 %v1345_v7, %v238_v45 }
  0x53   :  { %v390_v51 = vmax.f32 %v317_v46, 0.0  ;;  %v319_v53 = vadd.f32 %v1345_v7, %v239_v48 }
  0x54   :  { %v1228_v52 = vpack.c.bf16 %v389_v47, %v388_v44  ;;  %1302 = vst [vmem:[%s1706_s3 + $0x108] sm:$0xff] %v1223_v49   ;;  %v391_v54 = vmax.f32 %v318_v50, 0.0 }
  0x55   :  { %v392_v55 = vmax.f32 %v319_v53, 0.0 }
  0x56   :  { %1303 = vst [vmem:[%s1706_s3 + $0x110] sm:$0xff] %v1228_v52   ;;  %v1233_v56 = vpack.c.bf16 %v391_v54, %v390_v51 }
  0x57   :  { %v910_v57 = vpack.c.bf16 %v392_v55, %v392_v55 }
  0x58   :  { %1304 = vst [vmem:[%s1706_s3 + $0x118] sm:$0xff] %v1233_v56  }
  0x59   :  { %758 = vst [vmem:[%s1706_s3 + $0x120] sm:$0xf] %v910_v57 }

// kernel: generator_forward.17
= control target key start
LH: loop header
LB: loop body
LE: loop exit
PB: predicated region body
PF: predicated region fallthrough
CT: control target
= control target key end

     0   :  { %s3447_s12 = smov 0   ;;  %s3765_s0 = inlined_call_operand.vmem [shape: bf16[3072,128], index: 0, kind: input, shape index: {}]   ;;  %s3766_s1 = inlined_call_operand.vmem [shape: bf16[128,128], index: 1, kind: input, shape index: {}]   ;;  %s3767_s2 = inlined_call_operand.vmem [shape: f32[1,128], index: 2, kind: input, shape index: {}]   ;;  %s3768_s3 = inlined_call_operand.vmem [shape: bf16[3072,128], index: 3, kind: output, shape index: {}]  }
   0x1 LB: > { %s2127_s13 = sadd.s32 4294967295, %s3425_s12   ;;  %p2131_p0 = scmp.ge.s32.totalorder %s3425_s12, 1  ;;  %s3425_s12 = sphi %s3447_s12, %s13_s12  }
   0x2   : > { %p138_p1 = scmp.lt.s32.totalorder %s3425_s12, 4 }
   0x4   : > { %p139_p2 = pnand %p2131_p0, %p138_p1 }
   0x5   : > { %v3090_v0 = vld [vmem:[%s3766_s1] sm:$0xff] (!%p139_p2)   ;;  %s2132_s16 = sshll.u32 (!%p139_p2), %s2127_s13, 7  ;;  %v3091_v1 = vld [vmem:[%s3766_s1 + $0x8] sm:$0xff] (!%p139_p2)   ;;  %v3092_v2 = vld [vmem:[%s3766_s1 + $0x10] sm:$0xff] (!%p139_p2)  }
   0x6   : > { %142 = sbr.rel (%p139_p2) target bundleno = 396 (0x18c), region = 32  ;;  %p163_p3 = scmp.lt.s32.totalorder (!%p139_p2), %s2132_s16, 383  ;;  %2922 = vmatprep.subr.bf16.mxu0 (!%p139_p2), %v3090_v0  ;;  %3066 = vmatprep.subr.bf16.mxu1 (!%p139_p2), %v3090_v0  ;;  %v3093_v3 = vld [vmem:[%s3766_s1 + $0x18] sm:$0xff] (!%p139_p2)   ;;  %v3094_v6 = vld [vmem:[%s3766_s1 + $0x20] sm:$0xff] (!%p139_p2)   ;;  %v3095_v7 = vld [vmem:[%s3766_s1 + $0x28] sm:$0xff] (!%p139_p2)  }
   0x7   : > { %2923 = vmatpush3.bf16.msra.mxu0 (!%p139_p2), %v3090_v0  ;;  %3074 = vmatpush3.bf16.msra.mxu1 (!%p139_p2), %v3090_v0  ;;  %v3096_v8 = vld [vmem:[%s3766_s1 + $0x30] sm:$0xff] (!%p139_p2)   ;;  %v3097_v9 = vld [vmem:[%s3766_s1 + $0x38] sm:$0xff] (!%p139_p2)  }
   0x8   : > { %2924 = vmatprep.subr.bf16.mxu0 (!%p139_p2), %v3091_v1  ;;  %3067 = vmatprep.subr.bf16.mxu1 (!%p139_p2), %v3091_v1 }
   0xb   : > { %2925 = vmatpush3.bf16.msra.mxu0 (!%p139_p2), %v3091_v1  ;;  %3075 = vmatpush3.bf16.msra.mxu1 (!%p139_p2), %v3091_v1 }
   0xc   : > { %2926 = vmatprep.subr.bf16.mxu0 (!%p139_p2), %v3092_v2  ;;  %3068 = vmatprep.subr.bf16.mxu1 (!%p139_p2), %v3092_v2 }
   0xd   : > { %s3770_s16 = smov (!%p163_p3, %s2132_s16), 383 }
   0xe   : > { %s2133_s21 = sshll.u32 %s3770_s16, 2 }
   0xf   : > { %s3472_s24 = scalar_lea.vmem %s3765_s0, %s2133_s21  ;;  %2927 = vmatpush3.bf16.msra.mxu0 %v3092_v2  ;;  %3076 = vmatpush3.bf16.msra.mxu1 %v3092_v2  ;;  %s3579_s13 = scalar_lea.vmem %s3768_s3, %s2133_s21 }
  0x10   : > { %v3098_v4 = vld [vmem:[%s3472_s24] sm:$0xff]   ;;  %2928 = vmatprep.subr.bf16.mxu0 %v3093_v3  ;;  %3069 = vmatprep.subr.bf16.mxu1 %v3093_v3  ;;  %v3100_v10 = vld [vmem:[%s3472_s24 + $0x8] sm:$0xff]   ;;  %v3102_v12 = vld [vmem:[%s3472_s24 + $0x10] sm:$0xff]  }
  0x11   : > { %v3099_v5 = vld [vmem:[%s3472_s24 + $0x100] sm:$0xff]   ;;  %2938 = vmatprep.mubr.bf16.mxu0 %v3098_v4  ;;  %v3101_v11 = vld [vmem:[%s3472_s24 + $0x108] sm:$0xff]   ;;  %v3103_v13 = vld [vmem:[%s3472_s24 + $0x110] sm:$0xff]  }
  0x12   : > { %3002 = vmatprep.mubr.bf16.mxu1 %v3099_v5  ;;  %v3104_v14 = vld [vmem:[%s3472_s24 + $0x18] sm:$0xff]   ;;  %v3106_v16 = vld [vmem:[%s3472_s24 + $0x20] sm:$0xff]   ;;  %v3108_v18 = vld [vmem:[%s3472_s24 + $0x28] sm:$0xff]  }
  0x13   : > { %2929 = vmatpush3.bf16.msra.mxu0 %v3093_v3  ;;  %3077 = vmatpush3.bf16.msra.mxu1 %v3093_v3  ;;  %v3105_v15 = vld [vmem:[%s3472_s24 + $0x118] sm:$0xff]   ;;  %v3107_v17 = vld [vmem:[%s3472_s24 + $0x120] sm:$0xff]   ;;  %v3109_v19 = vld [vmem:[%s3472_s24 + $0x128] sm:$0xff]  }
  0x14   : > { %2930 = vmatprep.subr.bf16.mxu0 %v3094_v6  ;;  %3070 = vmatprep.subr.bf16.mxu1 %v3094_v6  ;;  %v3110_v20 = vld [vmem:[%s3472_s24 + $0x30] sm:$0xff]   ;;  %v3112_v22 = vld [vmem:[%s3472_s24 + $0x38] sm:$0xff]   ;;  %v3114_v24 = vld [vmem:[%s3472_s24 + $0x40] sm:$0xff]  }
  0x15   : > { %v3111_v21 = vld [vmem:[%s3472_s24 + $0x130] sm:$0xff]   ;;  %v3113_v23 = vld [vmem:[%s3472_s24 + $0x138] sm:$0xff]   ;;  %v3115_v25 = vld [vmem:[%s3472_s24 + $0x140] sm:$0xff]  }
  0x16   : > { %v3116_v26 = vld [vmem:[%s3472_s24 + $0x48] sm:$0xff]   ;;  %v3118_v28 = vld [vmem:[%s3472_s24 + $0x50] sm:$0xff]   ;;  %v3120_v30 = vld [vmem:[%s3472_s24 + $0x58] sm:$0xff]  }
  0x17   : > { %2931 = vmatpush3.bf16.msra.mxu0 %v3094_v6  ;;  %3078 = vmatpush3.bf16.msra.mxu1 %v3094_v6  ;;  %v3117_v27 = vld [vmem:[%s3472_s24 + $0x148] sm:$0xff]   ;;  %v3119_v29 = vld [vmem:[%s3472_s24 + $0x150] sm:$0xff]   ;;  %v3121_v31 = vld [vmem:[%s3472_s24 + $0x158] sm:$0xff]  }
  0x18   : > { %2932 = vmatprep.subr.bf16.mxu0 %v3095_v7  ;;  %3071 = vmatprep.subr.bf16.mxu1 %v3095_v7  ;;  %v3122_v32 = vld [vmem:[%s3472_s24 + $0x60] sm:$0xff]   ;;  %v3124_v34 = vld [vmem:[%s3472_s24 + $0x68] sm:$0xff]   ;;  %v3126_v36 = vld [vmem:[%s3472_s24 + $0x70] sm:$0xff]  }
  0x19   : > { %v3123_v33 = vld [vmem:[%s3472_s24 + $0x160] sm:$0xff]   ;;  %v3125_v35 = vld [vmem:[%s3472_s24 + $0x168] sm:$0xff]   ;;  %v3127_v37 = vld [vmem:[%s3472_s24 + $0x170] sm:$0xff]  }
  0x1a   : > { %v3128_v38 = vld [vmem:[%s3472_s24 + $0x78] sm:$0xff]   ;;  %v3130_v40 = vld [vmem:[%s3472_s24 + $0x80] sm:$0xff]   ;;  %v3132_v42 = vld [vmem:[%s3472_s24 + $0x88] sm:$0xff]  }
  0x1b   : > { %2933 = vmatpush3.bf16.msra.mxu0 %v3095_v7  ;;  %3079 = vmatpush3.bf16.msra.mxu1 %v3095_v7  ;;  %v3129_v39 = vld [vmem:[%s3472_s24 + $0x178] sm:$0xff]   ;;  %v3131_v41 = vld [vmem:[%s3472_s24 + $0x180] sm:$0xff]   ;;  %v3133_v43 = vld [vmem:[%s3472_s24 + $0x188] sm:$0xff]  }
  0x1c   : > { %2934 = vmatprep.subr.bf16.mxu0 %v3096_v8  ;;  %3072 = vmatprep.subr.bf16.mxu1 %v3096_v8  ;;  %v3134_v44 = vld [vmem:[%s3472_s24 + $0x90] sm:$0xff]   ;;  %v3136_v46 = vld [vmem:[%s3472_s24 + $0x98] sm:$0xff]   ;;  %v3138_v48 = vld [vmem:[%s3472_s24 + $0xa0] sm:$0xff]  }
  0x1d   : > { %v3135_v45 = vld [vmem:[%s3472_s24 + $0x190] sm:$0xff]   ;;  %v3137_v47 = vld [vmem:[%s3472_s24 + $0x198] sm:$0xff]   ;;  %v3139_v49 = vld [vmem:[%s3472_s24 + $0x1a0] sm:$0xff]  }
  0x1e   : > { %v3140_v50 = vld [vmem:[%s3472_s24 + $0xa8] sm:$0xff]   ;;  %v3142_v52 = vld [vmem:[%s3472_s24 + $0xb0] sm:$0xff]   ;;  %v3144_v54 = vld [vmem:[%s3472_s24 + $0xb8] sm:$0xff]  }
  0x1f   : > { %2935 = vmatpush3.bf16.msra.mxu0 %v3096_v8  ;;  %3080 = vmatpush3.bf16.msra.mxu1 %v3096_v8  ;;  %v3141_v51 = vld [vmem:[%s3472_s24 + $0x1a8] sm:$0xff]   ;;  %v3143_v53 = vld [vmem:[%s3472_s24 + $0x1b0] sm:$0xff]   ;;  %v3145_v55 = vld [vmem:[%s3472_s24 + $0x1b8] sm:$0xff]  }
  0x20   : > { %2936 = vmatprep.subr.bf16.mxu0 %v3097_v9  ;;  %3073 = vmatprep.subr.bf16.mxu1 %v3097_v9  ;;  %v3146_v56 = vld [vmem:[%s3472_s24 + $0xc0] sm:$0xff]   ;;  %v3148_v58 = vld [vmem:[%s3472_s24 + $0xc8] sm:$0xff]   ;;  %v3150_v60 = vld [vmem:[%s3472_s24 + $0xd0] sm:$0xff]  }
  0x21   : > { %v3147_v57 = vld [vmem:[%s3472_s24 + $0x1c0] sm:$0xff]   ;;  %v3149_v59 = vld [vmem:[%s3472_s24 + $0x1c8] sm:$0xff]   ;;  %v3151_v61 = vld [vmem:[%s3472_s24 + $0x1d0] sm:$0xff]  }
  0x22   : > { %v3152_v62 = vld [vmem:[%s3472_s24 + $0xd8] sm:$0xff]   ;;  %v3154_v0 = vld [vmem:[%s3472_s24 + $0xe0] sm:$0xff]   ;;  %v3156_v2 = vld [vmem:[%s3472_s24 + $0xe8] sm:$0xff]  }
  0x23   : > { %2937 = vmatpush3.bf16.msra.mxu0 %v3097_v9  ;;  %3081 = vmatpush3.bf16.msra.mxu1 %v3097_v9  ;;  %v3153_v63 = vld [vmem:[%s3472_s24 + $0x1d8] sm:$0xff]   ;;  %v3155_v1 = vld [vmem:[%s3472_s24 + $0x1e0] sm:$0xff]   ;;  %v3157_v3 = vld [vmem:[%s3472_s24 + $0x1e8] sm:$0xff]  }
  0x24   : > { %v3158_v4 = vld [vmem:[%s3472_s24 + $0xf0] sm:$0xff]   ;;  %v3160_v6 = vld [vmem:[%s3472_s24 + $0xf8] sm:$0xff]   ;;  %v3556_v8 = vld [vmem:[%s3767_s2] ss:$0 sm:$0xff] }
  0x25   : > { %v3159_v5 = vld [vmem:[%s3472_s24 + $0x1f0] sm:$0xff]   ;;  %v3161_v7 = vld [vmem:[%s3472_s24 + $0x1f8] sm:$0xff]  }
  0x26   : > { %2939 = vmatmul.mubr.bf16.vlgmr.msra.gmra.mrb[0].mxu0 %v3100_v10  ;;  %3003 = vmatmul.mubr.bf16.vlgmr.msra.gmra.mrb[0].mxu1 %v3101_v11 }
  0x27   : > { %2942 = vmatprep.mubr.bf16.mxu0 %v3102_v12  ;;  %3006 = vmatprep.mubr.bf16.mxu1 %v3103_v13 }
  0x2e   : > { %2943 = vmatmul.mubr.bf16.gmra.mrb[4].mxu0 %v3104_v14  ;;  %3007 = vmatmul.mubr.bf16.gmra.mrb[4].mxu1 %v3105_v15 }
  0x2f   : > { %2946 = vmatprep.mubr.bf16.mxu0 %v3106_v16  ;;  %3010 = vmatprep.mubr.bf16.mxu1 %v3107_v17 }
  0x36   : > { %2947 = vmatmul.mubr.bf16.gmra.mrb[8].mxu0 %v3108_v18  ;;  %3011 = vmatmul.mubr.bf16.gmra.mrb[8].mxu1 %v3109_v19 }
  0x37   : > { %2950 = vmatprep.mubr.bf16.mxu0 %v3110_v20  ;;  %3014 = vmatprep.mubr.bf16.mxu1 %v3111_v21 }
  0x3e   : > { %2951 = vmatmul.mubr.bf16.gmra.mrb[12].mxu0 %v3112_v22  ;;  %3015 = vmatmul.mubr.bf16.gmra.mrb[12].mxu1 %v3113_v23 }
  0x3f   : > { %2954 = vmatprep.mubr.bf16.mxu0 %v3114_v24  ;;  %3018 = vmatprep.mubr.bf16.mxu1 %v3115_v25 }
  0x46   : > { %2955 = vmatmul.mubr.bf16.gmra.mrb[16].mxu0 %v3116_v26  ;;  %3019 = vmatmul.mubr.bf16.gmra.mrb[16].mxu1 %v3117_v27 }
  0x47   : > { %2958 = vmatprep.mubr.bf16.mxu0 %v3118_v28  ;;  %3022 = vmatprep.mubr.bf16.mxu1 %v3119_v29 }
  0x4e   : > { %2959 = vmatmul.mubr.bf16.gmra.mrb[20].mxu0 %v3120_v30  ;;  %3023 = vmatmul.mubr.bf16.gmra.mrb[20].mxu1 %v3121_v31 }
  0x4f   : > { %2962 = vmatprep.mubr.bf16.mxu0 %v3122_v32  ;;  %3026 = vmatprep.mubr.bf16.mxu1 %v3123_v33 }
  0x56   : > { %2963 = vmatmul.mubr.bf16.gmra.mrb[24].mxu0 %v3124_v34  ;;  %3027 = vmatmul.mubr.bf16.gmra.mrb[24].mxu1 %v3125_v35 }
  0x57   : > { %2966 = vmatprep.mubr.bf16.mxu0 %v3126_v36  ;;  %3030 = vmatprep.mubr.bf16.mxu1 %v3127_v37 }
  0x5e   : > { %2967 = vmatmul.mubr.bf16.gmra.mrb[28].mxu0 %v3128_v38  ;;  %3031 = vmatmul.mubr.bf16.gmra.mrb[28].mxu1 %v3129_v39 }
  0x5f   : > { %2970 = vmatprep.mubr.bf16.mxu0 %v3130_v40  ;;  %3034 = vmatprep.mubr.bf16.mxu1 %v3131_v41 }
  0x66   : > { %2971 = vmatmul.mubr.bf16.gmra.mrb[32].mxu0 %v3132_v42  ;;  %3035 = vmatmul.mubr.bf16.gmra.mrb[32].mxu1 %v3133_v43 }
  0x67   : > { %2974 = vmatprep.mubr.bf16.mxu0 %v3134_v44  ;;  %3038 = vmatprep.mubr.bf16.mxu1 %v3135_v45 }
  0x6e   : > { %2975 = vmatmul.mubr.bf16.gmra.mrb[36].mxu0 %v3136_v46  ;;  %3039 = vmatmul.mubr.bf16.gmra.mrb[36].mxu1 %v3137_v47 }
  0x6f   : > { %2978 = vmatprep.mubr.bf16.mxu0 %v3138_v48  ;;  %3042 = vmatprep.mubr.bf16.mxu1 %v3139_v49 }
  0x76   : > { %2979 = vmatmul.mubr.bf16.gmra.mrb[40].mxu0 %v3140_v50  ;;  %3043 = vmatmul.mubr.bf16.gmra.mrb[40].mxu1 %v3141_v51 }
  0x77   : > { %2982 = vmatprep.mubr.bf16.mxu0 %v3142_v52  ;;  %3046 = vmatprep.mubr.bf16.mxu1 %v3143_v53 }
  0x7e   : > { %2983 = vmatmul.mubr.bf16.gmra.mrb[44].mxu0 %v3144_v54  ;;  %3047 = vmatmul.mubr.bf16.gmra.mrb[44].mxu1 %v3145_v55 }
  0x7f   : > { %2986 = vmatprep.mubr.bf16.mxu0 %v3146_v56  ;;  %3050 = vmatprep.mubr.bf16.mxu1 %v3147_v57 }
  0x86   : > { %2987 = vmatmul.mubr.bf16.gmra.mrb[48].mxu0 %v3148_v58  ;;  %3051 = vmatmul.mubr.bf16.gmra.mrb[48].mxu1 %v3149_v59 }
  0x87   : > { %2990 = vmatprep.mubr.bf16.mxu0 %v3150_v60  ;;  %3054 = vmatprep.mubr.bf16.mxu1 %v3151_v61 }
  0x8e   : > { %2991 = vmatmul.mubr.bf16.gmra.mrb[52].mxu0 %v3152_v62  ;;  %3055 = vmatmul.mubr.bf16.gmra.mrb[52].mxu1 %v3153_v63 }
  0x8f   : > { %2994 = vmatprep.mubr.bf16.mxu0 %v3154_v0  ;;  %3058 = vmatprep.mubr.bf16.mxu1 %v3155_v1 }
  0x96   : > { %2995 = vmatmul.mubr.bf16.gmra.mrb[56].mxu0 %v3156_v2  ;;  %3059 = vmatmul.mubr.bf16.gmra.mrb[56].mxu1 %v3157_v3 }
  0x97   : > { %2998 = vmatprep.mubr.bf16.mxu0 %v3158_v4  ;;  %3062 = vmatprep.mubr.bf16.mxu1 %v3159_v5 }
  0x9e   : > { %2999 = vmatmul.mubr.bf16.gmra.mrb[60].mxu0 %v3160_v6  ;;  %3063 = vmatmul.mubr.bf16.gmra.mrb[60].mxu1 %v3161_v7 }
  0xf9   : > { %v2940_v9 = vpop.f32.mrb[0].mxu0  ;;  %v3004_v10 = vpop.f32.mrb[0].mxu1 }
  0xfa   : > { %v801_v11 = vadd.f32 %v2940_v9, %v3556_v8  ;;  %v1057_v12 = vadd.f32 %v3004_v10, %v3556_v8  ;;  %v792_v13 = vpop.f32.mrb[1].mxu0  ;;  %v1048_v14 = vpop.f32.mrb[1].mxu1 }
  0xfb   : > { %v793_v15 = vadd.f32 %v3556_v8, %v792_v13  ;;  %v1049_v16 = vadd.f32 %v3556_v8, %v1048_v14  ;;  %v2941_v17 = vpop.f32.mrb[2].mxu0  ;;  %v3005_v18 = vpop.f32.mrb[2].mxu1 }
  0xfc   : > { %3162 = vtanh.f32 %v801_v11  ;;  %v804_v19 = vadd.f32 %v2941_v17, %v3556_v8  ;;  %v795_v20 = vpop.f32.mrb[3].mxu0  ;;  %v1051_v21 = vpop.f32.mrb[3].mxu1  ;;  %v1060_v22 = vadd.f32 %v3005_v18, %v3556_v8 }
  0xfd   : > { %3164 = vtanh.f32 %v1057_v12  ;;  %v796_v23 = vadd.f32 %v3556_v8, %v795_v20  ;;  %v1052_v24 = vadd.f32 %v3556_v8, %v1051_v21 }
  0xfe   : > { %3166 = vtanh.f32 %v793_v15 }
  0xff   : > { %3168 = vtanh.f32 %v1049_v16 }
 0x100   : > { %3170 = vtanh.f32 %v804_v19 }
 0x101   : > { %3172 = vtanh.f32 %v1060_v22  ;;  %v2944_v25 = vpop.f32.mrb[4].mxu0  ;;  %v3008_v26 = vpop.f32.mrb[4].mxu1 }
 0x102   : > { %3174 = vtanh.f32 %v796_v23  ;;  %v817_v27 = vadd.f32 %v2944_v25, %v3556_v8  ;;  %v1073_v28 = vadd.f32 %v3008_v26, %v3556_v8  ;;  %v808_v29 = vpop.f32.mrb[5].mxu0  ;;  %v1064_v30 = vpop.f32.mrb[5].mxu1 }
 0x103   : > { %3176 = vtanh.f32 %v1052_v24  ;;  %v809_v31 = vadd.f32 %v3556_v8, %v808_v29  ;;  %v1065_v32 = vadd.f32 %v3556_v8, %v1064_v30  ;;  %v2945_v33 = vpop.f32.mrb[6].mxu0  ;;  %v3009_v34 = vpop.f32.mrb[6].mxu1 }
 0x104   : > { %3178 = vtanh.f32 %v817_v27  ;;  %v820_v35 = vadd.f32 %v2945_v33, %v3556_v8  ;;  %v811_v36 = vpop.f32.mrb[7].mxu0  ;;  %v1067_v37 = vpop.f32.mrb[7].mxu1  ;;  %v1076_v38 = vadd.f32 %v3009_v34, %v3556_v8 }
 0x105   : > { %3180 = vtanh.f32 %v1073_v28  ;;  %v812_v40 = vadd.f32 %v3556_v8, %v811_v36  ;;  %v1068_v42 = vadd.f32 %v3556_v8, %v1067_v37 }
 0x106   : > { %v3163_v39 = vpop.eup %3162  ;;  %3182 = vtanh.f32 %v809_v31 }
 0x107   : > { %v3165_v41 = vpop.eup %3164  ;;  %3184 = vtanh.f32 %v1065_v32 }
 0x108   : > { %v3167_v43 = vpop.eup %3166  ;;  %3186 = vtanh.f32 %v820_v35 }
 0x109   : > { %v3169_v44 = vpop.eup %3168  ;;  %3188 = vtanh.f32 %v1076_v38  ;;  %v2948_v45 = vpop.f32.mrb[8].mxu0 }
 0x10a   : > { %v3012_v46 = vpop.f32.mrb[8].mxu1  ;;  %v3171_v47 = vpop.eup %3170  ;;  %3190 = vtanh.f32 %v812_v40  ;;  %v833_v48 = vadd.f32 %v2948_v45, %v3556_v8 }
 0x10b   : > { %v1089_v49 = vadd.f32 %v3012_v46, %v3556_v8  ;;  %v824_v50 = vpop.f32.mrb[9].mxu0  ;;  %v1080_v51 = vpop.f32.mrb[9].mxu1  ;;  %v2475_v53 = vpack.c.bf16 %v3171_v47, %v3163_v39  ;;  %3192 = vtanh.f32 %v1068_v42 }
 0x10c   : > { %v3173_v52 = vpop.eup %3172  ;;  %v825_v54 = vadd.f32 %v3556_v8, %v824_v50  ;;  %v1081_v55 = vadd.f32 %v3556_v8, %v1080_v51  ;;  %v2949_v56 = vpop.f32.mrb[10].mxu0  ;;  %3194 = vtanh.f32 %v833_v48 }
 0x10d   : > { %v3013_v57 = vpop.f32.mrb[10].mxu1  ;;  %v3175_v58 = vpop.eup %3174  ;;  %v2635_v59 = vpack.c.bf16 %v3173_v52, %v3165_v41  ;;  %v836_v60 = vadd.f32 %v2949_v56, %v3556_v8  ;;  %2787 = vst [vmem:[%s3579_s13 + $0x8] sm:$0xff] %v2475_v53   ;;  %3196 = vtanh.f32 %v1089_v49 }
 0x10e   : > { %v827_v61 = vpop.f32.mrb[11].mxu0  ;;  %v1083_v62 = vpop.f32.mrb[11].mxu1  ;;  %v2470_v0 = vpack.c.bf16 %v3175_v58, %v3167_v43  ;;  %v1092_v1 = vadd.f32 %v3013_v57, %v3556_v8  ;;  %3198 = vtanh.f32 %v825_v54 }
 0x10f   : > { %v3177_v63 = vpop.eup %3176  ;;  %2819 = vst [vmem:[%s3579_s13 + $0x108] sm:$0xff] %v2635_v59   ;;  %v828_v4 = vadd.f32 %v3556_v8, %v827_v61  ;;  %3200 = vtanh.f32 %v1081_v55  ;;  %v1084_v6 = vadd.f32 %v3556_v8, %v1083_v62 }
 0x110   : > { %v3179_v2 = vpop.eup %3178  ;;  %v2630_v3 = vpack.c.bf16 %v3177_v63, %v3169_v44  ;;  %2471 = vst [vmem:[%s3579_s13] sm:$0xff] %v2470_v0   ;;  %3202 = vtanh.f32 %v836_v60 }
 0x111   : > { %v3181_v5 = vpop.eup %3180  ;;  %3204 = vtanh.f32 %v1092_v1  ;;  %v2952_v10 = vpop.f32.mrb[12].mxu0 }
 0x112   : > { %v3183_v7 = vpop.eup %3182  ;;  %2818 = vst [vmem:[%s3579_s13 + $0x100] sm:$0xff] %v2630_v3   ;;  %v3016_v11 = vpop.f32.mrb[12].mxu1  ;;  %3206 = vtanh.f32 %v828_v4  ;;  %v849_v13 = vadd.f32 %v2952_v10, %v3556_v8 }
 0x113   : > { %v3185_v9 = vpop.eup %3184  ;;  %v1105_v14 = vadd.f32 %v3016_v11, %v3556_v8  ;;  %v840_v15 = vpop.f32.mrb[13].mxu0  ;;  %3208 = vtanh.f32 %v1084_v6 }
 0x114   : > { %v3187_v12 = vpop.eup %3186  ;;  %v1096_v16 = vpop.f32.mrb[13].mxu1  ;;  %v841_v19 = vadd.f32 %v3556_v8, %v840_v15  ;;  %3210 = vtanh.f32 %v849_v13 }
 0x115   : > { %v3189_v17 = vpop.eup %3188  ;;  %v2485_v18 = vpack.c.bf16 %v3187_v12, %v3179_v2  ;;  %v1097_v20 = vadd.f32 %v3556_v8, %v1096_v16  ;;  %v2953_v21 = vpop.f32.mrb[14].mxu0  ;;  %3212 = vtanh.f32 %v1105_v14 }
 0x116   : > { %v3017_v22 = vpop.f32.mrb[14].mxu1  ;;  %v3191_v23 = vpop.eup %3190  ;;  %v2645_v24 = vpack.c.bf16 %v3189_v17, %v3181_v5  ;;  %v852_v25 = vadd.f32 %v2953_v21, %v3556_v8  ;;  %3214 = vtanh.f32 %v841_v19 }
 0x117   : > { %v843_v26 = vpop.f32.mrb[15].mxu0  ;;  %v1099_v27 = vpop.f32.mrb[15].mxu1  ;;  %2789 = vst [vmem:[%s3579_s13 + $0x18] sm:$0xff] %v2485_v18   ;;  %v2480_v29 = vpack.c.bf16 %v3191_v23, %v3183_v7  ;;  %v1108_v30 = vadd.f32 %v3017_v22, %v3556_v8  ;;  %3216 = vtanh.f32 %v1097_v20 }
 0x118   : > { %v3193_v28 = vpop.eup %3192  ;;  %2821 = vst [vmem:[%s3579_s13 + $0x118] sm:$0xff] %v2645_v24   ;;  %v844_v33 = vadd.f32 %v3556_v8, %v843_v26  ;;  %v1100_v35 = vadd.f32 %v3556_v8, %v1099_v27  ;;  %3218 = vtanh.f32 %v852_v25 }
 0x119   : > { %v3195_v31 = vpop.eup %3194  ;;  %v2640_v32 = vpack.c.bf16 %v3193_v28, %v3185_v9  ;;  %2788 = vst [vmem:[%s3579_s13 + $0x10] sm:$0xff] %v2480_v29   ;;  %3220 = vtanh.f32 %v1108_v30  ;;  %v2956_v38 = vpop.f32.mrb[16].mxu0 }
 0x11a   : > { %v3197_v34 = vpop.eup %3196  ;;  %v3020_v39 = vpop.f32.mrb[16].mxu1  ;;  %3222 = vtanh.f32 %v844_v33  ;;  %v865_v41 = vadd.f32 %v2956_v38, %v3556_v8 }
 0x11b   : > { %v3199_v36 = vpop.eup %3198  ;;  %2820 = vst [vmem:[%s3579_s13 + $0x110] sm:$0xff] %v2640_v32   ;;  %v1121_v42 = vadd.f32 %v3020_v39, %v3556_v8  ;;  %v856_v43 = vpop.f32.mrb[17].mxu0  ;;  %3224 = vtanh.f32 %v1100_v35 }
 0x11c   : > { %v3201_v37 = vpop.eup %3200  ;;  %v1112_v44 = vpop.f32.mrb[17].mxu1  ;;  %v857_v47 = vadd.f32 %v3556_v8, %v856_v43  ;;  %3226 = vtanh.f32 %v865_v41 }
 0x11d   : > { %v3203_v40 = vpop.eup %3202  ;;  %v1113_v48 = vadd.f32 %v3556_v8, %v1112_v44  ;;  %v2957_v49 = vpop.f32.mrb[18].mxu0  ;;  %3228 = vtanh.f32 %v1121_v42 }
 0x11e   : > { %v3205_v45 = vpop.eup %3204  ;;  %v2495_v46 = vpack.c.bf16 %v3203_v40, %v3195_v31  ;;  %v3021_v50 = vpop.f32.mrb[18].mxu1  ;;  %v868_v53 = vadd.f32 %v2957_v49, %v3556_v8  ;;  %3230 = vtanh.f32 %v857_v47 }
 0x11f   : > { %v3207_v51 = vpop.eup %3206  ;;  %v2655_v52 = vpack.c.bf16 %v3205_v45, %v3197_v34  ;;  %v859_v54 = vpop.f32.mrb[19].mxu0  ;;  %v1124_v58 = vadd.f32 %v3021_v50, %v3556_v8  ;;  %3232 = vtanh.f32 %v1113_v48 }
 0x120   : > { %v1115_v55 = vpop.f32.mrb[19].mxu1  ;;  %v3209_v56 = vpop.eup %3208  ;;  %2791 = vst [vmem:[%s3579_s13 + $0x28] sm:$0xff] %v2495_v46   ;;  %v2490_v57 = vpack.c.bf16 %v3207_v51, %v3199_v36  ;;  %v860_v61 = vadd.f32 %v3556_v8, %v859_v54  ;;  %3234 = vtanh.f32 %v868_v53 }
 0x121   : > { %v3211_v59 = vpop.eup %3210  ;;  %2823 = vst [vmem:[%s3579_s13 + $0x128] sm:$0xff] %v2655_v52   ;;  %v2650_v60 = vpack.c.bf16 %v3209_v56, %v3201_v37  ;;  %v1116_v63 = vadd.f32 %v3556_v8, %v1115_v55  ;;  %3236 = vtanh.f32 %v1124_v58  ;;  %v2960_v2 = vpop.f32.mrb[20].mxu0 }
 0x122   : > { %v3213_v62 = vpop.eup %3212  ;;  %2790 = vst [vmem:[%s3579_s13 + $0x20] sm:$0xff] %v2490_v57   ;;  %v3024_v3 = vpop.f32.mrb[20].mxu1  ;;  %3238 = vtanh.f32 %v860_v61  ;;  %v881_v5 = vadd.f32 %v2960_v2, %v3556_v8 }
 0x123   : > { %v3215_v0 = vpop.eup %3214  ;;  %2822 = vst [vmem:[%s3579_s13 + $0x120] sm:$0xff] %v2650_v60   ;;  %v1137_v6 = vadd.f32 %v3024_v3, %v3556_v8  ;;  %v872_v7 = vpop.f32.mrb[21].mxu0  ;;  %3240 = vtanh.f32 %v1116_v63 }
 0x124   : > { %v3217_v1 = vpop.eup %3216  ;;  %v1128_v9 = vpop.f32.mrb[21].mxu1  ;;  %v873_v12 = vadd.f32 %v3556_v8, %v872_v7  ;;  %3242 = vtanh.f32 %v881_v5 }
 0x125   : > { %v3219_v4 = vpop.eup %3218  ;;  %v1129_v13 = vadd.f32 %v3556_v8, %v1128_v9  ;;  %v2961_v14 = vpop.f32.mrb[22].mxu0  ;;  %3244 = vtanh.f32 %v1137_v6 }
 0x126   : > { %v3221_v10 = vpop.eup %3220  ;;  %v2505_v11 = vpack.c.bf16 %v3219_v4, %v3211_v59  ;;  %v3025_v15 = vpop.f32.mrb[22].mxu1  ;;  %v884_v18 = vadd.f32 %v2961_v14, %v3556_v8  ;;  %3246 = vtanh.f32 %v873_v12 }
 0x127   : > { %v3223_v16 = vpop.eup %3222  ;;  %v2665_v17 = vpack.c.bf16 %v3221_v10, %v3213_v62  ;;  %v875_v19 = vpop.f32.mrb[23].mxu0  ;;  %v1140_v23 = vadd.f32 %v3025_v15, %v3556_v8  ;;  %3248 = vtanh.f32 %v1129_v13 }
 0x128   : > { %v1131_v20 = vpop.f32.mrb[23].mxu1  ;;  %v3225_v21 = vpop.eup %3224  ;;  %2793 = vst [vmem:[%s3579_s13 + $0x38] sm:$0xff] %v2505_v11   ;;  %v2500_v22 = vpack.c.bf16 %v3223_v16, %v3215_v0  ;;  %v876_v26 = vadd.f32 %v3556_v8, %v875_v19  ;;  %3250 = vtanh.f32 %v884_v18 }
 0x129   : > { %v3227_v24 = vpop.eup %3226  ;;  %2825 = vst [vmem:[%s3579_s13 + $0x138] sm:$0xff] %v2665_v17   ;;  %v2660_v25 = vpack.c.bf16 %v3225_v21, %v3217_v1  ;;  %v1132_v28 = vadd.f32 %v3556_v8, %v1131_v20  ;;  %3252 = vtanh.f32 %v1140_v23  ;;  %v2964_v31 = vpop.f32.mrb[24].mxu0 }
 0x12a   : > { %v3229_v27 = vpop.eup %3228  ;;  %2792 = vst [vmem:[%s3579_s13 + $0x30] sm:$0xff] %v2500_v22   ;;  %v3028_v32 = vpop.f32.mrb[24].mxu1  ;;  %3254 = vtanh.f32 %v876_v26  ;;  %v897_v34 = vadd.f32 %v2964_v31, %v3556_v8 }
 0x12b   : > { %v3231_v29 = vpop.eup %3230  ;;  %2824 = vst [vmem:[%s3579_s13 + $0x130] sm:$0xff] %v2660_v25   ;;  %v1153_v35 = vadd.f32 %v3028_v32, %v3556_v8  ;;  %v888_v36 = vpop.f32.mrb[25].mxu0  ;;  %3256 = vtanh.f32 %v1132_v28 }
 0x12c   : > { %v3233_v30 = vpop.eup %3232  ;;  %v1144_v37 = vpop.f32.mrb[25].mxu1  ;;  %v889_v40 = vadd.f32 %v3556_v8, %v888_v36  ;;  %3258 = vtanh.f32 %v897_v34 }
 0x12d   : > { %v3235_v33 = vpop.eup %3234  ;;  %v1145_v41 = vadd.f32 %v3556_v8, %v1144_v37  ;;  %v2965_v42 = vpop.f32.mrb[26].mxu0  ;;  %3260 = vtanh.f32 %v1153_v35 }
 0x12e   : > { %v3237_v38 = vpop.eup %3236  ;;  %v2515_v39 = vpack.c.bf16 %v3235_v33, %v3227_v24  ;;  %v3029_v43 = vpop.f32.mrb[26].mxu1  ;;  %v900_v46 = vadd.f32 %v2965_v42, %v3556_v8  ;;  %3262 = vtanh.f32 %v889_v40 }
 0x12f   : > { %v3239_v44 = vpop.eup %3238  ;;  %v2675_v45 = vpack.c.bf16 %v3237_v38, %v3229_v27  ;;  %v891_v47 = vpop.f32.mrb[27].mxu0  ;;  %v1156_v51 = vadd.f32 %v3029_v43, %v3556_v8  ;;  %3264 = vtanh.f32 %v1145_v41 }
 0x130   : > { %v1147_v48 = vpop.f32.mrb[27].mxu1  ;;  %v3241_v49 = vpop.eup %3240  ;;  %2795 = vst [vmem:[%s3579_s13 + $0x48] sm:$0xff] %v2515_v39   ;;  %v2510_v50 = vpack.c.bf16 %v3239_v44, %v3231_v29  ;;  %v892_v54 = vadd.f32 %v3556_v8, %v891_v47  ;;  %3266 = vtanh.f32 %v900_v46 }
 0x131   : > { %v3243_v52 = vpop.eup %3242  ;;  %2827 = vst [vmem:[%s3579_s13 + $0x148] sm:$0xff] %v2675_v45   ;;  %v2670_v53 = vpack.c.bf16 %v3241_v49, %v3233_v30  ;;  %v1148_v56 = vadd.f32 %v3556_v8, %v1147_v48  ;;  %3268 = vtanh.f32 %v1156_v51  ;;  %v2968_v59 = vpop.f32.mrb[28].mxu0 }
 0x132   : > { %v3245_v55 = vpop.eup %3244  ;;  %2794 = vst [vmem:[%s3579_s13 + $0x40] sm:$0xff] %v2510_v50   ;;  %v3032_v60 = vpop.f32.mrb[28].mxu1  ;;  %3270 = vtanh.f32 %v892_v54  ;;  %v913_v62 = vadd.f32 %v2968_v59, %v3556_v8 }
 0x133   : > { %v3247_v57 = vpop.eup %3246  ;;  %2826 = vst [vmem:[%s3579_s13 + $0x140] sm:$0xff] %v2670_v53   ;;  %v1169_v63 = vadd.f32 %v3032_v60, %v3556_v8  ;;  %v904_v0 = vpop.f32.mrb[29].mxu0  ;;  %3272 = vtanh.f32 %v1148_v56 }
 0x134   : > { %v3249_v58 = vpop.eup %3248  ;;  %v1160_v1 = vpop.f32.mrb[29].mxu1  ;;  %v905_v4 = vadd.f32 %v3556_v8, %v904_v0  ;;  %3274 = vtanh.f32 %v913_v62 }
 0x135   : > { %v3251_v61 = vpop.eup %3250  ;;  %v1161_v5 = vadd.f32 %v3556_v8, %v1160_v1  ;;  %v2969_v6 = vpop.f32.mrb[30].mxu0  ;;  %3276 = vtanh.f32 %v1169_v63 }
 0x136   : > { %v3253_v2 = vpop.eup %3252  ;;  %v2525_v3 = vpack.c.bf16 %v3251_v61, %v3243_v52  ;;  %v3033_v7 = vpop.f32.mrb[30].mxu1  ;;  %v916_v11 = vadd.f32 %v2969_v6, %v3556_v8  ;;  %3278 = vtanh.f32 %v905_v4 }
 0x137   : > { %v3255_v9 = vpop.eup %3254  ;;  %v2685_v10 = vpack.c.bf16 %v3253_v2, %v3245_v55  ;;  %v907_v12 = vpop.f32.mrb[31].mxu0  ;;  %v1172_v16 = vadd.f32 %v3033_v7, %v3556_v8  ;;  %3280 = vtanh.f32 %v1161_v5 }
 0x138   : > { %v1163_v13 = vpop.f32.mrb[31].mxu1  ;;  %v3257_v14 = vpop.eup %3256  ;;  %2797 = vst [vmem:[%s3579_s13 + $0x58] sm:$0xff] %v2525_v3   ;;  %v2520_v15 = vpack.c.bf16 %v3255_v9, %v3247_v57  ;;  %v908_v19 = vadd.f32 %v3556_v8, %v907_v12  ;;  %3282 = vtanh.f32 %v916_v11 }
 0x139   : > { %v3259_v17 = vpop.eup %3258  ;;  %2829 = vst [vmem:[%s3579_s13 + $0x158] sm:$0xff] %v2685_v10   ;;  %v2680_v18 = vpack.c.bf16 %v3257_v14, %v3249_v58  ;;  %v1164_v21 = vadd.f32 %v3556_v8, %v1163_v13  ;;  %3284 = vtanh.f32 %v1172_v16  ;;  %v2972_v24 = vpop.f32.mrb[32].mxu0 }
 0x13a   : > { %v3261_v20 = vpop.eup %3260  ;;  %2796 = vst [vmem:[%s3579_s13 + $0x50] sm:$0xff] %v2520_v15   ;;  %v3036_v25 = vpop.f32.mrb[32].mxu1  ;;  %3286 = vtanh.f32 %v908_v19  ;;  %v929_v27 = vadd.f32 %v2972_v24, %v3556_v8 }
 0x13b   : > { %v3263_v22 = vpop.eup %3262  ;;  %2828 = vst [vmem:[%s3579_s13 + $0x150] sm:$0xff] %v2680_v18   ;;  %v1185_v28 = vadd.f32 %v3036_v25, %v3556_v8  ;;  %v920_v29 = vpop.f32.mrb[33].mxu0  ;;  %3288 = vtanh.f32 %v1164_v21 }
 0x13c   : > { %v3265_v23 = vpop.eup %3264  ;;  %v1176_v30 = vpop.f32.mrb[33].mxu1  ;;  %v921_v33 = vadd.f32 %v3556_v8, %v920_v29  ;;  %3290 = vtanh.f32 %v929_v27 }
 0x13d   : > { %v3267_v26 = vpop.eup %3266  ;;  %v1177_v34 = vadd.f32 %v3556_v8, %v1176_v30  ;;  %v2973_v35 = vpop.f32.mrb[34].mxu0  ;;  %3292 = vtanh.f32 %v1185_v28 }
 0x13e   : > { %v3269_v31 = vpop.eup %3268  ;;  %v2535_v32 = vpack.c.bf16 %v3267_v26, %v3259_v17  ;;  %v3037_v36 = vpop.f32.mrb[34].mxu1  ;;  %v932_v39 = vadd.f32 %v2973_v35, %v3556_v8  ;;  %3294 = vtanh.f32 %v921_v33 }
 0x13f   : > { %v3271_v37 = vpop.eup %3270  ;;  %v2695_v38 = vpack.c.bf16 %v3269_v31, %v3261_v20  ;;  %v923_v40 = vpop.f32.mrb[35].mxu0  ;;  %v1188_v44 = vadd.f32 %v3037_v36, %v3556_v8  ;;  %3296 = vtanh.f32 %v1177_v34 }
 0x140   : > { %v1179_v41 = vpop.f32.mrb[35].mxu1  ;;  %v3273_v42 = vpop.eup %3272  ;;  %2799 = vst [vmem:[%s3579_s13 + $0x68] sm:$0xff] %v2535_v32   ;;  %v2530_v43 = vpack.c.bf16 %v3271_v37, %v3263_v22  ;;  %v924_v47 = vadd.f32 %v3556_v8, %v923_v40  ;;  %3298 = vtanh.f32 %v932_v39 }
 0x141   : > { %v3275_v45 = vpop.eup %3274  ;;  %2831 = vst [vmem:[%s3579_s13 + $0x168] sm:$0xff] %v2695_v38   ;;  %v2690_v46 = vpack.c.bf16 %v3273_v42, %v3265_v23  ;;  %v1180_v49 = vadd.f32 %v3556_v8, %v1179_v41  ;;  %3300 = vtanh.f32 %v1188_v44  ;;  %v2976_v52 = vpop.f32.mrb[36].mxu0 }
 0x142   : > { %v3277_v48 = vpop.eup %3276  ;;  %2798 = vst [vmem:[%s3579_s13 + $0x60] sm:$0xff] %v2530_v43   ;;  %v3040_v53 = vpop.f32.mrb[36].mxu1  ;;  %3302 = vtanh.f32 %v924_v47  ;;  %v945_v55 = vadd.f32 %v2976_v52, %v3556_v8 }
 0x143   : > { %v3279_v50 = vpop.eup %3278  ;;  %2830 = vst [vmem:[%s3579_s13 + $0x160] sm:$0xff] %v2690_v46   ;;  %v1201_v56 = vadd.f32 %v3040_v53, %v3556_v8  ;;  %v936_v57 = vpop.f32.mrb[37].mxu0  ;;  %3304 = vtanh.f32 %v1180_v49 }
 0x144   : > { %v3281_v51 = vpop.eup %3280  ;;  %v1192_v58 = vpop.f32.mrb[37].mxu1  ;;  %v937_v61 = vadd.f32 %v3556_v8, %v936_v57  ;;  %3306 = vtanh.f32 %v945_v55 }
 0x145   : > { %v3283_v54 = vpop.eup %3282  ;;  %v1193_v62 = vadd.f32 %v3556_v8, %v1192_v58  ;;  %v2977_v63 = vpop.f32.mrb[38].mxu0  ;;  %3308 = vtanh.f32 %v1201_v56 }
 0x146   : > { %v3285_v59 = vpop.eup %3284  ;;  %v2545_v60 = vpack.c.bf16 %v3283_v54, %v3275_v45  ;;  %v3041_v0 = vpop.f32.mrb[38].mxu1  ;;  %v948_v3 = vadd.f32 %v2977_v63, %v3556_v8  ;;  %3310 = vtanh.f32 %v937_v61 }
 0x147   : > { %v3287_v1 = vpop.eup %3286  ;;  %v2705_v2 = vpack.c.bf16 %v3285_v59, %v3277_v48  ;;  %v939_v4 = vpop.f32.mrb[39].mxu0  ;;  %v1204_v9 = vadd.f32 %v3041_v0, %v3556_v8  ;;  %3312 = vtanh.f32 %v1193_v62 }
 0x148   : > { %v1195_v5 = vpop.f32.mrb[39].mxu1  ;;  %v3289_v6 = vpop.eup %3288  ;;  %2801 = vst [vmem:[%s3579_s13 + $0x78] sm:$0xff] %v2545_v60   ;;  %v2540_v7 = vpack.c.bf16 %v3287_v1, %v3279_v50  ;;  %v940_v12 = vadd.f32 %v3556_v8, %v939_v4  ;;  %3314 = vtanh.f32 %v948_v3 }
 0x149   : > { %v3291_v10 = vpop.eup %3290  ;;  %2833 = vst [vmem:[%s3579_s13 + $0x178] sm:$0xff] %v2705_v2   ;;  %v2700_v11 = vpack.c.bf16 %v3289_v6, %v3281_v51  ;;  %v1196_v14 = vadd.f32 %v3556_v8, %v1195_v5  ;;  %3316 = vtanh.f32 %v1204_v9  ;;  %v2980_v17 = vpop.f32.mrb[40].mxu0 }
 0x14a   : > { %v3293_v13 = vpop.eup %3292  ;;  %2800 = vst [vmem:[%s3579_s13 + $0x70] sm:$0xff] %v2540_v7   ;;  %v3044_v18 = vpop.f32.mrb[40].mxu1  ;;  %3318 = vtanh.f32 %v940_v12  ;;  %v961_v20 = vadd.f32 %v2980_v17, %v3556_v8 }
 0x14b   : > { %v3295_v15 = vpop.eup %3294  ;;  %2832 = vst [vmem:[%s3579_s13 + $0x170] sm:$0xff] %v2700_v11   ;;  %v1217_v21 = vadd.f32 %v3044_v18, %v3556_v8  ;;  %v952_v22 = vpop.f32.mrb[41].mxu0  ;;  %3320 = vtanh.f32 %v1196_v14 }
 0x14c   : > { %v3297_v16 = vpop.eup %3296  ;;  %v1208_v23 = vpop.f32.mrb[41].mxu1  ;;  %v953_v26 = vadd.f32 %v3556_v8, %v952_v22  ;;  %3322 = vtanh.f32 %v961_v20 }
 0x14d   : > { %v3299_v19 = vpop.eup %3298  ;;  %v1209_v27 = vadd.f32 %v3556_v8, %v1208_v23  ;;  %v2981_v28 = vpop.f32.mrb[42].mxu0  ;;  %3324 = vtanh.f32 %v1217_v21 }
 0x14e   : > { %v3301_v24 = vpop.eup %3300  ;;  %v2555_v25 = vpack.c.bf16 %v3299_v19, %v3291_v10  ;;  %v3045_v29 = vpop.f32.mrb[42].mxu1  ;;  %v964_v32 = vadd.f32 %v2981_v28, %v3556_v8  ;;  %3326 = vtanh.f32 %v953_v26 }
 0x14f   : > { %v3303_v30 = vpop.eup %3302  ;;  %v2715_v31 = vpack.c.bf16 %v3301_v24, %v3293_v13  ;;  %v955_v33 = vpop.f32.mrb[43].mxu0  ;;  %v1220_v37 = vadd.f32 %v3045_v29, %v3556_v8  ;;  %3328 = vtanh.f32 %v1209_v27 }
 0x150   : > { %v1211_v34 = vpop.f32.mrb[43].mxu1  ;;  %v3305_v35 = vpop.eup %3304  ;;  %2803 = vst [vmem:[%s3579_s13 + $0x88] sm:$0xff] %v2555_v25   ;;  %v2550_v36 = vpack.c.bf16 %v3303_v30, %v3295_v15  ;;  %v956_v40 = vadd.f32 %v3556_v8, %v955_v33  ;;  %3330 = vtanh.f32 %v964_v32 }
 0x151   : > { %v3307_v38 = vpop.eup %3306  ;;  %2835 = vst [vmem:[%s3579_s13 + $0x188] sm:$0xff] %v2715_v31   ;;  %v2710_v39 = vpack.c.bf16 %v3305_v35, %v3297_v16  ;;  %v1212_v42 = vadd.f32 %v3556_v8, %v1211_v34  ;;  %3332 = vtanh.f32 %v1220_v37  ;;  %v2984_v45 = vpop.f32.mrb[44].mxu0 }
 0x152   : > { %v3309_v41 = vpop.eup %3308  ;;  %2802 = vst [vmem:[%s3579_s13 + $0x80] sm:$0xff] %v2550_v36   ;;  %v3048_v46 = vpop.f32.mrb[44].mxu1  ;;  %3334 = vtanh.f32 %v956_v40  ;;  %v977_v48 = vadd.f32 %v2984_v45, %v3556_v8 }
 0x153   : > { %v3311_v43 = vpop.eup %3310  ;;  %2834 = vst [vmem:[%s3579_s13 + $0x180] sm:$0xff] %v2710_v39   ;;  %v1233_v49 = vadd.f32 %v3048_v46, %v3556_v8  ;;  %v968_v50 = vpop.f32.mrb[45].mxu0  ;;  %3336 = vtanh.f32 %v1212_v42 }
 0x154   : > { %v3313_v44 = vpop.eup %3312  ;;  %v1224_v51 = vpop.f32.mrb[45].mxu1  ;;  %v969_v54 = vadd.f32 %v3556_v8, %v968_v50  ;;  %3338 = vtanh.f32 %v977_v48 }
 0x155   : > { %v3315_v47 = vpop.eup %3314  ;;  %v1225_v55 = vadd.f32 %v3556_v8, %v1224_v51  ;;  %v2985_v56 = vpop.f32.mrb[46].mxu0  ;;  %3340 = vtanh.f32 %v1233_v49 }
 0x156   : > { %v3317_v52 = vpop.eup %3316  ;;  %v2565_v53 = vpack.c.bf16 %v3315_v47, %v3307_v38  ;;  %v3049_v57 = vpop.f32.mrb[46].mxu1  ;;  %v980_v60 = vadd.f32 %v2985_v56, %v3556_v8  ;;  %3342 = vtanh.f32 %v969_v54 }
 0x157   : > { %v3319_v58 = vpop.eup %3318  ;;  %v2725_v59 = vpack.c.bf16 %v3317_v52, %v3309_v41  ;;  %v971_v61 = vpop.f32.mrb[47].mxu0  ;;  %v1236_v1 = vadd.f32 %v3049_v57, %v3556_v8  ;;  %3344 = vtanh.f32 %v1225_v55 }
 0x158   : > { %v1227_v62 = vpop.f32.mrb[47].mxu1  ;;  %v3321_v63 = vpop.eup %3320  ;;  %2805 = vst [vmem:[%s3579_s13 + $0x98] sm:$0xff] %v2565_v53   ;;  %v2560_v0 = vpack.c.bf16 %v3319_v58, %v3311_v43  ;;  %v972_v4 = vadd.f32 %v3556_v8, %v971_v61  ;;  %3346 = vtanh.f32 %v980_v60  ;;  %v3722_v58 = vld [vmem:[%s3767_s2] ss:$0 sm:$0xff] }
 0x159   : > { %v3323_v2 = vpop.eup %3322  ;;  %2837 = vst [vmem:[%s3579_s13 + $0x198] sm:$0xff] %v2725_v59   ;;  %v2720_v3 = vpack.c.bf16 %v3321_v63, %v3313_v44  ;;  %v1228_v6 = vadd.f32 %v3556_v8, %v1227_v62  ;;  %3348 = vtanh.f32 %v1236_v1  ;;  %v2988_v10 = vpop.f32.mrb[48].mxu0 }
 0x15a   : > { %v3325_v5 = vpop.eup %3324  ;;  %2804 = vst [vmem:[%s3579_s13 + $0x90] sm:$0xff] %v2560_v0   ;;  %v3052_v11 = vpop.f32.mrb[48].mxu1  ;;  %3350 = vtanh.f32 %v972_v4  ;;  %v993_v13 = vadd.f32 %v2988_v10, %v3556_v8 }
 0x15b   : > { %v3327_v7 = vpop.eup %3326  ;;  %2836 = vst [vmem:[%s3579_s13 + $0x190] sm:$0xff] %v2720_v3   ;;  %v1249_v14 = vadd.f32 %v3052_v11, %v3556_v8  ;;  %v984_v15 = vpop.f32.mrb[49].mxu0  ;;  %3352 = vtanh.f32 %v1228_v6 }
 0x15c   : > { %v3329_v9 = vpop.eup %3328  ;;  %v1240_v16 = vpop.f32.mrb[49].mxu1  ;;  %v985_v19 = vadd.f32 %v3556_v8, %v984_v15  ;;  %3354 = vtanh.f32 %v993_v13 }
 0x15d   : > { %v3331_v12 = vpop.eup %3330  ;;  %v1241_v20 = vadd.f32 %v3556_v8, %v1240_v16  ;;  %v2989_v21 = vpop.f32.mrb[50].mxu0  ;;  %3356 = vtanh.f32 %v1249_v14 }
 0x15e   : > { %v3333_v17 = vpop.eup %3332  ;;  %v2575_v18 = vpack.c.bf16 %v3331_v12, %v3323_v2  ;;  %v3053_v22 = vpop.f32.mrb[50].mxu1  ;;  %v996_v25 = vadd.f32 %v2989_v21, %v3556_v8  ;;  %3358 = vtanh.f32 %v985_v19 }
 0x15f   : > { %v3335_v23 = vpop.eup %3334  ;;  %v2735_v24 = vpack.c.bf16 %v3333_v17, %v3325_v5  ;;  %v987_v26 = vpop.f32.mrb[51].mxu0  ;;  %v1252_v30 = vadd.f32 %v3053_v22, %v3556_v8  ;;  %3360 = vtanh.f32 %v1241_v20 }
 0x160   : > { %v1243_v27 = vpop.f32.mrb[51].mxu1  ;;  %v3337_v28 = vpop.eup %3336  ;;  %2807 = vst [vmem:[%s3579_s13 + $0xa8] sm:$0xff] %v2575_v18   ;;  %v2570_v29 = vpack.c.bf16 %v3335_v23, %v3327_v7  ;;  %v988_v33 = vadd.f32 %v3556_v8, %v987_v26  ;;  %3362 = vtanh.f32 %v996_v25 }
 0x161   : > { %v3339_v31 = vpop.eup %3338  ;;  %2839 = vst [vmem:[%s3579_s13 + $0x1a8] sm:$0xff] %v2735_v24   ;;  %v2730_v32 = vpack.c.bf16 %v3337_v28, %v3329_v9  ;;  %v1244_v35 = vadd.f32 %v3556_v8, %v1243_v27  ;;  %3364 = vtanh.f32 %v1252_v30  ;;  %v2992_v38 = vpop.f32.mrb[52].mxu0 }
 0x162   : > { %v3341_v34 = vpop.eup %3340  ;;  %2806 = vst [vmem:[%s3579_s13 + $0xa0] sm:$0xff] %v2570_v29   ;;  %v3056_v39 = vpop.f32.mrb[52].mxu1  ;;  %3366 = vtanh.f32 %v988_v33  ;;  %v1009_v41 = vadd.f32 %v2992_v38, %v3556_v8 }
 0x163   : > { %v3343_v36 = vpop.eup %3342  ;;  %2838 = vst [vmem:[%s3579_s13 + $0x1a0] sm:$0xff] %v2730_v32   ;;  %v1265_v42 = vadd.f32 %v3056_v39, %v3556_v8  ;;  %v1000_v43 = vpop.f32.mrb[53].mxu0  ;;  %3368 = vtanh.f32 %v1244_v35 }
 0x164   : > { %v3345_v37 = vpop.eup %3344  ;;  %v1256_v44 = vpop.f32.mrb[53].mxu1  ;;  %v1001_v47 = vadd.f32 %v3556_v8, %v1000_v43  ;;  %3370 = vtanh.f32 %v1009_v41 }
 0x165   : > { %v3347_v40 = vpop.eup %3346  ;;  %v1257_v48 = vadd.f32 %v3556_v8, %v1256_v44  ;;  %v2993_v49 = vpop.f32.mrb[54].mxu0  ;;  %3372 = vtanh.f32 %v1265_v42 }
 0x166   : > { %v3349_v45 = vpop.eup %3348  ;;  %v2585_v46 = vpack.c.bf16 %v3347_v40, %v3339_v31  ;;  %v3057_v50 = vpop.f32.mrb[54].mxu1  ;;  %v1012_v53 = vadd.f32 %v2993_v49, %v3556_v8  ;;  %3374 = vtanh.f32 %v1001_v47 }
 0x167   : > { %v3351_v51 = vpop.eup %3350  ;;  %v2745_v52 = vpack.c.bf16 %v3349_v45, %v3341_v34  ;;  %v1003_v54 = vpop.f32.mrb[55].mxu0  ;;  %v1268_v59 = vadd.f32 %v3722_v58, %v3057_v50  ;;  %3376 = vtanh.f32 %v1257_v48 }
 0x168   : > { %v1259_v55 = vpop.f32.mrb[55].mxu1  ;;  %v3353_v56 = vpop.eup %3352  ;;  %2809 = vst [vmem:[%s3579_s13 + $0xb8] sm:$0xff] %v2585_v46   ;;  %v2580_v57 = vpack.c.bf16 %v3351_v51, %v3343_v36  ;;  %v1004_v8 = vadd.f32 %v3722_v58, %v1003_v54  ;;  %3378 = vtanh.f32 %v1012_v53 }
 0x169   : > { %v3355_v60 = vpop.eup %3354  ;;  %2841 = vst [vmem:[%s3579_s13 + $0x1b8] sm:$0xff] %v2745_v52   ;;  %v2740_v61 = vpack.c.bf16 %v3353_v56, %v3345_v37  ;;  %v1260_v63 = vadd.f32 %v3722_v58, %v1259_v55  ;;  %3380 = vtanh.f32 %v1268_v59  ;;  %v2996_v2 = vpop.f32.mrb[56].mxu0 }
 0x16a   : > { %v3357_v62 = vpop.eup %3356  ;;  %2808 = vst [vmem:[%s3579_s13 + $0xb0] sm:$0xff] %v2580_v57   ;;  %v3060_v3 = vpop.f32.mrb[56].mxu1  ;;  %3382 = vtanh.f32 %v1004_v8  ;;  %v1025_v5 = vadd.f32 %v3722_v58, %v2996_v2 }
 0x16b   : > { %v3359_v0 = vpop.eup %3358  ;;  %2840 = vst [vmem:[%s3579_s13 + $0x1b0] sm:$0xff] %v2740_v61   ;;  %v1281_v6 = vadd.f32 %v3722_v58, %v3060_v3  ;;  %v1016_v7 = vpop.f32.mrb[57].mxu0  ;;  %3384 = vtanh.f32 %v1260_v63 }
 0x16c   : > { %v3361_v1 = vpop.eup %3360  ;;  %v1272_v9 = vpop.f32.mrb[57].mxu1  ;;  %v1017_v12 = vadd.f32 %v3722_v58, %v1016_v7  ;;  %3386 = vtanh.f32 %v1025_v5 }
 0x16d   : > { %v3363_v4 = vpop.eup %3362  ;;  %v1273_v13 = vadd.f32 %v3722_v58, %v1272_v9  ;;  %v2997_v14 = vpop.f32.mrb[58].mxu0  ;;  %3388 = vtanh.f32 %v1281_v6 }
 0x16e   : > { %v3365_v10 = vpop.eup %3364  ;;  %v2595_v11 = vpack.c.bf16 %v3363_v4, %v3355_v60  ;;  %v3061_v15 = vpop.f32.mrb[58].mxu1  ;;  %v1028_v18 = vadd.f32 %v3722_v58, %v2997_v14  ;;  %3390 = vtanh.f32 %v1017_v12 }
 0x16f   : > { %v3367_v16 = vpop.eup %3366  ;;  %v2755_v17 = vpack.c.bf16 %v3365_v10, %v3357_v62  ;;  %v1019_v19 = vpop.f32.mrb[59].mxu0  ;;  %v1284_v23 = vadd.f32 %v3722_v58, %v3061_v15  ;;  %3392 = vtanh.f32 %v1273_v13 }
 0x170   : > { %v1275_v20 = vpop.f32.mrb[59].mxu1  ;;  %v3369_v21 = vpop.eup %3368  ;;  %2811 = vst [vmem:[%s3579_s13 + $0xc8] sm:$0xff] %v2595_v11   ;;  %v2590_v22 = vpack.c.bf16 %v3367_v16, %v3359_v0  ;;  %v1020_v26 = vadd.f32 %v3722_v58, %v1019_v19  ;;  %3394 = vtanh.f32 %v1028_v18 }
 0x171   : > { %v3371_v24 = vpop.eup %3370  ;;  %2843 = vst [vmem:[%s3579_s13 + $0x1c8] sm:$0xff] %v2755_v17   ;;  %v2750_v25 = vpack.c.bf16 %v3369_v21, %v3361_v1  ;;  %v1276_v28 = vadd.f32 %v3722_v58, %v1275_v20  ;;  %3396 = vtanh.f32 %v1284_v23  ;;  %v3000_v31 = vpop.f32.mrb[60].mxu0 }
 0x172   : > { %v3373_v27 = vpop.eup %3372  ;;  %2810 = vst [vmem:[%s3579_s13 + $0xc0] sm:$0xff] %v2590_v22   ;;  %v3064_v32 = vpop.f32.mrb[60].mxu1  ;;  %3398 = vtanh.f32 %v1020_v26  ;;  %v1041_v34 = vadd.f32 %v3722_v58, %v3000_v31 }
 0x173   : > { %v3375_v29 = vpop.eup %3374  ;;  %2842 = vst [vmem:[%s3579_s13 + $0x1c0] sm:$0xff] %v2750_v25   ;;  %v1297_v35 = vadd.f32 %v3722_v58, %v3064_v32  ;;  %v1032_v36 = vpop.f32.mrb[61].mxu0  ;;  %3400 = vtanh.f32 %v1276_v28 }
 0x174   : > { %v3377_v30 = vpop.eup %3376  ;;  %v1288_v37 = vpop.f32.mrb[61].mxu1  ;;  %v1033_v40 = vadd.f32 %v3722_v58, %v1032_v36  ;;  %3402 = vtanh.f32 %v1041_v34 }
 0x175   : > { %v3379_v33 = vpop.eup %3378  ;;  %v1289_v41 = vadd.f32 %v3722_v58, %v1288_v37  ;;  %v3001_v42 = vpop.f32.mrb[62].mxu0  ;;  %3404 = vtanh.f32 %v1297_v35 }
 0x176   : > { %v3381_v38 = vpop.eup %3380  ;;  %v2605_v39 = vpack.c.bf16 %v3379_v33, %v3371_v24  ;;  %v3065_v43 = vpop.f32.mrb[62].mxu1  ;;  %v1044_v46 = vadd.f32 %v3722_v58, %v3001_v42  ;;  %3406 = vtanh.f32 %v1033_v40 }
 0x177   : > { %v3383_v44 = vpop.eup %3382  ;;  %v2765_v45 = vpack.c.bf16 %v3381_v38, %v3373_v27  ;;  %v1035_v47 = vpop.f32.mrb[63].mxu0  ;;  %v1300_v51 = vadd.f32 %v3722_v58, %v3065_v43  ;;  %3408 = vtanh.f32 %v1289_v41 }
 0x178   : > { %v1291_v48 = vpop.f32.mrb[63].mxu1  ;;  %v3385_v49 = vpop.eup %3384  ;;  %2813 = vst [vmem:[%s3579_s13 + $0xd8] sm:$0xff] %v2605_v39   ;;  %v2600_v50 = vpack.c.bf16 %v3383_v44, %v3375_v29  ;;  %v1036_v54 = vadd.f32 %v3722_v58, %v1035_v47  ;;  %3410 = vtanh.f32 %v1044_v46 }
 0x179   : > { %v3387_v52 = vpop.eup %3386  ;;  %2845 = vst [vmem:[%s3579_s13 + $0x1d8] sm:$0xff] %v2765_v45   ;;  %v2760_v53 = vpack.c.bf16 %v3385_v49, %v3377_v30  ;;  %v1292_v56 = vadd.f32 %v3722_v58, %v1291_v48  ;;  %3412 = vtanh.f32 %v1300_v51 }
 0x17a   : > { %v3389_v55 = vpop.eup %3388  ;;  %2812 = vst [vmem:[%s3579_s13 + $0xd0] sm:$0xff] %v2600_v50   ;;  %3414 = vtanh.f32 %v1036_v54 }
 0x17b   : > { %v3391_v57 = vpop.eup %3390  ;;  %2844 = vst [vmem:[%s3579_s13 + $0x1d0] sm:$0xff] %v2760_v53   ;;  %3416 = vtanh.f32 %v1292_v56 }
 0x17c   : > { %v3393_v59 = vpop.eup %3392 }
 0x17d   : > { %v3395_v60 = vpop.eup %3394 }
 0x17e   : > { %v3397_v61 = vpop.eup %3396  ;;  %v2615_v8 = vpack.c.bf16 %v3395_v60, %v3387_v52 }
 0x17f   : > { %v3399_v62 = vpop.eup %3398  ;;  %v2775_v63 = vpack.c.bf16 %v3397_v61, %v3389_v55 }
 0x180   : > { %v3401_v0 = vpop.eup %3400  ;;  %2815 = vst [vmem:[%s3579_s13 + $0xe8] sm:$0xff] %v2615_v8   ;;  %v2610_v1 = vpack.c.bf16 %v3399_v62, %v3391_v57 }
 0x181   : > { %v3403_v58 = vpop.eup %3402  ;;  %2847 = vst [vmem:[%s3579_s13 + $0x1e8] sm:$0xff] %v2775_v63   ;;  %v2770_v2 = vpack.c.bf16 %v3401_v0, %v3393_v59 }
 0x182   : > { %v3405_v3 = vpop.eup %3404  ;;  %2814 = vst [vmem:[%s3579_s13 + $0xe0] sm:$0xff] %v2610_v1  }
 0x183   : > { %v3407_v4 = vpop.eup %3406  ;;  %2846 = vst [vmem:[%s3579_s13 + $0x1e0] sm:$0xff] %v2770_v2  }
 0x184   : > { %v3409_v5 = vpop.eup %3408 }
 0x185   : > { %v3411_v6 = vpop.eup %3410 }
 0x186   : > { %v3413_v7 = vpop.eup %3412  ;;  %v2625_v9 = vpack.c.bf16 %v3411_v6, %v3403_v58 }
 0x187   : > { %v3415_v10 = vpop.eup %3414  ;;  %v2785_v11 = vpack.c.bf16 %v3413_v7, %v3405_v3 }
 0x188   : > { %v3417_v12 = vpop.eup %3416  ;;  %2817 = vst [vmem:[%s3579_s13 + $0xf8] sm:$0xff] %v2625_v9   ;;  %v2620_v13 = vpack.c.bf16 %v3415_v10, %v3407_v4 }
 0x189   : > { %2849 = vst [vmem:[%s3579_s13 + $0x1f8] sm:$0xff] %v2785_v11   ;;  %v2780_v14 = vpack.c.bf16 %v3417_v12, %v3409_v5 }
 0x18a   : > { %2816 = vst [vmem:[%s3579_s13 + $0xf0] sm:$0xff] %v2620_v13  }
 0x18b   : > { %2848 = vst [vmem:[%s3579_s13 + $0x1f0] sm:$0xff] %v2780_v14  }
 0x18c PF: > { %s13_s12 = sadd.s32 1, %s3425_s12  }
 0x18d   : > { %p10_p4 = scmp.ge.s32.totalorder %s13_s12, 5  }
 0x18f   :  { %12 = sbr.rel (!%p10_p4) target bundleno = 1 (0x1), region = 62 }

</bundles_post_ra>
